<compile_context>
chip_gen: v6e
topology: v6e:2x2x1
jax: 0.10.0
libtpu: 0.0.40
codegen_flags: <defaults>
</compile_context>

<pallas_src>
import numpy as np
import jax
import jax.numpy as jnp
from jax import lax
from jax.experimental import pallas as pl
from jax.experimental.pallas import tpu as pltpu


# ----------------------------------------------------------------------------
# Fused im2col-GEMM + bias + ReLU + 2x2 max-pool kernel (NHWC, patches on K).
# ----------------------------------------------------------------------------
def _patch_gemm_relu_pool_kernel(p_ref, w_ref, b_ref, o_ref, act_scr, wpool_scr):
    # p_ref:      (Bt*Ho*Wo, K)        im2col patches, rows in (b, h, w) order
    # w_ref:      (K, Cout)            K ordered (kh, kw, cin)
    # b_ref:      (1, Cout)
    # o_ref:      (Bt, Hp, Wp, Cout)
    # act_scr:    (Bt*Ho*Wo, Cout) f32 post-ReLU conv activation (written once)
    # wpool_scr:  (Bt, Ho, Wp, Cout) f32 W-pooled activation
    bt, Ho, Wp, Cout = wpool_scr.shape
    Hp = Ho // 2

    # One MXU GEMM does the whole 5x5xCin contraction (f32 accumulate).
    y = jnp.dot(p_ref[...], w_ref[...], preferred_element_type=jnp.float32)
    y = jnp.maximum(y + b_ref[...], 0.0)
    act_scr[...] = y

    # 2x2 / stride-2 max pool.
    # W direction: Wo is even, so even/odd flat row index == even/odd w.
    n_w = bt * Ho * Wp
    wm = jnp.maximum(act_scr[pl.ds(0, n_w, 2), :],
                     act_scr[pl.ds(1, n_w, 2), :])          # (bt*Ho*Wp, Cout)
    wpool_scr[...] = wm.reshape(bt, Ho, Wp, Cout)
    # H direction: stride-2 reads along the (major) H axis.
    o_ref[...] = jnp.maximum(wpool_scr[:, pl.ds(0, Hp, 2), :, :],
                             wpool_scr[:, pl.ds(1, Hp, 2), :, :]).astype(o_ref.dtype)


def conv5x5_relu_pool(x, w, b, bt=8):
    """x: (B, H, W, Cin) f32, w: (25*Cin, Cout) im2col layout, b: (1, Cout)."""
    B, H, W, Cin = x.shape
    K, Cout = w.shape
    Ho, Wo = H - 4, W - 4
    Hp, Wp = Ho // 2, Wo // 2
    bt = min(bt, B)

    # im2col patch extraction in the XLA wrapper (layout plumbing, K = (kh,kw,cin)).
    # This keeps the kernel input lane-dense (K=75/800 lanes instead of Cin=3).
    cols = [x[:, kh:kh + Ho, kw:kw + Wo, :] for kh in range(5) for kw in range(5)]
    patches = jnp.concatenate(cols, axis=-1).reshape(B * Ho * Wo, K)

    return pl.pallas_call(
        _patch_gemm_relu_pool_kernel,
        out_shape=jax.ShapeDtypeStruct((B, Hp, Wp, Cout), x.dtype),
        grid=(pl.cdiv(B, bt),),
        in_specs=[
            pl.BlockSpec((bt * Ho * Wo, K), lambda i: (i, 0)),
            pl.BlockSpec((K, Cout), lambda i: (0, 0)),       # weights resident
            pl.BlockSpec((1, Cout), lambda i: (0, 0)),
        ],
        out_specs=pl.BlockSpec((bt, Hp, Wp, Cout), lambda i: (i, 0, 0, 0)),
        scratch_shapes=[
            pltpu.VMEM((bt * Ho * Wo, Cout), jnp.float32),
            pltpu.VMEM((bt, Ho, Wp, Cout), jnp.float32),
        ],
        compiler_params=pltpu.CompilerParams(
            dimension_semantics=("parallel",),   # batch blocks independent (both TCs on v7x)
        ),
    )(patches, w, b)


# ----------------------------------------------------------------------------
# Fused MLP heads: classifier (3 Linear + ReLUs) and domain (2 Linear + sigmoid)
# with the two first layers merged into one (1200, 200) GEMM.
# ----------------------------------------------------------------------------
def _dann_heads_kernel(f_ref, wh1_ref, bh1_ref, w2_ref, b2_ref, w3_ref, b3_ref,
                       wd2_ref, bd2_ref, label_ref, domain_ref):
    f = f_ref[...]                                                   # (bt, 1200)
    # fused first layer of both heads (feature read once, N=200 MXU fill)
    h = jnp.maximum(
        jnp.dot(f, wh1_ref[...], preferred_element_type=jnp.float32) + bh1_ref[...],
        0.0)                                                         # (bt, 200)
    hc = h[:, 0:100]       # classifier branch
    hd = h[:, 100:200]     # domain branch (GRL is the identity in the forward)

    c = jnp.maximum(
        jnp.dot(hc, w2_ref[...], preferred_element_type=jnp.float32) + b2_ref[...],
        0.0)
    label_ref[...] = (
        jnp.dot(c, w3_ref[...], preferred_element_type=jnp.float32) + b3_ref[...]
    ).astype(label_ref.dtype)

    logit = jnp.dot(hd, wd2_ref[...], preferred_element_type=jnp.float32) + bd2_ref[...]
    # numerically stable sigmoid via tanh (EUP slot, no inf intermediates)
    domain_ref[...] = (0.5 * (jnp.tanh(0.5 * logit) + 1.0)).astype(domain_ref.dtype)


def dann_heads(feat, w_h1, b_h1, w2, b2, w3, b3, wd2, bd2, bt=128):
    B, F = feat.shape
    bt = min(bt, B)
    ins = (feat, w_h1, b_h1, w2, b2, w3, b3, wd2, bd2)

    def resident(a):   # whole weight resident across all batch blocks
        shp = a.shape
        return pl.BlockSpec(shp, lambda i, _n=len(shp): (0,) * _n)

    return pl.pallas_call(
        _dann_heads_kernel,
        out_shape=(jax.ShapeDtypeStruct((B, 10), feat.dtype),
                   jax.ShapeDtypeStruct((B, 1), feat.dtype)),
        grid=(pl.cdiv(B, bt),),
        in_specs=[pl.BlockSpec((bt, F), lambda i: (i, 0))] + [resident(a) for a in ins[1:]],
        out_specs=(pl.BlockSpec((bt, 10), lambda i: (i, 0)),
                   pl.BlockSpec((bt, 1), lambda i: (i, 0))),
        compiler_params=pltpu.CompilerParams(
            dimension_semantics=("parallel",),
        ),
    )(*ins)


# ----------------------------------------------------------------------------
# One-time parameter preparation (PyTorch layouts -> kernel layouts).
# ----------------------------------------------------------------------------
def prepare_params(tp):
    def conv_w(w):   # (Cout, Cin, 5, 5) -> (25*Cin, Cout), K ordered (kh, kw, cin)
        cout, cin = w.shape[0], w.shape[1]
        return jnp.transpose(w, (2, 3, 1, 0)).reshape(25 * cin, cout)

    # Permute fc1/dom1 rows from NCHW-flatten order (PyTorch view(-1,1200)) to
    # NHWC-flatten order so the wrapper can flatten the NHWC activation directly.
    C, Hs, Ws = 48, 5, 5
    hh, ww, cc = np.meshgrid(np.arange(Hs), np.arange(Ws), np.arange(C), indexing="ij")
    nhwc_to_nchw = (cc * (Hs * Ws) + hh * Ws + ww).reshape(-1)       # (1200,)

    def head_w(w):   # (out, 1200) torch -> (1200, out), rows in NHWC order
        return jnp.transpose(w)[nhwc_to_nchw, :]

    w_fc1 = head_w(tp["fc1_w"])
    w_dom1 = head_w(tp["dom1_w"])
    return {
        "w_conv1": conv_w(tp["conv1_w"]), "b_conv1": tp["conv1_b"].reshape(1, -1),
        "w_conv2": conv_w(tp["conv2_w"]), "b_conv2": tp["conv2_b"].reshape(1, -1),
        # fused first layer of both heads
        "w_h1": jnp.concatenate([w_fc1, w_dom1], axis=1),            # (1200, 200)
        "b_h1": jnp.concatenate([tp["fc1_b"], tp["dom1_b"]]).reshape(1, -1),
        "w_fc2": jnp.transpose(tp["fc2_w"]), "b_fc2": tp["fc2_b"].reshape(1, -1),
        "w_fc3": jnp.transpose(tp["fc3_w"]), "b_fc3": tp["fc3_b"].reshape(1, -1),
        "w_dom2": jnp.transpose(tp["dom2_w"]), "b_dom2": tp["dom2_b"].reshape(1, -1),
    }


# ----------------------------------------------------------------------------
# Full forward pass (wrapper only does layout plumbing + im2col).
# ----------------------------------------------------------------------------
@jax.jit
def dann_forward(p, x):
    """x: (B, Cin, 32, 32) NCHW, like the PyTorch module. Returns (label, domain)."""
    B = x.shape[0]
    xh = jnp.transpose(x, (0, 2, 3, 1)).astype(jnp.float32)          # NCHW -> NHWC
    h = conv5x5_relu_pool(xh, p["w_conv1"], p["b_conv1"])            # (B, 14, 14, 32)
    h = conv5x5_relu_pool(h, p["w_conv2"], p["b_conv2"])             # (B,  5,  5, 48)
    feat = h.reshape(B, 1200)    # NHWC flatten; head weights pre-permuted to match
    label, domain = dann_heads(
        feat,
        p["w_h1"], p["b_h1"],
        p["w_fc2"], p["b_fc2"],
        p["w_fc3"], p["b_fc3"],
        p["w_dom2"], p["b_dom2"])
    return label, domain


# ----------------------------------------------------------------------------
# Pure-JAX reference in the ORIGINAL PyTorch layouts (validates all reorders).
# ----------------------------------------------------------------------------
def reference_forward(tp, x):
    def conv_block(h, w, b):
        y = lax.conv_general_dilated(h, w, (1, 1), "VALID",
                                     dimension_numbers=("NCHW", "OIHW", "NCHW"))
        y = jnp.maximum(y + b.reshape(1, -1, 1, 1), 0.0)
        return lax.reduce_window(y, -jnp.inf, lax.max,
                                 (1, 1, 2, 2), (1, 1, 2, 2), "VALID")

    h = conv_block(x.astype(jnp.float32), tp["conv1_w"], tp["conv1_b"])
    h = conv_block(h, tp["conv2_w"], tp["conv2_b"])
    feat = h.reshape(x.shape[0], -1)                                 # NCHW flatten
    c = jnp.maximum(feat @ tp["fc1_w"].T + tp["fc1_b"], 0.0)
    c = jnp.maximum(c @ tp["fc2_w"].T + tp["fc2_b"], 0.0)
    label = c @ tp["fc3_w"].T + tp["fc3_b"]
    d = jnp.maximum(feat @ tp["dom1_w"].T + tp["dom1_b"], 0.0)
    domain = jax.nn.sigmoid(d @ tp["dom2_w"].T + tp["dom2_b"])
    return label, domain


if __name__ == "__main__":
    key = jax.random.PRNGKey(0)
    ks = jax.random.split(key, 16)
    B, in_channel = 2, 3            # Linear(1200, .) forces 32x32 spatial input

    def init(k, shape, scale):
        return scale * jax.random.normal(k, shape, dtype=jnp.float32)

    # Parameters in PyTorch-equivalent layouts.
    torch_params = {
        "conv1_w": init(ks[0], (32, in_channel, 5, 5), 0.10),
        "conv1_b": init(ks[1], (32,), 0.10),
        "conv2_w": init(ks[2], (48, 32, 5, 5), 0.05),
        "conv2_b": init(ks[3], (48,), 0.05),
        "fc1_w":  init(ks[4], (100, 1200), 0.03),
        "fc1_b":  init(ks[5], (100,), 0.03),
        "fc2_w":  init(ks[6], (100, 100), 0.10),
        "fc2_b":  init(ks[7], (100,), 0.10),
        "fc3_w":  init(ks[8], (10, 100), 0.10),
        "fc3_b":  init(ks[9], (10,), 0.10),
        "dom1_w": init(ks[10], (100, 1200), 0.03),
        "dom1_b": init(ks[11], (100,), 0.03),
        "dom2_w": init(ks[12], (1, 100), 0.10),
        "dom2_b": init(ks[13], (1,), 0.10),
    }
    x = jax.random.normal(ks[14], (B, in_channel, 32, 32), dtype=jnp.float32)

    params = prepare_params(torch_params)   # one-time layout conversion
    label, domain = dann_forward(params, x)
    label, domain = jax.block_until_ready((label, domain))

    assert label.shape == (B, 10), label.shape
    assert domain.shape == (B, 1), domain.shape
    assert label.dtype == jnp.float32 and domain.dtype == jnp.float32

    ref_label, ref_domain = reference_forward(torch_params, x)
    assert jnp.allclose(label, ref_label, atol=1e-3, rtol=1e-3), "label mismatch vs reference"
    assert jnp.allclose(domain, ref_domain, atol=1e-3, rtol=1e-3), "domain mismatch vs reference"

    print("KERNEL_OK")
</pallas_src>

<mosaic_0001>
module attributes {stable_mosaic.version = 11 : i64} {
  func.func @_patch_gemm_relu_pool_kernel(%arg0: i32, %arg1: memref<1568x75xf32, #tpu.memory_space<vmem>>, %arg2: memref<75x32xf32, #tpu.memory_space<vmem>>, %arg3: memref<1x32xf32, #tpu.memory_space<vmem>>, %arg4: memref<2x14x14x32xf32, #tpu.memory_space<vmem>>, %arg5: memref<1568x32xf32, #tpu.memory_space<vmem>>, %arg6: memref<2x28x14x32xf32, #tpu.memory_space<vmem>>) attributes {dimension_semantics = [#tpu.dimension_semantics<parallel>], iteration_bounds = array<i64: 1>, scalar_prefetch = 0 : i64, scratch_operands = 2 : i64, tpu.core_type = #tpu.core_type<tc>, window_params = [{transform_indices = @transform_0, window_bounds = array<i64: 1568, 75>}, {pipeline_mode = #tpu.pipeline_mode<synchronous>, transform_indices = @transform_1, window_bounds = array<i64: 75, 32>}, {pipeline_mode = #tpu.pipeline_mode<synchronous>, transform_indices = @transform_2, window_bounds = array<i64: 1, 32>}, {transform_indices = @transform_3, window_bounds = array<i64: 2, 14, 14, 32>}]} {
    %c0 = arith.constant 0 : index
    %c0_0 = arith.constant 0 : index
    %0 = vector.load %arg1[%c0, %c0_0] : memref<1568x75xf32, #tpu.memory_space<vmem>>, vector<1568x75xf32>
    %c0_1 = arith.constant 0 : index
    %c0_2 = arith.constant 0 : index
    %1 = vector.load %arg2[%c0_1, %c0_2] : memref<75x32xf32, #tpu.memory_space<vmem>>, vector<75x32xf32>
    %cst = arith.constant dense<0.000000e+00> : vector<1568x32xf32>
    %2 = tpu.matmul %0, %1, %cst {dimension_numbers = #tpu.dot_dimension_numbers<[1], [0], [0], [1], [0, 0, 1, 1], [], []>} : vector<1568x75xf32>, vector<75x32xf32>, vector<1568x32xf32> -> vector<1568x32xf32>
    %c0_3 = arith.constant 0 : index
    %c0_4 = arith.constant 0 : index
    %3 = vector.load %arg3[%c0_3, %c0_4] : memref<1x32xf32, #tpu.memory_space<vmem>>, vector<1x32xf32>
    %4 = vector.broadcast %3 : vector<1x32xf32> to vector<1568x32xf32>
    %5 = arith.addf %2, %4 : vector<1568x32xf32>
    %cst_5 = arith.constant 0.000000e+00 : f32
    %6 = vector.broadcast %cst_5 : f32 to vector<1568x32xf32>
    %7 = arith.maximumf %5, %6 : vector<1568x32xf32>
    %c0_6 = arith.constant 0 : index
    %c0_7 = arith.constant 0 : index
    %8 = vector.load %arg5[%c0_6, %c0_7] : memref<1568x32xf32, #tpu.memory_space<vmem>>, vector<1568x32xf32>
    tpu.vector_store %arg5[%c0_6, %c0_7], %7 {strides = array<i32>} : memref<1568x32xf32, #tpu.memory_space<vmem>>, vector<1568x32xf32>,
    %c0_8 = arith.constant 0 : index
    %c0_9 = arith.constant 0 : index
    %9 = tpu.strided_load %arg5[%c0_8, %c0_9] {strides = array<i32: 2, 1>} : memref<1568x32xf32, #tpu.memory_space<vmem>>, vector<784x32xf32>
    %c1 = arith.constant 1 : index
    %c0_10 = arith.constant 0 : index
    %10 = tpu.strided_load %arg5[%c1, %c0_10] {strides = array<i32: 2, 1>} : memref<1568x32xf32, #tpu.memory_space<vmem>>, vector<784x32xf32>
    %11 = arith.maximumf %9, %10 : vector<784x32xf32>
    %12 = vector.shape_cast %11 : vector<784x32xf32> to vector<2x28x14x32xf32>
    %c0_11 = arith.constant 0 : index
    %c0_12 = arith.constant 0 : index
    %c0_13 = arith.constant 0 : index
    %c0_14 = arith.constant 0 : index
    %13 = vector.load %arg6[%c0_11, %c0_12, %c0_13, %c0_14] : memref<2x28x14x32xf32, #tpu.memory_space<vmem>>, vector<2x28x14x32xf32>
    tpu.vector_store %arg6[%c0_11, %c0_12, %c0_13, %c0_14], %12 {strides = array<i32>} : memref<2x28x14x32xf32, #tpu.memory_space<vmem>>, vector<2x28x14x32xf32>,
    %c0_15 = arith.constant 0 : index
    %c0_16 = arith.constant 0 : index
    %c0_17 = arith.constant 0 : index
    %c0_18 = arith.constant 0 : index
    %14 = tpu.strided_load %arg6[%c0_15, %c0_16, %c0_17, %c0_18] {strides = array<i32: 1, 2, 1, 1>} : memref<2x28x14x32xf32, #tpu.memory_space<vmem>>, vector<2x14x14x32xf32>
    %c0_19 = arith.constant 0 : index
    %c1_20 = arith.constant 1 : index
    %c0_21 = arith.constant 0 : index
    %c0_22 = arith.constant 0 : index
    %15 = tpu.strided_load %arg6[%c0_19, %c1_20, %c0_21, %c0_22] {strides = array<i32: 1, 2, 1, 1>} : memref<2x28x14x32xf32, #tpu.memory_space<vmem>>, vector<2x14x14x32xf32>
    %16 = arith.maximumf %14, %15 : vector<2x14x14x32xf32>
    %c0_23 = arith.constant 0 : index
    %c0_24 = arith.constant 0 : index
    %c0_25 = arith.constant 0 : index
    %c0_26 = arith.constant 0 : index
    %17 = vector.load %arg4[%c0_23, %c0_24, %c0_25, %c0_26] : memref<2x14x14x32xf32, #tpu.memory_space<vmem>>, vector<2x14x14x32xf32>
    tpu.vector_store %arg4[%c0_23, %c0_24, %c0_25, %c0_26], %16 {strides = array<i32>} : memref<2x14x14x32xf32, #tpu.memory_space<vmem>>, vector<2x14x14x32xf32>,
    return
  }
  func.func @transform_0(%arg0: i32) -> (i32, i32) {
    %c0_i32 = arith.constant 0 : i32
    %c0_i32_0 = arith.constant 0 : i32
    return %arg0, %c0_i32 : i32, i32
  }
  func.func @transform_1(%arg0: i32) -> (i32, i32) {
    %c0_i32 = arith.constant 0 : i32
    %c0_i32_0 = arith.constant 0 : i32
    %c0_i32_1 = arith.constant 0 : i32
    return %c0_i32, %c0_i32_0 : i32, i32
  }
  func.func @transform_2(%arg0: i32) -> (i32, i32) {
    %c0_i32 = arith.constant 0 : i32
    %c0_i32_0 = arith.constant 0 : i32
    %c0_i32_1 = arith.constant 0 : i32
    return %c0_i32, %c0_i32_0 : i32, i32
  }
  func.func @transform_3(%arg0: i32) -> (i32, i32, i32, i32) {
    %c0_i32 = arith.constant 0 : i32
    %c0_i32_0 = arith.constant 0 : i32
    %c0_i32_1 = arith.constant 0 : i32
    %c0_i32_2 = arith.constant 0 : i32
    return %arg0, %c0_i32, %c0_i32_0, %c0_i32_1 : i32, i32, i32, i32
  }
}

module attributes {stable_mosaic.version = 11 : i64} {
  func.func @_patch_gemm_relu_pool_kernel(%arg0: i32, %arg1: memref<200x800xf32, #tpu.memory_space<vmem>>, %arg2: memref<800x48xf32, #tpu.memory_space<vmem>>, %arg3: memref<1x48xf32, #tpu.memory_space<vmem>>, %arg4: memref<2x5x5x48xf32, #tpu.memory_space<vmem>>, %arg5: memref<200x48xf32, #tpu.memory_space<vmem>>, %arg6: memref<2x10x5x48xf32, #tpu.memory_space<vmem>>) attributes {dimension_semantics = [#tpu.dimension_semantics<parallel>], iteration_bounds = array<i64: 1>, scalar_prefetch = 0 : i64, scratch_operands = 2 : i64, tpu.core_type = #tpu.core_type<tc>, window_params = [{transform_indices = @transform_0, window_bounds = array<i64: 200, 800>}, {pipeline_mode = #tpu.pipeline_mode<synchronous>, transform_indices = @transform_1, window_bounds = array<i64: 800, 48>}, {pipeline_mode = #tpu.pipeline_mode<synchronous>, transform_indices = @transform_2, window_bounds = array<i64: 1, 48>}, {transform_indices = @transform_3, window_bounds = array<i64: 2, 5, 5, 48>}]} {
    %c0 = arith.constant 0 : index
    %c0_0 = arith.constant 0 : index
    %0 = vector.load %arg1[%c0, %c0_0] : memref<200x800xf32, #tpu.memory_space<vmem>>, vector<200x800xf32>
    %c0_1 = arith.constant 0 : index
    %c0_2 = arith.constant 0 : index
    %1 = vector.load %arg2[%c0_1, %c0_2] : memref<800x48xf32, #tpu.memory_space<vmem>>, vector<800x48xf32>
    %cst = arith.constant dense<0.000000e+00> : vector<200x48xf32>
    %2 = tpu.matmul %0, %1, %cst {dimension_numbers = #tpu.dot_dimension_numbers<[1], [0], [0], [1], [0, 0, 1, 1], [], []>} : vector<200x800xf32>, vector<800x48xf32>, vector<200x48xf32> -> vector<200x48xf32>
    %c0_3 = arith.constant 0 : index
    %c0_4 = arith.constant 0 : index
    %3 = vector.load %arg3[%c0_3, %c0_4] : memref<1x48xf32, #tpu.memory_space<vmem>>, vector<1x48xf32>
    %4 = vector.broadcast %3 : vector<1x48xf32> to vector<200x48xf32>
    %5 = arith.addf %2, %4 : vector<200x48xf32>
    %cst_5 = arith.constant 0.000000e+00 : f32
    %6 = vector.broadcast %cst_5 : f32 to vector<200x48xf32>
    %7 = arith.maximumf %5, %6 : vector<200x48xf32>
    %c0_6 = arith.constant 0 : index
    %c0_7 = arith.constant 0 : index
    %8 = vector.load %arg5[%c0_6, %c0_7] : memref<200x48xf32, #tpu.memory_space<vmem>>, vector<200x48xf32>
    tpu.vector_store %arg5[%c0_6, %c0_7], %7 {strides = array<i32>} : memref<200x48xf32, #tpu.memory_space<vmem>>, vector<200x48xf32>,
    %c0_8 = arith.constant 0 : index
    %c0_9 = arith.constant 0 : index
    %9 = tpu.strided_load %arg5[%c0_8, %c0_9] {strides = array<i32: 2, 1>} : memref<200x48xf32, #tpu.memory_space<vmem>>, vector<100x48xf32>
    %c1 = arith.constant 1 : index
    %c0_10 = arith.constant 0 : index
    %10 = tpu.strided_load %arg5[%c1, %c0_10] {strides = array<i32: 2, 1>} : memref<200x48xf32, #tpu.memory_space<vmem>>, vector<100x48xf32>
    %11 = arith.maximumf %9, %10 : vector<100x48xf32>
    %12 = vector.shape_cast %11 : vector<100x48xf32> to vector<2x10x5x48xf32>
    %c0_11 = arith.constant 0 : index
    %c0_12 = arith.constant 0 : index
    %c0_13 = arith.constant 0 : index
    %c0_14 = arith.constant 0 : index
    %13 = vector.load %arg6[%c0_11, %c0_12, %c0_13, %c0_14] : memref<2x10x5x48xf32, #tpu.memory_space<vmem>>, vector<2x10x5x48xf32>
    tpu.vector_store %arg6[%c0_11, %c0_12, %c0_13, %c0_14], %12 {strides = array<i32>} : memref<2x10x5x48xf32, #tpu.memory_space<vmem>>, vector<2x10x5x48xf32>,
    %c0_15 = arith.constant 0 : index
    %c0_16 = arith.constant 0 : index
    %c0_17 = arith.constant 0 : index
    %c0_18 = arith.constant 0 : index
    %14 = tpu.strided_load %arg6[%c0_15, %c0_16, %c0_17, %c0_18] {strides = array<i32: 1, 2, 1, 1>} : memref<2x10x5x48xf32, #tpu.memory_space<vmem>>, vector<2x5x5x48xf32>
    %c0_19 = arith.constant 0 : index
    %c1_20 = arith.constant 1 : index
    %c0_21 = arith.constant 0 : index
    %c0_22 = arith.constant 0 : index
    %15 = tpu.strided_load %arg6[%c0_19, %c1_20, %c0_21, %c0_22] {strides = array<i32: 1, 2, 1, 1>} : memref<2x10x5x48xf32, #tpu.memory_space<vmem>>, vector<2x5x5x48xf32>
    %16 = arith.maximumf %14, %15 : vector<2x5x5x48xf32>
    %c0_23 = arith.constant 0 : index
    %c0_24 = arith.constant 0 : index
    %c0_25 = arith.constant 0 : index
    %c0_26 = arith.constant 0 : index
    %17 = vector.load %arg4[%c0_23, %c0_24, %c0_25, %c0_26] : memref<2x5x5x48xf32, #tpu.memory_space<vmem>>, vector<2x5x5x48xf32>
    tpu.vector_store %arg4[%c0_23, %c0_24, %c0_25, %c0_26], %16 {strides = array<i32>} : memref<2x5x5x48xf32, #tpu.memory_space<vmem>>, vector<2x5x5x48xf32>,
    return
  }
  func.func @transform_0(%arg0: i32) -> (i32, i32) {
    %c0_i32 = arith.constant 0 : i32
    %c0_i32_0 = arith.constant 0 : i32
    return %arg0, %c0_i32 : i32, i32
  }
  func.func @transform_1(%arg0: i32) -> (i32, i32) {
    %c0_i32 = arith.constant 0 : i32
    %c0_i32_0 = arith.constant 0 : i32
    %c0_i32_1 = arith.constant 0 : i32
    return %c0_i32, %c0_i32_0 : i32, i32
  }
  func.func @transform_2(%arg0: i32) -> (i32, i32) {
    %c0_i32 = arith.constant 0 : i32
    %c0_i32_0 = arith.constant 0 : i32
    %c0_i32_1 = arith.constant 0 : i32
    return %c0_i32, %c0_i32_0 : i32, i32
  }
  func.func @transform_3(%arg0: i32) -> (i32, i32, i32, i32) {
    %c0_i32 = arith.constant 0 : i32
    %c0_i32_0 = arith.constant 0 : i32
    %c0_i32_1 = arith.constant 0 : i32
    %c0_i32_2 = arith.constant 0 : i32
    return %arg0, %c0_i32, %c0_i32_0, %c0_i32_1 : i32, i32, i32, i32
  }
}

module attributes {stable_mosaic.version = 11 : i64} {
  func.func @_dann_heads_kernel(%arg0: i32, %arg1: memref<2x1200xf32, #tpu.memory_space<vmem>>, %arg2: memref<1200x200xf32, #tpu.memory_space<vmem>>, %arg3: memref<1x200xf32, #tpu.memory_space<vmem>>, %arg4: memref<100x100xf32, #tpu.memory_space<vmem>>, %arg5: memref<1x100xf32, #tpu.memory_space<vmem>>, %arg6: memref<100x10xf32, #tpu.memory_space<vmem>>, %arg7: memref<1x10xf32, #tpu.memory_space<vmem>>, %arg8: memref<100x1xf32, #tpu.memory_space<vmem>>, %arg9: memref<1x1xf32, #tpu.memory_space<vmem>>, %arg10: memref<2x10xf32, #tpu.memory_space<vmem>>, %arg11: memref<2x1xf32, #tpu.memory_space<vmem>>) attributes {dimension_semantics = [#tpu.dimension_semantics<parallel>], iteration_bounds = array<i64: 1>, scalar_prefetch = 0 : i64, scratch_operands = 0 : i64, tpu.core_type = #tpu.core_type<tc>, window_params = [{transform_indices = @transform_0, window_bounds = array<i64: 2, 1200>}, {pipeline_mode = #tpu.pipeline_mode<synchronous>, transform_indices = @transform_1, window_bounds = array<i64: 1200, 200>}, {pipeline_mode = #tpu.pipeline_mode<synchronous>, transform_indices = @transform_2, window_bounds = array<i64: 1, 200>}, {pipeline_mode = #tpu.pipeline_mode<synchronous>, transform_indices = @transform_3, window_bounds = array<i64: 100, 100>}, {pipeline_mode = #tpu.pipeline_mode<synchronous>, transform_indices = @transform_4, window_bounds = array<i64: 1, 100>}, {pipeline_mode = #tpu.pipeline_mode<synchronous>, transform_indices = @transform_5, window_bounds = array<i64: 100, 10>}, {pipeline_mode = #tpu.pipeline_mode<synchronous>, transform_indices = @transform_6, window_bounds = array<i64: 1, 10>}, {pipeline_mode = #tpu.pipeline_mode<synchronous>, transform_indices = @transform_7, window_bounds = array<i64: 100, 1>}, {pipeline_mode = #tpu.pipeline_mode<synchronous>, transform_indices = @transform_8, window_bounds = array<i64: 1, 1>}, {transform_indices = @transform_9, window_bounds = array<i64: 2, 10>}, {transform_indices = @transform_10, window_bounds = array<i64: 2, 1>}]} {
    %c0 = arith.constant 0 : index
    %c0_0 = arith.constant 0 : index
    %0 = vector.load %arg1[%c0, %c0_0] : memref<2x1200xf32, #tpu.memory_space<vmem>>, vector<2x1200xf32>
    %c0_1 = arith.constant 0 : index
    %c0_2 = arith.constant 0 : index
    %1 = vector.load %arg2[%c0_1, %c0_2] : memref<1200x200xf32, #tpu.memory_space<vmem>>, vector<1200x200xf32>
    %cst = arith.constant dense<0.000000e+00> : vector<2x200xf32>
    %2 = tpu.matmul %0, %1, %cst {dimension_numbers = #tpu.dot_dimension_numbers<[1], [0], [0], [1], [0, 0, 1, 1], [], []>} : vector<2x1200xf32>, vector<1200x200xf32>, vector<2x200xf32> -> vector<2x200xf32>
    %c0_3 = arith.constant 0 : index
    %c0_4 = arith.constant 0 : index
    %3 = vector.load %arg3[%c0_3, %c0_4] : memref<1x200xf32, #tpu.memory_space<vmem>>, vector<1x200xf32>
    %4 = vector.broadcast %3 : vector<1x200xf32> to vector<2x200xf32>
    %5 = arith.addf %2, %4 : vector<2x200xf32>
    %cst_5 = arith.constant 0.000000e+00 : f32
    %6 = vector.broadcast %cst_5 : f32 to vector<2x200xf32>
    %7 = arith.maximumf %5, %6 : vector<2x200xf32>
    %8 = vector.extract_strided_slice %7 {offsets = [0, 0], sizes = [2, 100], strides = [1, 1]} : vector<2x200xf32> to vector<2x100xf32>
    %9 = vector.extract_strided_slice %7 {offsets = [0, 100], sizes = [2, 100], strides = [1, 1]} : vector<2x200xf32> to vector<2x100xf32>
    %c0_6 = arith.constant 0 : index
    %c0_7 = arith.constant 0 : index
    %10 = vector.load %arg4[%c0_6, %c0_7] : memref<100x100xf32, #tpu.memory_space<vmem>>, vector<100x100xf32>
    %cst_8 = arith.constant dense<0.000000e+00> : vector<2x100xf32>
    %11 = tpu.matmul %8, %10, %cst_8 {dimension_numbers = #tpu.dot_dimension_numbers<[1], [0], [0], [1], [0, 0, 1, 1], [], []>} : vector<2x100xf32>, vector<100x100xf32>, vector<2x100xf32> -> vector<2x100xf32>
    %c0_9 = arith.constant 0 : index
    %c0_10 = arith.constant 0 : index
    %12 = vector.load %arg5[%c0_9, %c0_10] : memref<1x100xf32, #tpu.memory_space<vmem>>, vector<1x100xf32>
    %13 = vector.broadcast %12 : vector<1x100xf32> to vector<2x100xf32>
    %14 = arith.addf %11, %13 : vector<2x100xf32>
    %cst_11 = arith.constant 0.000000e+00 : f32
    %15 = vector.broadcast %cst_11 : f32 to vector<2x100xf32>
    %16 = arith.maximumf %14, %15 : vector<2x100xf32>
    %c0_12 = arith.constant 0 : index
    %c0_13 = arith.constant 0 : index
    %17 = vector.load %arg6[%c0_12, %c0_13] : memref<100x10xf32, #tpu.memory_space<vmem>>, vector<100x10xf32>
    %cst_14 = arith.constant dense<0.000000e+00> : vector<2x10xf32>
    %18 = tpu.matmul %16, %17, %cst_14 {dimension_numbers = #tpu.dot_dimension_numbers<[1], [0], [0], [1], [0, 0, 1, 1], [], []>} : vector<2x100xf32>, vector<100x10xf32>, vector<2x10xf32> -> vector<2x10xf32>
    %c0_15 = arith.constant 0 : index
    %c0_16 = arith.constant 0 : index
    %19 = vector.load %arg7[%c0_15, %c0_16] : memref<1x10xf32, #tpu.memory_space<vmem>>, vector<1x10xf32>
    %20 = vector.broadcast %19 : vector<1x10xf32> to vector<2x10xf32>
    %21 = arith.addf %18, %20 : vector<2x10xf32>
    %c0_17 = arith.constant 0 : index
    %c0_18 = arith.constant 0 : index
    %22 = vector.load %arg10[%c0_17, %c0_18] : memref<2x10xf32, #tpu.memory_space<vmem>>, vector<2x10xf32>
    tpu.vector_store %arg10[%c0_17, %c0_18], %21 {strides = array<i32>} : memref<2x10xf32, #tpu.memory_space<vmem>>, vector<2x10xf32>,
    %c0_19 = arith.constant 0 : index
    %c0_20 = arith.constant 0 : index
    %23 = vector.load %arg8[%c0_19, %c0_20] : memref<100x1xf32, #tpu.memory_space<vmem>>, vector<100x1xf32>
    %cst_21 = arith.constant dense<0.000000e+00> : vector<2x1xf32>
    %24 = tpu.matmul %9, %23, %cst_21 {dimension_numbers = #tpu.dot_dimension_numbers<[1], [0], [0], [1], [0, 0, 1, 1], [], []>} : vector<2x100xf32>, vector<100x1xf32>, vector<2x1xf32> -> vector<2x1xf32>
    %c0_22 = arith.constant 0 : index
    %c0_23 = arith.constant 0 : index
    %25 = vector.load %arg9[%c0_22, %c0_23] : memref<1x1xf32, #tpu.memory_space<vmem>>, vector<1x1xf32>
    %26 = vector.broadcast %25 : vector<1x1xf32> to vector<2x1xf32>
    %27 = arith.addf %24, %26 : vector<2x1xf32>
    %cst_24 = arith.constant 5.000000e-01 : f32
    %28 = vector.broadcast %cst_24 : f32 to vector<2x1xf32>
    %29 = arith.mulf %28, %27 : vector<2x1xf32>
    %30 = math.tanh %29 : vector<2x1xf32>
    %cst_25 = arith.constant 1.000000e+00 : f32
    %31 = vector.broadcast %cst_25 : f32 to vector<2x1xf32>
    %32 = arith.addf %30, %31 : vector<2x1xf32>
    %cst_26 = arith.constant 5.000000e-01 : f32
    %33 = vector.broadcast %cst_26 : f32 to vector<2x1xf32>
    %34 = arith.mulf %33, %32 : vector<2x1xf32>
    %c0_27 = arith.constant 0 : index
    %c0_28 = arith.constant 0 : index
    %35 = vector.load %arg11[%c0_27, %c0_28] : memref<2x1xf32, #tpu.memory_space<vmem>>, vector<2x1xf32>
    tpu.vector_store %arg11[%c0_27, %c0_28], %34 {strides = array<i32>} : memref<2x1xf32, #tpu.memory_space<vmem>>, vector<2x1xf32>,
    return
  }
  func.func @transform_0(%arg0: i32) -> (i32, i32) {
    %c0_i32 = arith.constant 0 : i32
    %c0_i32_0 = arith.constant 0 : i32
    return %arg0, %c0_i32 : i32, i32
  }
  func.func @transform_1(%arg0: i32) -> (i32, i32) {
    %c0_i32 = arith.constant 0 : i32
    %c0_i32_0 = arith.constant 0 : i32
    %c0_i32_1 = arith.constant 0 : i32
    return %c0_i32, %c0_i32_0 : i32, i32
  }
  func.func @transform_2(%arg0: i32) -> (i32, i32) {
    %c0_i32 = arith.constant 0 : i32
    %c0_i32_0 = arith.constant 0 : i32
    %c0_i32_1 = arith.constant 0 : i32
    return %c0_i32, %c0_i32_0 : i32, i32
  }
  func.func @transform_3(%arg0: i32) -> (i32, i32) {
    %c0_i32 = arith.constant 0 : i32
    %c0_i32_0 = arith.constant 0 : i32
    %c0_i32_1 = arith.constant 0 : i32
    return %c0_i32, %c0_i32_0 : i32, i32
  }
  func.func @transform_4(%arg0: i32) -> (i32, i32) {
    %c0_i32 = arith.constant 0 : i32
    %c0_i32_0 = arith.constant 0 : i32
    %c0_i32_1 = arith.constant 0 : i32
    return %c0_i32, %c0_i32_0 : i32, i32
  }
  func.func @transform_5(%arg0: i32) -> (i32, i32) {
    %c0_i32 = arith.constant 0 : i32
    %c0_i32_0 = arith.constant 0 : i32
    %c0_i32_1 = arith.constant 0 : i32
    return %c0_i32, %c0_i32_0 : i32, i32
  }
  func.func @transform_6(%arg0: i32) -> (i32, i32) {
    %c0_i32 = arith.constant 0 : i32
    %c0_i32_0 = arith.constant 0 : i32
    %c0_i32_1 = arith.constant 0 : i32
    return %c0_i32, %c0_i32_0 : i32, i32
  }
  func.func @transform_7(%arg0: i32) -> (i32, i32) {
    %c0_i32 = arith.constant 0 : i32
    %c0_i32_0 = arith.constant 0 : i32
    %c0_i32_1 = arith.constant 0 : i32
    return %c0_i32, %c0_i32_0 : i32, i32
  }
  func.func @transform_8(%arg0: i32) -> (i32, i32) {
    %c0_i32 = arith.constant 0 : i32
    %c0_i32_0 = arith.constant 0 : i32
    %c0_i32_1 = arith.constant 0 : i32
    return %c0_i32, %c0_i32_0 : i32, i32
  }
  func.func @transform_9(%arg0: i32) -> (i32, i32) {
    %c0_i32 = arith.constant 0 : i32
    %c0_i32_0 = arith.constant 0 : i32
    return %arg0, %c0_i32 : i32, i32
  }
  func.func @transform_10(%arg0: i32) -> (i32, i32) {
    %c0_i32 = arith.constant 0 : i32
    %c0_i32_0 = arith.constant 0 : i32
    return %arg0, %c0_i32 : i32, i32
  }
}

</mosaic_0001>

<bundles_post_ra>
// kernel: dann_forward.3
= control target key start
LH: loop header
LB: loop body
LE: loop exit
PB: predicated region body
PF: predicated region fallthrough
CT: control target
= control target key end

     0   :  { %vm816_vm0 = vcmask 1042432   ;;  %vm227_vm1 = vcmask 613376   ;;  %vm2061_vm2 = vcmask 261120   ;;  %vm6472_vm3 = vcmask 259072   ;;  %s10170_s1 = inlined_call_operand.vmem [shape: f32[75,32], index: 1, kind: input, shape index: {}]   ;;  %s10171_s0 = inlined_call_operand.vmem [shape: f32[1568,75], index: 0, kind: input, shape index: {}]   ;;  %s10172_s2 = inlined_call_operand.vmem [shape: f32[1,32], index: 2, kind: input, shape index: {}]   ;;  %s10173_s3 = inlined_call_operand.vmem [shape: f32[2,14,14,32], index: 3, kind: output, shape index: {}]  }
   0x1   :  { %v219_v0 = vld [vmem:[%s10170_s1 + $0x48] sm:$0x7]  ;;  %v218_v1 = vld [vmem:[%s10170_s1 + $0x40] sm:$0xff]  ;;  %v217_v2 = vld [vmem:[%s10170_s1 + $0x38] sm:$0xff] }
   0x2   :  { %7217 = vmatprep.subr.msk.mxu0 %vm816_vm0, %v219_v0  ;;  %7531 = vmatprep.subr.msk.mxu1 %vm816_vm0, %v219_v0  ;;  %v216_v3 = vld [vmem:[%s10170_s1 + $0x30] sm:$0xff]  ;;  %v215_v4 = vld [vmem:[%s10170_s1 + $0x28] sm:$0xff]  ;;  %v214_v5 = vld [vmem:[%s10170_s1 + $0x20] sm:$0xff] }
   0x3   :  { %7218 = vmatpush3.msk.msra.mxu0 %vm816_vm0, %v219_v0  ;;  %7541 = vmatpush3.msk.msra.mxu1 %vm816_vm0, %v219_v0  ;;  %v213_v6 = vld [vmem:[%s10170_s1 + $0x18] sm:$0xff]  ;;  %v212_v7 = vld [vmem:[%s10170_s1 + $0x10] sm:$0xff]  ;;  %v211_v8 = vld [vmem:[%s10170_s1 + $0x8] sm:$0xff] }
   0x4   :  { %7219 = vmatprep.subr.mxu0 %v218_v1  ;;  %7532 = vmatprep.subr.mxu1 %v218_v1  ;;  %v210_v9 = vld [vmem:[%s10170_s1] sm:$0xff]  ;;  %v112_v11 = vld [vmem:[%s10171_s0 + $0x310] sm:$0xff]  ;;  %v15_v12 = vld [vmem:[%s10171_s0 + $0x8] sm:$0xff] }
   0x5   :  { %7220 = vmatpush3.msra.mxu0 %v218_v1  ;;  %7542 = vmatpush3.msra.mxu1 %v218_v1  ;;  %v14_v10 = vld [vmem:[%s10171_s0] sm:$0xff]  ;;  %v113_v13 = vld [vmem:[%s10171_s0 + $0x318] sm:$0xff]  ;;  %v16_v14 = vld [vmem:[%s10171_s0 + $0x10] sm:$0xff] }
   0x6   :  { %7221 = vmatprep.subr.mxu0 %v217_v2  ;;  %7533 = vmatprep.subr.mxu1 %v217_v2  ;;  %v114_v15 = vld [vmem:[%s10171_s0 + $0x320] sm:$0xff]  ;;  %v17_v16 = vld [vmem:[%s10171_s0 + $0x18] sm:$0xff]  ;;  %v115_v17 = vld [vmem:[%s10171_s0 + $0x328] sm:$0xff] }
   0x7   :  { %7222 = vmatpush3.msra.mxu0 %v217_v2  ;;  %7543 = vmatpush3.msra.mxu1 %v217_v2  ;;  %v18_v18 = vld [vmem:[%s10171_s0 + $0x20] sm:$0xff]  ;;  %v116_v19 = vld [vmem:[%s10171_s0 + $0x330] sm:$0xff]  ;;  %v19_v20 = vld [vmem:[%s10171_s0 + $0x28] sm:$0xff] }
   0x8   :  { %7223 = vmatprep.subr.mxu0 %v216_v3  ;;  %7534 = vmatprep.subr.mxu1 %v216_v3  ;;  %v117_v21 = vld [vmem:[%s10171_s0 + $0x338] sm:$0xff]  ;;  %v20_v22 = vld [vmem:[%s10171_s0 + $0x30] sm:$0xff]  ;;  %v118_v23 = vld [vmem:[%s10171_s0 + $0x340] sm:$0xff] }
   0x9   :  { %7224 = vmatpush3.msra.mxu0 %v216_v3  ;;  %7544 = vmatpush3.msra.mxu1 %v216_v3  ;;  %v21_v24 = vld [vmem:[%s10171_s0 + $0x38] sm:$0xff]  ;;  %v119_v25 = vld [vmem:[%s10171_s0 + $0x348] sm:$0xff]  ;;  %v22_v26 = vld [vmem:[%s10171_s0 + $0x40] sm:$0xff] }
   0xa   :  { %7225 = vmatprep.subr.mxu0 %v215_v4  ;;  %7535 = vmatprep.subr.mxu1 %v215_v4  ;;  %v120_v27 = vld [vmem:[%s10171_s0 + $0x350] sm:$0xff]  ;;  %v23_v28 = vld [vmem:[%s10171_s0 + $0x48] sm:$0xff]  ;;  %v121_v29 = vld [vmem:[%s10171_s0 + $0x358] sm:$0xff] }
   0xb   :  { %7226 = vmatpush3.msra.mxu0 %v215_v4  ;;  %7545 = vmatpush3.msra.mxu1 %v215_v4  ;;  %v24_v30 = vld [vmem:[%s10171_s0 + $0x50] sm:$0xff]  ;;  %v122_v31 = vld [vmem:[%s10171_s0 + $0x360] sm:$0xff]  ;;  %v25_v32 = vld [vmem:[%s10171_s0 + $0x58] sm:$0xff] }
   0xc   :  { %7227 = vmatprep.subr.mxu0 %v214_v5  ;;  %7536 = vmatprep.subr.mxu1 %v214_v5  ;;  %v123_v33 = vld [vmem:[%s10171_s0 + $0x368] sm:$0xff]  ;;  %v26_v34 = vld [vmem:[%s10171_s0 + $0x60] sm:$0xff]  ;;  %v124_v35 = vld [vmem:[%s10171_s0 + $0x370] sm:$0xff] }
   0xd   :  { %7228 = vmatpush3.msra.mxu0 %v214_v5  ;;  %7546 = vmatpush3.msra.mxu1 %v214_v5  ;;  %v27_v36 = vld [vmem:[%s10171_s0 + $0x68] sm:$0xff]  ;;  %v125_v37 = vld [vmem:[%s10171_s0 + $0x378] sm:$0xff]  ;;  %v28_v38 = vld [vmem:[%s10171_s0 + $0x70] sm:$0xff] }
   0xe   :  { %7229 = vmatprep.subr.mxu0 %v213_v6  ;;  %7537 = vmatprep.subr.mxu1 %v213_v6  ;;  %v126_v39 = vld [vmem:[%s10171_s0 + $0x380] sm:$0xff]  ;;  %v29_v40 = vld [vmem:[%s10171_s0 + $0x78] sm:$0xff]  ;;  %v127_v41 = vld [vmem:[%s10171_s0 + $0x388] sm:$0xff] }
   0xf   :  { %7230 = vmatpush3.msra.mxu0 %v213_v6  ;;  %7547 = vmatpush3.msra.mxu1 %v213_v6  ;;  %v30_v42 = vld [vmem:[%s10171_s0 + $0x80] sm:$0xff]  ;;  %v128_v43 = vld [vmem:[%s10171_s0 + $0x390] sm:$0xff]  ;;  %v31_v44 = vld [vmem:[%s10171_s0 + $0x88] sm:$0xff] }
  0x10   :  { %7231 = vmatprep.subr.mxu0 %v212_v7  ;;  %7538 = vmatprep.subr.mxu1 %v212_v7  ;;  %v129_v45 = vld [vmem:[%s10171_s0 + $0x398] sm:$0xff]  ;;  %v32_v46 = vld [vmem:[%s10171_s0 + $0x90] sm:$0xff]  ;;  %v130_v47 = vld [vmem:[%s10171_s0 + $0x3a0] sm:$0xff] }
  0x11   :  { %7232 = vmatpush3.msra.mxu0 %v212_v7  ;;  %7548 = vmatpush3.msra.mxu1 %v212_v7  ;;  %v33_v48 = vld [vmem:[%s10171_s0 + $0x98] sm:$0xff]  ;;  %v131_v49 = vld [vmem:[%s10171_s0 + $0x3a8] sm:$0xff]  ;;  %v34_v50 = vld [vmem:[%s10171_s0 + $0xa0] sm:$0xff] }
  0x12   :  { %7233 = vmatprep.subr.mxu0 %v211_v8  ;;  %7539 = vmatprep.subr.mxu1 %v211_v8  ;;  %v132_v51 = vld [vmem:[%s10171_s0 + $0x3b0] sm:$0xff]  ;;  %v35_v52 = vld [vmem:[%s10171_s0 + $0xa8] sm:$0xff]  ;;  %v133_v53 = vld [vmem:[%s10171_s0 + $0x3b8] sm:$0xff] }
  0x13   :  { %7234 = vmatpush3.msra.mxu0 %v211_v8  ;;  %7549 = vmatpush3.msra.mxu1 %v211_v8  ;;  %v36_v54 = vld [vmem:[%s10171_s0 + $0xb0] sm:$0xff]  ;;  %v134_v55 = vld [vmem:[%s10171_s0 + $0x3c0] sm:$0xff]  ;;  %v37_v56 = vld [vmem:[%s10171_s0 + $0xb8] sm:$0xff] }
  0x14   :  { %7235 = vmatprep.subr.mxu0 %v210_v9  ;;  %7540 = vmatprep.subr.mxu1 %v210_v9  ;;  %v135_v57 = vld [vmem:[%s10171_s0 + $0x3c8] sm:$0xff]  ;;  %v38_v58 = vld [vmem:[%s10171_s0 + $0xc0] sm:$0xff]  ;;  %v136_v59 = vld [vmem:[%s10171_s0 + $0x3d0] sm:$0xff] }
  0x15   :  { %7236 = vmatpush3.msra.mxu0 %v210_v9  ;;  %7550 = vmatpush3.msra.mxu1 %v210_v9  ;;  %v39_v60 = vld [vmem:[%s10171_s0 + $0xc8] sm:$0xff]  ;;  %v137_v61 = vld [vmem:[%s10171_s0 + $0x3d8] sm:$0xff]  ;;  %v40_v62 = vld [vmem:[%s10171_s0 + $0xd0] sm:$0xff] }
  0x16   :  { %7237 = vmatprep.mubr.msk.f32.mxu0 %vm227_vm1, %v14_v10  ;;  %7384 = vmatprep.mubr.msk.f32.mxu1 %vm227_vm1, %v112_v11  ;;  %v138_v63 = vld [vmem:[%s10171_s0 + $0x3e0] sm:$0xff]  ;;  %v41_v0 = vld [vmem:[%s10171_s0 + $0xd8] sm:$0xff]  ;;  %v139_v1 = vld [vmem:[%s10171_s0 + $0x3e8] sm:$0xff] }
  0x17   :  { %7238 = vmatmul.mubr.msk.f32.vlgmr.msra.gmra.mxu0 %vm227_vm1, %v15_v12  ;;  %7385 = vmatmul.mubr.msk.f32.vlgmr.msra.gmra.mxu1 %vm227_vm1, %v113_v13  ;;  %v42_v2 = vld [vmem:[%s10171_s0 + $0xe0] sm:$0xff]  ;;  %v140_v3 = vld [vmem:[%s10171_s0 + $0x3f0] sm:$0xff]  ;;  %v43_v4 = vld [vmem:[%s10171_s0 + $0xe8] sm:$0xff] }
  0x18   :  { %7240 = vmatprep.mubr.msk.f32.mxu0 %vm227_vm1, %v16_v14  ;;  %7387 = vmatprep.mubr.msk.f32.mxu1 %vm227_vm1, %v114_v15  ;;  %v141_v5 = vld [vmem:[%s10171_s0 + $0x3f8] sm:$0xff]  ;;  %v44_v6 = vld [vmem:[%s10171_s0 + $0xf0] sm:$0xff]  ;;  %v142_v7 = vld [vmem:[%s10171_s0 + $0x400] sm:$0xff] }
  0x19   :  { %v45_v8 = vld [vmem:[%s10171_s0 + $0xf8] sm:$0xff]  ;;  %v143_v9 = vld [vmem:[%s10171_s0 + $0x408] sm:$0xff]  ;;  %v46_v10 = vld [vmem:[%s10171_s0 + $0x100] sm:$0xff] }
  0x1a   :  { %v144_v11 = vld [vmem:[%s10171_s0 + $0x410] sm:$0xff]  ;;  %v47_v12 = vld [vmem:[%s10171_s0 + $0x108] sm:$0xff]  ;;  %v145_v13 = vld [vmem:[%s10171_s0 + $0x418] sm:$0xff] }
  0x1b   :  { %7241 = vmatmul.mubr.msk.f32.gmra.mxu0 %vm227_vm1, %v17_v16  ;;  %7388 = vmatmul.mubr.msk.f32.gmra.mxu1 %vm227_vm1, %v115_v17  ;;  %v48_v14 = vld [vmem:[%s10171_s0 + $0x110] sm:$0xff]  ;;  %v146_v15 = vld [vmem:[%s10171_s0 + $0x420] sm:$0xff]  ;;  %v49_v16 = vld [vmem:[%s10171_s0 + $0x118] sm:$0xff] }
  0x1c   :  { %7243 = vmatprep.mubr.msk.f32.mxu0 %vm227_vm1, %v18_v18  ;;  %7390 = vmatprep.mubr.msk.f32.mxu1 %vm227_vm1, %v116_v19  ;;  %v147_v17 = vld [vmem:[%s10171_s0 + $0x428] sm:$0xff]  ;;  %v50_v18 = vld [vmem:[%s10171_s0 + $0x120] sm:$0xff]  ;;  %v148_v19 = vld [vmem:[%s10171_s0 + $0x430] sm:$0xff] }
  0x1f   :  { %7244 = vmatmul.mubr.msk.f32.gmra.mxu0 %vm227_vm1, %v19_v20  ;;  %7391 = vmatmul.mubr.msk.f32.gmra.mxu1 %vm227_vm1, %v117_v21  ;;  %v51_v20 = vld [vmem:[%s10171_s0 + $0x128] sm:$0xff]  ;;  %v149_v21 = vld [vmem:[%s10171_s0 + $0x438] sm:$0xff] }
  0x20   :  { %7246 = vmatprep.mubr.msk.f32.mxu0 %vm227_vm1, %v20_v22  ;;  %7393 = vmatprep.mubr.msk.f32.mxu1 %vm227_vm1, %v118_v23  ;;  %v52_v22 = vld [vmem:[%s10171_s0 + $0x130] sm:$0xff]  ;;  %v150_v23 = vld [vmem:[%s10171_s0 + $0x440] sm:$0xff] }
  0x23   :  { %7247 = vmatmul.mubr.msk.f32.gmra.mxu0 %vm227_vm1, %v21_v24  ;;  %7394 = vmatmul.mubr.msk.f32.gmra.mxu1 %vm227_vm1, %v119_v25  ;;  %v53_v24 = vld [vmem:[%s10171_s0 + $0x138] sm:$0xff]  ;;  %v151_v25 = vld [vmem:[%s10171_s0 + $0x448] sm:$0xff] }
  0x24   :  { %7249 = vmatprep.mubr.msk.f32.mxu0 %vm227_vm1, %v22_v26  ;;  %7396 = vmatprep.mubr.msk.f32.mxu1 %vm227_vm1, %v120_v27  ;;  %v54_v26 = vld [vmem:[%s10171_s0 + $0x140] sm:$0xff]  ;;  %v152_v27 = vld [vmem:[%s10171_s0 + $0x450] sm:$0xff] }
  0x27   :  { %7250 = vmatmul.mubr.msk.f32.gmra.mxu0 %vm227_vm1, %v23_v28  ;;  %7397 = vmatmul.mubr.msk.f32.gmra.mxu1 %vm227_vm1, %v121_v29  ;;  %v55_v28 = vld [vmem:[%s10171_s0 + $0x148] sm:$0xff]  ;;  %v153_v29 = vld [vmem:[%s10171_s0 + $0x458] sm:$0xff] }
  0x28   :  { %7252 = vmatprep.mubr.msk.f32.mxu0 %vm227_vm1, %v24_v30  ;;  %7399 = vmatprep.mubr.msk.f32.mxu1 %vm227_vm1, %v122_v31  ;;  %v56_v30 = vld [vmem:[%s10171_s0 + $0x150] sm:$0xff]  ;;  %v154_v31 = vld [vmem:[%s10171_s0 + $0x460] sm:$0xff] }
  0x2b   :  { %7253 = vmatmul.mubr.msk.f32.gmra.mxu0 %vm227_vm1, %v25_v32  ;;  %7400 = vmatmul.mubr.msk.f32.gmra.mxu1 %vm227_vm1, %v123_v33  ;;  %v57_v32 = vld [vmem:[%s10171_s0 + $0x158] sm:$0xff]  ;;  %v155_v33 = vld [vmem:[%s10171_s0 + $0x468] sm:$0xff] }
  0x2c   :  { %7255 = vmatprep.mubr.msk.f32.mxu0 %vm227_vm1, %v26_v34  ;;  %7402 = vmatprep.mubr.msk.f32.mxu1 %vm227_vm1, %v124_v35  ;;  %v58_v34 = vld [vmem:[%s10171_s0 + $0x160] sm:$0xff]  ;;  %v156_v35 = vld [vmem:[%s10171_s0 + $0x470] sm:$0xff] }
  0x2f   :  { %7256 = vmatmul.mubr.msk.f32.gmra.mxu0 %vm227_vm1, %v27_v36  ;;  %7403 = vmatmul.mubr.msk.f32.gmra.mxu1 %vm227_vm1, %v125_v37  ;;  %v59_v36 = vld [vmem:[%s10171_s0 + $0x168] sm:$0xff]  ;;  %v157_v37 = vld [vmem:[%s10171_s0 + $0x478] sm:$0xff] }
  0x30   :  { %7258 = vmatprep.mubr.msk.f32.mxu0 %vm227_vm1, %v28_v38  ;;  %7405 = vmatprep.mubr.msk.f32.mxu1 %vm227_vm1, %v126_v39  ;;  %v60_v38 = vld [vmem:[%s10171_s0 + $0x170] sm:$0xff]  ;;  %v158_v39 = vld [vmem:[%s10171_s0 + $0x480] sm:$0xff] }
  0x33   :  { %7259 = vmatmul.mubr.msk.f32.gmra.mxu0 %vm227_vm1, %v29_v40  ;;  %7406 = vmatmul.mubr.msk.f32.gmra.mxu1 %vm227_vm1, %v127_v41  ;;  %v61_v40 = vld [vmem:[%s10171_s0 + $0x178] sm:$0xff]  ;;  %v159_v41 = vld [vmem:[%s10171_s0 + $0x488] sm:$0xff] }
  0x34   :  { %7261 = vmatprep.mubr.msk.f32.mxu0 %vm227_vm1, %v30_v42  ;;  %7408 = vmatprep.mubr.msk.f32.mxu1 %vm227_vm1, %v128_v43  ;;  %v62_v42 = vld [vmem:[%s10171_s0 + $0x180] sm:$0xff]  ;;  %v160_v43 = vld [vmem:[%s10171_s0 + $0x490] sm:$0xff] }
  0x37   :  { %7262 = vmatmul.mubr.msk.f32.gmra.mxu0 %vm227_vm1, %v31_v44  ;;  %7409 = vmatmul.mubr.msk.f32.gmra.mxu1 %vm227_vm1, %v129_v45  ;;  %v63_v44 = vld [vmem:[%s10171_s0 + $0x188] sm:$0xff]  ;;  %v161_v45 = vld [vmem:[%s10171_s0 + $0x498] sm:$0xff] }
  0x38   :  { %7264 = vmatprep.mubr.msk.f32.mxu0 %vm227_vm1, %v32_v46  ;;  %7411 = vmatprep.mubr.msk.f32.mxu1 %vm227_vm1, %v130_v47  ;;  %v64_v46 = vld [vmem:[%s10171_s0 + $0x190] sm:$0xff]  ;;  %v162_v47 = vld [vmem:[%s10171_s0 + $0x4a0] sm:$0xff] }
  0x3b   :  { %7265 = vmatmul.mubr.msk.f32.gmra.mxu0 %vm227_vm1, %v33_v48  ;;  %7412 = vmatmul.mubr.msk.f32.gmra.mxu1 %vm227_vm1, %v131_v49  ;;  %v65_v48 = vld [vmem:[%s10171_s0 + $0x198] sm:$0xff]  ;;  %v163_v49 = vld [vmem:[%s10171_s0 + $0x4a8] sm:$0xff] }
  0x3c   :  { %7267 = vmatprep.mubr.msk.f32.mxu0 %vm227_vm1, %v34_v50  ;;  %7414 = vmatprep.mubr.msk.f32.mxu1 %vm227_vm1, %v132_v51  ;;  %v66_v50 = vld [vmem:[%s10171_s0 + $0x1a0] sm:$0xff]  ;;  %v164_v51 = vld [vmem:[%s10171_s0 + $0x4b0] sm:$0xff] }
  0x3f   :  { %7268 = vmatmul.mubr.msk.f32.gmra.mxu0 %vm227_vm1, %v35_v52  ;;  %7415 = vmatmul.mubr.msk.f32.gmra.mxu1 %vm227_vm1, %v133_v53  ;;  %v67_v52 = vld [vmem:[%s10171_s0 + $0x1a8] sm:$0xff]  ;;  %v165_v53 = vld [vmem:[%s10171_s0 + $0x4b8] sm:$0xff] }
  0x40   :  { %7270 = vmatprep.mubr.msk.f32.mxu0 %vm227_vm1, %v36_v54  ;;  %7417 = vmatprep.mubr.msk.f32.mxu1 %vm227_vm1, %v134_v55  ;;  %v68_v54 = vld [vmem:[%s10171_s0 + $0x1b0] sm:$0xff]  ;;  %v166_v55 = vld [vmem:[%s10171_s0 + $0x4c0] sm:$0xff] }
  0x43   :  { %7271 = vmatmul.mubr.msk.f32.gmra.mxu0 %vm227_vm1, %v37_v56  ;;  %7418 = vmatmul.mubr.msk.f32.gmra.mxu1 %vm227_vm1, %v135_v57  ;;  %v69_v56 = vld [vmem:[%s10171_s0 + $0x1b8] sm:$0xff]  ;;  %v167_v57 = vld [vmem:[%s10171_s0 + $0x4c8] sm:$0xff] }
  0x44   :  { %7273 = vmatprep.mubr.msk.f32.mxu0 %vm227_vm1, %v38_v58  ;;  %7420 = vmatprep.mubr.msk.f32.mxu1 %vm227_vm1, %v136_v59  ;;  %v70_v58 = vld [vmem:[%s10171_s0 + $0x1c0] sm:$0xff]  ;;  %v168_v59 = vld [vmem:[%s10171_s0 + $0x4d0] sm:$0xff] }
  0x47   :  { %7274 = vmatmul.mubr.msk.f32.gmra.mxu0 %vm227_vm1, %v39_v60  ;;  %7421 = vmatmul.mubr.msk.f32.gmra.mxu1 %vm227_vm1, %v137_v61  ;;  %v71_v60 = vld [vmem:[%s10171_s0 + $0x1c8] sm:$0xff]  ;;  %v169_v61 = vld [vmem:[%s10171_s0 + $0x4d8] sm:$0xff] }
  0x48   :  { %7276 = vmatprep.mubr.msk.f32.mxu0 %vm227_vm1, %v40_v62  ;;  %7423 = vmatprep.mubr.msk.f32.mxu1 %vm227_vm1, %v138_v63  ;;  %v72_v62 = vld [vmem:[%s10171_s0 + $0x1d0] sm:$0xff]  ;;  %v170_v63 = vld [vmem:[%s10171_s0 + $0x4e0] sm:$0xff] }
  0x4b   :  { %7277 = vmatmul.mubr.msk.f32.gmra.mxu0 %vm227_vm1, %v41_v0  ;;  %7424 = vmatmul.mubr.msk.f32.gmra.mxu1 %vm227_vm1, %v139_v1  ;;  %v73_v0 = vld [vmem:[%s10171_s0 + $0x1d8] sm:$0xff]  ;;  %v171_v1 = vld [vmem:[%s10171_s0 + $0x4e8] sm:$0xff] }
  0x4c   :  { %7279 = vmatprep.mubr.msk.f32.mxu0 %vm227_vm1, %v42_v2  ;;  %7426 = vmatprep.mubr.msk.f32.mxu1 %vm227_vm1, %v140_v3  ;;  %v74_v2 = vld [vmem:[%s10171_s0 + $0x1e0] sm:$0xff]  ;;  %v172_v3 = vld [vmem:[%s10171_s0 + $0x4f0] sm:$0xff] }
  0x4f   :  { %7280 = vmatmul.mubr.msk.f32.gmra.mxu0 %vm227_vm1, %v43_v4  ;;  %7427 = vmatmul.mubr.msk.f32.gmra.mxu1 %vm227_vm1, %v141_v5  ;;  %v75_v4 = vld [vmem:[%s10171_s0 + $0x1e8] sm:$0xff]  ;;  %v173_v5 = vld [vmem:[%s10171_s0 + $0x4f8] sm:$0xff] }
  0x50   :  { %7282 = vmatprep.mubr.msk.f32.mxu0 %vm227_vm1, %v44_v6  ;;  %7429 = vmatprep.mubr.msk.f32.mxu1 %vm227_vm1, %v142_v7  ;;  %v76_v6 = vld [vmem:[%s10171_s0 + $0x1f0] sm:$0xff]  ;;  %v174_v7 = vld [vmem:[%s10171_s0 + $0x500] sm:$0xff] }
  0x53   :  { %7283 = vmatmul.mubr.msk.f32.gmra.mxu0 %vm227_vm1, %v45_v8  ;;  %7430 = vmatmul.mubr.msk.f32.gmra.mxu1 %vm227_vm1, %v143_v9  ;;  %v77_v8 = vld [vmem:[%s10171_s0 + $0x1f8] sm:$0xff]  ;;  %v175_v9 = vld [vmem:[%s10171_s0 + $0x508] sm:$0xff] }
  0x54   :  { %7285 = vmatprep.mubr.msk.f32.mxu0 %vm227_vm1, %v46_v10  ;;  %7432 = vmatprep.mubr.msk.f32.mxu1 %vm227_vm1, %v144_v11  ;;  %v78_v10 = vld [vmem:[%s10171_s0 + $0x200] sm:$0xff]  ;;  %v176_v11 = vld [vmem:[%s10171_s0 + $0x510] sm:$0xff] }
  0x57   :  { %7286 = vmatmul.mubr.msk.f32.gmra.mxu0 %vm227_vm1, %v47_v12  ;;  %7433 = vmatmul.mubr.msk.f32.gmra.mxu1 %vm227_vm1, %v145_v13  ;;  %v79_v12 = vld [vmem:[%s10171_s0 + $0x208] sm:$0xff]  ;;  %v177_v13 = vld [vmem:[%s10171_s0 + $0x518] sm:$0xff] }
  0x58   :  { %7288 = vmatprep.mubr.msk.f32.mxu0 %vm227_vm1, %v48_v14  ;;  %7435 = vmatprep.mubr.msk.f32.mxu1 %vm227_vm1, %v146_v15  ;;  %v80_v14 = vld [vmem:[%s10171_s0 + $0x210] sm:$0xff]  ;;  %v178_v15 = vld [vmem:[%s10171_s0 + $0x520] sm:$0xff] }
  0x5b   :  { %7289 = vmatmul.mubr.msk.f32.gmra.mxu0 %vm227_vm1, %v49_v16  ;;  %7436 = vmatmul.mubr.msk.f32.gmra.mxu1 %vm227_vm1, %v147_v17  ;;  %v81_v16 = vld [vmem:[%s10171_s0 + $0x218] sm:$0xff]  ;;  %v179_v17 = vld [vmem:[%s10171_s0 + $0x528] sm:$0xff] }
  0x5c   :  { %7291 = vmatprep.mubr.msk.f32.mxu0 %vm227_vm1, %v50_v18  ;;  %7438 = vmatprep.mubr.msk.f32.mxu1 %vm227_vm1, %v148_v19  ;;  %v82_v18 = vld [vmem:[%s10171_s0 + $0x220] sm:$0xff]  ;;  %v180_v19 = vld [vmem:[%s10171_s0 + $0x530] sm:$0xff] }
  0x5f   :  { %7292 = vmatmul.mubr.msk.f32.gmra.mxu0 %vm227_vm1, %v51_v20  ;;  %7439 = vmatmul.mubr.msk.f32.gmra.mxu1 %vm227_vm1, %v149_v21  ;;  %v83_v20 = vld [vmem:[%s10171_s0 + $0x228] sm:$0xff]  ;;  %v181_v21 = vld [vmem:[%s10171_s0 + $0x538] sm:$0xff] }
  0x60   :  { %7294 = vmatprep.mubr.msk.f32.mxu0 %vm227_vm1, %v52_v22  ;;  %7441 = vmatprep.mubr.msk.f32.mxu1 %vm227_vm1, %v150_v23  ;;  %v84_v22 = vld [vmem:[%s10171_s0 + $0x230] sm:$0xff]  ;;  %v182_v23 = vld [vmem:[%s10171_s0 + $0x540] sm:$0xff] }
  0x63   :  { %7295 = vmatmul.mubr.msk.f32.gmra.mxu0 %vm227_vm1, %v53_v24  ;;  %7442 = vmatmul.mubr.msk.f32.gmra.mxu1 %vm227_vm1, %v151_v25  ;;  %v85_v24 = vld [vmem:[%s10171_s0 + $0x238] sm:$0xff]  ;;  %v183_v25 = vld [vmem:[%s10171_s0 + $0x548] sm:$0xff] }
  0x64   :  { %7297 = vmatprep.mubr.msk.f32.mxu0 %vm227_vm1, %v54_v26  ;;  %7444 = vmatprep.mubr.msk.f32.mxu1 %vm227_vm1, %v152_v27  ;;  %v86_v26 = vld [vmem:[%s10171_s0 + $0x240] sm:$0xff]  ;;  %v184_v27 = vld [vmem:[%s10171_s0 + $0x550] sm:$0xff] }
  0x67   :  { %7298 = vmatmul.mubr.msk.f32.gmra.mxu0 %vm227_vm1, %v55_v28  ;;  %7445 = vmatmul.mubr.msk.f32.gmra.mxu1 %vm227_vm1, %v153_v29  ;;  %v87_v28 = vld [vmem:[%s10171_s0 + $0x248] sm:$0xff]  ;;  %v185_v29 = vld [vmem:[%s10171_s0 + $0x558] sm:$0xff] }
  0x68   :  { %7300 = vmatprep.mubr.msk.f32.mxu0 %vm227_vm1, %v56_v30  ;;  %7447 = vmatprep.mubr.msk.f32.mxu1 %vm227_vm1, %v154_v31  ;;  %v88_v30 = vld [vmem:[%s10171_s0 + $0x250] sm:$0xff]  ;;  %v186_v31 = vld [vmem:[%s10171_s0 + $0x560] sm:$0xff] }
  0x6b   :  { %7301 = vmatmul.mubr.msk.f32.gmra.mxu0 %vm227_vm1, %v57_v32  ;;  %7448 = vmatmul.mubr.msk.f32.gmra.mxu1 %vm227_vm1, %v155_v33  ;;  %v89_v32 = vld [vmem:[%s10171_s0 + $0x258] sm:$0xff]  ;;  %v187_v33 = vld [vmem:[%s10171_s0 + $0x568] sm:$0xff] }
  0x6c   :  { %7303 = vmatprep.mubr.msk.f32.mxu0 %vm227_vm1, %v58_v34  ;;  %7450 = vmatprep.mubr.msk.f32.mxu1 %vm227_vm1, %v156_v35  ;;  %v90_v34 = vld [vmem:[%s10171_s0 + $0x260] sm:$0xff]  ;;  %v188_v35 = vld [vmem:[%s10171_s0 + $0x570] sm:$0xff] }
  0x6f   :  { %7304 = vmatmul.mubr.msk.f32.gmra.mxu0 %vm227_vm1, %v59_v36  ;;  %7451 = vmatmul.mubr.msk.f32.gmra.mxu1 %vm227_vm1, %v157_v37  ;;  %v91_v36 = vld [vmem:[%s10171_s0 + $0x268] sm:$0xff]  ;;  %v189_v37 = vld [vmem:[%s10171_s0 + $0x578] sm:$0xff] }
  0x70   :  { %7306 = vmatprep.mubr.msk.f32.mxu0 %vm227_vm1, %v60_v38  ;;  %7453 = vmatprep.mubr.msk.f32.mxu1 %vm227_vm1, %v158_v39  ;;  %v92_v38 = vld [vmem:[%s10171_s0 + $0x270] sm:$0xff]  ;;  %v190_v39 = vld [vmem:[%s10171_s0 + $0x580] sm:$0xff] }
  0x73   :  { %7307 = vmatmul.mubr.msk.f32.gmra.mxu0 %vm227_vm1, %v61_v40  ;;  %7454 = vmatmul.mubr.msk.f32.gmra.mxu1 %vm227_vm1, %v159_v41  ;;  %v93_v40 = vld [vmem:[%s10171_s0 + $0x278] sm:$0xff]  ;;  %v191_v41 = vld [vmem:[%s10171_s0 + $0x588] sm:$0xff] }
  0x74   :  { %7309 = vmatprep.mubr.msk.f32.mxu0 %vm227_vm1, %v62_v42  ;;  %7456 = vmatprep.mubr.msk.f32.mxu1 %vm227_vm1, %v160_v43  ;;  %v94_v42 = vld [vmem:[%s10171_s0 + $0x280] sm:$0xff]  ;;  %v192_v43 = vld [vmem:[%s10171_s0 + $0x590] sm:$0xff] }
  0x77   :  { %7310 = vmatmul.mubr.msk.f32.gmra.mxu0 %vm227_vm1, %v63_v44  ;;  %7457 = vmatmul.mubr.msk.f32.gmra.mxu1 %vm227_vm1, %v161_v45  ;;  %v95_v44 = vld [vmem:[%s10171_s0 + $0x288] sm:$0xff]  ;;  %v193_v45 = vld [vmem:[%s10171_s0 + $0x598] sm:$0xff] }
  0x78   :  { %7312 = vmatprep.mubr.msk.f32.mxu0 %vm227_vm1, %v64_v46  ;;  %7459 = vmatprep.mubr.msk.f32.mxu1 %vm227_vm1, %v162_v47  ;;  %v96_v46 = vld [vmem:[%s10171_s0 + $0x290] sm:$0xff]  ;;  %v194_v47 = vld [vmem:[%s10171_s0 + $0x5a0] sm:$0xff] }
  0x7b   :  { %7313 = vmatmul.mubr.msk.f32.gmra.mxu0 %vm227_vm1, %v65_v48  ;;  %7460 = vmatmul.mubr.msk.f32.gmra.mxu1 %vm227_vm1, %v163_v49  ;;  %v97_v48 = vld [vmem:[%s10171_s0 + $0x298] sm:$0xff]  ;;  %v195_v49 = vld [vmem:[%s10171_s0 + $0x5a8] sm:$0xff] }
  0x7c   :  { %7315 = vmatprep.mubr.msk.f32.mxu0 %vm227_vm1, %v66_v50  ;;  %7462 = vmatprep.mubr.msk.f32.mxu1 %vm227_vm1, %v164_v51  ;;  %v98_v50 = vld [vmem:[%s10171_s0 + $0x2a0] sm:$0xff]  ;;  %v196_v51 = vld [vmem:[%s10171_s0 + $0x5b0] sm:$0xff] }
  0x7f   :  { %7316 = vmatmul.mubr.msk.f32.gmra.mxu0 %vm227_vm1, %v67_v52  ;;  %7463 = vmatmul.mubr.msk.f32.gmra.mxu1 %vm227_vm1, %v165_v53  ;;  %v99_v52 = vld [vmem:[%s10171_s0 + $0x2a8] sm:$0xff]  ;;  %v197_v53 = vld [vmem:[%s10171_s0 + $0x5b8] sm:$0xff] }
  0x80   :  { %7318 = vmatprep.mubr.msk.f32.mxu0 %vm227_vm1, %v68_v54  ;;  %7465 = vmatprep.mubr.msk.f32.mxu1 %vm227_vm1, %v166_v55  ;;  %v100_v54 = vld [vmem:[%s10171_s0 + $0x2b0] sm:$0xff]  ;;  %v198_v55 = vld [vmem:[%s10171_s0 + $0x5c0] sm:$0xff] }
  0x83   :  { %7319 = vmatmul.mubr.msk.f32.gmra.mxu0 %vm227_vm1, %v69_v56  ;;  %7466 = vmatmul.mubr.msk.f32.gmra.mxu1 %vm227_vm1, %v167_v57  ;;  %v101_v56 = vld [vmem:[%s10171_s0 + $0x2b8] sm:$0xff]  ;;  %v199_v57 = vld [vmem:[%s10171_s0 + $0x5c8] sm:$0xff] }
  0x84   :  { %7321 = vmatprep.mubr.msk.f32.mxu0 %vm227_vm1, %v70_v58  ;;  %7468 = vmatprep.mubr.msk.f32.mxu1 %vm227_vm1, %v168_v59  ;;  %v102_v58 = vld [vmem:[%s10171_s0 + $0x2c0] sm:$0xff]  ;;  %v200_v59 = vld [vmem:[%s10171_s0 + $0x5d0] sm:$0xff] }
  0x87   :  { %7322 = vmatmul.mubr.msk.f32.gmra.mxu0 %vm227_vm1, %v71_v60  ;;  %7469 = vmatmul.mubr.msk.f32.gmra.mxu1 %vm227_vm1, %v169_v61  ;;  %v103_v60 = vld [vmem:[%s10171_s0 + $0x2c8] sm:$0xff]  ;;  %v201_v61 = vld [vmem:[%s10171_s0 + $0x5d8] sm:$0xff] }
  0x88   :  { %7324 = vmatprep.mubr.msk.f32.mxu0 %vm227_vm1, %v72_v62  ;;  %7471 = vmatprep.mubr.msk.f32.mxu1 %vm227_vm1, %v170_v63  ;;  %v104_v62 = vld [vmem:[%s10171_s0 + $0x2d0] sm:$0xff]  ;;  %v202_v63 = vld [vmem:[%s10171_s0 + $0x5e0] sm:$0xff] }
  0x8b   :  { %7325 = vmatmul.mubr.msk.f32.gmra.mxu0 %vm227_vm1, %v73_v0  ;;  %7472 = vmatmul.mubr.msk.f32.gmra.mxu1 %vm227_vm1, %v171_v1  ;;  %v105_v0 = vld [vmem:[%s10171_s0 + $0x2d8] sm:$0xff]  ;;  %v203_v1 = vld [vmem:[%s10171_s0 + $0x5e8] sm:$0xff] }
  0x8c   :  { %7327 = vmatprep.mubr.msk.f32.mxu0 %vm227_vm1, %v74_v2  ;;  %7474 = vmatprep.mubr.msk.f32.mxu1 %vm227_vm1, %v172_v3  ;;  %v106_v2 = vld [vmem:[%s10171_s0 + $0x2e0] sm:$0xff]  ;;  %v204_v3 = vld [vmem:[%s10171_s0 + $0x5f0] sm:$0xff] }
  0x8f   :  { %7328 = vmatmul.mubr.msk.f32.gmra.mxu0 %vm227_vm1, %v75_v4  ;;  %7475 = vmatmul.mubr.msk.f32.gmra.mxu1 %vm227_vm1, %v173_v5  ;;  %v107_v4 = vld [vmem:[%s10171_s0 + $0x2e8] sm:$0xff]  ;;  %v205_v5 = vld [vmem:[%s10171_s0 + $0x5f8] sm:$0xff] }
  0x90   :  { %7330 = vmatprep.mubr.msk.f32.mxu0 %vm227_vm1, %v76_v6  ;;  %7477 = vmatprep.mubr.msk.f32.mxu1 %vm227_vm1, %v174_v7  ;;  %v108_v6 = vld [vmem:[%s10171_s0 + $0x2f0] sm:$0xff]  ;;  %v206_v7 = vld [vmem:[%s10171_s0 + $0x600] sm:$0xff] }
  0x93   :  { %7331 = vmatmul.mubr.msk.f32.gmra.mxu0 %vm227_vm1, %v77_v8  ;;  %7478 = vmatmul.mubr.msk.f32.gmra.mxu1 %vm227_vm1, %v175_v9  ;;  %v109_v8 = vld [vmem:[%s10171_s0 + $0x2f8] sm:$0xff]  ;;  %v207_v9 = vld [vmem:[%s10171_s0 + $0x608] sm:$0xff] }
  0x94   :  { %7333 = vmatprep.mubr.msk.f32.mxu0 %vm227_vm1, %v78_v10  ;;  %7480 = vmatprep.mubr.msk.f32.mxu1 %vm227_vm1, %v176_v11  ;;  %v110_v10 = vld [vmem:[%s10171_s0 + $0x300] sm:$0xff]  ;;  %v208_v11 = vld [vmem:[%s10171_s0 + $0x610] sm:$0xff] }
  0x97   :  { %7334 = vmatmul.mubr.msk.f32.gmra.mxu0 %vm227_vm1, %v79_v12  ;;  %7481 = vmatmul.mubr.msk.f32.gmra.mxu1 %vm227_vm1, %v177_v13  ;;  %v111_v12 = vld [vmem:[%s10171_s0 + $0x308] sm:$0xff]  ;;  %v209_v13 = vld [vmem:[%s10171_s0 + $0x618] sm:$0xff] }
  0x98   :  { %7336 = vmatprep.mubr.msk.f32.mxu0 %vm227_vm1, %v80_v14  ;;  %7483 = vmatprep.mubr.msk.f32.mxu1 %vm227_vm1, %v178_v15  ;;  %v8392_v14 = vld [vmem:[%s10172_s2] ss:$0 sm:$0xff] }
  0x9b   :  { %7337 = vmatmul.mubr.msk.f32.gmra.mxu0 %vm227_vm1, %v81_v16  ;;  %7484 = vmatmul.mubr.msk.f32.gmra.mxu1 %vm227_vm1, %v179_v17 }
  0x9c   :  { %7339 = vmatprep.mubr.msk.f32.mxu0 %vm227_vm1, %v82_v18  ;;  %7486 = vmatprep.mubr.msk.f32.mxu1 %vm227_vm1, %v180_v19 }
  0x9f   :  { %7340 = vmatmul.mubr.msk.f32.gmra.mxu0 %vm227_vm1, %v83_v20  ;;  %7487 = vmatmul.mubr.msk.f32.gmra.mxu1 %vm227_vm1, %v181_v21 }
  0xa0   :  { %7342 = vmatprep.mubr.msk.f32.mxu0 %vm227_vm1, %v84_v22  ;;  %7489 = vmatprep.mubr.msk.f32.mxu1 %vm227_vm1, %v182_v23 }
  0xa3   :  { %7343 = vmatmul.mubr.msk.f32.gmra.mxu0 %vm227_vm1, %v85_v24  ;;  %7490 = vmatmul.mubr.msk.f32.gmra.mxu1 %vm227_vm1, %v183_v25  ;;  %v7556_v25 = vmov 1983009808  }
  0xa4   :  { %7345 = vmatprep.mubr.msk.f32.mxu0 %vm227_vm1, %v86_v26  ;;  %7492 = vmatprep.mubr.msk.f32.mxu1 %vm227_vm1, %v184_v27  ;;  %v2847_v26 = vunpack.c.l.s4 %v7556_v25  ;;  %v2849_v27 = vlaneseq }
  0xa7   :  { %7346 = vmatmul.mubr.msk.f32.gmra.mxu0 %vm227_vm1, %v87_v28  ;;  %7493 = vmatmul.mubr.msk.f32.gmra.mxu1 %vm227_vm1, %v185_v29 }
  0xa8   :  { %7348 = vmatprep.mubr.msk.f32.mxu0 %vm227_vm1, %v88_v30  ;;  %7495 = vmatprep.mubr.msk.f32.mxu1 %vm227_vm1, %v186_v31 }
  0xab   :  { %7349 = vmatmul.mubr.msk.f32.gmra.mxu0 %vm227_vm1, %v89_v32  ;;  %7496 = vmatmul.mubr.msk.f32.gmra.mxu1 %vm227_vm1, %v187_v33 }
  0xac   :  { %7351 = vmatprep.mubr.msk.f32.mxu0 %vm227_vm1, %v90_v34  ;;  %7498 = vmatprep.mubr.msk.f32.mxu1 %vm227_vm1, %v188_v35 }
  0xaf   :  { %7352 = vmatmul.mubr.msk.f32.gmra.mxu0 %vm227_vm1, %v91_v36  ;;  %7499 = vmatmul.mubr.msk.f32.gmra.mxu1 %vm227_vm1, %v189_v37 }
  0xb0   :  { %7354 = vmatprep.mubr.msk.f32.mxu0 %vm227_vm1, %v92_v38  ;;  %7501 = vmatprep.mubr.msk.f32.mxu1 %vm227_vm1, %v190_v39 }
  0xb3   :  { %7355 = vmatmul.mubr.msk.f32.gmra.mxu0 %vm227_vm1, %v93_v40  ;;  %7502 = vmatmul.mubr.msk.f32.gmra.mxu1 %vm227_vm1, %v191_v41  ;;  %v2848_v40 = vunpack.c.0.s8 %v2847_v26  ;;  %v2850_v41 = vshrl.u32 %v2849_v27, 7 }
  0xb4   :  { %7357 = vmatprep.mubr.msk.f32.mxu0 %vm227_vm1, %v94_v42  ;;  %7504 = vmatprep.mubr.msk.f32.mxu1 %vm227_vm1, %v192_v43 }
  0xb7   :  { %7358 = vmatmul.mubr.msk.f32.gmra.mxu0 %vm227_vm1, %v95_v44  ;;  %7505 = vmatmul.mubr.msk.f32.gmra.mxu1 %vm227_vm1, %v193_v45 }
  0xb8   :  { %7360 = vmatprep.mubr.msk.f32.mxu0 %vm227_vm1, %v96_v46  ;;  %7507 = vmatprep.mubr.msk.f32.mxu1 %vm227_vm1, %v194_v47 }
  0xbb   :  { %7361 = vmatmul.mubr.msk.f32.gmra.mxu0 %vm227_vm1, %v97_v48  ;;  %7508 = vmatmul.mubr.msk.f32.gmra.mxu1 %vm227_vm1, %v195_v49 }
  0xbc   :  { %7363 = vmatprep.mubr.msk.f32.mxu0 %vm227_vm1, %v98_v50  ;;  %7510 = vmatprep.mubr.msk.f32.mxu1 %vm227_vm1, %v196_v51 }
  0xbf   :  { %7364 = vmatmul.mubr.msk.f32.gmra.mxu0 %vm227_vm1, %v99_v52  ;;  %7511 = vmatmul.mubr.msk.f32.gmra.mxu1 %vm227_vm1, %v197_v53 }
  0xc0   :  { %7366 = vmatprep.mubr.msk.f32.mxu0 %vm227_vm1, %v100_v54  ;;  %7513 = vmatprep.mubr.msk.f32.mxu1 %vm227_vm1, %v198_v55  ;;  %v8416_v54 = vsub.s32 %v2848_v40, %v2850_v41 }
  0xc3   :  { %7367 = vmatmul.mubr.msk.f32.gmra.mxu0 %vm227_vm1, %v101_v56  ;;  %7514 = vmatmul.mubr.msk.f32.gmra.mxu1 %vm227_vm1, %v199_v57 }
  0xc4   :  { %7369 = vmatprep.mubr.msk.f32.mxu0 %vm227_vm1, %v102_v58  ;;  %7516 = vmatprep.mubr.msk.f32.mxu1 %vm227_vm1, %v200_v59 }
  0xc7   :  { %7370 = vmatmul.mubr.msk.f32.gmra.mxu0 %vm227_vm1, %v103_v60  ;;  %7517 = vmatmul.mubr.msk.f32.gmra.mxu1 %vm227_vm1, %v201_v61 }
  0xc8   :  { %7372 = vmatprep.mubr.msk.f32.mxu0 %vm227_vm1, %v104_v62  ;;  %7519 = vmatprep.mubr.msk.f32.mxu1 %vm227_vm1, %v202_v63 }
  0xcb   :  { %7373 = vmatmul.mubr.msk.f32.gmra.mxu0 %vm227_vm1, %v105_v0  ;;  %7520 = vmatmul.mubr.msk.f32.gmra.mxu1 %vm227_vm1, %v203_v1 }
  0xcc   :  { %7375 = vmatprep.mubr.msk.f32.mxu0 %vm227_vm1, %v106_v2  ;;  %7522 = vmatprep.mubr.msk.f32.mxu1 %vm227_vm1, %v204_v3 }
  0xcf   :  { %7376 = vmatmul.mubr.msk.f32.gmra.mxu0 %vm227_vm1, %v107_v4  ;;  %7523 = vmatmul.mubr.msk.f32.gmra.mxu1 %vm227_vm1, %v205_v5 }
  0xd0   :  { %7378 = vmatprep.mubr.msk.f32.mxu0 %vm227_vm1, %v108_v6  ;;  %7525 = vmatprep.mubr.msk.f32.mxu1 %vm227_vm1, %v206_v7 }
  0xd3   :  { %7379 = vmatmul.mubr.msk.f32.gmra.mxu0 %vm227_vm1, %v109_v8  ;;  %7526 = vmatmul.mubr.msk.f32.gmra.mxu1 %vm227_vm1, %v207_v9 }
  0xd4   :  { %7381 = vmatprep.mubr.msk.f32.mxu0 %vm227_vm1, %v110_v10  ;;  %7528 = vmatprep.mubr.msk.f32.mxu1 %vm227_vm1, %v208_v11 }
  0xd7   :  { %v7239_v15 = vpop.f32.mrf.mxu0  ;;  %7382 = vmatmul.mubr.msk.f32.gmra.mxu0 %vm227_vm1, %v111_v12  ;;  %v7386_v16 = vpop.f32.mrf.mxu1  ;;  %7529 = vmatmul.mubr.msk.f32.gmra.mxu1 %vm227_vm1, %v209_v13 }
  0xd8   :  { %v892_v17 = vadd.f32 %v7239_v15, %v8392_v14  ;;  %v1382_v18 = vadd.f32 %v7386_v16, %v8392_v14 }
  0xd9   :  { %v886_v19 = vpop.f32.mrf.mxu0  ;;  %v1376_v20 = vpop.f32.mrf.mxu1 }
  0xda   :  { %v1866_v21 = vmax.f32 %v892_v17, 0.0  ;;  %v1964_v22 = vmax.f32 %v1382_v18, 0.0  ;;  %v887_v23 = vadd.f32 %v8392_v14, %v886_v19  ;;  %v1377_v24 = vadd.f32 %v8392_v14, %v1376_v20 }
  0xdb   :  { %v7242_v28 = vpop.f32.mrf.mxu0  ;;  %v7389_v29 = vpop.f32.mrf.mxu1 }
  0xdc   :  { %2063 = vst.msk [vmem:[#allocation2 + $0x8] sm:$0xff] %vm2061_vm2, %v1866_v21  ;;  %2161 = vst.msk [vmem:[#allocation2 + $0x318] sm:$0xff] %vm2061_vm2, %v1964_v22  ;;  %v1865_v30 = vmax.f32 %v887_v23, 0.0  ;;  %v1963_v31 = vmax.f32 %v1377_v24, 0.0  ;;  %v902_v32 = vadd.f32 %v7242_v28, %v8392_v14  ;;  %v1392_v33 = vadd.f32 %v7389_v29, %v8392_v14 }
  0xdd   :  { %v896_v34 = vpop.f32.mrf.mxu0  ;;  %v1386_v35 = vpop.f32.mrf.mxu1 }
  0xde   :  { %2062 = vst.msk [vmem:[#allocation2] sm:$0xff] %vm2061_vm2, %v1865_v30  ;;  %2160 = vst.msk [vmem:[#allocation2 + $0x310] sm:$0xff] %vm2061_vm2, %v1963_v31  ;;  %v1868_v36 = vmax.f32 %v902_v32, 0.0  ;;  %v1966_v37 = vmax.f32 %v1392_v33, 0.0  ;;  %v897_v38 = vadd.f32 %v8392_v14, %v896_v34  ;;  %v1387_v39 = vadd.f32 %v8392_v14, %v1386_v35 }
  0xdf   :  { %v7245_v42 = vpop.f32.mrf.mxu0  ;;  %v7392_v43 = vpop.f32.mrf.mxu1 }
  0xe0   :  { %2065 = vst.msk [vmem:[#allocation2 + $0x18] sm:$0xff] %vm2061_vm2, %v1868_v36  ;;  %2163 = vst.msk [vmem:[#allocation2 + $0x328] sm:$0xff] %vm2061_vm2, %v1966_v37  ;;  %v1867_v44 = vmax.f32 %v897_v38, 0.0  ;;  %v1965_v45 = vmax.f32 %v1387_v39, 0.0  ;;  %v912_v46 = vadd.f32 %v7245_v42, %v8392_v14  ;;  %v1402_v47 = vadd.f32 %v7392_v43, %v8392_v14 }
  0xe1   :  { %v906_v48 = vpop.f32.mrf.mxu0  ;;  %v1396_v49 = vpop.f32.mrf.mxu1 }
  0xe2   :  { %2064 = vst.msk [vmem:[#allocation2 + $0x10] sm:$0xff] %vm2061_vm2, %v1867_v44  ;;  %2162 = vst.msk [vmem:[#allocation2 + $0x320] sm:$0xff] %vm2061_vm2, %v1965_v45  ;;  %v1870_v50 = vmax.f32 %v912_v46, 0.0  ;;  %v1968_v51 = vmax.f32 %v1402_v47, 0.0  ;;  %v907_v52 = vadd.f32 %v8392_v14, %v906_v48  ;;  %v1397_v53 = vadd.f32 %v8392_v14, %v1396_v49 }
  0xe3   :  { %v7248_v55 = vpop.f32.mrf.mxu0  ;;  %v7395_v56 = vpop.f32.mrf.mxu1 }
  0xe4   :  { %2067 = vst.msk [vmem:[#allocation2 + $0x28] sm:$0xff] %vm2061_vm2, %v1870_v50  ;;  %2165 = vst.msk [vmem:[#allocation2 + $0x338] sm:$0xff] %vm2061_vm2, %v1968_v51  ;;  %v1869_v57 = vmax.f32 %v907_v52, 0.0  ;;  %v1967_v58 = vmax.f32 %v1397_v53, 0.0  ;;  %v922_v59 = vadd.f32 %v7248_v55, %v8392_v14  ;;  %v1412_v60 = vadd.f32 %v7395_v56, %v8392_v14 }
  0xe5   :  { %v2258_v61 = vld [vmem:[#allocation2] ss:$2 sm:$0xff]  ;;  %v2454_v62 = vld [vmem:[#allocation2 + $0x1] ss:$2 sm:$0xff]  ;;  %v2356_v63 = vld [vmem:[#allocation2 + $0x310] ss:$2 sm:$0xff]  ;;  %v916_v0 = vpop.f32.mrf.mxu0  ;;  %v1406_v1 = vpop.f32.mrf.mxu1 }
  0xe6   :  { %v2649_v2 = vmax.f32 %v2258_v61, %v2454_v62  ;;  %v2552_v3 = vld [vmem:[#allocation2 + $0x311] ss:$2 sm:$0xff]  ;;  %2066 = vst.msk [vmem:[#allocation2 + $0x20] sm:$0xff] %vm2061_vm2, %v1869_v57  ;;  %2164 = vst.msk [vmem:[#allocation2 + $0x330] sm:$0xff] %vm2061_vm2, %v1967_v58  ;;  %v1872_v4 = vmax.f32 %v922_v59, 0.0  ;;  %v1970_v5 = vmax.f32 %v1412_v60, 0.0  ;;  %v917_v6 = vadd.f32 %v8392_v14, %v916_v0 }
  0xe7   :  { %v2698_v7 = vmax.f32 %v2356_v63, %v2552_v3  ;;  %v1407_v8 = vadd.f32 %v8392_v14, %v1406_v1  ;;  %v7251_v9 = vpop.f32.mrf.mxu0  ;;  %v7398_v10 = vpop.f32.mrf.mxu1 }
  0xe8   :  { %v2845_v11 = vcombine.high %v2649_v2, %v2649_v2  ;;  %v2852_v12 = vrot.slane %v2649_v2, %v8416_v54  ;;  %2069 = vst.msk [vmem:[#allocation2 + $0x38] sm:$0xff] %vm2061_vm2, %v1872_v4  ;;  %2167 = vst.msk [vmem:[#allocation2 + $0x348] sm:$0xff] %vm2061_vm2, %v1970_v5  ;;  %v1871_v13 = vmax.f32 %v917_v6, 0.0  ;;  %v932_v15 = vadd.f32 %v7251_v9, %v8392_v14 }
  0xe9   :  { %v3678_v16 = vcombine.high %v2698_v7, %v2698_v7  ;;  %v3685_v17 = vrot.slane %v2698_v7, %v8416_v54  ;;  %v2260_v18 = vld [vmem:[#allocation2 + $0x10] ss:$2 sm:$0xff]  ;;  %v2456_v19 = vld [vmem:[#allocation2 + $0x11] ss:$2 sm:$0xff]  ;;  %v2358_v20 = vld [vmem:[#allocation2 + $0x320] ss:$2 sm:$0xff]  ;;  %v8432_v21 = vadd.f32 %v7398_v10, %v8392_v14  ;;  %v8434_v22 = vpop.f32.mrf.mxu0  ;;  %v8436_v23 = vpop.f32.mrf.mxu1 }
  0xea   :  { %v2859_v24 = vrot.slane %v2845_v11, %v8416_v54  ;;  %v2860_v25 = vcombine.high %v2852_v12, %v2852_v12  ;;  %v2650_v26 = vmax.f32 %v2260_v18, %v2456_v19  ;;  %v2554_v27 = vld [vmem:[#allocation2 + $0x321] ss:$2 sm:$0xff]  ;;  %2068 = vst.msk [vmem:[#allocation2 + $0x30] sm:$0xff] %vm2061_vm2, %v1871_v13  ;;  %v1969_v28 = vmax.f32 %v1407_v8, 0.0 }
  0xeb   :  { %v3692_v29 = vrot.slane %v3678_v16, %v8416_v54  ;;  %v3693_v30 = vcombine.high %v3685_v17, %v3685_v17  ;;  %v2699_v31 = vmax.f32 %v2358_v20, %v2554_v27  ;;  %v1874_v32 = vmax.f32 %v932_v15, 0.0  ;;  %v8441_v33 = vpop.f32.mrf.mxu0  ;;  %v8443_v34 = vpop.f32.mrf.mxu1 }
  0xec   :  { %v2861_v35 = vcombine.high %v2859_v24, %v2859_v24  ;;  %v4511_v36 = vcombine.low %v2852_v12, %v2860_v25  ;;  %v2862_v37 = vcombine.high %v2650_v26, %v2650_v26  ;;  %v2869_v38 = vrot.slane %v2650_v26, %v8416_v54  ;;  %2166 = vst.msk [vmem:[#allocation2 + $0x340] sm:$0xff] %vm2061_vm2, %v1969_v28 }
  0xed   :  { %v3694_v39 = vcombine.high %v3692_v29, %v3692_v29  ;;  %v5435_v40 = vcombine.low %v3685_v17, %v3693_v30  ;;  %v3695_v41 = vcombine.high %v2699_v31, %v2699_v31  ;;  %v3702_v42 = vrot.slane %v2699_v31, %v8416_v54  ;;  %v2262_v43 = vld [vmem:[#allocation2 + $0x20] ss:$2 sm:$0xff]  ;;  %v2458_v44 = vld [vmem:[#allocation2 + $0x21] ss:$2 sm:$0xff]  ;;  %2071 = vst.msk [vmem:[#allocation2 + $0x48] sm:$0xff] %vm2061_vm2, %v1874_v32  ;;  %v8449_v45 = vpop.f32.mrf.mxu0  ;;  %v8451_v46 = vpop.f32.mrf.mxu1 }
  0xee   :  { %v4512_v47 = vcombine.low %v2859_v24, %v2861_v35  ;;  %v4519_v48 = vrot.slane %v4511_v36, %v8416_v54  ;;  %v2876_v49 = vrot.slane %v2862_v37, %v8416_v54  ;;  %v2877_v50 = vcombine.high %v2869_v38, %v2869_v38  ;;  %v2360_v62 = vld [vmem:[#allocation2 + $0x330] ss:$2 sm:$0xff]  ;;  %v2556_v63 = vld [vmem:[#allocation2 + $0x331] ss:$2 sm:$0xff] }
  0xef   :  { %v5436_v51 = vcombine.low %v3692_v29, %v3694_v39  ;;  %v5443_v52 = vrot.slane %v5435_v40, %v8416_v54  ;;  %v3709_v53 = vrot.slane %v3695_v41, %v8416_v54  ;;  %v3710_v55 = vcombine.high %v3702_v42, %v3702_v42  ;;  %v8457_v56 = vpop.f32.mrf.mxu0  ;;  %v8459_v57 = vpop.f32.mrf.mxu1 }
  0xf0   :  { %v4526_v58 = vrot.slane %v4512_v47, %v8416_v54  ;;  %v4528_v59 = vcombine.low %v2869_v38, %v2877_v50  ;;  %v4542_v60 = vrot.slane %v2876_v49, %v8416_v54  ;;  %v2651_v61 = vmax.f32 %v2262_v43, %v2458_v44 }
  0xf1   :  { %v5450_v0 = vrot.slane %v5436_v51, %v8416_v54  ;;  %v5452_v1 = vcombine.low %v3702_v42, %v3710_v55  ;;  %v5466_v2 = vrot.slane %v3709_v53, %v8416_v54  ;;  %v2878_v3 = vcombine.high %v2876_v49, %v2876_v49  ;;  %v8465_v4 = vpop.f32.mrf.mxu0  ;;  %v8467_v5 = vpop.f32.mrf.mxu1  ;;  %v2264_v10 = vld [vmem:[#allocation2 + $0x30] ss:$2 sm:$0xff]  ;;  %v2460_v11 = vld [vmem:[#allocation2 + $0x31] ss:$2 sm:$0xff] }
  0xf2   :  { %v4527_v6 = vcombine.low %v4519_v48, %v4526_v58  ;;  %v4535_v7 = vrot.slane %v4528_v59, %v8416_v54  ;;  %v2879_v8 = vcombine.high %v2651_v61, %v2651_v61  ;;  %v2886_v9 = vrot.slane %v2651_v61, %v8416_v54 }
  0xf3   :  { %v5451_v12 = vcombine.low %v5443_v52, %v5450_v0  ;;  %v5459_v13 = vrot.slane %v5452_v1, %v8416_v54  ;;  %v2700_v15 = vmax.f32 %v2360_v62, %v2556_v63  ;;  %v3711_v16 = vcombine.high %v3709_v53, %v3709_v53  ;;  %v2362_v17 = vld [vmem:[#allocation2 + $0x340] ss:$2 sm:$0xff]  ;;  %v2558_v18 = vld [vmem:[#allocation2 + $0x341] ss:$2 sm:$0xff]  ;;  %v8472_v19 = vpop.f32.mrf.mxu0  ;;  %v8474_v20 = vpop.f32.mrf.mxu1 }
  0xf4   :  { %6471 = vst.msk [vmem:[#allocation3] sm:$0xff] %vm2061_vm2, %v4527_v6  ;;  %v4543_v24 = vcombine.low %v4535_v7, %v4542_v60  ;;  %v2893_v25 = vrot.slane %v2879_v8, %v8416_v54  ;;  %v2894_v26 = vcombine.high %v2886_v9, %v2886_v9  ;;  %v4544_v27 = vcombine.low %v2878_v3, %v2886_v9 }
  0xf5   :  { %6528 = vst.msk [vmem:[#allocation3 + $0x1c0] sm:$0xff] %vm2061_vm2, %v5451_v12  ;;  %v5467_v28 = vcombine.low %v5459_v13, %v5466_v2  ;;  %v3712_v29 = vcombine.high %v2700_v15, %v2700_v15  ;;  %v3719_v30 = vrot.slane %v2700_v15, %v8416_v54  ;;  %v2652_v31 = vmax.f32 %v2264_v10, %v2460_v11  ;;  %v8480_v32 = vpop.f32.mrf.mxu0  ;;  %v8482_v35 = vpop.f32.mrf.mxu1 }
  0xf6   :  { %6473 = vst.msk [vmem:[#allocation3 + $0x8] sm:$0x3f] %vm6472_vm3, %v4543_v24  ;;  %v4545_v36 = vcombine.low %v2894_v26, %v2893_v25  ;;  %v4552_v37 = vrot.slane %v4544_v27, %v8416_v54  ;;  %v2895_v38 = vcombine.high %v2893_v25, %v2893_v25  ;;  %v2701_v39 = vmax.f32 %v2362_v17, %v2558_v18 }
  0xf7   :  { %6529 = vst.msk [vmem:[#allocation3 + $0x1c8] sm:$0x3f] %vm6472_vm3, %v5467_v28  ;;  %v3726_v40 = vrot.slane %v3712_v29, %v8416_v54  ;;  %v3727_v41 = vcombine.high %v3719_v30, %v3719_v30  ;;  %v5468_v42 = vcombine.low %v3711_v16, %v3719_v30  ;;  %v2896_v43 = vcombine.high %v2652_v31, %v2652_v31  ;;  %v8488_v44 = vpop.f32.mrf.mxu0  ;;  %v8490_v47 = vpop.f32.mrf.mxu1 }
  0xf8   :  { %v4559_v48 = vrot.slane %v4545_v36, %v8416_v54  ;;  %v2903_v49 = vrot.slane %v2652_v31, %v8416_v54  ;;  %v3729_v50 = vcombine.high %v2701_v39, %v2701_v39  ;;  %v3736_v51 = vrot.slane %v2701_v39, %v8416_v54 }
  0xf9   :  { %v5469_v52 = vcombine.low %v3727_v41, %v3726_v40  ;;  %v5476_v53 = vrot.slane %v5468_v42, %v8416_v54  ;;  %v2910_v55 = vrot.slane %v2896_v43, %v8416_v54  ;;  %v3728_v58 = vcombine.high %v3726_v40, %v3726_v40  ;;  %v8497_v59 = vpop.f32.mrf.mxu0  ;;  %v8500_v0 = vpop.f32.mrf.mxu1 }
  0xfa   :  { %v4560_v60 = vcombine.low %v4552_v37, %v4559_v48  ;;  %v2911_v61 = vcombine.high %v2903_v49, %v2903_v49  ;;  %v4561_v62 = vcombine.low %v2895_v38, %v2903_v49  ;;  %v3743_v63 = vrot.slane %v3729_v50, %v8416_v54 }
  0xfb   :  { %v5483_v1 = vrot.slane %v5469_v52, %v8416_v54  ;;  %v2912_v2 = vcombine.high %v2910_v55, %v2910_v55  ;;  %v3744_v3 = vcombine.high %v3736_v51, %v3736_v51  ;;  %v5485_v6 = vcombine.low %v3728_v58, %v3736_v51  ;;  %v8503_v7 = vpop.f32.mrf.mxu0  ;;  %v8520_v26 = vpop.f32.mrf.mxu1  ;;  %v6584_v43 = vld [vmem:[#allocation3] sm:$0xff] }
  0xfc   :  { %6474 = vst.msk [vmem:[#allocation3 + $0x10] sm:$0xff] %vm2061_vm2, %v4560_v60  ;;  %v4568_v8 = vrot.slane %v4561_v62, %v8416_v54  ;;  %v4575_v9 = vrot.slane %v2911_v61, %v8416_v54  ;;  %v3745_v10 = vcombine.high %v3743_v63, %v3743_v63  ;;  %v1972_v11 = vmax.f32 %v8432_v21, 0.0 }
  0xfd   :  { %v5484_v12 = vcombine.low %v5476_v53, %v5483_v1  ;;  %v8509_v13 = vcombine.low %v2910_v55, %v2912_v2  ;;  %v5492_v15 = vrot.slane %v5485_v6, %v8416_v54  ;;  %v5499_v16 = vrot.slane %v3744_v3, %v8416_v54  ;;  %v8529_v30 = vpop.f32.mrf.mxu0  ;;  %v1466_v42 = vpop.f32.mrf.mxu1  ;;  %v6585_v60 = vld [vmem:[#allocation3 + $0x8] sm:$0x3f] }
  0xfe   :  { %v4576_v17 = vcombine.low %v4568_v8, %v4575_v9  ;;  %v8513_v18 = vcombine.low %v3743_v63, %v3745_v10  ;;  %2169 = vst.msk [vmem:[#allocation2 + $0x358] sm:$0xff] %vm2061_vm2, %v1972_v11  ;;  %v927_v24 = vadd.f32 %v8392_v14, %v8434_v22  ;;  %v1417_v25 = vadd.f32 %v8392_v14, %v8436_v23  ;;  %v6613_v2 = vld [vmem:[#allocation3 + $0x1c8] sm:$0x3f] }
  0xff   :  { %6530 = vst.msk [vmem:[#allocation3 + $0x1d0] sm:$0xff] %vm2061_vm2, %v5484_v12  ;;  %v4585_v21 = vrot.slane %v8509_v13, %v8416_v54  ;;  %v5500_v27 = vcombine.low %v5492_v15, %v5499_v16  ;;  %v942_v28 = vadd.f32 %v8441_v33, %v8392_v14  ;;  %v1432_v29 = vadd.f32 %v8443_v34, %v8392_v14  ;;  %v7269_v50 = vpop.f32.mrf.mxu0  ;;  %v7416_v1 = vpop.f32.mrf.mxu1 }
 0x100   :  { %6475 = vst.msk [vmem:[#allocation3 + $0x18] sm:$0x3f] %vm6472_vm3, %v4576_v17  ;;  %v5509_v22 = vrot.slane %v8513_v18, %v8416_v54  ;;  %v1873_v23 = vmax.f32 %v927_v24, 0.0  ;;  %v1971_v31 = vmax.f32 %v1417_v25, 0.0  ;;  %v937_v36 = vadd.f32 %v8392_v14, %v8449_v45 }
 0x101   :  { %6531 = vst.msk [vmem:[#allocation3 + $0x1d8] sm:$0x3f] %vm6472_vm3, %v5500_v27  ;;  %v1876_v37 = vmax.f32 %v942_v28, 0.0  ;;  %v1974_v38 = vmax.f32 %v1432_v29, 0.0  ;;  %v1427_v33 = vadd.f32 %v8392_v14, %v8451_v46  ;;  %v952_v34 = vadd.f32 %v8457_v56, %v8392_v14 }
 0x102   :  { %2070 = vst.msk [vmem:[#allocation2 + $0x40] sm:$0xff] %vm2061_vm2, %v1873_v23  ;;  %2168 = vst.msk [vmem:[#allocation2 + $0x350] sm:$0xff] %vm2061_vm2, %v1971_v31  ;;  %v1875_v39 = vmax.f32 %v937_v36, 0.0  ;;  %v1442_v40 = vadd.f32 %v8459_v57, %v8392_v14  ;;  %v947_v45 = vadd.f32 %v8392_v14, %v8465_v4  ;;  %v1437_v41 = vadd.f32 %v8392_v14, %v8467_v5 }
 0x103   :  { %v6641_v46 = vld [vmem:[#allocation3 + $0x10] sm:$0xff]  ;;  %2073 = vst.msk [vmem:[#allocation2 + $0x58] sm:$0xff] %vm2061_vm2, %v1876_v37  ;;  %2171 = vst.msk [vmem:[#allocation2 + $0x368] sm:$0xff] %vm2061_vm2, %v1974_v38  ;;  %v1973_v56 = vmax.f32 %v1427_v33, 0.0  ;;  %v1878_v48 = vmax.f32 %v952_v34, 0.0  ;;  %v962_v49 = vadd.f32 %v8472_v19, %v8392_v14  ;;  %v1452_v57 = vadd.f32 %v8474_v20, %v8392_v14  ;;  %v6612_v20 = vld [vmem:[#allocation3 + $0x1c0] sm:$0xff] }
 0x104   :  { %v6697_v4 = vmax.f32 %v6584_v43, %v6641_v46  ;;  %2072 = vst.msk [vmem:[#allocation2 + $0x50] sm:$0xff] %vm2061_vm2, %v1875_v39  ;;  %v1976_v5 = vmax.f32 %v1442_v40, 0.0  ;;  %v1877_v51 = vmax.f32 %v947_v45, 0.0  ;;  %v1975_v52 = vmax.f32 %v1437_v41, 0.0 }
 0x105   :  { %2170 = vst.msk [vmem:[#allocation2 + $0x360] sm:$0xff] %vm2061_vm2, %v1973_v56  ;;  %2075 = vst.msk [vmem:[#allocation2 + $0x68] sm:$0xff] %vm2061_vm2, %v1878_v48  ;;  %v1880_v53 = vmax.f32 %v962_v49, 0.0  ;;  %v1978_v55 = vmax.f32 %v1452_v57, 0.0  ;;  %v957_v58 = vadd.f32 %v8392_v14, %v8480_v32  ;;  %v1447_v19 = vadd.f32 %v8392_v14, %v8482_v35 }
 0x106   :  { %6753 = vst.msk [vmem:[%s10173_s3] sm:$0xff] %vm2061_vm2, %v6697_v4  ;;  %v6669_v61 = vld [vmem:[#allocation3 + $0x1d0] sm:$0xff]  ;;  %2173 = vst.msk [vmem:[#allocation2 + $0x378] sm:$0xff] %vm2061_vm2, %v1976_v5  ;;  %v972_v32 = vadd.f32 %v8488_v44, %v8392_v14  ;;  %v1462_v35 = vadd.f32 %v8490_v47, %v8392_v14  ;;  %v967_v62 = vadd.f32 %v8392_v14, %v8497_v59  ;;  %v986_v47 = vpop.f32.mrf.mxu0 }
 0x107   :  { %2074 = vst.msk [vmem:[#allocation2 + $0x60] sm:$0xff] %vm2061_vm2, %v1877_v51  ;;  %2172 = vst.msk [vmem:[#allocation2 + $0x370] sm:$0xff] %vm2061_vm2, %v1975_v52  ;;  %v1457_v63 = vadd.f32 %v8392_v14, %v8500_v0  ;;  %v6725_v3 = vmax.f32 %v6612_v20, %v6669_v61  ;;  %v6642_v6 = vld [vmem:[#allocation3 + $0x18] sm:$0x3f]  ;;  %v1879_v8 = vmax.f32 %v957_v58, 0.0  ;;  %v1977_v9 = vmax.f32 %v1447_v19, 0.0 }
 0x108   :  { %2077 = vst.msk [vmem:[#allocation2 + $0x78] sm:$0xff] %vm2061_vm2, %v1880_v53  ;;  %2175 = vst.msk [vmem:[#allocation2 + $0x388] sm:$0xff] %vm2061_vm2, %v1978_v55  ;;  %v982_v44 = vadd.f32 %v8503_v7, %v8392_v14  ;;  %v6698_v10 = vmax.f32 %v6585_v60, %v6642_v6  ;;  %v6670_v11 = vld [vmem:[#allocation3 + $0x1d8] sm:$0x3f]  ;;  %v1882_v59 = vmax.f32 %v972_v32, 0.0  ;;  %v1980_v12 = vmax.f32 %v1462_v35, 0.0  ;;  %v8611_v40 = vpop.f32.mrf.mxu0 }
 0x109   :  { %v1881_v15 = vmax.f32 %v967_v62, 0.0  ;;  %6781 = vst.msk [vmem:[%s10173_s3 + $0xe0] sm:$0xff] %vm2061_vm2, %v6725_v3  ;;  %v6726_v0 = vmax.f32 %v6613_v2, %v6670_v11  ;;  %v2266_v16 = vld [vmem:[#allocation2 + $0x40] ss:$2 sm:$0xff]  ;;  %v2462_v17 = vld [vmem:[#allocation2 + $0x41] ss:$2 sm:$0xff]  ;;  %v1472_v7 = vadd.f32 %v8520_v26, %v8392_v14  ;;  %v977_v25 = vadd.f32 %v8392_v14, %v8529_v30  ;;  %v8602_v30 = vpop.f32.mrf.mxu1 }
 0x10a   :  { %v2364_v24 = vld [vmem:[#allocation2 + $0x350] ss:$2 sm:$0xff]  ;;  %2076 = vst.msk [vmem:[#allocation2 + $0x70] sm:$0xff] %vm2061_vm2, %v1879_v8  ;;  %2174 = vst.msk [vmem:[#allocation2 + $0x380] sm:$0xff] %vm2061_vm2, %v1977_v9  ;;  %v1467_v27 = vadd.f32 %v8392_v14, %v1466_v42  ;;  %v2653_v28 = vmax.f32 %v2266_v16, %v2462_v17  ;;  %v2560_v29 = vld [vmem:[#allocation2 + $0x351] ss:$2 sm:$0xff]  ;;  %v8600_v31 = vadd.f32 %v7269_v50, %v8392_v14  ;;  %v8629_v60 = vpop.f32.mrf.mxu0 }
 0x10b   :  { %6754 = vst.msk [vmem:[%s10173_s3 + $0x8] sm:$0x3f] %vm6472_vm3, %v6698_v10  ;;  %v1979_v23 = vmax.f32 %v1457_v63, 0.0  ;;  %v1884_v26 = vmax.f32 %v982_v44, 0.0  ;;  %6782 = vst.msk [vmem:[%s10173_s3 + $0xe8] sm:$0x3f] %vm6472_vm3, %v6726_v0  ;;  %v2702_v36 = vmax.f32 %v2364_v24, %v2560_v29  ;;  %v8609_v39 = vadd.f32 %v7416_v1, %v8392_v14  ;;  %v8625_v53 = vpop.f32.mrf.mxu1 }
 0x10c   :  { %2079 = vst.msk [vmem:[#allocation2 + $0x88] sm:$0xff] %vm2061_vm2, %v1882_v59  ;;  %2177 = vst.msk [vmem:[#allocation2 + $0x398] sm:$0xff] %vm2061_vm2, %v1980_v12  ;;  %v2268_v37 = vld [vmem:[#allocation2 + $0x50] ss:$2 sm:$0xff]  ;;  %v2464_v38 = vld [vmem:[#allocation2 + $0x51] ss:$2 sm:$0xff]  ;;  %v2913_v45 = vcombine.high %v2653_v28, %v2653_v28  ;;  %v2920_v41 = vrot.slane %v2653_v28, %v8416_v54  ;;  %v8620_v50 = vadd.f32 %v8392_v14, %v986_v47  ;;  %v8639_v24 = vpop.f32.mrf.mxu0 }
 0x10d   :  { %2078 = vst.msk [vmem:[#allocation2 + $0x80] sm:$0xff] %vm2061_vm2, %v1881_v15  ;;  %v1982_v33 = vmax.f32 %v1472_v7, 0.0  ;;  %v1883_v34 = vmax.f32 %v977_v25, 0.0  ;;  %v2654_v42 = vmax.f32 %v2268_v37, %v2464_v38  ;;  %v2366_v43 = vld [vmem:[#allocation2 + $0x360] ss:$2 sm:$0xff]  ;;  %2176 = vst.msk [vmem:[#allocation2 + $0x390] sm:$0xff] %vm2061_vm2, %v1979_v23  ;;  %v3746_v48 = vcombine.high %v2702_v36, %v2702_v36  ;;  %v8635_v11 = vpop.f32.mrf.mxu1 }
 0x10e   :  { %v2562_v46 = vld [vmem:[#allocation2 + $0x361] ss:$2 sm:$0xff]  ;;  %2081 = vst.msk [vmem:[#allocation2 + $0x98] sm:$0xff] %vm2061_vm2, %v1884_v26  ;;  %v1981_v56 = vmax.f32 %v1467_v27, 0.0  ;;  %v3753_v49 = vrot.slane %v2702_v36, %v8416_v54  ;;  %v2927_v4 = vrot.slane %v2913_v45, %v8416_v54  ;;  %v2928_v5 = vcombine.high %v2920_v41, %v2920_v41  ;;  %v2270_v63 = vld [vmem:[#allocation2 + $0x60] ss:$2 sm:$0xff] }
 0x10f   :  { %v2703_v57 = vmax.f32 %v2366_v43, %v2562_v46  ;;  %2179 = vst.msk [vmem:[#allocation2 + $0x3a8] sm:$0xff] %vm2061_vm2, %v1982_v33  ;;  %2080 = vst.msk [vmem:[#allocation2 + $0x90] sm:$0xff] %vm2061_vm2, %v1883_v34  ;;  %v2930_v51 = vcombine.high %v2654_v42, %v2654_v42  ;;  %v2937_v52 = vrot.slane %v2654_v42, %v8416_v54  ;;  %v2466_v1 = vld [vmem:[#allocation2 + $0x61] ss:$2 sm:$0xff]  ;;  %v2368_v16 = vld [vmem:[#allocation2 + $0x370] ss:$2 sm:$0xff]  ;;  %v8656_v42 = vpop.f32.mrf.mxu1 }
 0x110   :  { %2178 = vst.msk [vmem:[#allocation2 + $0x3a0] sm:$0xff] %vm2061_vm2, %v1981_v56  ;;  %v3760_v55 = vrot.slane %v3746_v48, %v8416_v54  ;;  %v3761_v58 = vcombine.high %v3753_v49, %v3753_v49  ;;  %v2929_v61 = vcombine.high %v2927_v4, %v2927_v4  ;;  %v4578_v32 = vcombine.low %v2920_v41, %v2928_v5  ;;  %v2564_v17 = vld [vmem:[#allocation2 + $0x371] ss:$2 sm:$0xff]  ;;  %v8660_v56 = vpop.f32.mrf.mxu0 }
 0x111   :  { %v3763_v19 = vcombine.high %v2703_v57, %v2703_v57  ;;  %v3770_v20 = vrot.slane %v2703_v57, %v8416_v54  ;;  %v2944_v35 = vrot.slane %v2930_v51, %v8416_v54  ;;  %v2945_v62 = vcombine.high %v2937_v52, %v2937_v52  ;;  %v2272_v29 = vld [vmem:[#allocation2 + $0x70] ss:$2 sm:$0xff]  ;;  %v2468_v23 = vld [vmem:[#allocation2 + $0x71] ss:$2 sm:$0xff]  ;;  %v2370_v45 = vld [vmem:[#allocation2 + $0x380] ss:$2 sm:$0xff] }
 0x112   :  { %v3762_v2 = vcombine.high %v3760_v55, %v3760_v55  ;;  %v5502_v3 = vcombine.low %v3753_v49, %v3761_v58  ;;  %v4608_v6 = vrot.slane %v2937_v52, %v8416_v54  ;;  %v4592_v9 = vrot.slane %v4578_v32, %v8416_v54  ;;  %v2566_v41 = vld [vmem:[#allocation2 + $0x381] ss:$2 sm:$0xff]  ;;  %v8668_v32 = vpop.f32.mrf.mxu1 }
 0x113   :  { %v3777_v8 = vrot.slane %v3763_v19, %v8416_v54  ;;  %v4594_v44 = vcombine.low %v2927_v4, %v2929_v61  ;;  %v4610_v47 = vcombine.low %v2945_v62, %v2944_v35  ;;  %v3778_v10 = vcombine.high %v3770_v20, %v3770_v20 }
 0x114   :  { %v5516_v59 = vrot.slane %v5502_v3, %v8416_v54  ;;  %v5518_v12 = vcombine.low %v3760_v55, %v3762_v2  ;;  %v5532_v15 = vrot.slane %v3770_v20, %v8416_v54  ;;  %v2655_v0 = vmax.f32 %v2270_v63, %v2466_v1  ;;  %v8672_v2 = vpop.f32.mrf.mxu0 }
 0x115   :  { %v4593_v7 = vcombine.low %v4585_v21, %v4592_v9  ;;  %v4601_v25 = vrot.slane %v4594_v44, %v8416_v54  ;;  %v4618_v27 = vrot.slane %v4610_v47, %v8416_v54  ;;  %v8646_v28 = vcombine.low %v3778_v10, %v3777_v8  ;;  %v2274_v44 = vld [vmem:[#allocation2 + $0x80] ss:$2 sm:$0xff]  ;;  %v2470_v47 = vld [vmem:[#allocation2 + $0x81] ss:$2 sm:$0xff] }
 0x116   :  { %v5517_v26 = vcombine.low %v5509_v22, %v5516_v59  ;;  %v5525_v36 = vrot.slane %v5518_v12, %v8416_v54  ;;  %v2946_v37 = vcombine.high %v2944_v35, %v2944_v35  ;;  %v2947_v38 = vcombine.high %v2655_v0, %v2655_v0 }
 0x117   :  { %6476 = vst.msk [vmem:[#allocation3 + $0x20] sm:$0xff] %vm2061_vm2, %v4593_v7  ;;  %v4609_v13 = vcombine.low %v4601_v25, %v4608_v6  ;;  %v5542_v21 = vrot.slane %v8646_v28, %v8416_v54  ;;  %v2954_v33 = vrot.slane %v2655_v0, %v8416_v54  ;;  %v2704_v34 = vmax.f32 %v2368_v16, %v2564_v17  ;;  %v2372_v0 = vld [vmem:[#allocation2 + $0x390] ss:$2 sm:$0xff]  ;;  %v2568_v16 = vld [vmem:[#allocation2 + $0x391] ss:$2 sm:$0xff] }
 0x118   :  { %6532 = vst.msk [vmem:[#allocation3 + $0x1e0] sm:$0xff] %vm2061_vm2, %v5517_v26  ;;  %v5533_v18 = vcombine.low %v5525_v36, %v5532_v15  ;;  %v2961_v22 = vrot.slane %v2947_v38, %v8416_v54  ;;  %v3779_v43 = vcombine.high %v3777_v8, %v3777_v8  ;;  %v2656_v46 = vmax.f32 %v2272_v29, %v2468_v23  ;;  %v2276_v17 = vld [vmem:[#allocation2 + $0x90] ss:$2 sm:$0xff]  ;;  %v2472_v29 = vld [vmem:[#allocation2 + $0x91] ss:$2 sm:$0xff]  ;;  %v8680_v36 = vpop.f32.mrf.mxu1 }
 0x119   :  { %6477 = vst.msk [vmem:[#allocation3 + $0x28] sm:$0x3f] %vm6472_vm3, %v4609_v13  ;;  %v2962_v48 = vcombine.high %v2954_v33, %v2954_v33  ;;  %v4611_v49 = vcombine.low %v2946_v37, %v2954_v33  ;;  %v3780_v57 = vcombine.high %v2704_v34, %v2704_v34  ;;  %v3787_v4 = vrot.slane %v2704_v34, %v8416_v54  ;;  %v2374_v23 = vld [vmem:[#allocation2 + $0x3a0] ss:$2 sm:$0xff]  ;;  %v2570_v26 = vld [vmem:[#allocation2 + $0x3a1] ss:$2 sm:$0xff]  ;;  %v8684_v34 = vpop.f32.mrf.mxu0 }
 0x11a   :  { %6533 = vst.msk [vmem:[#allocation3 + $0x1e8] sm:$0x3f] %vm6472_vm3, %v5533_v18  ;;  %v2963_v5 = vcombine.high %v2961_v22, %v2961_v22  ;;  %v2964_v51 = vcombine.high %v2656_v46, %v2656_v46  ;;  %v2971_v52 = vrot.slane %v2656_v46, %v8416_v54  ;;  %v2705_v55 = vmax.f32 %v2370_v45, %v2566_v41 }
 0x11b   :  { %v4625_v58 = vrot.slane %v4611_v49, %v8416_v54  ;;  %v4627_v19 = vcombine.low %v2962_v48, %v2961_v22  ;;  %v3794_v20 = vrot.slane %v3780_v57, %v8416_v54  ;;  %v3795_v61 = vcombine.high %v3787_v4, %v3787_v4 }
 0x11c   :  { %v4641_v35 = vrot.slane %v2963_v5, %v8416_v54  ;;  %v5535_v62 = vcombine.low %v3779_v43, %v3787_v4  ;;  %v2978_v63 = vrot.slane %v2964_v51, %v8416_v54  ;;  %v2979_v1 = vcombine.high %v2971_v52, %v2971_v52  ;;  %v8691_v51 = vpop.f32.mrf.mxu1 }
 0x11d   :  { %v4626_v3 = vcombine.low %v4618_v27, %v4625_v58  ;;  %v4634_v6 = vrot.slane %v4627_v19, %v8416_v54  ;;  %v3796_v8 = vcombine.high %v3794_v20, %v3794_v20  ;;  %v5551_v9 = vcombine.low %v3795_v61, %v3794_v20  ;;  %v8694_v20 = vpop.f32.mrf.mxu0 }
 0x11e   :  { %v5549_v10 = vrot.slane %v5535_v62, %v8416_v54  ;;  %v2980_v59 = vcombine.high %v2978_v63, %v2978_v63  ;;  %v4643_v12 = vcombine.low %v2971_v52, %v2979_v1  ;;  %v3797_v15 = vcombine.high %v2705_v55, %v2705_v55  ;;  %v6586_v1 = vld [vmem:[#allocation3 + $0x20] sm:$0xff] }
 0x11f   :  { %v4642_v7 = vcombine.low %v4634_v6, %v4641_v35  ;;  %6478 = vst.msk [vmem:[#allocation3 + $0x30] sm:$0xff] %vm2061_vm2, %v4626_v3  ;;  %v5558_v25 = vrot.slane %v5551_v9, %v8416_v54  ;;  %v5565_v27 = vrot.slane %v3796_v8, %v8416_v54  ;;  %v3804_v28 = vrot.slane %v2705_v55, %v8416_v54 }
 0x120   :  { %v5550_v37 = vcombine.low %v5542_v21, %v5549_v10  ;;  %v4644_v38 = vcombine.low %v2978_v63, %v2980_v59  ;;  %v4651_v13 = vrot.slane %v4643_v12, %v8416_v54  ;;  %v3811_v33 = vrot.slane %v3797_v15, %v8416_v54  ;;  %v8707_v15 = vpop.f32.mrf.mxu1 }
 0x121   :  { %6479 = vst.msk [vmem:[#allocation3 + $0x38] sm:$0x3f] %vm6472_vm3, %v4642_v7  ;;  %v5566_v45 = vcombine.low %v5558_v25, %v5565_v27  ;;  %v3812_v41 = vcombine.high %v3804_v28, %v3804_v28  ;;  %v2657_v18 = vmax.f32 %v2274_v44, %v2470_v47  ;;  %v2706_v22 = vmax.f32 %v2372_v0, %v2568_v16  ;;  %v6587_v0 = vld [vmem:[#allocation3 + $0x28] sm:$0x3f] }
 0x122   :  { %6534 = vst.msk [vmem:[#allocation3 + $0x1f0] sm:$0xff] %vm2061_vm2, %v5550_v37  ;;  %v4658_v43 = vrot.slane %v4644_v38, %v8416_v54  ;;  %v3813_v46 = vcombine.high %v3811_v33, %v3811_v33  ;;  %v2658_v48 = vmax.f32 %v2276_v17, %v2472_v29  ;;  %v2707_v21 = vmax.f32 %v2374_v23, %v2570_v26  ;;  %v6614_v29 = vld [vmem:[#allocation3 + $0x1e0] sm:$0xff] }
 0x123   :  { %6535 = vst.msk [vmem:[#allocation3 + $0x1f8] sm:$0x3f] %vm6472_vm3, %v5566_v45  ;;  %v5567_v49 = vcombine.low %v3804_v28, %v3812_v41  ;;  %v2981_v57 = vcombine.high %v2657_v18, %v2657_v18  ;;  %v2988_v4 = vrot.slane %v2657_v18, %v8416_v54  ;;  %v3814_v5 = vcombine.high %v2706_v22, %v2706_v22  ;;  %v8709_v28 = vpop.f32.mrf.mxu0 }
 0x124   :  { %v4659_v52 = vcombine.low %v4651_v13, %v4658_v43  ;;  %v5568_v55 = vcombine.low %v3811_v33, %v3813_v46  ;;  %v3821_v58 = vrot.slane %v2706_v22, %v8416_v54  ;;  %v2998_v19 = vcombine.high %v2658_v48, %v2658_v48  ;;  %v6615_v33 = vld [vmem:[#allocation3 + $0x1e8] sm:$0x3f] }
 0x125   :  { %v5575_v61 = vrot.slane %v5567_v49, %v8416_v54  ;;  %v2995_v35 = vrot.slane %v2981_v57, %v8416_v54  ;;  %v2996_v62 = vcombine.high %v2988_v4, %v2988_v4  ;;  %v3828_v63 = vrot.slane %v3814_v5, %v8416_v54 }
 0x126   :  { %v6643_v3 = vld [vmem:[#allocation3 + $0x30] sm:$0xff]  ;;  %6480 = vst.msk [vmem:[#allocation3 + $0x40] sm:$0xff] %vm2061_vm2, %v4659_v52  ;;  %v5582_v6 = vrot.slane %v5568_v55, %v8416_v54  ;;  %v3829_v8 = vcombine.high %v3821_v58, %v3821_v58  ;;  %v3005_v9 = vrot.slane %v2658_v48, %v8416_v54  ;;  %v8703_v44 = vrot.slane %v2998_v19, %v8416_v54  ;;  %v8736_v19 = vpop.f32.mrf.mxu0 }
 0x127   :  { %v6699_v47 = vmax.f32 %v6586_v1, %v6643_v3  ;;  %v4660_v10 = vcombine.low %v2988_v4, %v2996_v62  ;;  %v4674_v59 = vrot.slane %v2995_v35, %v8416_v54  ;;  %v5598_v12 = vrot.slane %v3828_v63, %v8416_v54  ;;  %v8727_v4 = vpop.f32.mrf.mxu1 }
 0x128   :  { %v6644_v16 = vld [vmem:[#allocation3 + $0x38] sm:$0x3f]  ;;  %v5583_v17 = vcombine.low %v5575_v61, %v5582_v6  ;;  %v5584_v7 = vcombine.low %v3821_v58, %v3829_v8  ;;  %v2997_v25 = vcombine.high %v2995_v35, %v2995_v35  ;;  %v3013_v27 = vcombine.high %v3005_v9, %v3005_v9 }
 0x129   :  { %v6700_v23 = vmax.f32 %v6587_v0, %v6644_v16  ;;  %6755 = vst.msk [vmem:[%s10173_s3 + $0x10] sm:$0xff] %vm2061_vm2, %v6699_v47  ;;  %v6671_v26 = vld [vmem:[#allocation3 + $0x1f0] sm:$0xff]  ;;  %v4667_v37 = vrot.slane %v4660_v10, %v8416_v54  ;;  %v3830_v38 = vcombine.high %v3828_v63, %v3828_v63  ;;  %v3831_v13 = vcombine.high %v2707_v21, %v2707_v21 }
 0x12a   :  { %v6672_v45 = vld [vmem:[#allocation3 + $0x1f8] sm:$0x3f]  ;;  %v6727_v41 = vmax.f32 %v6614_v29, %v6671_v26  ;;  %6536 = vst.msk [vmem:[#allocation3 + $0x200] sm:$0xff] %vm2061_vm2, %v5583_v17  ;;  %v5591_v18 = vrot.slane %v5584_v7, %v8416_v54  ;;  %v4676_v22 = vcombine.low %v2997_v25, %v3005_v9  ;;  %v4677_v43 = vcombine.low %v3013_v27, %v8703_v44 }
 0x12b   :  { %6756 = vst.msk [vmem:[%s10173_s3 + $0x18] sm:$0x3f] %vm6472_vm3, %v6700_v23  ;;  %v6728_v46 = vmax.f32 %v6615_v33, %v6672_v45  ;;  %v4675_v48 = vcombine.low %v4667_v37, %v4674_v59  ;;  %v3838_v49 = vrot.slane %v2707_v21, %v8416_v54  ;;  %v8725_v57 = vrot.slane %v3831_v13, %v8416_v54 }
 0x12c   :  { %6783 = vst.msk [vmem:[%s10173_s3 + $0xf0] sm:$0xff] %vm2061_vm2, %v6727_v41  ;;  %v5599_v5 = vcombine.low %v5591_v18, %v5598_v12  ;;  %v4684_v52 = vrot.slane %v4676_v22, %v8416_v54  ;;  %v4691_v55 = vrot.slane %v4677_v43, %v8416_v54  ;;  %v1886_v58 = vmax.f32 %v8600_v31, 0.0  ;;  %v1036_v12 = vpop.f32.mrf.mxu0 }
 0x12d   :  { %6784 = vst.msk [vmem:[%s10173_s3 + $0xf8] sm:$0x3f] %vm6472_vm3, %v6728_v46  ;;  %6481 = vst.msk [vmem:[#allocation3 + $0x48] sm:$0x3f] %vm6472_vm3, %v4675_v48  ;;  %v3846_v21 = vcombine.high %v3838_v49, %v3838_v49  ;;  %v5600_v61 = vcombine.low %v3830_v38, %v3838_v49  ;;  %v1984_v35 = vmax.f32 %v8609_v39, 0.0  ;;  %v1885_v62 = vmax.f32 %v8620_v50, 0.0 }
 0x12e   :  { %6537 = vst.msk [vmem:[#allocation3 + $0x208] sm:$0x3f] %vm6472_vm3, %v5599_v5  ;;  %v4692_v63 = vcombine.low %v4684_v52, %v4691_v55  ;;  %v3014_v31 = vcombine.high %v8703_v44, %v8703_v44  ;;  %v1477_v1 = vadd.f32 %v8392_v14, %v8602_v30  ;;  %v3847_v3 = vcombine.high %v8725_v57, %v8725_v57  ;;  %v8760_v50 = vld [vmem:[%s10172_s2] ss:$0 sm:$0xff]  ;;  %v8766_v30 = vpop.f32.mrf.mxu1  ;;  %v7287_v37 = vpop.f32.mrf.mxu0 }
 0x12f   :  { %2083 = vst.msk [vmem:[#allocation2 + $0xa8] sm:$0xff] %vm2061_vm2, %v1886_v58  ;;  %v5601_v6 = vcombine.low %v3846_v21, %v8725_v57  ;;  %v5608_v39 = vrot.slane %v5600_v61, %v8416_v54  ;;  %2181 = vst.msk [vmem:[#allocation2 + $0x3b8] sm:$0xff] %vm2061_vm2, %v1984_v35  ;;  %v1002_v8 = vadd.f32 %v8760_v50, %v8611_v40  ;;  %v6588_v22 = vld [vmem:[#allocation3 + $0x40] sm:$0xff] }
 0x130   :  { %2082 = vst.msk [vmem:[#allocation2 + $0xa0] sm:$0xff] %vm2061_vm2, %v1885_v62  ;;  %v1492_v14 = vadd.f32 %v8760_v50, %v8625_v53  ;;  %6482 = vst.msk [vmem:[#allocation3 + $0x50] sm:$0xff] %vm2061_vm2, %v4692_v63  ;;  %v1983_v9 = vmax.f32 %v1477_v1, 0.0  ;;  %v997_v47 = vadd.f32 %v8760_v50, %v8629_v60  ;;  %v1487_v10 = vadd.f32 %v8760_v50, %v8635_v11  ;;  %v1526_v29 = vpop.f32.mrf.mxu1  ;;  %v8813_v55 = vpop.f32.mrf.mxu0 }
 0x131   :  { %v1012_v59 = vadd.f32 %v8760_v50, %v8639_v24  ;;  %v5615_v40 = vrot.slane %v5601_v6, %v8416_v54  ;;  %v1888_v0 = vmax.f32 %v1002_v8, 0.0  ;;  %v1502_v53 = vadd.f32 %v8760_v50, %v8656_v42  ;;  %v6616_v8 = vld [vmem:[#allocation3 + $0x200] sm:$0xff] }
 0x132   :  { %v1986_v16 = vmax.f32 %v1492_v14, 0.0  ;;  %2180 = vst.msk [vmem:[#allocation2 + $0x3b0] sm:$0xff] %vm2061_vm2, %v1983_v9  ;;  %v1887_v17 = vmax.f32 %v997_v47, 0.0  ;;  %v1985_v7 = vmax.f32 %v1487_v10, 0.0  ;;  %v1007_v60 = vadd.f32 %v8760_v50, %v8660_v56  ;;  %v7434_v49 = vpop.f32.mrf.mxu1 }
 0x133   :  { %v1890_v25 = vmax.f32 %v1012_v59, 0.0  ;;  %v5616_v11 = vcombine.low %v5608_v39, %v5615_v40  ;;  %2085 = vst.msk [vmem:[#allocation2 + $0xb8] sm:$0xff] %vm2061_vm2, %v1888_v0  ;;  %v1988_v24 = vmax.f32 %v1502_v53, 0.0  ;;  %v1497_v27 = vadd.f32 %v8760_v50, %v8668_v32 }
 0x134   :  { %2183 = vst.msk [vmem:[#allocation2 + $0x3c8] sm:$0xff] %vm2061_vm2, %v1986_v16  ;;  %v1022_v42 = vadd.f32 %v8760_v50, %v8672_v2  ;;  %2084 = vst.msk [vmem:[#allocation2 + $0xb0] sm:$0xff] %vm2061_vm2, %v1887_v17  ;;  %v1889_v56 = vmax.f32 %v1007_v60, 0.0  ;;  %v1512_v23 = vadd.f32 %v8760_v50, %v8680_v36  ;;  %v1017_v26 = vadd.f32 %v8760_v50, %v8684_v34  ;;  %v8847_v60 = vpop.f32.mrf.mxu0 }
 0x135   :  { %2182 = vst.msk [vmem:[#allocation2 + $0x3c0] sm:$0xff] %vm2061_vm2, %v1985_v7  ;;  %2087 = vst.msk [vmem:[#allocation2 + $0xc8] sm:$0xff] %vm2061_vm2, %v1890_v25  ;;  %v1507_v32 = vadd.f32 %v8760_v50, %v8691_v51  ;;  %v1987_v2 = vmax.f32 %v1497_v27, 0.0  ;;  %v1032_v13 = vadd.f32 %v8760_v50, %v8694_v20  ;;  %v1522_v33 = vadd.f32 %v8760_v50, %v8707_v15 }
 0x136   :  { %6538 = vst.msk [vmem:[#allocation3 + $0x210] sm:$0xff] %vm2061_vm2, %v5616_v11  ;;  %2185 = vst.msk [vmem:[#allocation2 + $0x3d8] sm:$0xff] %vm2061_vm2, %v1988_v24  ;;  %v1892_v38 = vmax.f32 %v1022_v42, 0.0  ;;  %v1990_v34 = vmax.f32 %v1512_v23, 0.0  ;;  %v1891_v41 = vmax.f32 %v1017_v26, 0.0  ;;  %v1027_v51 = vadd.f32 %v8760_v50, %v8709_v28 }
 0x137   :  { %v2278_v36 = vld [vmem:[#allocation2 + $0xa0] ss:$2 sm:$0xff]  ;;  %v2474_v45 = vld [vmem:[#allocation2 + $0xa1] ss:$2 sm:$0xff]  ;;  %2086 = vst.msk [vmem:[#allocation2 + $0xc0] sm:$0xff] %vm2061_vm2, %v1889_v56  ;;  %v1517_v18 = vadd.f32 %v8760_v50, %v8727_v4  ;;  %v6645_v43 = vld [vmem:[#allocation3 + $0x50] sm:$0xff]  ;;  %v1042_v4 = vadd.f32 %v8760_v50, %v8736_v19  ;;  %v1532_v62 = vadd.f32 %v8760_v50, %v8766_v30  ;;  %v8822_v63 = vadd.f32 %v8760_v50, %v1036_v12  ;;  %v8843_v12 = vpop.f32.mrf.mxu1 }
 0x138   :  { %v2659_v46 = vmax.f32 %v2278_v36, %v2474_v45  ;;  %2184 = vst.msk [vmem:[#allocation2 + $0x3d0] sm:$0xff] %vm2061_vm2, %v1987_v2  ;;  %2089 = vst.msk [vmem:[#allocation2 + $0xd8] sm:$0xff] %vm2061_vm2, %v1892_v38  ;;  %v1989_v20 = vmax.f32 %v1507_v32, 0.0  ;;  %v1894_v15 = vmax.f32 %v1032_v13, 0.0  ;;  %v1992_v48 = vmax.f32 %v1522_v33, 0.0 }
 0x139   :  { %v6701_v5 = vmax.f32 %v6588_v22, %v6645_v43  ;;  %2187 = vst.msk [vmem:[#allocation2 + $0x3e8] sm:$0xff] %vm2061_vm2, %v1990_v34  ;;  %2088 = vst.msk [vmem:[#allocation2 + $0xd0] sm:$0xff] %vm2061_vm2, %v1891_v41  ;;  %v1893_v28 = vmax.f32 %v1027_v51, 0.0  ;;  %v1991_v52 = vmax.f32 %v1517_v18, 0.0  ;;  %v2376_v61 = vld [vmem:[#allocation2 + $0x3b0] ss:$2 sm:$0xff]  ;;  %v8831_v6 = vadd.f32 %v8760_v50, %v1526_v29  ;;  %v8861_v13 = vpop.f32.mrf.mxu1  ;;  %v8866_v41 = vpop.f32.mrf.mxu0 }
 0x13a   :  { %v3015_v58 = vcombine.high %v2659_v46, %v2659_v46  ;;  %v3022_v21 = vrot.slane %v2659_v46, %v8416_v54  ;;  %v2572_v35 = vld [vmem:[#allocation2 + $0x3b1] ss:$2 sm:$0xff]  ;;  %2186 = vst.msk [vmem:[#allocation2 + $0x3e0] sm:$0xff] %vm2061_vm2, %v1989_v20  ;;  %2091 = vst.msk [vmem:[#allocation2 + $0xe8] sm:$0xff] %vm2061_vm2, %v1894_v15  ;;  %v1896_v1 = vmax.f32 %v1042_v4, 0.0  ;;  %v8834_v39 = vadd.f32 %v8760_v50, %v7287_v37 }
 0x13b   :  { %2189 = vst.msk [vmem:[#allocation2 + $0x3f8] sm:$0xff] %vm2061_vm2, %v1992_v48  ;;  %6757 = vst.msk [vmem:[%s10173_s3 + $0x20] sm:$0xff] %vm2061_vm2, %v6701_v5  ;;  %v2708_v19 = vmax.f32 %v2376_v61, %v2572_v35  ;;  %v2280_v47 = vld [vmem:[#allocation2 + $0xb0] ss:$2 sm:$0xff]  ;;  %v2476_v10 = vld [vmem:[#allocation2 + $0xb1] ss:$2 sm:$0xff]  ;;  %v8841_v59 = vadd.f32 %v8760_v50, %v7434_v49  ;;  %v8872_v4 = vpop.f32.mrf.mxu1 }
 0x13c   :  { %2090 = vst.msk [vmem:[#allocation2 + $0xe0] sm:$0xff] %vm2061_vm2, %v1893_v28  ;;  %2188 = vst.msk [vmem:[#allocation2 + $0x3f0] sm:$0xff] %vm2061_vm2, %v1991_v52  ;;  %v3029_v14 = vrot.slane %v3015_v58, %v8416_v54  ;;  %v3030_v30 = vcombine.high %v3022_v21, %v3022_v21  ;;  %v4693_v9 = vcombine.low %v3014_v31, %v3022_v21  ;;  %v2378_v17 = vld [vmem:[#allocation2 + $0x3c0] ss:$2 sm:$0xff]  ;;  %v2574_v7 = vld [vmem:[#allocation2 + $0x3c1] ss:$2 sm:$0xff] }
 0x13d   :  { %v6673_v40 = vld [vmem:[#allocation3 + $0x210] sm:$0xff]  ;;  %v3848_v0 = vcombine.high %v2708_v19, %v2708_v19  ;;  %v3855_v16 = vrot.slane %v2708_v19, %v8416_v54  ;;  %v2660_v53 = vmax.f32 %v2280_v47, %v2476_v10  ;;  %2093 = vst.msk [vmem:[#allocation2 + $0xf8] sm:$0xff] %vm2061_vm2, %v1896_v1  ;;  %v1994_v25 = vmax.f32 %v1532_v62, 0.0  ;;  %v8877_v62 = vpop.f32.mrf.mxu0 }
 0x13e   :  { %v6729_v44 = vmax.f32 %v6616_v8, %v6673_v40  ;;  %v3031_v31 = vcombine.high %v3029_v14, %v3029_v14  ;;  %v4700_v11 = vrot.slane %v4693_v9, %v8416_v54  ;;  %v4707_v24 = vrot.slane %v3030_v30, %v8416_v54  ;;  %v2282_v2 = vld [vmem:[#allocation2 + $0xc0] ss:$2 sm:$0xff]  ;;  %v2478_v38 = vld [vmem:[#allocation2 + $0xc1] ss:$2 sm:$0xff] }
 0x13f   :  { %v3862_v27 = vrot.slane %v3848_v0, %v8416_v54  ;;  %v3863_v42 = vcombine.high %v3855_v16, %v3855_v16  ;;  %v5617_v29 = vcombine.low %v3847_v3, %v3855_v16  ;;  %v3032_v56 = vcombine.high %v2660_v53, %v2660_v53  ;;  %2191 = vst.msk [vmem:[#allocation2 + $0x408] sm:$0xff] %vm2061_vm2, %v1994_v25  ;;  %v2380_v45 = vld [vmem:[#allocation2 + $0x3d0] ss:$2 sm:$0xff]  ;;  %v2576_v34 = vld [vmem:[#allocation2 + $0x3d1] ss:$2 sm:$0xff] }
 0x140   :  { %6785 = vst.msk [vmem:[%s10173_s3 + $0x100] sm:$0xff] %vm2061_vm2, %v6729_v44  ;;  %v4708_v23 = vcombine.low %v4700_v11, %v4707_v24  ;;  %v4709_v26 = vcombine.low %v3029_v14, %v3031_v31  ;;  %v3039_v32 = vrot.slane %v2660_v53, %v8416_v54  ;;  %v2709_v37 = vmax.f32 %v2378_v17, %v2574_v7  ;;  %v2284_v30 = vld [vmem:[#allocation2 + $0xd0] ss:$2 sm:$0xff]  ;;  %v2480_v9 = vld [vmem:[#allocation2 + $0xd1] ss:$2 sm:$0xff]  ;;  %v8885_v44 = vpop.f32.mrf.mxu1 }
 0x141   :  { %v3864_v33 = vcombine.high %v3862_v27, %v3862_v27  ;;  %v5624_v57 = vrot.slane %v5617_v29, %v8416_v54  ;;  %v5631_v3 = vrot.slane %v3863_v42, %v8416_v54  ;;  %v3046_v36 = vrot.slane %v3032_v56, %v8416_v54  ;;  %v6589_v16 = vld [vmem:[#allocation3 + $0x48] sm:$0x3f] }
 0x142   :  { %v4717_v51 = vrot.slane %v4709_v26, %v8416_v54  ;;  %6483 = vst.msk [vmem:[#allocation3 + $0x58] sm:$0x3f] %vm6472_vm3, %v4708_v23  ;;  %v3047_v18 = vcombine.high %v3039_v32, %v3039_v32  ;;  %v3865_v22 = vcombine.high %v2709_v37, %v2709_v37  ;;  %v3872_v43 = vrot.slane %v2709_v37, %v8416_v54  ;;  %v2382_v29 = vld [vmem:[#allocation2 + $0x3e0] ss:$2 sm:$0xff]  ;;  %v2578_v56 = vld [vmem:[#allocation2 + $0x3e1] ss:$2 sm:$0xff]  ;;  %v8888_v23 = vpop.f32.mrf.mxu0 }
 0x143   :  { %v5632_v46 = vcombine.low %v5624_v57, %v5631_v3  ;;  %v5633_v20 = vcombine.low %v3862_v27, %v3864_v33  ;;  %v3048_v15 = vcombine.high %v3046_v36, %v3046_v36  ;;  %v2661_v48 = vmax.f32 %v2282_v2, %v2478_v38  ;;  %v2286_v38 = vld [vmem:[#allocation2 + $0xe0] ss:$2 sm:$0xff]  ;;  %v2482_v33 = vld [vmem:[#allocation2 + $0xe1] ss:$2 sm:$0xff] }
 0x144   :  { %v4710_v49 = vcombine.low %v3039_v32, %v3047_v18  ;;  %v3879_v5 = vrot.slane %v3865_v22, %v8416_v54  ;;  %v3880_v28 = vcombine.high %v3872_v43, %v3872_v43  ;;  %v2710_v52 = vmax.f32 %v2380_v45, %v2576_v34  ;;  %v6617_v34 = vld [vmem:[#allocation3 + $0x208] sm:$0x3f] }
 0x145   :  { %v5641_v58 = vrot.slane %v5633_v20, %v8416_v54  ;;  %6539 = vst.msk [vmem:[#allocation3 + $0x218] sm:$0x3f] %vm6472_vm3, %v5632_v46  ;;  %v4726_v21 = vcombine.low %v3046_v36, %v3048_v15  ;;  %v3049_v61 = vcombine.high %v2661_v48, %v2661_v48  ;;  %v3056_v35 = vrot.slane %v2661_v48, %v8416_v54  ;;  %v8901_v20 = vpop.f32.mrf.mxu1 }
 0x146   :  { %v4724_v19 = vrot.slane %v4710_v49, %v8416_v54  ;;  %v3881_v1 = vcombine.high %v3879_v5, %v3879_v5  ;;  %v5634_v8 = vcombine.low %v3872_v43, %v3880_v28  ;;  %v3882_v14 = vcombine.high %v2710_v52, %v2710_v52  ;;  %v2384_v28 = vld [vmem:[#allocation2 + $0x3f0] ss:$2 sm:$0xff] }
 0x147   :  { %v3063_v47 = vrot.slane %v3049_v61, %v8416_v54  ;;  %v3064_v10 = vcombine.high %v3056_v35, %v3056_v35  ;;  %v4733_v40 = vrot.slane %v4726_v21, %v8416_v54  ;;  %v4740_v0 = vrot.slane %v3056_v35, %v8416_v54 }
 0x148   :  { %v4725_v53 = vcombine.low %v4717_v51, %v4724_v19  ;;  %v5648_v17 = vrot.slane %v5634_v8, %v8416_v54  ;;  %v5650_v7 = vcombine.low %v3879_v5, %v3881_v1  ;;  %v3889_v25 = vrot.slane %v2710_v52, %v8416_v54  ;;  %v2580_v52 = vld [vmem:[#allocation2 + $0x3f1] ss:$2 sm:$0xff] }
 0x149   :  { %v6646_v31 = vld [vmem:[#allocation3 + $0x58] sm:$0x3f]  ;;  %v4741_v11 = vcombine.low %v4733_v40, %v4740_v0  ;;  %v4742_v24 = vcombine.low %v3064_v10, %v3063_v47  ;;  %v3896_v27 = vrot.slane %v3882_v14, %v8416_v54  ;;  %v2662_v42 = vmax.f32 %v2284_v30, %v2480_v9  ;;  %v8916_v0 = vpop.f32.mrf.mxu1 }
 0x14a   :  { %v6702_v26 = vmax.f32 %v6589_v16, %v6646_v31  ;;  %6484 = vst.msk [vmem:[#allocation3 + $0x60] sm:$0xff] %vm2061_vm2, %v4725_v53  ;;  %v5649_v32 = vcombine.low %v5641_v58, %v5648_v17  ;;  %v3897_v37 = vcombine.high %v3889_v25, %v3889_v25  ;;  %v5657_v2 = vrot.slane %v5650_v7, %v8416_v54  ;;  %v8904_v58 = vpop.f32.mrf.mxu0 }
 0x14b   :  { %v4750_v57 = vrot.slane %v4742_v24, %v8416_v54  ;;  %6485 = vst.msk [vmem:[#allocation3 + $0x68] sm:$0x3f] %vm6472_vm3, %v4741_v11  ;;  %v5664_v3 = vrot.slane %v3889_v25, %v8416_v54  ;;  %v3065_v36 = vcombine.high %v3063_v47, %v3063_v47  ;;  %v3066_v45 = vcombine.high %v2662_v42, %v2662_v42 }
 0x14c   :  { %6758 = vst.msk [vmem:[%s10173_s3 + $0x28] sm:$0x3f] %vm6472_vm3, %v6702_v26  ;;  %v6674_v51 = vld [vmem:[#allocation3 + $0x218] sm:$0x3f]  ;;  %v5666_v18 = vcombine.low %v3897_v37, %v3896_v27  ;;  %v3073_v22 = vrot.slane %v2662_v42, %v8416_v54  ;;  %v2711_v43 = vmax.f32 %v2382_v29, %v2578_v56  ;;  %v3898_v46 = vcombine.high %v3896_v27, %v3896_v27  ;;  %v8920_v25 = vpop.f32.mrf.mxu0 }
 0x14d   :  { %6540 = vst.msk [vmem:[#allocation3 + $0x220] sm:$0xff] %vm2061_vm2, %v5649_v32  ;;  %v6730_v15 = vmax.f32 %v6617_v34, %v6674_v51  ;;  %v5665_v48 = vcombine.low %v5657_v2, %v5664_v3  ;;  %v3080_v49 = vrot.slane %v3066_v45, %v8416_v54  ;;  %v2663_v5 = vmax.f32 %v2286_v38, %v2482_v33  ;;  %v8927_v33 = vpop.f32.mrf.mxu1 }
 0x14e   :  { %v5674_v21 = vrot.slane %v5666_v18, %v8416_v54  ;;  %v3081_v61 = vcombine.high %v3073_v22, %v3073_v22  ;;  %v4743_v35 = vcombine.low %v3065_v36, %v3073_v22  ;;  %v3899_v19 = vcombine.high %v2711_v43, %v2711_v43  ;;  %v8931_v34 = vpop.f32.mrf.mxu0 }
 0x14f   :  { %6786 = vst.msk [vmem:[%s10173_s3 + $0x108] sm:$0x3f] %vm6472_vm3, %v6730_v15  ;;  %6541 = vst.msk [vmem:[#allocation3 + $0x228] sm:$0x3f] %vm6472_vm3, %v5665_v48  ;;  %v3082_v1 = vcombine.high %v3080_v49, %v3080_v49  ;;  %v3906_v8 = vrot.slane %v2711_v43, %v8416_v54  ;;  %v3083_v14 = vcombine.high %v2663_v5, %v2663_v5  ;;  %v1895_v22 = vmax.f32 %v8822_v63, 0.0 }
 0x150   :  { %v3090_v30 = vrot.slane %v2663_v5, %v8416_v54  ;;  %v4757_v9 = vrot.slane %v4743_v35, %v8416_v54  ;;  %v4759_v47 = vcombine.low %v3081_v61, %v3080_v49  ;;  %v3913_v10 = vrot.slane %v3899_v19, %v8416_v54  ;;  %v8955_v35 = vpop.f32.mrf.mxu0 }
 0x151   :  { %v2712_v40 = vmax.f32 %v2384_v28, %v2580_v52  ;;  %v4773_v16 = vrot.slane %v3082_v1, %v8416_v54  ;;  %v3914_v53 = vcombine.high %v3906_v8, %v3906_v8  ;;  %v5667_v17 = vcombine.low %v3898_v46, %v3906_v8  ;;  %2092 = vst.msk [vmem:[#allocation2 + $0xf0] sm:$0xff] %vm2061_vm2, %v1895_v22  ;;  %v8947_v52 = vpop.f32.mrf.mxu1  ;;  %v6590_v8 = vld [vmem:[#allocation3 + $0x60] sm:$0xff] }
 0x152   :  { %v3097_v7 = vrot.slane %v3083_v14, %v8416_v54  ;;  %v4758_v31 = vcombine.low %v4750_v57, %v4757_v9  ;;  %v4766_v11 = vrot.slane %v4759_v47, %v8416_v54  ;;  %v3915_v24 = vcombine.high %v3913_v10, %v3913_v10 }
 0x153   :  { %v3098_v27 = vcombine.high %v3090_v30, %v3090_v30  ;;  %v5681_v42 = vrot.slane %v5667_v17, %v8416_v54  ;;  %v5683_v29 = vcombine.low %v3914_v53, %v3913_v10  ;;  %v3916_v26 = vcombine.high %v2712_v40, %v2712_v40  ;;  %v6591_v53 = vld [vmem:[#allocation3 + $0x68] sm:$0x3f] }
 0x154   :  { %v3099_v56 = vcombine.high %v3097_v7, %v3097_v7  ;;  %v4774_v32 = vcombine.low %v4766_v11, %v4773_v16  ;;  %6486 = vst.msk [vmem:[#allocation3 + $0x70] sm:$0xff] %vm2061_vm2, %v4758_v31  ;;  %v5697_v37 = vrot.slane %v3915_v24, %v8416_v54  ;;  %v3923_v38 = vrot.slane %v2712_v40, %v8416_v54  ;;  %v8971_v16 = vpop.f32.mrf.mxu1  ;;  %v6618_v24 = vld [vmem:[#allocation3 + $0x220] sm:$0xff] }
 0x155   :  { %v4775_v2 = vcombine.low %v3090_v30, %v3098_v27  ;;  %v5682_v57 = vcombine.low %v5674_v21, %v5681_v42  ;;  %v5690_v3 = vrot.slane %v5683_v29, %v8416_v54  ;;  %v3930_v45 = vrot.slane %v3916_v26, %v8416_v54 }
 0x156   :  { %v4776_v36 = vcombine.low %v3097_v7, %v3099_v56  ;;  %6487 = vst.msk [vmem:[#allocation3 + $0x78] sm:$0x3f] %vm6472_vm3, %v4774_v32  ;;  %v3931_v18 = vcombine.high %v3923_v38, %v3923_v38  ;;  %v1993_v43 = vmax.f32 %v8831_v6, 0.0  ;;  %v1898_v49 = vmax.f32 %v8834_v39, 0.0 }
 0x157   :  { %v4783_v51 = vrot.slane %v4775_v2, %v8416_v54  ;;  %v5698_v46 = vcombine.low %v5690_v3, %v5697_v37  ;;  %6542 = vst.msk [vmem:[#allocation3 + $0x230] sm:$0xff] %vm2061_vm2, %v5682_v57  ;;  %v3932_v48 = vcombine.high %v3930_v45, %v3930_v45  ;;  %v1996_v28 = vmax.f32 %v8841_v59, 0.0 }
 0x158   :  { %v4790_v15 = vrot.slane %v4776_v36, %v8416_v54  ;;  %v5699_v5 = vcombine.low %v3923_v38, %v3931_v18  ;;  %2190 = vst.msk [vmem:[#allocation2 + $0x400] sm:$0xff] %vm2061_vm2, %v1993_v43  ;;  %v1047_v63 = vadd.f32 %v8760_v50, %v8813_v55  ;;  %v1537_v6 = vadd.f32 %v8760_v50, %v8843_v12  ;;  %v2484_v32 = vld [vmem:[#allocation2 + $0xf1] ss:$2 sm:$0xff] }
 0x159   :  { %6543 = vst.msk [vmem:[#allocation3 + $0x238] sm:$0x3f] %vm6472_vm3, %v5698_v46  ;;  %v5700_v61 = vcombine.low %v3930_v45, %v3932_v48  ;;  %v1062_v39 = vadd.f32 %v8760_v50, %v8847_v60  ;;  %v1552_v59 = vadd.f32 %v8760_v50, %v8861_v13  ;;  %v1057_v1 = vadd.f32 %v8760_v50, %v8866_v41 }
 0x15a   :  { %v4791_v21 = vcombine.low %v4783_v51, %v4790_v15  ;;  %2095 = vst.msk [vmem:[#allocation2 + $0x108] sm:$0xff] %vm2061_vm2, %v1898_v49  ;;  %v5707_v55 = vrot.slane %v5699_v5, %v8416_v54  ;;  %2193 = vst.msk [vmem:[#allocation2 + $0x418] sm:$0xff] %vm2061_vm2, %v1996_v28  ;;  %v1897_v12 = vmax.f32 %v1047_v63, 0.0  ;;  %v1995_v19 = vmax.f32 %v1537_v6, 0.0  ;;  %v9004_v51 = vpop.f32.mrf.mxu1 }
 0x15b   :  { %v6647_v14 = vld [vmem:[#allocation3 + $0x70] sm:$0xff]  ;;  %v5714_v60 = vrot.slane %v5700_v61, %v8416_v54  ;;  %v1900_v30 = vmax.f32 %v1062_v39, 0.0  ;;  %v1998_v9 = vmax.f32 %v1552_v59, 0.0  ;;  %v1547_v13 = vadd.f32 %v8760_v50, %v8872_v4 }
 0x15c   :  { %6488 = vst.msk [vmem:[#allocation3 + $0x80] sm:$0xff] %vm2061_vm2, %v4791_v21  ;;  %v6703_v47 = vmax.f32 %v6590_v8, %v6647_v14  ;;  %2094 = vst.msk [vmem:[#allocation2 + $0x100] sm:$0xff] %vm2061_vm2, %v1897_v12  ;;  %v1899_v10 = vmax.f32 %v1057_v1, 0.0  ;;  %v1072_v41 = vadd.f32 %v8760_v50, %v8877_v62  ;;  %v1562_v40 = vadd.f32 %v8760_v50, %v8885_v44  ;;  %v8979_v62 = vpop.f32.mrf.mxu0  ;;  %v6619_v44 = vld [vmem:[#allocation3 + $0x228] sm:$0x3f]  ;;  %v9031_v8 = vpop.f32.mrf.mxu1 }
 0x15d   :  { %2192 = vst.msk [vmem:[#allocation2 + $0x410] sm:$0xff] %vm2061_vm2, %v1995_v19  ;;  %v6648_v17 = vld [vmem:[#allocation3 + $0x78] sm:$0x3f]  ;;  %v5715_v7 = vcombine.low %v5707_v55, %v5714_v60  ;;  %2097 = vst.msk [vmem:[#allocation2 + $0x118] sm:$0xff] %vm2061_vm2, %v1900_v30  ;;  %v1997_v4 = vmax.f32 %v1547_v13, 0.0  ;;  %v1067_v31 = vadd.f32 %v8760_v50, %v8888_v23  ;;  %v1557_v11 = vadd.f32 %v8760_v50, %v8901_v20 }
 0x15e   :  { %2195 = vst.msk [vmem:[#allocation2 + $0x428] sm:$0xff] %vm2061_vm2, %v1998_v9  ;;  %v6704_v27 = vmax.f32 %v6591_v53, %v6648_v17  ;;  %6759 = vst.msk [vmem:[%s10173_s3 + $0x30] sm:$0xff] %vm2061_vm2, %v6703_v47  ;;  %v6675_v42 = vld [vmem:[#allocation3 + $0x230] sm:$0xff]  ;;  %v1902_v29 = vmax.f32 %v1072_v41, 0.0  ;;  %v2000_v56 = vmax.f32 %v1562_v40, 0.0  ;;  %v1082_v23 = vadd.f32 %v8760_v50, %v8904_v58  ;;  %v9010_v46 = vpop.f32.mrf.mxu0 }
 0x15f   :  { %2096 = vst.msk [vmem:[#allocation2 + $0x110] sm:$0xff] %vm2061_vm2, %v1899_v10  ;;  %v6731_v26 = vmax.f32 %v6618_v24, %v6675_v42  ;;  %6544 = vst.msk [vmem:[#allocation3 + $0x240] sm:$0xff] %vm2061_vm2, %v5715_v7  ;;  %v2288_v20 = vld [vmem:[#allocation2 + $0xf0] ss:$2 sm:$0xff]  ;;  %v2386_v37 = vld [vmem:[#allocation2 + $0x400] ss:$2 sm:$0xff]  ;;  %v1572_v2 = vadd.f32 %v8760_v50, %v8916_v0  ;;  %v1077_v38 = vadd.f32 %v8760_v50, %v8920_v25 }
 0x160   :  { %2194 = vst.msk [vmem:[#allocation2 + $0x420] sm:$0xff] %vm2061_vm2, %v1997_v4  ;;  %v1567_v57 = vadd.f32 %v8760_v50, %v8927_v33  ;;  %v6676_v58 = vld [vmem:[#allocation3 + $0x238] sm:$0x3f]  ;;  %v2664_v3 = vmax.f32 %v2288_v20, %v2484_v32  ;;  %v2582_v36 = vld [vmem:[#allocation2 + $0x401] ss:$2 sm:$0xff]  ;;  %2099 = vst.msk [vmem:[#allocation2 + $0x128] sm:$0xff] %vm2061_vm2, %v1902_v29  ;;  %v1092_v25 = vadd.f32 %v8760_v50, %v8931_v34  ;;  %v9034_v9 = vpop.f32.mrf.mxu0 }
 0x161   :  { %6760 = vst.msk [vmem:[%s10173_s3 + $0x38] sm:$0x3f] %vm6472_vm3, %v6704_v27  ;;  %v1901_v45 = vmax.f32 %v1067_v31, 0.0  ;;  %v1999_v0 = vmax.f32 %v1557_v11, 0.0  ;;  %v6732_v33 = vmax.f32 %v6619_v44, %v6676_v58  ;;  %v2713_v18 = vmax.f32 %v2386_v37, %v2582_v36  ;;  %v9044_v27 = vpop.f32.mrf.mxu1 }
 0x162   :  { %2197 = vst.msk [vmem:[#allocation2 + $0x438] sm:$0xff] %vm2061_vm2, %v2000_v56  ;;  %6787 = vst.msk [vmem:[%s10173_s3 + $0x110] sm:$0xff] %vm2061_vm2, %v6731_v26  ;;  %v1904_v22 = vmax.f32 %v1082_v23, 0.0  ;;  %v2002_v43 = vmax.f32 %v1572_v2, 0.0  ;;  %v3100_v15 = vcombine.high %v2664_v3, %v2664_v3  ;;  %v3107_v48 = vrot.slane %v2664_v3, %v8416_v54  ;;  %v9047_v20 = vpop.f32.mrf.mxu0 }
 0x163   :  { %2098 = vst.msk [vmem:[#allocation2 + $0x120] sm:$0xff] %vm2061_vm2, %v1901_v45  ;;  %2196 = vst.msk [vmem:[#allocation2 + $0x430] sm:$0xff] %vm2061_vm2, %v1999_v0  ;;  %v1903_v34 = vmax.f32 %v1077_v38, 0.0  ;;  %v2001_v49 = vmax.f32 %v1567_v57, 0.0  ;;  %v3933_v5 = vcombine.high %v2713_v18, %v2713_v18  ;;  %v3940_v28 = vrot.slane %v2713_v18, %v8416_v54  ;;  %v2290_v63 = vld [vmem:[#allocation2 + $0x100] ss:$2 sm:$0xff] }
 0x164   :  { %6788 = vst.msk [vmem:[%s10173_s3 + $0x118] sm:$0x3f] %vm6472_vm3, %v6732_v33  ;;  %v2486_v6 = vld [vmem:[#allocation2 + $0x101] ss:$2 sm:$0xff]  ;;  %v2388_v21 = vld [vmem:[#allocation2 + $0x410] ss:$2 sm:$0xff]  ;;  %v1582_v61 = vadd.f32 %v8760_v50, %v8947_v52  ;;  %v9026_v39 = vadd.f32 %v8760_v50, %v8955_v35  ;;  %v3114_v59 = vrot.slane %v3100_v15, %v8416_v54  ;;  %v3115_v55 = vcombine.high %v3107_v48, %v3107_v48  ;;  %v9054_v15 = vpop.f32.mrf.mxu1 }
 0x165   :  { %2101 = vst.msk [vmem:[#allocation2 + $0x138] sm:$0xff] %vm2061_vm2, %v1904_v22  ;;  %2199 = vst.msk [vmem:[#allocation2 + $0x448] sm:$0xff] %vm2061_vm2, %v2002_v43  ;;  %v2665_v12 = vmax.f32 %v2290_v63, %v2486_v6  ;;  %v2584_v19 = vld [vmem:[#allocation2 + $0x411] ss:$2 sm:$0xff]  ;;  %v1906_v1 = vmax.f32 %v1092_v25, 0.0  ;;  %v3947_v14 = vrot.slane %v3933_v5, %v8416_v54  ;;  %v3948_v60 = vcombine.high %v3940_v28, %v3940_v28 }
 0x166   :  { %2100 = vst.msk [vmem:[#allocation2 + $0x130] sm:$0xff] %vm2061_vm2, %v1903_v34  ;;  %2198 = vst.msk [vmem:[#allocation2 + $0x440] sm:$0xff] %vm2061_vm2, %v2001_v49  ;;  %v2714_v52 = vmax.f32 %v2388_v21, %v2584_v19  ;;  %v2004_v30 = vmax.f32 %v1582_v61, 0.0  ;;  %v4792_v35 = vcombine.low %v3107_v48, %v3115_v55  ;;  %v4806_v13 = vrot.slane %v3114_v59, %v8416_v54  ;;  %v2292_v41 = vld [vmem:[#allocation2 + $0x110] ss:$2 sm:$0xff] }
 0x167   :  { %v3116_v47 = vcombine.high %v3114_v59, %v3114_v59  ;;  %v3117_v10 = vcombine.high %v2665_v12, %v2665_v12  ;;  %v2488_v40 = vld [vmem:[#allocation2 + $0x111] ss:$2 sm:$0xff]  ;;  %2103 = vst.msk [vmem:[#allocation2 + $0x148] sm:$0xff] %vm2061_vm2, %v1906_v1  ;;  %v5716_v53 = vcombine.low %v3940_v28, %v3948_v60  ;;  %v5730_v17 = vrot.slane %v3947_v14, %v8416_v54  ;;  %v2390_v26 = vld [vmem:[#allocation2 + $0x420] ss:$2 sm:$0xff]  ;;  %v9058_v28 = vpop.f32.mrf.mxu0 }
 0x168   :  { %v3124_v7 = vrot.slane %v2665_v12, %v8416_v54  ;;  %v3949_v4 = vcombine.high %v3947_v14, %v3947_v14  ;;  %2201 = vst.msk [vmem:[#allocation2 + $0x458] sm:$0xff] %vm2061_vm2, %v2004_v30  ;;  %v4799_v31 = vrot.slane %v4792_v35, %v8416_v54  ;;  %v3950_v24 = vcombine.high %v2714_v52, %v2714_v52  ;;  %v2586_v57 = vld [vmem:[#allocation2 + $0x421] ss:$2 sm:$0xff] }
 0x169   :  { %v3131_v11 = vrot.slane %v3117_v10, %v8416_v54  ;;  %v3957_v44 = vrot.slane %v2714_v52, %v8416_v54  ;;  %v5723_v42 = vrot.slane %v5716_v53, %v8416_v54  ;;  %v2666_v23 = vmax.f32 %v2292_v41, %v2488_v40  ;;  %v9070_v53 = vpop.f32.mrf.mxu0 }
 0x16a   :  { %v3132_v29 = vcombine.high %v3124_v7, %v3124_v7  ;;  %v4808_v56 = vcombine.low %v3116_v47, %v3124_v7  ;;  %v4807_v32 = vcombine.low %v4799_v31, %v4806_v13  ;;  %v3964_v37 = vrot.slane %v3950_v24, %v8416_v54  ;;  %v2294_v58 = vld [vmem:[#allocation2 + $0x120] ss:$2 sm:$0xff]  ;;  %v2490_v3 = vld [vmem:[#allocation2 + $0x121] ss:$2 sm:$0xff]  ;;  %v2392_v1 = vld [vmem:[#allocation2 + $0x430] ss:$2 sm:$0xff]  ;;  %v9065_v13 = vpop.f32.mrf.mxu1 }
 0x16b   :  { %v3965_v2 = vcombine.high %v3957_v44, %v3957_v44  ;;  %v5732_v38 = vcombine.low %v3949_v4, %v3957_v44  ;;  %v5731_v36 = vcombine.low %v5723_v42, %v5730_v17  ;;  %v3133_v25 = vcombine.high %v3131_v11, %v3131_v11  ;;  %v2588_v14 = vld [vmem:[#allocation2 + $0x431] ss:$2 sm:$0xff] }
 0x16c   :  { %v4809_v45 = vcombine.low %v3132_v29, %v3131_v11  ;;  %v4816_v0 = vrot.slane %v4808_v56, %v8416_v54  ;;  %6489 = vst.msk [vmem:[#allocation3 + $0x88] sm:$0x3f] %vm6472_vm3, %v4807_v32  ;;  %v3134_v22 = vcombine.high %v2666_v23, %v2666_v23  ;;  %v3141_v43 = vrot.slane %v2666_v23, %v8416_v54 }
 0x16d   :  { %v5733_v33 = vcombine.low %v3965_v2, %v3964_v37  ;;  %v5740_v18 = vrot.slane %v5732_v38, %v8416_v54  ;;  %6545 = vst.msk [vmem:[#allocation3 + $0x248] sm:$0x3f] %vm6472_vm3, %v5731_v36  ;;  %v2715_v34 = vmax.f32 %v2390_v26, %v2586_v57  ;;  %v3966_v49 = vcombine.high %v3964_v37, %v3964_v37  ;;  %v2296_v11 = vld [vmem:[#allocation2 + $0x130] ss:$2 sm:$0xff]  ;;  %v2492_v24 = vld [vmem:[#allocation2 + $0x131] ss:$2 sm:$0xff]  ;;  %v9079_v57 = vpop.f32.mrf.mxu1 }
 0x16e   :  { %v4823_v48 = vrot.slane %v4809_v45, %v8416_v54  ;;  %v2667_v5 = vmax.f32 %v2294_v58, %v2490_v3  ;;  %v3148_v6 = vrot.slane %v3134_v22, %v8416_v54  ;;  %v3149_v21 = vcombine.high %v3141_v43, %v3141_v43  ;;  %v2394_v23 = vld [vmem:[#allocation2 + $0x440] ss:$2 sm:$0xff]  ;;  %v2590_v26 = vld [vmem:[#allocation2 + $0x441] ss:$2 sm:$0xff] }
 0x16f   :  { %v5747_v63 = vrot.slane %v5733_v33, %v8416_v54  ;;  %v4825_v61 = vcombine.low %v3133_v25, %v3141_v43  ;;  %v3967_v55 = vcombine.high %v2715_v34, %v2715_v34  ;;  %v3974_v12 = vrot.slane %v2715_v34, %v8416_v54 }
 0x170   :  { %v4824_v59 = vcombine.low %v4816_v0, %v4823_v48  ;;  %v3151_v19 = vcombine.high %v2667_v5, %v2667_v5  ;;  %v3150_v52 = vcombine.high %v3148_v6, %v3148_v6  ;;  %v4839_v35 = vrot.slane %v3149_v21, %v8416_v54  ;;  %v9081_v0 = vpop.f32.mrf.mxu0 }
 0x171   :  { %v5748_v60 = vcombine.low %v5740_v18, %v5747_v63  ;;  %v4832_v30 = vrot.slane %v4825_v61, %v8416_v54  ;;  %v3981_v47 = vrot.slane %v3967_v55, %v8416_v54  ;;  %v3982_v10 = vcombine.high %v3974_v12, %v3974_v12  ;;  %v9089_v55 = vpop.f32.mrf.mxu1 }
 0x172   :  { %6490 = vst.msk [vmem:[#allocation3 + $0x90] sm:$0xff] %vm2061_vm2, %v4824_v59  ;;  %v5749_v41 = vcombine.low %v3966_v49, %v3974_v12  ;;  %v3158_v40 = vrot.slane %v2667_v5, %v8416_v54  ;;  %v4841_v7 = vcombine.low %v3148_v6, %v3150_v52  ;;  %v3165_v4 = vrot.slane %v3151_v19, %v8416_v54  ;;  %v6592_v5 = vld [vmem:[#allocation3 + $0x80] sm:$0xff] }
 0x173   :  { %6546 = vst.msk [vmem:[#allocation3 + $0x250] sm:$0xff] %vm2061_vm2, %v5748_v60  ;;  %v4840_v17 = vcombine.low %v4832_v30, %v4839_v35  ;;  %v2716_v31 = vmax.f32 %v2392_v1, %v2588_v14  ;;  %v3983_v44 = vcombine.high %v3981_v47, %v3981_v47  ;;  %v5763_v29 = vrot.slane %v3982_v10, %v8416_v54  ;;  %v6620_v12 = vld [vmem:[#allocation3 + $0x240] sm:$0xff]  ;;  %v9094_v30 = vpop.f32.mrf.mxu0 }
 0x174   :  { %v5756_v42 = vrot.slane %v5749_v41, %v8416_v54  ;;  %v3166_v56 = vcombine.high %v3158_v40, %v3158_v40  ;;  %v4849_v32 = vrot.slane %v4841_v7, %v8416_v54  ;;  %v3167_v37 = vcombine.high %v3165_v4, %v3165_v4 }
 0x175   :  { %6491 = vst.msk [vmem:[#allocation3 + $0x98] sm:$0x3f] %vm6472_vm3, %v4840_v17  ;;  %v3984_v2 = vcombine.high %v2716_v31, %v2716_v31  ;;  %v3991_v38 = vrot.slane %v2716_v31, %v8416_v54  ;;  %v5765_v3 = vcombine.low %v3981_v47, %v3983_v44  ;;  %v2668_v45 = vmax.f32 %v2296_v11, %v2492_v24 }
 0x176   :  { %v5764_v58 = vcombine.low %v5756_v42, %v5763_v29  ;;  %v4842_v36 = vcombine.low %v3158_v40, %v3166_v56  ;;  %v4858_v25 = vcombine.low %v3165_v4, %v3167_v37  ;;  %v2717_v22 = vmax.f32 %v2394_v23, %v2590_v26  ;;  %v6593_v40 = vld [vmem:[#allocation3 + $0x88] sm:$0x3f]  ;;  %v9116_v56 = vpop.f32.mrf.mxu1  ;;  %v9124_v37 = vpop.f32.mrf.mxu0 }
 0x177   :  { %v3998_v33 = vrot.slane %v3984_v2, %v8416_v54  ;;  %v3999_v18 = vcombine.high %v3991_v38, %v3991_v38  ;;  %v5773_v43 = vrot.slane %v5765_v3, %v8416_v54  ;;  %v3168_v34 = vcombine.high %v2668_v45, %v2668_v45  ;;  %v6621_v2 = vld [vmem:[#allocation3 + $0x248] sm:$0x3f] }
 0x178   :  { %6547 = vst.msk [vmem:[#allocation3 + $0x258] sm:$0x3f] %vm6472_vm3, %v5764_v58  ;;  %v4856_v48 = vrot.slane %v4842_v36, %v8416_v54  ;;  %v3175_v49 = vrot.slane %v2668_v45, %v8416_v54  ;;  %v4865_v61 = vrot.slane %v4858_v25, %v8416_v54  ;;  %v4001_v59 = vcombine.high %v2717_v22, %v2717_v22 }
 0x179   :  { %v6649_v63 = vld [vmem:[#allocation3 + $0x90] sm:$0xff]  ;;  %v4000_v6 = vcombine.high %v3998_v33, %v3998_v33  ;;  %v5766_v21 = vcombine.low %v3991_v38, %v3999_v18  ;;  %v9092_v60 = vrot.slane %v3168_v34, %v8416_v54  ;;  %v4008_v4 = vrot.slane %v2717_v22, %v8416_v54 }
 0x17a   :  { %v6705_v19 = vmax.f32 %v6592_v5, %v6649_v63  ;;  %v6677_v1 = vld [vmem:[#allocation3 + $0x250] sm:$0xff]  ;;  %v4857_v14 = vcombine.low %v4849_v32, %v4856_v48  ;;  %v3183_v52 = vcombine.high %v3175_v49, %v3175_v49  ;;  %v4872_v41 = vrot.slane %v3175_v49, %v8416_v54  ;;  %v7461_v49 = vpop.f32.mrf.mxu1  ;;  %v1136_v63 = vpop.f32.mrf.mxu0 }
 0x17b   :  { %v6733_v35 = vmax.f32 %v6620_v12, %v6677_v1  ;;  %v5780_v47 = vrot.slane %v5766_v21, %v8416_v54  ;;  %v5782_v10 = vcombine.low %v3998_v33, %v4000_v6  ;;  %v9108_v31 = vrot.slane %v4001_v59, %v8416_v54  ;;  %v9164_v6 = vld [vmem:[%s10172_s2] ss:$0 sm:$0xff] }
 0x17c   :  { %6761 = vst.msk [vmem:[%s10173_s3 + $0x40] sm:$0xff] %vm2061_vm2, %v6705_v19  ;;  %v6650_v17 = vld [vmem:[#allocation3 + $0x98] sm:$0x3f]  ;;  %6492 = vst.msk [vmem:[#allocation3 + $0xa0] sm:$0xff] %vm2061_vm2, %v4857_v14  ;;  %v9104_v7 = vcombine.low %v3183_v52, %v9092_v60  ;;  %v1905_v11 = vmax.f32 %v9026_v39, 0.0  ;;  %v4873_v42 = vcombine.low %v4865_v61, %v4872_v41  ;;  %v4016_v26 = vcombine.high %v4008_v4, %v4008_v4  ;;  %v1626_v52 = vpop.f32.mrf.mxu1 }
 0x17d   :  { %6789 = vst.msk [vmem:[%s10173_s3 + $0x120] sm:$0xff] %vm2061_vm2, %v6733_v35  ;;  %v6706_v24 = vmax.f32 %v6593_v40, %v6650_v17  ;;  %v5781_v44 = vcombine.low %v5773_v43, %v5780_v47  ;;  %v5789_v29 = vrot.slane %v5782_v10, %v8416_v54  ;;  %v5796_v32 = vrot.slane %v4008_v4, %v8416_v54  ;;  %v9184_v10 = vpop.f32.mrf.mxu0 }
 0x17e   :  { %v4882_v23 = vrot.slane %v9104_v7, %v8416_v54  ;;  %2102 = vst.msk [vmem:[#allocation2 + $0x140] sm:$0xff] %vm2061_vm2, %v1905_v11  ;;  %v3184_v39 = vcombine.high %v9092_v60, %v9092_v60  ;;  %v1577_v58 = vadd.f32 %v8760_v50, %v8971_v16  ;;  %v4017_v3 = vcombine.high %v9108_v31, %v9108_v31 }
 0x17f   :  { %6762 = vst.msk [vmem:[%s10173_s3 + $0x48] sm:$0x3f] %vm6472_vm3, %v6706_v24  ;;  %v6678_v38 = vld [vmem:[#allocation3 + $0x258] sm:$0x3f]  ;;  %6493 = vst.msk [vmem:[#allocation3 + $0xa8] sm:$0x3f] %vm6472_vm3, %v4873_v42  ;;  %v1102_v36 = vadd.f32 %v8760_v50, %v8979_v62  ;;  %v1592_v45 = vadd.f32 %v8760_v50, %v9004_v51  ;;  %v5797_v33 = vcombine.low %v5789_v29, %v5796_v32  ;;  %v9204_v29 = vpop.f32.mrf.mxu1 }
 0x180   :  { %6548 = vst.msk [vmem:[#allocation3 + $0x260] sm:$0xff] %vm2061_vm2, %v5781_v44  ;;  %v6734_v25 = vmax.f32 %v6621_v2, %v6678_v38  ;;  %v9141_v18 = vcombine.low %v4016_v26, %v9108_v31  ;;  %v1097_v22 = vadd.f32 %v8760_v50, %v9010_v46  ;;  %v2003_v43 = vmax.f32 %v1577_v58, 0.0  ;;  %v9210_v58 = vpop.f32.mrf.mxu0 }
 0x181   :  { %v1908_v48 = vmax.f32 %v1102_v36, 0.0  ;;  %v2006_v16 = vmax.f32 %v1592_v45, 0.0  ;;  %v1587_v34 = vadd.f32 %v8760_v50, %v9031_v8  ;;  %6549 = vst.msk [vmem:[#allocation3 + $0x268] sm:$0x3f] %vm6472_vm3, %v5797_v33  ;;  %v1112_v46 = vadd.f32 %v8760_v50, %v9034_v9 }
 0x182   :  { %6790 = vst.msk [vmem:[%s10173_s3 + $0x128] sm:$0x3f] %vm6472_vm3, %v6734_v25  ;;  %v5806_v62 = vrot.slane %v9141_v18, %v8416_v54  ;;  %v1907_v51 = vmax.f32 %v1097_v22, 0.0  ;;  %v1602_v5 = vadd.f32 %v8760_v50, %v9044_v27  ;;  %v1107_v21 = vadd.f32 %v9164_v6, %v9047_v20 }
 0x183   :  { %2200 = vst.msk [vmem:[#allocation2 + $0x450] sm:$0xff] %vm2061_vm2, %v2003_v43  ;;  %2105 = vst.msk [vmem:[#allocation2 + $0x158] sm:$0xff] %vm2061_vm2, %v1908_v48  ;;  %v2005_v8 = vmax.f32 %v1587_v34, 0.0  ;;  %v1597_v9 = vadd.f32 %v9164_v6, %v9054_v15  ;;  %v1122_v50 = vadd.f32 %v9164_v6, %v9058_v28  ;;  %v1910_v27 = vmax.f32 %v1112_v46, 0.0 }
 0x184   :  { %2203 = vst.msk [vmem:[#allocation2 + $0x468] sm:$0xff] %vm2061_vm2, %v2006_v16  ;;  %2104 = vst.msk [vmem:[#allocation2 + $0x150] sm:$0xff] %vm2061_vm2, %v1907_v51  ;;  %v2008_v61 = vmax.f32 %v1602_v5, 0.0  ;;  %v1612_v59 = vadd.f32 %v9164_v6, %v9065_v13  ;;  %v1117_v12 = vadd.f32 %v9164_v6, %v9070_v53  ;;  %v1909_v20 = vmax.f32 %v1107_v21, 0.0 }
 0x185   :  { %v2298_v19 = vld [vmem:[#allocation2 + $0x140] ss:$2 sm:$0xff]  ;;  %v2494_v1 = vld [vmem:[#allocation2 + $0x141] ss:$2 sm:$0xff]  ;;  %2202 = vst.msk [vmem:[#allocation2 + $0x460] sm:$0xff] %vm2061_vm2, %v2005_v8  ;;  %v2007_v14 = vmax.f32 %v1597_v9, 0.0  ;;  %v1607_v15 = vadd.f32 %v9164_v6, %v9079_v57  ;;  %v1132_v28 = vadd.f32 %v9164_v6, %v9081_v0  ;;  %v1622_v0 = vadd.f32 %v9164_v6, %v9089_v55  ;;  %v9222_v8 = vpop.f32.mrf.mxu1 }
 0x186   :  { %v2669_v35 = vmax.f32 %v2298_v19, %v2494_v1  ;;  %2107 = vst.msk [vmem:[#allocation2 + $0x168] sm:$0xff] %vm2061_vm2, %v1910_v27  ;;  %2205 = vst.msk [vmem:[#allocation2 + $0x478] sm:$0xff] %vm2061_vm2, %v2008_v61  ;;  %v1912_v13 = vmax.f32 %v1122_v50, 0.0  ;;  %v2010_v53 = vmax.f32 %v1612_v59, 0.0  ;;  %v1911_v47 = vmax.f32 %v1117_v12, 0.0  ;;  %v9229_v61 = vpop.f32.mrf.mxu0 }
 0x187   :  { %2106 = vst.msk [vmem:[#allocation2 + $0x160] sm:$0xff] %vm2061_vm2, %v1909_v20  ;;  %2204 = vst.msk [vmem:[#allocation2 + $0x470] sm:$0xff] %vm2061_vm2, %v2007_v14  ;;  %v2009_v41 = vmax.f32 %v1607_v15, 0.0  ;;  %v1914_v57 = vmax.f32 %v1132_v28, 0.0  ;;  %v1127_v40 = vadd.f32 %v9164_v6, %v9094_v30  ;;  %v1617_v11 = vadd.f32 %v9164_v6, %v9116_v56 }
 0x188   :  { %v3185_v17 = vcombine.high %v2669_v35, %v2669_v35  ;;  %v3192_v4 = vrot.slane %v2669_v35, %v8416_v54  ;;  %2109 = vst.msk [vmem:[#allocation2 + $0x178] sm:$0xff] %vm2061_vm2, %v1912_v13  ;;  %2207 = vst.msk [vmem:[#allocation2 + $0x488] sm:$0xff] %vm2061_vm2, %v2010_v53  ;;  %v1142_v24 = vadd.f32 %v9164_v6, %v9124_v37  ;;  %v2012_v55 = vmax.f32 %v1622_v0, 0.0 }
 0x189   :  { %2108 = vst.msk [vmem:[#allocation2 + $0x170] sm:$0xff] %vm2061_vm2, %v1911_v47  ;;  %2206 = vst.msk [vmem:[#allocation2 + $0x480] sm:$0xff] %vm2061_vm2, %v2009_v41  ;;  %v1913_v30 = vmax.f32 %v1127_v40, 0.0  ;;  %v1632_v44 = vadd.f32 %v9164_v6, %v7461_v49  ;;  %v1137_v42 = vadd.f32 %v9164_v6, %v1136_v63  ;;  %v2011_v38 = vmax.f32 %v1617_v11, 0.0 }
 0x18a   :  { %2111 = vst.msk [vmem:[#allocation2 + $0x188] sm:$0xff] %vm2061_vm2, %v1914_v57  ;;  %v3199_v26 = vrot.slane %v3185_v17, %v8416_v54  ;;  %v3200_v32 = vcombine.high %v3192_v4, %v3192_v4  ;;  %v4875_v56 = vcombine.low %v3184_v39, %v3192_v4  ;;  %v2396_v37 = vld [vmem:[#allocation2 + $0x450] ss:$2 sm:$0xff]  ;;  %v2592_v2 = vld [vmem:[#allocation2 + $0x451] ss:$2 sm:$0xff]  ;;  %2209 = vst.msk [vmem:[#allocation2 + $0x498] sm:$0xff] %vm2061_vm2, %v2012_v55  ;;  %v9245_v17 = vpop.f32.mrf.mxu0 }
 0x18b   :  { %v2718_v36 = vmax.f32 %v2396_v37, %v2592_v2  ;;  %v2300_v45 = vld [vmem:[#allocation2 + $0x150] ss:$2 sm:$0xff]  ;;  %v2496_v25 = vld [vmem:[#allocation2 + $0x151] ss:$2 sm:$0xff]  ;;  %2110 = vst.msk [vmem:[#allocation2 + $0x180] sm:$0xff] %vm2061_vm2, %v1913_v30  ;;  %v1916_v33 = vmax.f32 %v1142_v24, 0.0  ;;  %v9215_v43 = vadd.f32 %v9164_v6, %v1626_v52 }
 0x18c   :  { %v2014_v22 = vmax.f32 %v1632_v44, 0.0  ;;  %v3201_v48 = vcombine.high %v3199_v26, %v3199_v26  ;;  %v4889_v60 = vrot.slane %v4875_v56, %v8416_v54  ;;  %v4891_v39 = vcombine.low %v3200_v32, %v3199_v26  ;;  %v2398_v34 = vld [vmem:[#allocation2 + $0x460] ss:$2 sm:$0xff]  ;;  %v2594_v49 = vld [vmem:[#allocation2 + $0x461] ss:$2 sm:$0xff]  ;;  %2208 = vst.msk [vmem:[#allocation2 + $0x490] sm:$0xff] %vm2061_vm2, %v2011_v38 }
 0x18d   :  { %v2670_v16 = vmax.f32 %v2300_v45, %v2496_v25  ;;  %v4018_v51 = vcombine.high %v2718_v36, %v2718_v36  ;;  %v4025_v46 = vrot.slane %v2718_v36, %v8416_v54  ;;  %v2719_v5 = vmax.f32 %v2398_v34, %v2594_v49  ;;  %2113 = vst.msk [vmem:[#allocation2 + $0x198] sm:$0xff] %vm2061_vm2, %v1916_v33 }
 0x18e   :  { %2211 = vst.msk [vmem:[#allocation2 + $0x4a8] sm:$0xff] %vm2061_vm2, %v2014_v22  ;;  %v1915_v63 = vmax.f32 %v1137_v42, 0.0  ;;  %v4890_v21 = vcombine.low %v4882_v23, %v4889_v60  ;;  %v4898_v9 = vrot.slane %v4891_v39, %v8416_v54  ;;  %v4905_v50 = vrot.slane %v3201_v48, %v8416_v54  ;;  %v2302_v20 = vld [vmem:[#allocation2 + $0x160] ss:$2 sm:$0xff]  ;;  %v2498_v14 = vld [vmem:[#allocation2 + $0x161] ss:$2 sm:$0xff]  ;;  %v9260_v22 = vpop.f32.mrf.mxu0 }
 0x18f   :  { %v3202_v27 = vcombine.high %v2670_v16, %v2670_v16  ;;  %v4032_v59 = vrot.slane %v4018_v51, %v8416_v54  ;;  %v4033_v12 = vcombine.high %v4025_v46, %v4025_v46  ;;  %v5799_v19 = vcombine.low %v4017_v3, %v4025_v46  ;;  %v9241_v3 = vpop.f32.mrf.mxu1  ;;  %v2400_v0 = vld [vmem:[#allocation2 + $0x470] ss:$2 sm:$0xff]  ;;  %v2596_v40 = vld [vmem:[#allocation2 + $0x471] ss:$2 sm:$0xff]  ;;  %v6594_v48 = vld [vmem:[#allocation3 + $0xa0] sm:$0xff] }
 0x190   :  { %v3209_v1 = vrot.slane %v2670_v16, %v8416_v54  ;;  %2112 = vst.msk [vmem:[#allocation2 + $0x190] sm:$0xff] %vm2061_vm2, %v1915_v63  ;;  %v4906_v7 = vcombine.low %v4898_v9, %v4905_v50  ;;  %6494 = vst.msk [vmem:[#allocation3 + $0xb0] sm:$0xff] %vm2061_vm2, %v4890_v21  ;;  %v4035_v15 = vcombine.high %v2719_v5, %v2719_v5  ;;  %v2304_v32 = vld [vmem:[#allocation2 + $0x170] ss:$2 sm:$0xff]  ;;  %v2500_v56 = vld [vmem:[#allocation2 + $0x171] ss:$2 sm:$0xff] }
 0x191   :  { %v3216_v23 = vrot.slane %v3202_v27, %v8416_v54  ;;  %v4042_v28 = vrot.slane %v2719_v5, %v8416_v54  ;;  %v4034_v52 = vcombine.high %v4032_v59, %v4032_v59  ;;  %v5813_v35 = vrot.slane %v5799_v19, %v8416_v54  ;;  %v2402_v21 = vld [vmem:[#allocation2 + $0x480] ss:$2 sm:$0xff]  ;;  %v2598_v9 = vld [vmem:[#allocation2 + $0x481] ss:$2 sm:$0xff] }
 0x192   :  { %v5815_v13 = vcombine.low %v4033_v12, %v4032_v59  ;;  %v3217_v31 = vcombine.high %v3209_v1, %v3209_v1  ;;  %6495 = vst.msk [vmem:[#allocation3 + $0xb8] sm:$0x3f] %vm6472_vm3, %v4906_v7  ;;  %v4049_v47 = vrot.slane %v4035_v15, %v8416_v54  ;;  %v2671_v57 = vmax.f32 %v2302_v20, %v2498_v14  ;;  %v6595_v50 = vld [vmem:[#allocation3 + $0xa8] sm:$0x3f] }
 0x193   :  { %v3218_v53 = vcombine.high %v3216_v23, %v3216_v23  ;;  %v4050_v41 = vcombine.high %v4042_v28, %v4042_v28  ;;  %v5814_v4 = vcombine.low %v5806_v62, %v5813_v35  ;;  %v5829_v24 = vrot.slane %v4034_v52, %v8416_v54  ;;  %v9255_v62 = vpop.f32.mrf.mxu1 }
 0x194   :  { %v5822_v11 = vrot.slane %v5815_v13, %v8416_v54  ;;  %v4907_v55 = vcombine.low %v3209_v1, %v3217_v31  ;;  %v4051_v44 = vcombine.high %v4049_v47, %v4049_v47  ;;  %v3219_v26 = vcombine.high %v2671_v57, %v2671_v57 }
 0x195   :  { %v4908_v30 = vcombine.low %v3216_v23, %v3218_v53  ;;  %v5831_v42 = vcombine.low %v4042_v28, %v4050_v41  ;;  %6550 = vst.msk [vmem:[#allocation3 + $0x270] sm:$0xff] %vm2061_vm2, %v5814_v4  ;;  %v3226_v38 = vrot.slane %v2671_v57, %v8416_v54  ;;  %v2720_v18 = vmax.f32 %v2400_v0, %v2596_v40  ;;  %v9267_v20 = vpop.f32.mrf.mxu1  ;;  %v9275_v28 = vpop.f32.mrf.mxu0  ;;  %v2306_v53 = vld [vmem:[#allocation2 + $0x180] ss:$2 sm:$0xff] }
 0x196   :  { %v5830_v37 = vcombine.low %v5822_v11, %v5829_v24  ;;  %v4915_v2 = vrot.slane %v4907_v55, %v8416_v54  ;;  %v5832_v45 = vcombine.low %v4049_v47, %v4051_v44  ;;  %v3233_v33 = vrot.slane %v3219_v26, %v8416_v54  ;;  %v2502_v47 = vld [vmem:[#allocation2 + $0x181] ss:$2 sm:$0xff]  ;;  %v2404_v26 = vld [vmem:[#allocation2 + $0x490] ss:$2 sm:$0xff] }
 0x197   :  { %v4922_v36 = vrot.slane %v4908_v30, %v8416_v54  ;;  %v5839_v25 = vrot.slane %v5831_v42, %v8416_v54  ;;  %v6651_v60 = vld [vmem:[#allocation3 + $0xb0] sm:$0xff]  ;;  %v3234_v39 = vcombine.high %v3226_v38, %v3226_v38  ;;  %v4052_v16 = vcombine.high %v2720_v18, %v2720_v18  ;;  %v6622_v41 = vld [vmem:[#allocation3 + $0x260] sm:$0xff]  ;;  %v6623_v24 = vld [vmem:[#allocation3 + $0x268] sm:$0x3f] }
 0x198   :  { %6551 = vst.msk [vmem:[#allocation3 + $0x278] sm:$0x3f] %vm6472_vm3, %v5830_v37  ;;  %v4059_v34 = vrot.slane %v2720_v18, %v8416_v54  ;;  %v2672_v49 = vmax.f32 %v2304_v32, %v2500_v56  ;;  %v6707_v51 = vmax.f32 %v6594_v48, %v6651_v60  ;;  %v5846_v5 = vrot.slane %v5832_v45, %v8416_v54  ;;  %v2600_v32 = vld [vmem:[#allocation2 + $0x491] ss:$2 sm:$0xff]  ;;  %v9286_v56 = vpop.f32.mrf.mxu1  ;;  %v2308_v45 = vld [vmem:[#allocation2 + $0x190] ss:$2 sm:$0xff] }
 0x199   :  { %v4923_v46 = vcombine.low %v4915_v2, %v4922_v36  ;;  %v4938_v63 = vrot.slane %v3233_v33, %v8416_v54  ;;  %v6652_v27 = vld [vmem:[#allocation3 + $0xb8] sm:$0x3f]  ;;  %v4924_v59 = vcombine.low %v3226_v38, %v3234_v39  ;;  %v4066_v12 = vrot.slane %v4052_v16, %v8416_v54 }
 0x19a   :  { %v4067_v19 = vcombine.high %v4059_v34, %v4059_v34  ;;  %v3235_v1 = vcombine.high %v3233_v33, %v3233_v33  ;;  %v6708_v14 = vmax.f32 %v6595_v50, %v6652_v27  ;;  %6763 = vst.msk [vmem:[%s10173_s3 + $0x50] sm:$0xff] %vm2061_vm2, %v6707_v51  ;;  %v5847_v7 = vcombine.low %v5839_v25, %v5846_v5  ;;  %v2504_v25 = vld [vmem:[#allocation2 + $0x191] ss:$2 sm:$0xff]  ;;  %v9290_v33 = vpop.f32.mrf.mxu0  ;;  %v9305_v50 = vpop.f32.mrf.mxu1 }
 0x19b   :  { %6496 = vst.msk [vmem:[#allocation3 + $0xc0] sm:$0xff] %vm2061_vm2, %v4923_v46  ;;  %v3236_v23 = vcombine.high %v2672_v49, %v2672_v49  ;;  %v3243_v15 = vrot.slane %v2672_v49, %v8416_v54  ;;  %v4931_v52 = vrot.slane %v4924_v59, %v8416_v54  ;;  %v5862_v13 = vrot.slane %v4066_v12, %v8416_v54 }
 0x19c   :  { %v5848_v35 = vcombine.low %v4059_v34, %v4067_v19  ;;  %v2721_v31 = vmax.f32 %v2402_v21, %v2598_v9  ;;  %6764 = vst.msk [vmem:[%s10173_s3 + $0x58] sm:$0x3f] %vm6472_vm3, %v6708_v14  ;;  %v6679_v57 = vld [vmem:[#allocation3 + $0x270] sm:$0xff]  ;;  %v4068_v11 = vcombine.high %v4066_v12, %v4066_v12  ;;  %v2673_v36 = vmax.f32 %v2306_v53, %v2502_v47 }
 0x19d   :  { %6552 = vst.msk [vmem:[#allocation3 + $0x280] sm:$0xff] %vm2061_vm2, %v5847_v7  ;;  %v3250_v0 = vrot.slane %v3236_v23, %v8416_v54  ;;  %v3251_v40 = vcombine.high %v3243_v15, %v3243_v15  ;;  %v4940_v4 = vcombine.low %v3235_v1, %v3243_v15  ;;  %v6735_v55 = vmax.f32 %v6622_v41, %v6679_v57  ;;  %v9309_v1 = vpop.f32.mrf.mxu0 }
 0x19e   :  { %v4939_v30 = vcombine.low %v4931_v52, %v4938_v63  ;;  %v5855_v44 = vrot.slane %v5848_v35, %v8416_v54  ;;  %v4069_v42 = vcombine.high %v2721_v31, %v2721_v31  ;;  %v4076_v18 = vrot.slane %v2721_v31, %v8416_v54 }
 0x19f   :  { %v6680_v37 = vld [vmem:[#allocation3 + $0x278] sm:$0x3f]  ;;  %v4941_v2 = vcombine.low %v3251_v40, %v3250_v0  ;;  %v4948_v38 = vrot.slane %v4940_v4, %v8416_v54  ;;  %6791 = vst.msk [vmem:[%s10173_s3 + $0x130] sm:$0xff] %vm2061_vm2, %v6735_v55  ;;  %v3252_v16 = vcombine.high %v3250_v0, %v3250_v0  ;;  %v3253_v46 = vcombine.high %v2673_v36, %v2673_v36  ;;  %v9318_v0 = vpop.f32.mrf.mxu1  ;;  %v9321_v55 = vpop.f32.mrf.mxu0 }
 0x1a0   :  { %v6736_v48 = vmax.f32 %v6623_v24, %v6680_v37  ;;  %6497 = vst.msk [vmem:[#allocation3 + $0xc8] sm:$0x3f] %vm6472_vm3, %v4939_v30  ;;  %v5863_v60 = vcombine.low %v5855_v44, %v5862_v13  ;;  %v4083_v39 = vrot.slane %v4069_v42, %v8416_v54  ;;  %v4084_v49 = vcombine.high %v4076_v18, %v4076_v18 }
 0x1a1   :  { %v4955_v34 = vrot.slane %v4941_v2, %v8416_v54  ;;  %v5864_v51 = vcombine.low %v4068_v11, %v4076_v18  ;;  %v3260_v5 = vrot.slane %v2673_v36, %v8416_v54  ;;  %v2722_v63 = vmax.f32 %v2404_v26, %v2600_v32 }
 0x1a2   :  { %6792 = vst.msk [vmem:[%s10173_s3 + $0x138] sm:$0x3f] %vm6472_vm3, %v6736_v48  ;;  %6553 = vst.msk [vmem:[#allocation3 + $0x288] sm:$0x3f] %vm6472_vm3, %v5863_v60  ;;  %v4085_v21 = vcombine.high %v4083_v39, %v4083_v39  ;;  %v2674_v9 = vmax.f32 %v2308_v45, %v2504_v25  ;;  %v5865_v59 = vcombine.low %v4084_v49, %v4083_v39  ;;  %v9335_v48 = vpop.f32.mrf.mxu1  ;;  %v6596_v49 = vld [vmem:[#allocation3 + $0xc0] sm:$0xff] }
 0x1a3   :  { %v4956_v27 = vcombine.low %v4948_v38, %v4955_v34  ;;  %v5872_v12 = vrot.slane %v5864_v51, %v8416_v54  ;;  %v3267_v19 = vrot.slane %v3253_v46, %v8416_v54  ;;  %v3268_v14 = vcombine.high %v3260_v5, %v3260_v5  ;;  %v9344_v34 = vpop.f32.mrf.mxu0 }
 0x1a4   :  { %v4957_v7 = vcombine.low %v3252_v16, %v3260_v5  ;;  %v4086_v23 = vcombine.high %v2722_v63, %v2722_v63  ;;  %v4093_v15 = vrot.slane %v2722_v63, %v8416_v54  ;;  %v5879_v52 = vrot.slane %v5865_v59, %v8416_v54 }
 0x1a5   :  { %6498 = vst.msk [vmem:[#allocation3 + $0xd0] sm:$0xff] %vm2061_vm2, %v4956_v27  ;;  %v3269_v35 = vcombine.high %v3267_v19, %v3267_v19  ;;  %v3270_v13 = vcombine.high %v2674_v9, %v2674_v9  ;;  %v3277_v31 = vrot.slane %v2674_v9, %v8416_v54  ;;  %v4971_v47 = vrot.slane %v3268_v14, %v8416_v54  ;;  %v6624_v14 = vld [vmem:[#allocation3 + $0x280] sm:$0xff] }
 0x1a6   :  { %v4964_v53 = vrot.slane %v4957_v7, %v8416_v54  ;;  %v4100_v41 = vrot.slane %v4086_v23, %v8416_v54  ;;  %v4101_v57 = vcombine.high %v4093_v15, %v4093_v15  ;;  %v5880_v40 = vcombine.low %v5872_v12, %v5879_v52  ;;  %v7332_v23 = vpop.f32.mrf.mxu0 }
 0x1a7   :  { %v4973_v4 = vcombine.low %v3267_v19, %v3269_v35  ;;  %v5881_v11 = vcombine.low %v4085_v21, %v4093_v15  ;;  %v3284_v24 = vrot.slane %v3270_v13, %v8416_v54  ;;  %v3285_v26 = vcombine.high %v3277_v31, %v3277_v31  ;;  %v1676_v19 = vpop.f32.mrf.mxu1  ;;  %v6597_v15 = vld [vmem:[#allocation3 + $0xc8] sm:$0x3f] }
 0x1a8   :  { %v4972_v30 = vcombine.low %v4964_v53, %v4971_v47  ;;  %v4102_v44 = vcombine.high %v4100_v41, %v4100_v41  ;;  %v5895_v42 = vrot.slane %v4101_v57, %v8416_v54  ;;  %6554 = vst.msk [vmem:[#allocation3 + $0x290] sm:$0xff] %vm2061_vm2, %v5880_v40  ;;  %v2013_v38 = vmax.f32 %v9215_v43, 0.0 }
 0x1a9   :  { %v4981_v32 = vrot.slane %v4973_v4, %v8416_v54  ;;  %v5888_v37 = vrot.slane %v5881_v11, %v8416_v54  ;;  %v3286_v2 = vcombine.high %v3284_v24, %v3284_v24  ;;  %v4974_v36 = vcombine.low %v3277_v31, %v3285_v26  ;;  %v1196_v26 = vpop.f32.mrf.mxu0 }
 0x1aa   :  { %6499 = vst.msk [vmem:[#allocation3 + $0xd8] sm:$0x3f] %vm6472_vm3, %v4972_v30  ;;  %v9329_v18 = vcombine.low %v4100_v41, %v4102_v44  ;;  %v1152_v45 = vadd.f32 %v9164_v6, %v9184_v10  ;;  %v1642_v25 = vadd.f32 %v9164_v6, %v9204_v29  ;;  %v1147_v43 = vadd.f32 %v9164_v6, %v9210_v58 }
 0x1ab   :  { %v5896_v60 = vcombine.low %v5888_v37, %v5895_v42  ;;  %v9337_v39 = vcombine.low %v3284_v24, %v3286_v2  ;;  %2210 = vst.msk [vmem:[#allocation2 + $0x4a0] sm:$0xff] %vm2061_vm2, %v2013_v38  ;;  %v1637_v16 = vadd.f32 %v9164_v6, %v9222_v8  ;;  %v4988_v51 = vrot.slane %v4974_v36, %v8416_v54 }
 0x1ac   :  { %v6653_v10 = vld [vmem:[#allocation3 + $0xd0] sm:$0xff]  ;;  %v5905_v29 = vrot.slane %v9329_v18, %v8416_v54  ;;  %v1918_v46 = vmax.f32 %v1152_v45, 0.0  ;;  %v2016_v5 = vmax.f32 %v1642_v25, 0.0  ;;  %v1917_v21 = vmax.f32 %v1147_v43, 0.0 }
 0x1ad   :  { %v6709_v63 = vmax.f32 %v6596_v49, %v6653_v10  ;;  %6555 = vst.msk [vmem:[#allocation3 + $0x298] sm:$0x3f] %vm6472_vm3, %v5896_v60  ;;  %v4997_v58 = vrot.slane %v9337_v39, %v8416_v54  ;;  %v2015_v9 = vmax.f32 %v1637_v16, 0.0  ;;  %v4989_v8 = vcombine.low %v4981_v32, %v4988_v51  ;;  %v6625_v32 = vld [vmem:[#allocation3 + $0x288] sm:$0x3f] }
 0x1ae   :  { %2115 = vst.msk [vmem:[#allocation2 + $0x1a8] sm:$0xff] %vm2061_vm2, %v1918_v46  ;;  %2213 = vst.msk [vmem:[#allocation2 + $0x4b8] sm:$0xff] %vm2061_vm2, %v2016_v5  ;;  %v1162_v27 = vadd.f32 %v9164_v6, %v9229_v61  ;;  %v1652_v59 = vadd.f32 %v9164_v6, %v9241_v3  ;;  %v1157_v12 = vadd.f32 %v9164_v6, %v9245_v17 }
 0x1af   :  { %6765 = vst.msk [vmem:[%s10173_s3 + $0x60] sm:$0xff] %vm2061_vm2, %v6709_v63  ;;  %2114 = vst.msk [vmem:[#allocation2 + $0x1a0] sm:$0xff] %vm2061_vm2, %v1917_v21  ;;  %v1647_v61 = vadd.f32 %v9164_v6, %v9255_v62  ;;  %v1172_v3 = vadd.f32 %v9164_v6, %v9260_v22  ;;  %v1662_v17 = vadd.f32 %v9164_v6, %v9267_v20  ;;  %v6681_v52 = vld [vmem:[#allocation3 + $0x290] sm:$0xff] }
 0x1b0   :  { %2212 = vst.msk [vmem:[#allocation2 + $0x4b0] sm:$0xff] %vm2061_vm2, %v2015_v9  ;;  %v1167_v7 = vadd.f32 %v9164_v6, %v9275_v28  ;;  %6500 = vst.msk [vmem:[#allocation3 + $0xe0] sm:$0xff] %vm2061_vm2, %v4989_v8  ;;  %v1920_v35 = vmax.f32 %v1162_v27, 0.0  ;;  %v2018_v13 = vmax.f32 %v1652_v59, 0.0  ;;  %v1919_v31 = vmax.f32 %v1157_v12, 0.0  ;;  %v9429_v9 = vpop.f32.mrf.mxu0 }
 0x1b1   :  { %v1657_v62 = vadd.f32 %v9164_v6, %v9286_v56  ;;  %v6737_v53 = vmax.f32 %v6624_v14, %v6681_v52  ;;  %v6654_v47 = vld [vmem:[#allocation3 + $0xd8] sm:$0x3f]  ;;  %v2017_v22 = vmax.f32 %v1647_v61, 0.0  ;;  %v1922_v41 = vmax.f32 %v1172_v3, 0.0  ;;  %v7479_v56 = vpop.f32.mrf.mxu1 }
 0x1b2   :  { %v2020_v57 = vmax.f32 %v1662_v17, 0.0  ;;  %v6710_v20 = vmax.f32 %v6597_v15, %v6654_v47  ;;  %v2406_v40 = vld [vmem:[#allocation2 + $0x4a0] ss:$2 sm:$0xff]  ;;  %v2602_v4 = vld [vmem:[#allocation2 + $0x4a1] ss:$2 sm:$0xff]  ;;  %2117 = vst.msk [vmem:[#allocation2 + $0x1b8] sm:$0xff] %vm2061_vm2, %v1920_v35  ;;  %v1182_v24 = vadd.f32 %v9164_v6, %v9290_v33  ;;  %v1672_v44 = vadd.f32 %v9164_v6, %v9305_v50 }
 0x1b3   :  { %2215 = vst.msk [vmem:[#allocation2 + $0x4c8] sm:$0xff] %vm2061_vm2, %v2018_v13  ;;  %2116 = vst.msk [vmem:[#allocation2 + $0x1b0] sm:$0xff] %vm2061_vm2, %v1919_v31  ;;  %v1921_v28 = vmax.f32 %v1167_v7, 0.0  ;;  %v2019_v11 = vmax.f32 %v1657_v62, 0.0  ;;  %v2723_v30 = vmax.f32 %v2406_v40, %v2602_v4  ;;  %v1177_v42 = vadd.f32 %v9164_v6, %v9309_v1  ;;  %v9421_v10 = vpop.f32.mrf.mxu1 }
 0x1b4   :  { %6793 = vst.msk [vmem:[%s10173_s3 + $0x140] sm:$0xff] %vm2061_vm2, %v6737_v53  ;;  %2214 = vst.msk [vmem:[#allocation2 + $0x4c0] sm:$0xff] %vm2061_vm2, %v2017_v22  ;;  %v1667_v33 = vadd.f32 %v9164_v6, %v9318_v0  ;;  %v6682_v37 = vld [vmem:[#allocation3 + $0x298] sm:$0x3f]  ;;  %v1924_v2 = vmax.f32 %v1182_v24, 0.0  ;;  %v1192_v50 = vadd.f32 %v9164_v6, %v9321_v55  ;;  %v1682_v1 = vadd.f32 %v9164_v6, %v9335_v48  ;;  %v9441_v22 = vpop.f32.mrf.mxu0 }
 0x1b5   :  { %2119 = vst.msk [vmem:[#allocation2 + $0x1c8] sm:$0xff] %vm2061_vm2, %v1922_v41  ;;  %2217 = vst.msk [vmem:[#allocation2 + $0x4d8] sm:$0xff] %vm2061_vm2, %v2020_v57  ;;  %v1187_v0 = vadd.f32 %v9164_v6, %v9344_v34  ;;  %v6738_v38 = vmax.f32 %v6625_v32, %v6682_v37  ;;  %v4103_v36 = vcombine.high %v2723_v30, %v2723_v30  ;;  %v2022_v25 = vmax.f32 %v1672_v44, 0.0  ;;  %v9437_v13 = vpop.f32.mrf.mxu1 }
 0x1b6   :  { %6766 = vst.msk [vmem:[%s10173_s3 + $0x68] sm:$0x3f] %vm6472_vm3, %v6710_v20  ;;  %v4110_v45 = vrot.slane %v2723_v30, %v8416_v54  ;;  %v2310_v60 = vld [vmem:[#allocation2 + $0x1a0] ss:$2 sm:$0xff]  ;;  %v2506_v43 = vld [vmem:[#allocation2 + $0x1a1] ss:$2 sm:$0xff]  ;;  %v9410_v49 = vadd.f32 %v9164_v6, %v1676_v19  ;;  %v9413_v55 = vadd.f32 %v9164_v6, %v7332_v23  ;;  %v9416_v48 = vadd.f32 %v9164_v6, %v7479_v56 }
 0x1b7   :  { %2118 = vst.msk [vmem:[#allocation2 + $0x1c0] sm:$0xff] %vm2061_vm2, %v1921_v28  ;;  %2216 = vst.msk [vmem:[#allocation2 + $0x4d0] sm:$0xff] %vm2061_vm2, %v2019_v11  ;;  %v2408_v16 = vld [vmem:[#allocation2 + $0x4b0] ss:$2 sm:$0xff]  ;;  %v9419_v34 = vadd.f32 %v9164_v6, %v1196_v26  ;;  %v4117_v51 = vrot.slane %v4103_v36, %v8416_v54  ;;  %v2675_v5 = vmax.f32 %v2310_v60, %v2506_v43  ;;  %v2604_v63 = vld [vmem:[#allocation2 + $0x4b1] ss:$2 sm:$0xff]  ;;  %v9459_v36 = vpop.f32.mrf.mxu0 }
 0x1b8   :  { %2121 = vst.msk [vmem:[#allocation2 + $0x1d8] sm:$0xff] %vm2061_vm2, %v1924_v2  ;;  %v4118_v46 = vcombine.high %v4110_v45, %v4110_v45  ;;  %2219 = vst.msk [vmem:[#allocation2 + $0x4e8] sm:$0xff] %vm2061_vm2, %v2022_v25  ;;  %v1923_v21 = vmax.f32 %v1177_v42, 0.0  ;;  %v2724_v8 = vmax.f32 %v2408_v16, %v2604_v63  ;;  %v2021_v27 = vmax.f32 %v1667_v33, 0.0 }
 0x1b9   :  { %6794 = vst.msk [vmem:[%s10173_s3 + $0x148] sm:$0x3f] %vm6472_vm3, %v6738_v38  ;;  %v1926_v59 = vmax.f32 %v1192_v50, 0.0  ;;  %v2024_v12 = vmax.f32 %v1682_v1, 0.0  ;;  %v4119_v19 = vcombine.high %v4117_v51, %v4117_v51  ;;  %v3287_v61 = vcombine.high %v2675_v5, %v2675_v5  ;;  %v9455_v1 = vpop.f32.mrf.mxu1 }
 0x1ba   :  { %v5898_v14 = vcombine.low %v4110_v45, %v4118_v46  ;;  %v3294_v3 = vrot.slane %v2675_v5, %v8416_v54  ;;  %v2312_v17 = vld [vmem:[#allocation2 + $0x1b0] ss:$2 sm:$0xff]  ;;  %v2508_v7 = vld [vmem:[#allocation2 + $0x1b1] ss:$2 sm:$0xff]  ;;  %2120 = vst.msk [vmem:[#allocation2 + $0x1d0] sm:$0xff] %vm2061_vm2, %v1923_v21  ;;  %v4120_v23 = vcombine.high %v2724_v8, %v2724_v8  ;;  %v4127_v15 = vrot.slane %v2724_v8, %v8416_v54 }
 0x1bb   :  { %v2676_v52 = vmax.f32 %v2312_v17, %v2508_v7  ;;  %2218 = vst.msk [vmem:[#allocation2 + $0x4e0] sm:$0xff] %vm2061_vm2, %v2021_v27  ;;  %2123 = vst.msk [vmem:[#allocation2 + $0x1e8] sm:$0xff] %vm2061_vm2, %v1926_v59  ;;  %v1925_v35 = vmax.f32 %v1187_v0, 0.0  ;;  %v5914_v62 = vcombine.low %v4117_v51, %v4119_v19  ;;  %v3301_v53 = vrot.slane %v3287_v61, %v8416_v54  ;;  %v2410_v4 = vld [vmem:[#allocation2 + $0x4c0] ss:$2 sm:$0xff]  ;;  %v9467_v59 = vpop.f32.mrf.mxu1 }
 0x1bc   :  { %2221 = vst.msk [vmem:[#allocation2 + $0x4f8] sm:$0xff] %vm2061_vm2, %v2024_v12  ;;  %v5912_v31 = vrot.slane %v5898_v14, %v8416_v54  ;;  %v3302_v47 = vcombine.high %v3294_v3, %v3294_v3  ;;  %v5004_v41 = vrot.slane %v3294_v3, %v8416_v54  ;;  %v4134_v57 = vrot.slane %v4120_v23, %v8416_v54  ;;  %v2606_v28 = vld [vmem:[#allocation2 + $0x4c1] ss:$2 sm:$0xff]  ;;  %v9470_v3 = vpop.f32.mrf.mxu0 }
 0x1bd   :  { %v4135_v20 = vcombine.high %v4127_v15, %v4127_v15  ;;  %v5928_v40 = vrot.slane %v4127_v15, %v8416_v54  ;;  %2122 = vst.msk [vmem:[#allocation2 + $0x1e0] sm:$0xff] %vm2061_vm2, %v1925_v35  ;;  %v5921_v56 = vrot.slane %v5914_v62, %v8416_v54  ;;  %v3303_v30 = vcombine.high %v3301_v53, %v3301_v53 }
 0x1be   :  { %v5913_v11 = vcombine.low %v5905_v29, %v5912_v31  ;;  %v5006_v24 = vcombine.low %v3302_v47, %v3301_v53  ;;  %v2314_v44 = vld [vmem:[#allocation2 + $0x1c0] ss:$2 sm:$0xff]  ;;  %v5005_v42 = vcombine.low %v4997_v58, %v5004_v41  ;;  %v3304_v26 = vcombine.high %v2676_v52, %v2676_v52  ;;  %v2510_v37 = vld [vmem:[#allocation2 + $0x1c1] ss:$2 sm:$0xff]  ;;  %v2412_v2 = vld [vmem:[#allocation2 + $0x4d0] ss:$2 sm:$0xff] }
 0x1bf   :  { %v5930_v33 = vcombine.low %v4135_v20, %v4134_v57  ;;  %v3311_v32 = vrot.slane %v2676_v52, %v8416_v54  ;;  %v2608_v50 = vld [vmem:[#allocation2 + $0x4d1] ss:$2 sm:$0xff]  ;;  %v5929_v29 = vcombine.low %v5921_v56, %v5928_v40  ;;  %v2725_v0 = vmax.f32 %v2410_v4, %v2606_v28  ;;  %v9479_v4 = vpop.f32.mrf.mxu1 }
 0x1c0   :  { %6556 = vst.msk [vmem:[#allocation3 + $0x2a0] sm:$0xff] %vm2061_vm2, %v5913_v11  ;;  %v5014_v18 = vrot.slane %v5006_v24, %v8416_v54  ;;  %v4136_v38 = vcombine.high %v4134_v57, %v4134_v57  ;;  %v3318_v58 = vrot.slane %v3304_v26, %v8416_v54  ;;  %v2677_v46 = vmax.f32 %v2314_v44, %v2510_v37 }
 0x1c1   :  { %6501 = vst.msk [vmem:[#allocation3 + $0xe8] sm:$0x3f] %vm6472_vm3, %v5005_v42  ;;  %v5938_v39 = vrot.slane %v5930_v33, %v8416_v54  ;;  %v3319_v45 = vcombine.high %v3311_v32, %v3311_v32  ;;  %v5007_v25 = vcombine.low %v3303_v30, %v3311_v32  ;;  %v2316_v60 = vld [vmem:[#allocation2 + $0x1d0] ss:$2 sm:$0xff]  ;;  %v2512_v43 = vld [vmem:[#allocation2 + $0x1d1] ss:$2 sm:$0xff]  ;;  %v4137_v16 = vcombine.high %v2725_v0, %v2725_v0  ;;  %v9483_v30 = vpop.f32.mrf.mxu0 }
 0x1c2   :  { %6557 = vst.msk [vmem:[#allocation3 + $0x2a8] sm:$0x3f] %vm6472_vm3, %v5929_v29  ;;  %v4144_v51 = vrot.slane %v2725_v0, %v8416_v54  ;;  %v2726_v5 = vmax.f32 %v2412_v2, %v2608_v50  ;;  %v3320_v63 = vcombine.high %v3318_v58, %v3318_v58  ;;  %v2678_v27 = vmax.f32 %v2316_v60, %v2512_v43  ;;  %v2414_v20 = vld [vmem:[#allocation2 + $0x4e0] ss:$2 sm:$0xff]  ;;  %v2610_v40 = vld [vmem:[#allocation2 + $0x4e1] ss:$2 sm:$0xff] }
 0x1c3   :  { %v5021_v21 = vrot.slane %v5007_v25, %v8416_v54  ;;  %v5023_v8 = vcombine.low %v3319_v45, %v3318_v58  ;;  %v4151_v12 = vrot.slane %v4137_v16, %v8416_v54  ;;  %v3321_v61 = vcombine.high %v2677_v46, %v2677_v46  ;;  %v9491_v45 = vpop.f32.mrf.mxu1 }
 0x1c4   :  { %v4152_v19 = vcombine.high %v4144_v51, %v4144_v51  ;;  %v5931_v14 = vcombine.low %v4136_v38, %v4144_v51  ;;  %v5037_v23 = vrot.slane %v3320_v63, %v8416_v54  ;;  %v3328_v15 = vrot.slane %v2677_v46, %v8416_v54  ;;  %v2514_v29 = vld [vmem:[#allocation2 + $0x1e1] ss:$2 sm:$0xff]  ;;  %v9496_v51 = vpop.f32.mrf.mxu0 }
 0x1c5   :  { %v5022_v17 = vcombine.low %v5014_v18, %v5021_v21  ;;  %v5030_v7 = vrot.slane %v5023_v8, %v8416_v54  ;;  %v4153_v52 = vcombine.high %v4151_v12, %v4151_v12  ;;  %v3335_v62 = vrot.slane %v3321_v61, %v8416_v54  ;;  %v2318_v18 = vld [vmem:[#allocation2 + $0x1e0] ss:$2 sm:$0xff] }
 0x1c6   :  { %v5945_v35 = vrot.slane %v5931_v14, %v8416_v54  ;;  %v5947_v31 = vcombine.low %v4152_v19, %v4151_v12  ;;  %v3336_v47 = vcombine.high %v3328_v15, %v3328_v15  ;;  %v4154_v41 = vcombine.high %v2726_v5, %v2726_v5  ;;  %v6598_v8 = vld [vmem:[#allocation3 + $0xe0] sm:$0xff] }
 0x1c7   :  { %v5038_v53 = vcombine.low %v5030_v7, %v5037_v23  ;;  %6502 = vst.msk [vmem:[#allocation3 + $0xf0] sm:$0xff] %vm2061_vm2, %v5022_v17  ;;  %v4161_v57 = vrot.slane %v2726_v5, %v8416_v54  ;;  %v5961_v24 = vrot.slane %v4153_v52, %v8416_v54  ;;  %v3337_v56 = vcombine.high %v3335_v62, %v3335_v62  ;;  %v9504_v52 = vpop.f32.mrf.mxu1 }
 0x1c8   :  { %v5946_v28 = vcombine.low %v5938_v39, %v5945_v35  ;;  %v5954_v11 = vrot.slane %v5947_v31, %v8416_v54  ;;  %v5039_v44 = vcombine.low %v3328_v15, %v3336_v47  ;;  %v4168_v42 = vrot.slane %v4154_v41, %v8416_v54  ;;  %v6599_v35 = vld [vmem:[#allocation3 + $0xe8] sm:$0x3f] }
 0x1c9   :  { %6503 = vst.msk [vmem:[#allocation3 + $0xf8] sm:$0x3f] %vm6472_vm3, %v5038_v53  ;;  %v4169_v33 = vcombine.high %v4161_v57, %v4161_v57  ;;  %v3338_v26 = vcombine.high %v2678_v27, %v2678_v27  ;;  %v5040_v37 = vcombine.low %v3335_v62, %v3337_v56  ;;  %v3345_v2 = vrot.slane %v2678_v27, %v8416_v54 }
 0x1ca   :  { %v5962_v32 = vcombine.low %v5954_v11, %v5961_v24  ;;  %6558 = vst.msk [vmem:[#allocation3 + $0x2b0] sm:$0xff] %vm2061_vm2, %v5946_v28  ;;  %v2727_v50 = vmax.f32 %v2414_v20, %v2610_v40  ;;  %v5047_v0 = vrot.slane %v5039_v44, %v8416_v54  ;;  %v4170_v38 = vcombine.high %v4168_v42, %v4168_v42  ;;  %v6626_v20 = vld [vmem:[#allocation3 + $0x2a0] sm:$0xff] }
 0x1cb   :  { %v5963_v39 = vcombine.low %v4161_v57, %v4169_v33  ;;  %v3352_v58 = vrot.slane %v3338_v26, %v8416_v54  ;;  %v5054_v25 = vrot.slane %v5040_v37, %v8416_v54  ;;  %v3353_v60 = vcombine.high %v3345_v2, %v3345_v2  ;;  %v9511_v57 = vpop.f32.mrf.mxu0 }
 0x1cc   :  { %6559 = vst.msk [vmem:[#allocation3 + $0x2b8] sm:$0x3f] %vm6472_vm3, %v5962_v32  ;;  %v4171_v43 = vcombine.high %v2727_v50, %v2727_v50  ;;  %v4178_v16 = vrot.slane %v2727_v50, %v8416_v54  ;;  %v5964_v46 = vcombine.low %v4168_v42, %v4170_v38  ;;  %v2679_v21 = vmax.f32 %v2318_v18, %v2514_v29  ;;  %v6627_v32 = vld [vmem:[#allocation3 + $0x2a8] sm:$0x3f]  ;;  %v9532_v29 = vpop.f32.mrf.mxu1 }
 0x1cd   :  { %v5971_v5 = vrot.slane %v5963_v39, %v8416_v54  ;;  %v5070_v63 = vrot.slane %v3352_v58, %v8416_v54  ;;  %v5055_v12 = vcombine.low %v5047_v0, %v5054_v25  ;;  %v5056_v19 = vcombine.low %v3345_v2, %v3353_v60  ;;  %v1236_v25 = vpop.f32.mrf.mxu0 }
 0x1ce   :  { %v6655_v27 = vld [vmem:[#allocation3 + $0xf0] sm:$0xff]  ;;  %v9501_v14 = vrot.slane %v4171_v43, %v8416_v54  ;;  %v4186_v61 = vcombine.high %v4178_v16, %v4178_v16  ;;  %v5978_v7 = vrot.slane %v5964_v46, %v8416_v54  ;;  %v3354_v23 = vcombine.high %v3352_v58, %v3352_v58 }
 0x1cf   :  { %v6711_v17 = vmax.f32 %v6598_v8, %v6655_v27  ;;  %v3355_v15 = vcombine.high %v2679_v21, %v2679_v21  ;;  %6504 = vst.msk [vmem:[#allocation3 + $0x100] sm:$0xff] %vm2061_vm2, %v5055_v12  ;;  %v5063_v62 = vrot.slane %v5056_v19, %v8416_v54  ;;  %v3362_v41 = vrot.slane %v2679_v21, %v8416_v54 }
 0x1d0   :  { %v6656_v31 = vld [vmem:[#allocation3 + $0xf8] sm:$0x3f]  ;;  %v5980_v53 = vcombine.low %v4178_v16, %v4186_v61  ;;  %v5994_v47 = vrot.slane %v9501_v14, %v8416_v54  ;;  %v5979_v11 = vcombine.low %v5971_v5, %v5978_v7  ;;  %v2023_v56 = vmax.f32 %v9410_v49, 0.0  ;;  %v7347_v61 = vpop.f32.mrf.mxu0 }
 0x1d1   :  { %v6712_v40 = vmax.f32 %v6599_v35, %v6656_v31  ;;  %6767 = vst.msk [vmem:[%s10173_s3 + $0x70] sm:$0xff] %vm2061_vm2, %v6711_v17  ;;  %v6683_v28 = vld [vmem:[#allocation3 + $0x2b0] sm:$0xff]  ;;  %v9518_v24 = vrot.slane %v3355_v15, %v8416_v54  ;;  %v5071_v42 = vcombine.low %v5063_v62, %v5070_v63  ;;  %v3370_v26 = vcombine.high %v3362_v41, %v3362_v41  ;;  %v9566_v63 = vld [vmem:[%s10172_s2] ss:$0 sm:$0xff] }
 0x1d2   :  { %v6739_v44 = vmax.f32 %v6626_v20, %v6683_v28  ;;  %v5987_v33 = vrot.slane %v5980_v53, %v8416_v54  ;;  %6560 = vst.msk [vmem:[#allocation3 + $0x2c0] sm:$0xff] %vm2061_vm2, %v5979_v11  ;;  %v5072_v2 = vcombine.low %v3354_v23, %v3362_v41  ;;  %2220 = vst.msk [vmem:[#allocation2 + $0x4f0] sm:$0xff] %vm2061_vm2, %v2023_v56  ;;  %v1928_v50 = vmax.f32 %v9413_v55, 0.0 }
 0x1d3   :  { %6768 = vst.msk [vmem:[%s10173_s3 + $0x78] sm:$0x3f] %vm6472_vm3, %v6712_v40  ;;  %v6684_v37 = vld [vmem:[#allocation3 + $0x2b8] sm:$0x3f]  ;;  %v4187_v49 = vcombine.high %v9501_v14, %v9501_v14  ;;  %v2026_v18 = vmax.f32 %v9416_v48, 0.0  ;;  %v5073_v39 = vcombine.low %v3370_v26, %v9518_v24  ;;  %v1927_v58 = vmax.f32 %v9419_v34, 0.0 }
 0x1d4   :  { %v6740_v0 = vmax.f32 %v6627_v32, %v6684_v37  ;;  %6795 = vst.msk [vmem:[%s10173_s3 + $0x150] sm:$0xff] %vm2061_vm2, %v6739_v44  ;;  %v5995_v38 = vcombine.low %v5987_v33, %v5994_v47  ;;  %v5080_v55 = vrot.slane %v5072_v2, %v8416_v54  ;;  %2125 = vst.msk [vmem:[#allocation2 + $0x1f8] sm:$0xff] %vm2061_vm2, %v1928_v50 }
 0x1d5   :  { %6505 = vst.msk [vmem:[#allocation3 + $0x108] sm:$0x3f] %vm6472_vm3, %v5071_v42  ;;  %v3371_v48 = vcombine.high %v9518_v24, %v9518_v24  ;;  %v1687_v60 = vadd.f32 %v9164_v6, %v9421_v10  ;;  %v1212_v43 = vadd.f32 %v9164_v6, %v9429_v9  ;;  %v5087_v34 = vrot.slane %v5073_v39, %v8416_v54 }
 0x1d6   :  { %2223 = vst.msk [vmem:[#allocation2 + $0x508] sm:$0xff] %vm2061_vm2, %v2026_v18  ;;  %2124 = vst.msk [vmem:[#allocation2 + $0x1f0] sm:$0xff] %vm2061_vm2, %v1927_v58  ;;  %v1702_v16 = vadd.f32 %v9164_v6, %v9437_v13  ;;  %v1207_v10 = vadd.f32 %v9164_v6, %v9441_v22  ;;  %v1697_v9 = vadd.f32 %v9164_v6, %v9455_v1  ;;  %v1726_v13 = vpop.f32.mrf.mxu1  ;;  %v6600_v32 = vld [vmem:[#allocation3 + $0x100] sm:$0xff] }
 0x1d7   :  { %6796 = vst.msk [vmem:[%s10173_s3 + $0x158] sm:$0x3f] %vm6472_vm3, %v6740_v0  ;;  %6561 = vst.msk [vmem:[#allocation3 + $0x2c8] sm:$0x3f] %vm6472_vm3, %v5995_v38  ;;  %v2025_v46 = vmax.f32 %v1687_v60, 0.0  ;;  %v1930_v5 = vmax.f32 %v1212_v43, 0.0  ;;  %v1222_v21 = vadd.f32 %v9566_v63, %v9459_v36  ;;  %v1712_v8 = vadd.f32 %v9566_v63, %v9467_v59 }
 0x1d8   :  { %v5088_v27 = vcombine.low %v5080_v55, %v5087_v34  ;;  %v2028_v12 = vmax.f32 %v1702_v16, 0.0  ;;  %v1929_v22 = vmax.f32 %v1207_v10, 0.0  ;;  %v2027_v19 = vmax.f32 %v1697_v9, 0.0 }
 0x1d9   :  { %2222 = vst.msk [vmem:[#allocation2 + $0x500] sm:$0xff] %vm2061_vm2, %v2025_v46  ;;  %2127 = vst.msk [vmem:[#allocation2 + $0x208] sm:$0xff] %vm2061_vm2, %v1930_v5  ;;  %v1932_v6 = vmax.f32 %v1222_v21, 0.0  ;;  %v2030_v1 = vmax.f32 %v1712_v8, 0.0  ;;  %v1217_v17 = vadd.f32 %v9566_v63, %v9470_v3  ;;  %v1707_v36 = vadd.f32 %v9566_v63, %v9479_v4  ;;  %v2416_v59 = vld [vmem:[#allocation2 + $0x4f0] ss:$2 sm:$0xff] }
 0x1da   :  { %6506 = vst.msk [vmem:[#allocation3 + $0x110] sm:$0xff] %vm2061_vm2, %v5088_v27  ;;  %v2612_v7 = vld [vmem:[#allocation2 + $0x4f1] ss:$2 sm:$0xff]  ;;  %2225 = vst.msk [vmem:[#allocation2 + $0x518] sm:$0xff] %vm2061_vm2, %v2028_v12  ;;  %v1232_v23 = vadd.f32 %v9566_v63, %v9483_v30  ;;  %v1722_v15 = vadd.f32 %v9566_v63, %v9491_v45  ;;  %v1227_v3 = vadd.f32 %v9566_v63, %v9496_v51  ;;  %v9594_v30 = vpop.f32.mrf.mxu1  ;;  %v9596_v51 = vpop.f32.mrf.mxu0 }
 0x1db   :  { %2126 = vst.msk [vmem:[#allocation2 + $0x200] sm:$0xff] %vm2061_vm2, %v1929_v22  ;;  %2224 = vst.msk [vmem:[#allocation2 + $0x510] sm:$0xff] %vm2061_vm2, %v2027_v19  ;;  %v1717_v4 = vadd.f32 %v9566_v63, %v9504_v52  ;;  %v2728_v35 = vmax.f32 %v2416_v59, %v2612_v7  ;;  %v1931_v31 = vmax.f32 %v1217_v17, 0.0  ;;  %v2029_v62 = vmax.f32 %v1707_v36, 0.0 }
 0x1dc   :  { %2129 = vst.msk [vmem:[#allocation2 + $0x218] sm:$0xff] %vm2061_vm2, %v1932_v6  ;;  %2227 = vst.msk [vmem:[#allocation2 + $0x528] sm:$0xff] %vm2061_vm2, %v2030_v1  ;;  %v1242_v53 = vadd.f32 %v9566_v63, %v9511_v57  ;;  %v1934_v47 = vmax.f32 %v1232_v23, 0.0  ;;  %v2032_v45 = vmax.f32 %v1722_v15, 0.0  ;;  %v1933_v41 = vmax.f32 %v1227_v3, 0.0  ;;  %v9620_v60 = vpop.f32.mrf.mxu0 }
 0x1dd   :  { %v2031_v20 = vmax.f32 %v1717_v4, 0.0  ;;  %v4188_v40 = vcombine.high %v2728_v35, %v2728_v35  ;;  %v4195_v52 = vrot.slane %v2728_v35, %v8416_v54  ;;  %v2320_v28 = vld [vmem:[#allocation2 + $0x1f0] ss:$2 sm:$0xff]  ;;  %v2516_v11 = vld [vmem:[#allocation2 + $0x1f1] ss:$2 sm:$0xff]  ;;  %2128 = vst.msk [vmem:[#allocation2 + $0x210] sm:$0xff] %vm2061_vm2, %v1931_v31  ;;  %v1732_v57 = vadd.f32 %v9566_v63, %v9532_v29  ;;  %v9616_v29 = vpop.f32.mrf.mxu1 }
 0x1de   :  { %2226 = vst.msk [vmem:[#allocation2 + $0x520] sm:$0xff] %vm2061_vm2, %v2029_v62  ;;  %v1237_v56 = vadd.f32 %v9566_v63, %v1236_v25  ;;  %v2680_v44 = vmax.f32 %v2320_v28, %v2516_v11  ;;  %2131 = vst.msk [vmem:[#allocation2 + $0x228] sm:$0xff] %vm2061_vm2, %v1934_v47  ;;  %v1936_v42 = vmax.f32 %v1242_v53, 0.0  ;;  %v1727_v33 = vadd.f32 %v9566_v63, %v1726_v13  ;;  %v9640_v36 = vpop.f32.mrf.mxu0 }
 0x1df   :  { %2229 = vst.msk [vmem:[#allocation2 + $0x538] sm:$0xff] %vm2061_vm2, %v2032_v45  ;;  %2130 = vst.msk [vmem:[#allocation2 + $0x220] sm:$0xff] %vm2061_vm2, %v1933_v41  ;;  %v9610_v26 = vadd.f32 %v9566_v63, %v7347_v61  ;;  %v4202_v37 = vrot.slane %v4188_v40, %v8416_v54  ;;  %v4203_v2 = vcombine.high %v4195_v52, %v4195_v52  ;;  %v2034_v18 = vmax.f32 %v1732_v57, 0.0  ;;  %v9632_v6 = vpop.f32.mrf.mxu1 }
 0x1e0   :  { %2228 = vst.msk [vmem:[#allocation2 + $0x530] sm:$0xff] %vm2061_vm2, %v2031_v20  ;;  %v5996_v50 = vcombine.low %v4187_v49, %v4195_v52  ;;  %v3372_v0 = vcombine.high %v2680_v44, %v2680_v44  ;;  %v3379_v38 = vrot.slane %v2680_v44, %v8416_v54  ;;  %v2418_v39 = vld [vmem:[#allocation2 + $0x500] ss:$2 sm:$0xff]  ;;  %v2614_v58 = vld [vmem:[#allocation2 + $0x501] ss:$2 sm:$0xff]  ;;  %2133 = vst.msk [vmem:[#allocation2 + $0x238] sm:$0xff] %vm2061_vm2, %v1936_v42  ;;  %v9653_v42 = vpop.f32.mrf.mxu0 }
 0x1e1   :  { %v1935_v25 = vmax.f32 %v1237_v56, 0.0  ;;  %v2033_v55 = vmax.f32 %v1727_v33, 0.0  ;;  %v6657_v43 = vld [vmem:[#allocation3 + $0x110] sm:$0xff]  ;;  %v5997_v34 = vcombine.low %v4203_v2, %v4202_v37  ;;  %v2729_v14 = vmax.f32 %v2418_v39, %v2614_v58  ;;  %2231 = vst.msk [vmem:[#allocation2 + $0x548] sm:$0xff] %vm2061_vm2, %v2034_v18  ;;  %v9647_v28 = vpop.f32.mrf.mxu1 }
 0x1e2   :  { %v6004_v16 = vrot.slane %v5996_v50, %v8416_v54  ;;  %v4204_v49 = vcombine.high %v4202_v37, %v4202_v37  ;;  %v2322_v10 = vld [vmem:[#allocation2 + $0x200] ss:$2 sm:$0xff]  ;;  %v2518_v9 = vld [vmem:[#allocation2 + $0x201] ss:$2 sm:$0xff]  ;;  %v6713_v46 = vmax.f32 %v6600_v32, %v6657_v43  ;;  %v3386_v5 = vrot.slane %v3372_v0, %v8416_v54  ;;  %v2420_v13 = vld [vmem:[#allocation2 + $0x510] ss:$2 sm:$0xff] }
 0x1e3   :  { %v3387_v21 = vcombine.high %v3379_v38, %v3379_v38  ;;  %v5089_v8 = vcombine.low %v3371_v48, %v3379_v38  ;;  %v2616_v27 = vld [vmem:[#allocation2 + $0x511] ss:$2 sm:$0xff]  ;;  %2132 = vst.msk [vmem:[#allocation2 + $0x230] sm:$0xff] %vm2061_vm2, %v1935_v25  ;;  %2230 = vst.msk [vmem:[#allocation2 + $0x540] sm:$0xff] %vm2061_vm2, %v2033_v55  ;;  %v6011_v12 = vrot.slane %v5997_v34, %v8416_v54  ;;  %v9659_v43 = vpop.f32.mrf.mxu1  ;;  %v6628_v34 = vld [vmem:[#allocation3 + $0x2c0] sm:$0xff] }
 0x1e4   :  { %v4205_v22 = vcombine.high %v2729_v14, %v2729_v14  ;;  %v4212_v19 = vrot.slane %v2729_v14, %v8416_v54  ;;  %v2681_v61 = vmax.f32 %v2322_v10, %v2518_v9  ;;  %6769 = vst.msk [vmem:[%s10173_s3 + $0x80] sm:$0xff] %vm2061_vm2, %v6713_v46  ;;  %v3388_v24 = vcombine.high %v3386_v5, %v3386_v5  ;;  %v2324_v62 = vld [vmem:[#allocation2 + $0x210] ss:$2 sm:$0xff]  ;;  %v2520_v53 = vld [vmem:[#allocation2 + $0x211] ss:$2 sm:$0xff]  ;;  %v9662_v9 = vpop.f32.mrf.mxu0 }
 0x1e5   :  { %v5096_v48 = vrot.slane %v5089_v8, %v8416_v54  ;;  %v5103_v1 = vrot.slane %v3387_v21, %v8416_v54  ;;  %v2730_v17 = vmax.f32 %v2420_v13, %v2616_v27  ;;  %v6012_v59 = vcombine.low %v6004_v16, %v6011_v12  ;;  %v2422_v40 = vld [vmem:[#allocation2 + $0x520] ss:$2 sm:$0xff]  ;;  %v2618_v52 = vld [vmem:[#allocation2 + $0x521] ss:$2 sm:$0xff] }
 0x1e6   :  { %v4219_v7 = vrot.slane %v4205_v22, %v8416_v54  ;;  %v4220_v23 = vcombine.high %v4212_v19, %v4212_v19  ;;  %v6013_v15 = vcombine.low %v4204_v49, %v4212_v19  ;;  %v5105_v4 = vcombine.low %v3386_v5, %v3388_v24  ;;  %v6601_v46 = vld [vmem:[#allocation3 + $0x108] sm:$0x3f] }
 0x1e7   :  { %v5104_v3 = vcombine.low %v5096_v48, %v5103_v1  ;;  %v3389_v35 = vcombine.high %v2681_v61, %v2681_v61  ;;  %v3396_v31 = vrot.slane %v2681_v61, %v8416_v54  ;;  %6562 = vst.msk [vmem:[#allocation3 + $0x2d0] sm:$0xff] %vm2061_vm2, %v6012_v59  ;;  %v4222_v20 = vcombine.high %v2730_v17, %v2730_v17  ;;  %v2326_v27 = vld [vmem:[#allocation2 + $0x220] ss:$2 sm:$0xff]  ;;  %v2522_v12 = vld [vmem:[#allocation2 + $0x221] ss:$2 sm:$0xff] }
 0x1e8   :  { %v4221_v47 = vcombine.high %v4219_v7, %v4219_v7  ;;  %v6020_v45 = vrot.slane %v6013_v15, %v8416_v54  ;;  %v6027_v41 = vrot.slane %v4220_v23, %v8416_v54  ;;  %v5113_v11 = vrot.slane %v5105_v4, %v8416_v54  ;;  %v2424_v1 = vld [vmem:[#allocation2 + $0x530] ss:$2 sm:$0xff] }
 0x1e9   :  { %6507 = vst.msk [vmem:[#allocation3 + $0x118] sm:$0x3f] %vm6472_vm3, %v5104_v3  ;;  %v3403_v57 = vrot.slane %v3389_v35, %v8416_v54  ;;  %v3404_v56 = vcombine.high %v3396_v31, %v3396_v31  ;;  %v4229_v44 = vrot.slane %v2730_v17, %v8416_v54  ;;  %v4236_v37 = vrot.slane %v4222_v20, %v8416_v54  ;;  %v2620_v17 = vld [vmem:[#allocation2 + $0x531] ss:$2 sm:$0xff] }
 0x1ea   :  { %v6028_v33 = vcombine.low %v6020_v45, %v6027_v41  ;;  %v6029_v32 = vcombine.low %v4219_v7, %v4221_v47  ;;  %v2682_v2 = vmax.f32 %v2324_v62, %v2520_v53  ;;  %v2731_v38 = vmax.f32 %v2422_v40, %v2618_v52  ;;  %v2328_v4 = vld [vmem:[#allocation2 + $0x230] ss:$2 sm:$0xff]  ;;  %v2524_v35 = vld [vmem:[#allocation2 + $0x231] ss:$2 sm:$0xff]  ;;  %v9674_v41 = vpop.f32.mrf.mxu0 }
 0x1eb   :  { %v3405_v50 = vcombine.high %v3403_v57, %v3403_v57  ;;  %v5106_v18 = vcombine.low %v3396_v31, %v3404_v56  ;;  %v4237_v0 = vcombine.high %v4229_v44, %v4229_v44  ;;  %v4238_v58 = vcombine.high %v4236_v37, %v4236_v37  ;;  %v9671_v31 = vpop.f32.mrf.mxu1 }
 0x1ec   :  { %v6037_v39 = vrot.slane %v6029_v32, %v8416_v54  ;;  %6563 = vst.msk [vmem:[#allocation3 + $0x2d8] sm:$0x3f] %vm6472_vm3, %v6028_v33  ;;  %v3406_v25 = vcombine.high %v2682_v2, %v2682_v2  ;;  %v3413_v55 = vrot.slane %v2682_v2, %v8416_v54  ;;  %v4239_v10 = vcombine.high %v2731_v38, %v2731_v38 }
 0x1ed   :  { %v5120_v16 = vrot.slane %v5106_v18, %v8416_v54  ;;  %v5122_v14 = vcombine.low %v3403_v57, %v3405_v50  ;;  %v6030_v49 = vcombine.low %v4229_v44, %v4237_v0  ;;  %v6046_v5 = vcombine.low %v4236_v37, %v4238_v58  ;;  %v6629_v57 = vld [vmem:[#allocation3 + $0x2c8] sm:$0x3f] }
 0x1ee   :  { %v3420_v21 = vrot.slane %v3406_v25, %v8416_v54  ;;  %v3421_v8 = vcombine.high %v3413_v55, %v3413_v55  ;;  %v5136_v13 = vrot.slane %v3413_v55, %v8416_v54  ;;  %v6685_v22 = vld [vmem:[#allocation3 + $0x2d0] sm:$0xff]  ;;  %v4246_v48 = vrot.slane %v2731_v38, %v8416_v54  ;;  %v9689_v38 = vpop.f32.mrf.mxu1 }
 0x1ef   :  { %v5121_v19 = vcombine.low %v5113_v11, %v5120_v16  ;;  %v6044_v61 = vrot.slane %v6030_v49, %v8416_v54  ;;  %v5129_v24 = vrot.slane %v5122_v14, %v8416_v54  ;;  %v6741_v59 = vmax.f32 %v6628_v34, %v6685_v22  ;;  %v9693_v34 = vpop.f32.mrf.mxu0 }
 0x1f0   :  { %v6658_v7 = vld [vmem:[#allocation3 + $0x118] sm:$0x3f]  ;;  %v5138_v23 = vcombine.low %v3421_v8, %v3420_v21  ;;  %v4253_v15 = vrot.slane %v4239_v10, %v8416_v54  ;;  %v6053_v3 = vrot.slane %v6046_v5, %v8416_v54  ;;  %v4254_v45 = vcombine.high %v4246_v48, %v4246_v48 }
 0x1f1   :  { %v6714_v62 = vmax.f32 %v6601_v46, %v6658_v7  ;;  %6508 = vst.msk [vmem:[#allocation3 + $0x120] sm:$0xff] %vm2061_vm2, %v5121_v19  ;;  %v6045_v53 = vcombine.low %v6037_v39, %v6044_v61  ;;  %v5137_v47 = vcombine.low %v5129_v24, %v5136_v13  ;;  %6797 = vst.msk [vmem:[%s10173_s3 + $0x160] sm:$0xff] %vm2061_vm2, %v6741_v59  ;;  %v9705_v19 = vpop.f32.mrf.mxu1  ;;  %v2622_v59 = vld [vmem:[#allocation2 + $0x541] ss:$2 sm:$0xff]  ;;  %v9708_v7 = vpop.f32.mrf.mxu0 }
 0x1f2   :  { %v5146_v20 = vrot.slane %v5138_v23, %v8416_v54  ;;  %v6060_v40 = vrot.slane %v4246_v48, %v8416_v54  ;;  %v2683_v52 = vmax.f32 %v2326_v27, %v2522_v12  ;;  %v3422_v11 = vcombine.high %v3420_v21, %v3420_v21 }
 0x1f3   :  { %6770 = vst.msk [vmem:[%s10173_s3 + $0x88] sm:$0x3f] %vm6472_vm3, %v6714_v62  ;;  %v6686_v56 = vld [vmem:[#allocation3 + $0x2d8] sm:$0x3f]  ;;  %6509 = vst.msk [vmem:[#allocation3 + $0x128] sm:$0x3f] %vm6472_vm3, %v5137_v47  ;;  %v6062_v44 = vcombine.low %v4254_v45, %v4253_v15  ;;  %v2732_v33 = vmax.f32 %v2424_v1, %v2620_v17  ;;  %v4255_v32 = vcombine.high %v4253_v15, %v4253_v15 }
 0x1f4   :  { %6564 = vst.msk [vmem:[#allocation3 + $0x2e0] sm:$0xff] %vm2061_vm2, %v6045_v53  ;;  %v2684_v37 = vmax.f32 %v2328_v4, %v2524_v35  ;;  %v6742_v2 = vmax.f32 %v6629_v57, %v6686_v56  ;;  %v6061_v50 = vcombine.low %v6053_v3, %v6060_v40  ;;  %v3423_v18 = vcombine.high %v2683_v52, %v2683_v52  ;;  %v2426_v17 = vld [vmem:[#allocation2 + $0x540] ss:$2 sm:$0xff] }
 0x1f5   :  { %v3430_v0 = vrot.slane %v2683_v52, %v8416_v54  ;;  %v6070_v39 = vrot.slane %v6062_v44, %v8416_v54  ;;  %v4256_v58 = vcombine.high %v2732_v33, %v2732_v33  ;;  %v4263_v25 = vrot.slane %v2732_v33, %v8416_v54 }
 0x1f6   :  { %v3440_v55 = vcombine.high %v2684_v37, %v2684_v37  ;;  %6798 = vst.msk [vmem:[%s10173_s3 + $0x168] sm:$0x3f] %vm6472_vm3, %v6742_v2  ;;  %6565 = vst.msk [vmem:[#allocation3 + $0x2e8] sm:$0x3f] %vm6472_vm3, %v6061_v50  ;;  %v3437_v16 = vrot.slane %v3423_v18, %v8416_v54  ;;  %v3447_v10 = vrot.slane %v2684_v37, %v8416_v54 }
 0x1f7   :  { %v3438_v14 = vcombine.high %v3430_v0, %v3430_v0  ;;  %v5139_v49 = vcombine.low %v3422_v11, %v3430_v0  ;;  %v4270_v46 = vrot.slane %v4256_v58, %v8416_v54  ;;  %v4271_v5 = vcombine.high %v4263_v25, %v4263_v25 }
 0x1f8   :  { %v6063_v21 = vcombine.low %v4255_v32, %v4263_v25  ;;  %v3454_v8 = vrot.slane %v3440_v55, %v8416_v54  ;;  %v3439_v13 = vcombine.high %v3437_v16, %v3437_v16  ;;  %v3455_v22 = vcombine.high %v3447_v10, %v3447_v10  ;;  %v9725_v32 = vpop.f32.mrf.mxu0 }
 0x1f9   :  { %v5153_v27 = vrot.slane %v5139_v49, %v8416_v54  ;;  %v5155_v12 = vcombine.low %v3438_v14, %v3437_v16  ;;  %v4272_v61 = vcombine.high %v4270_v46, %v4270_v46  ;;  %v6079_v48 = vcombine.low %v4271_v5, %v4270_v46 }
 0x1fa   :  { %v6077_v24 = vrot.slane %v6063_v21, %v8416_v54  ;;  %v3456_v1 = vcombine.high %v3454_v8, %v3454_v8  ;;  %v5169_v3 = vrot.slane %v3439_v13, %v8416_v54  ;;  %v5171_v4 = vcombine.low %v3447_v10, %v3455_v22  ;;  %v9749_v49 = vpop.f32.mrf.mxu0  ;;  %v6602_v21 = vld [vmem:[#allocation3 + $0x120] sm:$0xff] }
 0x1fb   :  { %v5154_v23 = vcombine.low %v5146_v20, %v5153_v27  ;;  %v5162_v15 = vrot.slane %v5155_v12, %v8416_v54  ;;  %v6086_v62 = vrot.slane %v6079_v48, %v8416_v54  ;;  %v6093_v53 = vrot.slane %v4272_v61, %v8416_v54  ;;  %v9717_v20 = vpop.f32.mrf.mxu1  ;;  %v6630_v12 = vld [vmem:[#allocation3 + $0x2e0] sm:$0xff] }
 0x1fc   :  { %v6078_v35 = vcombine.low %v6070_v39, %v6077_v24  ;;  %v5172_v47 = vcombine.low %v3454_v8, %v3456_v1  ;;  %v5179_v40 = vrot.slane %v5171_v4, %v8416_v54  ;;  %v2733_v52 = vmax.f32 %v2426_v17, %v2622_v59 }
 0x1fd   :  { %v5170_v45 = vcombine.low %v5162_v15, %v5169_v3  ;;  %6510 = vst.msk [vmem:[#allocation3 + $0x130] sm:$0xff] %vm2061_vm2, %v5154_v23  ;;  %v1938_v11 = vmax.f32 %v9610_v26, 0.0  ;;  %v6094_v57 = vcombine.low %v6086_v62, %v6093_v53  ;;  %v1742_v44 = vadd.f32 %v9566_v63, %v9594_v30  ;;  %v9738_v16 = vpop.f32.mrf.mxu1  ;;  %v1296_v3 = vpop.f32.mrf.mxu0  ;;  %v6631_v4 = vld [vmem:[#allocation3 + $0x2e8] sm:$0x3f] }
 0x1fe   :  { %6566 = vst.msk [vmem:[#allocation3 + $0x2f0] sm:$0xff] %vm2061_vm2, %v6078_v35  ;;  %v5186_v56 = vrot.slane %v5172_v47, %v8416_v54  ;;  %v1247_v33 = vadd.f32 %v9566_v63, %v9596_v51  ;;  %v4273_v37 = vcombine.high %v2733_v52, %v2733_v52  ;;  %v4280_v26 = vrot.slane %v2733_v52, %v8416_v54 }
 0x1ff   :  { %6511 = vst.msk [vmem:[#allocation3 + $0x138] sm:$0x3f] %vm6472_vm3, %v5170_v45  ;;  %v1737_v2 = vadd.f32 %v9566_v63, %v9616_v29  ;;  %v1262_v50 = vadd.f32 %v9566_v63, %v9620_v60  ;;  %6567 = vst.msk [vmem:[#allocation3 + $0x2f8] sm:$0x3f] %vm6472_vm3, %v6094_v57  ;;  %v2036_v18 = vmax.f32 %v1742_v44, 0.0  ;;  %v1752_v0 = vadd.f32 %v9566_v63, %v9632_v6  ;;  %v9761_v1 = vpop.f32.mrf.mxu1 }
 0x200   :  { %2135 = vst.msk [vmem:[#allocation2 + $0x248] sm:$0xff] %vm2061_vm2, %v1938_v11  ;;  %v5187_v30 = vcombine.low %v5179_v40, %v5186_v56  ;;  %v1937_v51 = vmax.f32 %v1247_v33, 0.0  ;;  %v4287_v39 = vrot.slane %v4273_v37, %v8416_v54  ;;  %v4288_v58 = vcombine.high %v4280_v26, %v4280_v26 }
 0x201   :  { %v2035_v25 = vmax.f32 %v1737_v2, 0.0  ;;  %v1940_v55 = vmax.f32 %v1262_v50, 0.0  ;;  %2233 = vst.msk [vmem:[#allocation2 + $0x558] sm:$0xff] %vm2061_vm2, %v2036_v18  ;;  %v2038_v29 = vmax.f32 %v1752_v0, 0.0  ;;  %v1257_v60 = vadd.f32 %v9566_v63, %v9640_v36  ;;  %v1786_v37 = vpop.f32.mrf.mxu1 }
 0x202   :  { %6512 = vst.msk [vmem:[#allocation3 + $0x140] sm:$0xff] %vm2061_vm2, %v5187_v30  ;;  %2134 = vst.msk [vmem:[#allocation2 + $0x240] sm:$0xff] %vm2061_vm2, %v1937_v51  ;;  %v1747_v6 = vadd.f32 %v9566_v63, %v9647_v28  ;;  %v1272_v14 = vadd.f32 %v9566_v63, %v9653_v42  ;;  %v4289_v10 = vcombine.high %v4287_v39, %v4287_v39 }
 0x203   :  { %v6095_v46 = vcombine.low %v4280_v26, %v4288_v58  ;;  %2232 = vst.msk [vmem:[#allocation2 + $0x550] sm:$0xff] %vm2061_vm2, %v2035_v25  ;;  %2137 = vst.msk [vmem:[#allocation2 + $0x258] sm:$0xff] %vm2061_vm2, %v1940_v55  ;;  %v1762_v5 = vadd.f32 %v9566_v63, %v9659_v43  ;;  %v1267_v36 = vadd.f32 %v9566_v63, %v9662_v9  ;;  %v1939_v28 = vmax.f32 %v1257_v60, 0.0  ;;  %v6603_v9 = vld [vmem:[#allocation3 + $0x128] sm:$0x3f] }
 0x204   :  { %v6659_v8 = vld [vmem:[#allocation3 + $0x130] sm:$0xff]  ;;  %2235 = vst.msk [vmem:[#allocation2 + $0x568] sm:$0xff] %vm2061_vm2, %v2038_v29  ;;  %v2037_v42 = vmax.f32 %v1747_v6, 0.0  ;;  %v1942_v13 = vmax.f32 %v1272_v14, 0.0  ;;  %v1757_v27 = vadd.f32 %v9566_v63, %v9671_v31  ;;  %v6096_v24 = vcombine.low %v4287_v39, %v4289_v10 }
 0x205   :  { %v6715_v22 = vmax.f32 %v6602_v21, %v6659_v8  ;;  %v6687_v61 = vld [vmem:[#allocation3 + $0x2f0] sm:$0xff]  ;;  %v6103_v48 = vrot.slane %v6095_v46, %v8416_v54  ;;  %v2040_v43 = vmax.f32 %v1762_v5, 0.0  ;;  %2136 = vst.msk [vmem:[#allocation2 + $0x250] sm:$0xff] %vm2061_vm2, %v1939_v28  ;;  %v1941_v23 = vmax.f32 %v1267_v36, 0.0 }
 0x206   :  { %v6660_v17 = vld [vmem:[#allocation3 + $0x138] sm:$0x3f]  ;;  %v6743_v59 = vmax.f32 %v6630_v12, %v6687_v61  ;;  %2234 = vst.msk [vmem:[#allocation2 + $0x560] sm:$0xff] %vm2061_vm2, %v2037_v42  ;;  %2139 = vst.msk [vmem:[#allocation2 + $0x268] sm:$0xff] %vm2061_vm2, %v1942_v13  ;;  %v2039_v31 = vmax.f32 %v1757_v27, 0.0  ;;  %v1282_v15 = vadd.f32 %v9566_v63, %v9674_v41  ;;  %v6110_v53 = vrot.slane %v6096_v24, %v8416_v54 }
 0x207   :  { %v6716_v35 = vmax.f32 %v6603_v9, %v6660_v17  ;;  %6771 = vst.msk [vmem:[%s10173_s3 + $0x90] sm:$0xff] %vm2061_vm2, %v6715_v22  ;;  %v6688_v62 = vld [vmem:[#allocation3 + $0x2f8] sm:$0x3f]  ;;  %2237 = vst.msk [vmem:[#allocation2 + $0x578] sm:$0xff] %vm2061_vm2, %v2040_v43  ;;  %v1772_v47 = vadd.f32 %v9566_v63, %v9689_v38  ;;  %v1277_v45 = vadd.f32 %v9566_v63, %v9693_v34 }
 0x208   :  { %v6744_v41 = vmax.f32 %v6631_v4, %v6688_v62  ;;  %6799 = vst.msk [vmem:[%s10173_s3 + $0x170] sm:$0xff] %vm2061_vm2, %v6743_v59  ;;  %2138 = vst.msk [vmem:[#allocation2 + $0x260] sm:$0xff] %vm2061_vm2, %v1941_v23  ;;  %v1944_v40 = vmax.f32 %v1282_v15, 0.0  ;;  %v1767_v52 = vadd.f32 %v9566_v63, %v9705_v19  ;;  %v1292_v38 = vadd.f32 %v9566_v63, %v9708_v7 }
 0x209   :  { %2236 = vst.msk [vmem:[#allocation2 + $0x570] sm:$0xff] %vm2061_vm2, %v2039_v31  ;;  %v6111_v34 = vcombine.low %v6103_v48, %v6110_v53  ;;  %v2330_v11 = vld [vmem:[#allocation2 + $0x240] ss:$2 sm:$0xff]  ;;  %v2526_v57 = vld [vmem:[#allocation2 + $0x241] ss:$2 sm:$0xff]  ;;  %v2042_v56 = vmax.f32 %v1772_v47, 0.0  ;;  %v1782_v44 = vadd.f32 %v9566_v63, %v9717_v20  ;;  %v1287_v33 = vadd.f32 %v9566_v63, %v9725_v32  ;;  %v9803_v20 = vpop.f32.mrf.mxu0 }
 0x20a   :  { %6772 = vst.msk [vmem:[%s10173_s3 + $0x98] sm:$0x3f] %vm6472_vm3, %v6716_v35  ;;  %6800 = vst.msk [vmem:[%s10173_s3 + $0x178] sm:$0x3f] %vm6472_vm3, %v6744_v41  ;;  %v2685_v19 = vmax.f32 %v2330_v11, %v2526_v57  ;;  %v2428_v7 = vld [vmem:[#allocation2 + $0x550] ss:$2 sm:$0xff]  ;;  %v1777_v30 = vadd.f32 %v9566_v63, %v9738_v16  ;;  %v1302_v55 = vadd.f32 %v9566_v63, %v9749_v49  ;;  %v9823_v49 = vpop.f32.mrf.mxu1 }
 0x20b   :  { %v2624_v26 = vld [vmem:[#allocation2 + $0x551] ss:$2 sm:$0xff]  ;;  %2141 = vst.msk [vmem:[#allocation2 + $0x278] sm:$0xff] %vm2061_vm2, %v1944_v40  ;;  %v1943_v2 = vmax.f32 %v1277_v45, 0.0  ;;  %v2041_v50 = vmax.f32 %v1767_v52, 0.0  ;;  %6568 = vst.msk [vmem:[#allocation3 + $0x300] sm:$0xff] %vm2061_vm2, %v6111_v34  ;;  %v9818_v10 = vadd.f32 %v9566_v63, %v9761_v1  ;;  %v9821_v46 = vadd.f32 %v9566_v63, %v1296_v3  ;;  %v9827_v42 = vpop.f32.mrf.mxu0 }
 0x20c   :  { %v2734_v32 = vmax.f32 %v2428_v7, %v2624_v26  ;;  %2239 = vst.msk [vmem:[#allocation2 + $0x588] sm:$0xff] %vm2061_vm2, %v2042_v56  ;;  %v1946_v18 = vmax.f32 %v1292_v38, 0.0  ;;  %v2044_v51 = vmax.f32 %v1782_v44, 0.0  ;;  %v1945_v0 = vmax.f32 %v1287_v33, 0.0  ;;  %v2332_v60 = vld [vmem:[#allocation2 + $0x250] ss:$2 sm:$0xff]  ;;  %v9837_v15 = vpop.f32.mrf.mxu1 }
 0x20d   :  { %v3457_v39 = vcombine.high %v2685_v19, %v2685_v19  ;;  %v3464_v58 = vrot.slane %v2685_v19, %v8416_v54  ;;  %2140 = vst.msk [vmem:[#allocation2 + $0x270] sm:$0xff] %vm2061_vm2, %v1943_v2  ;;  %2238 = vst.msk [vmem:[#allocation2 + $0x580] sm:$0xff] %vm2061_vm2, %v2041_v50  ;;  %v2043_v25 = vmax.f32 %v1777_v30, 0.0  ;;  %v2528_v6 = vld [vmem:[#allocation2 + $0x251] ss:$2 sm:$0xff]  ;;  %v1948_v28 = vmax.f32 %v1302_v55, 0.0  ;;  %v9842_v53 = vpop.f32.mrf.mxu0 }
 0x20e   :  { %v4290_v16 = vcombine.high %v2734_v32, %v2734_v32  ;;  %v4297_v29 = vrot.slane %v2734_v32, %v8416_v54  ;;  %v2430_v14 = vld [vmem:[#allocation2 + $0x560] ss:$2 sm:$0xff]  ;;  %2143 = vst.msk [vmem:[#allocation2 + $0x288] sm:$0xff] %vm2061_vm2, %v1946_v18  ;;  %2241 = vst.msk [vmem:[#allocation2 + $0x598] sm:$0xff] %vm2061_vm2, %v2044_v51  ;;  %v2686_v21 = vmax.f32 %v2332_v60, %v2528_v6  ;;  %v2626_v8 = vld [vmem:[#allocation2 + $0x561] ss:$2 sm:$0xff]  ;;  %v9847_v2 = vpop.f32.mrf.mxu1 }
 0x20f   :  { %2142 = vst.msk [vmem:[#allocation2 + $0x280] sm:$0xff] %vm2061_vm2, %v1945_v0  ;;  %v3471_v5 = vrot.slane %v3457_v39, %v8416_v54  ;;  %v3472_v36 = vcombine.high %v3464_v58, %v3464_v58  ;;  %2240 = vst.msk [vmem:[#allocation2 + $0x590] sm:$0xff] %vm2061_vm2, %v2043_v25  ;;  %v2735_v12 = vmax.f32 %v2430_v14, %v2626_v8  ;;  %v2334_v1 = vld [vmem:[#allocation2 + $0x260] ss:$2 sm:$0xff]  ;;  %v2530_v9 = vld [vmem:[#allocation2 + $0x261] ss:$2 sm:$0xff]  ;;  %v9852_v51 = vpop.f32.mrf.mxu0 }
 0x210   :  { %v4304_v13 = vrot.slane %v4290_v16, %v8416_v54  ;;  %v4305_v27 = vcombine.high %v4297_v29, %v4297_v29  ;;  %v9831_v22 = vadd.f32 %v9566_v63, %v1786_v37  ;;  %v3474_v43 = vcombine.high %v2686_v21, %v2686_v21  ;;  %2145 = vst.msk [vmem:[#allocation2 + $0x298] sm:$0xff] %vm2061_vm2, %v1948_v28  ;;  %v2432_v52 = vld [vmem:[#allocation2 + $0x570] ss:$2 sm:$0xff]  ;;  %v2628_v56 = vld [vmem:[#allocation2 + $0x571] ss:$2 sm:$0xff]  ;;  %v9859_v28 = vpop.f32.mrf.mxu1 }
 0x211   :  { %v5188_v61 = vcombine.low %v3464_v58, %v3472_v36  ;;  %v5202_v24 = vrot.slane %v3471_v5, %v8416_v54  ;;  %v3473_v48 = vcombine.high %v3471_v5, %v3471_v5  ;;  %v3481_v23 = vrot.slane %v2686_v21, %v8416_v54 }
 0x212   :  { %v6112_v17 = vcombine.low %v4297_v29, %v4305_v27  ;;  %v6126_v59 = vrot.slane %v4304_v13, %v8416_v54  ;;  %v4306_v31 = vcombine.high %v4304_v13, %v4304_v13  ;;  %v3488_v4 = vrot.slane %v3474_v43, %v8416_v54 }
 0x213   :  { %v5195_v3 = vrot.slane %v5188_v61, %v8416_v54  ;;  %v4307_v35 = vcombine.high %v2735_v12, %v2735_v12  ;;  %v4314_v62 = vrot.slane %v2735_v12, %v8416_v54  ;;  %v3489_v45 = vcombine.high %v3481_v23, %v3481_v23 }
 0x214   :  { %v6119_v47 = vrot.slane %v6112_v17, %v8416_v54  ;;  %v5204_v41 = vcombine.low %v3473_v48, %v3481_v23  ;;  %v2687_v40 = vmax.f32 %v2334_v1, %v2530_v9  ;;  %v2336_v44 = vld [vmem:[#allocation2 + $0x270] ss:$2 sm:$0xff]  ;;  %v2532_v33 = vld [vmem:[#allocation2 + $0x271] ss:$2 sm:$0xff]  ;;  %v3490_v26 = vcombine.high %v3488_v4, %v3488_v4  ;;  %v2434_v21 = vld [vmem:[#allocation2 + $0x580] ss:$2 sm:$0xff] }
 0x215   :  { %v5203_v38 = vcombine.low %v5195_v3, %v5202_v24  ;;  %v4321_v34 = vrot.slane %v4307_v35, %v8416_v54  ;;  %v4322_v11 = vcombine.high %v4314_v62, %v4314_v62  ;;  %v6128_v57 = vcombine.low %v4306_v31, %v4314_v62  ;;  %v2630_v8 = vld [vmem:[#allocation2 + $0x581] ss:$2 sm:$0xff]  ;;  %v9863_v24 = vpop.f32.mrf.mxu0 }
 0x216   :  { %v6127_v37 = vcombine.low %v6119_v47, %v6126_v59  ;;  %v5205_v19 = vcombine.low %v3489_v45, %v3488_v4  ;;  %v5212_v7 = vrot.slane %v5204_v41, %v8416_v54  ;;  %v3491_v32 = vcombine.high %v2687_v40, %v2687_v40  ;;  %v2338_v3 = vld [vmem:[#allocation2 + $0x280] ss:$2 sm:$0xff]  ;;  %v2534_v4 = vld [vmem:[#allocation2 + $0x281] ss:$2 sm:$0xff]  ;;  %v2436_v41 = vld [vmem:[#allocation2 + $0x590] ss:$2 sm:$0xff] }
 0x217   :  { %6513 = vst.msk [vmem:[#allocation3 + $0x148] sm:$0x3f] %vm6472_vm3, %v5203_v38  ;;  %v6129_v50 = vcombine.low %v4322_v11, %v4321_v34  ;;  %v6136_v30 = vrot.slane %v6128_v57, %v8416_v54  ;;  %v3498_v18 = vrot.slane %v2687_v40, %v8416_v54  ;;  %v2736_v39 = vmax.f32 %v2432_v52, %v2628_v56  ;;  %v2632_v40 = vld [vmem:[#allocation2 + $0x591] ss:$2 sm:$0xff]  ;;  %v9872_v52 = vpop.f32.mrf.mxu1  ;;  %v9877_v56 = vpop.f32.mrf.mxu0 }
 0x218   :  { %6569 = vst.msk [vmem:[#allocation3 + $0x308] sm:$0x3f] %vm6472_vm3, %v6127_v37  ;;  %v5219_v0 = vrot.slane %v5205_v19, %v8416_v54  ;;  %v4323_v58 = vcombine.high %v4321_v34, %v4321_v34  ;;  %v2688_v25 = vmax.f32 %v2336_v44, %v2532_v33  ;;  %v3505_v16 = vrot.slane %v3491_v32, %v8416_v54 }
 0x219   :  { %v6143_v55 = vrot.slane %v6129_v50, %v8416_v54  ;;  %v3506_v29 = vcombine.high %v3498_v18, %v3498_v18  ;;  %v5221_v60 = vcombine.low %v3490_v26, %v3498_v18  ;;  %v4324_v14 = vcombine.high %v2736_v39, %v2736_v39 }
 0x21a   :  { %v5220_v6 = vcombine.low %v5212_v7, %v5219_v0  ;;  %v4331_v5 = vrot.slane %v2736_v39, %v8416_v54  ;;  %v3508_v36 = vcombine.high %v2688_v25, %v2688_v25  ;;  %v3507_v27 = vcombine.high %v3505_v16, %v3505_v16 }
 0x21b   :  { %v6144_v13 = vcombine.low %v6136_v30, %v6143_v55  ;;  %v5228_v12 = vrot.slane %v5221_v60, %v8416_v54  ;;  %v5235_v61 = vrot.slane %v3506_v29, %v8416_v54  ;;  %v4338_v48 = vrot.slane %v4324_v14, %v8416_v54  ;;  %v9887_v14 = vpop.f32.mrf.mxu0 }
 0x21c   :  { %6514 = vst.msk [vmem:[#allocation3 + $0x150] sm:$0xff] %vm2061_vm2, %v5220_v6  ;;  %v4339_v43 = vcombine.high %v4331_v5, %v4331_v5  ;;  %v6145_v1 = vcombine.low %v4323_v58, %v4331_v5  ;;  %v3515_v9 = vrot.slane %v2688_v25, %v8416_v54  ;;  %v5237_v59 = vcombine.low %v3505_v16, %v3507_v27  ;;  %v9884_v58 = vpop.f32.mrf.mxu1  ;;  %v6604_v25 = vld [vmem:[#allocation3 + $0x140] sm:$0xff] }
 0x21d   :  { %6570 = vst.msk [vmem:[#allocation3 + $0x310] sm:$0xff] %vm2061_vm2, %v6144_v13  ;;  %v5236_v17 = vcombine.low %v5228_v12, %v5235_v61  ;;  %v3522_v23 = vrot.slane %v3508_v36, %v8416_v54  ;;  %v2737_v31 = vmax.f32 %v2434_v21, %v2630_v8  ;;  %v4340_v35 = vcombine.high %v4338_v48, %v4338_v48  ;;  %v6632_v5 = vld [vmem:[#allocation3 + $0x300] sm:$0xff] }
 0x21e   :  { %v6152_v62 = vrot.slane %v6145_v1, %v8416_v54  ;;  %v6159_v47 = vrot.slane %v4339_v43, %v8416_v54  ;;  %v3523_v45 = vcombine.high %v3515_v9, %v3515_v9  ;;  %v5245_v38 = vrot.slane %v5237_v59, %v8416_v54  ;;  %v6605_v1 = vld [vmem:[#allocation3 + $0x148] sm:$0x3f] }
 0x21f   :  { %6515 = vst.msk [vmem:[#allocation3 + $0x158] sm:$0x3f] %vm6472_vm3, %v5236_v17  ;;  %v3524_v34 = vcombine.high %v3522_v23, %v3522_v23  ;;  %v4341_v11 = vcombine.high %v2737_v31, %v2737_v31  ;;  %v4348_v57 = vrot.slane %v2737_v31, %v8416_v54  ;;  %v6161_v33 = vcombine.low %v4338_v48, %v4340_v35 }
 0x220   :  { %v6160_v44 = vcombine.low %v6152_v62, %v6159_v47  ;;  %v5238_v37 = vcombine.low %v3515_v9, %v3523_v45  ;;  %v2689_v19 = vmax.f32 %v2338_v3, %v2534_v4  ;;  %v2738_v30 = vmax.f32 %v2436_v41, %v2632_v40  ;;  %v7521_v3 = vpop.f32.mrf.mxu1  ;;  %v1336_v45 = vpop.f32.mrf.mxu0 }
 0x221   :  { %v5254_v7 = vcombine.low %v3522_v23, %v3524_v34  ;;  %v4355_v26 = vrot.slane %v4341_v11, %v8416_v54  ;;  %v4356_v50 = vcombine.high %v4348_v57, %v4348_v57  ;;  %v6169_v32 = vrot.slane %v6161_v33, %v8416_v54 }
 0x222   :  { %6571 = vst.msk [vmem:[#allocation3 + $0x318] sm:$0x3f] %vm6472_vm3, %v6160_v44  ;;  %v5252_v18 = vrot.slane %v5238_v37, %v8416_v54  ;;  %v3525_v0 = vcombine.high %v2689_v19, %v2689_v19  ;;  %v3532_v39 = vrot.slane %v2689_v19, %v8416_v54  ;;  %v4358_v6 = vcombine.high %v2738_v30, %v2738_v30 }
 0x223   :  { %v6661_v55 = vld [vmem:[#allocation3 + $0x150] sm:$0xff]  ;;  %v4357_v16 = vcombine.high %v4355_v26, %v4355_v26  ;;  %v6162_v29 = vcombine.low %v4348_v57, %v4356_v50  ;;  %v5261_v60 = vrot.slane %v5254_v7, %v8416_v54  ;;  %v4365_v59 = vrot.slane %v2738_v30, %v8416_v54 }
 0x224   :  { %v6717_v36 = vmax.f32 %v6604_v25, %v6661_v55  ;;  %v6689_v21 = vld [vmem:[#allocation3 + $0x310] sm:$0xff]  ;;  %v5253_v8 = vcombine.low %v5245_v38, %v5252_v18  ;;  %v9890_v13 = vrot.slane %v3525_v0, %v8416_v54  ;;  %v3540_v27 = vcombine.high %v3532_v39, %v3532_v39 }
 0x225   :  { %v6745_v12 = vmax.f32 %v6632_v5, %v6689_v21  ;;  %v6176_v61 = vrot.slane %v6162_v29, %v8416_v54  ;;  %v6178_v48 = vcombine.low %v4355_v26, %v4357_v16  ;;  %v5268_v43 = vrot.slane %v3532_v39, %v8416_v54  ;;  %v1826_v26 = vpop.f32.mrf.mxu1 }
 0x226   :  { %6773 = vst.msk [vmem:[%s10173_s3 + $0xa0] sm:$0xff] %vm2061_vm2, %v6717_v36  ;;  %v6662_v9 = vld [vmem:[#allocation3 + $0x158] sm:$0x3f]  ;;  %6516 = vst.msk [vmem:[#allocation3 + $0x160] sm:$0xff] %vm2061_vm2, %v5253_v8  ;;  %v9900_v17 = vcombine.low %v3540_v27, %v9890_v13  ;;  %v9904_v23 = vrot.slane %v4358_v6, %v8416_v54  ;;  %v2046_v31 = vmax.f32 %v9818_v10, 0.0  ;;  %v4373_v41 = vcombine.high %v4365_v59, %v4365_v59 }
 0x227   :  { %6801 = vst.msk [vmem:[%s10173_s3 + $0x180] sm:$0xff] %vm2061_vm2, %v6745_v12  ;;  %v6718_v4 = vmax.f32 %v6605_v1, %v6662_v9  ;;  %v6177_v35 = vcombine.low %v6169_v32, %v6176_v61  ;;  %v5269_v62 = vcombine.low %v5261_v60, %v5268_v43  ;;  %v6185_v47 = vrot.slane %v6178_v48, %v8416_v54  ;;  %v6633_v10 = vld [vmem:[#allocation3 + $0x308] sm:$0x3f]  ;;  %v7377_v32 = vpop.f32.mrf.mxu0  ;;  %v7524_v60 = vpop.f32.mrf.mxu1 }
 0x228   :  { %v6192_v40 = vrot.slane %v4365_v59, %v8416_v54  ;;  %2243 = vst.msk [vmem:[#allocation2 + $0x5a8] sm:$0xff] %vm2061_vm2, %v2046_v31  ;;  %v1947_v38 = vmax.f32 %v9821_v46, 0.0  ;;  %v5278_v11 = vrot.slane %v9900_v17, %v8416_v54  ;;  %v3541_v57 = vcombine.high %v9890_v13, %v9890_v13 }
 0x229   :  { %6774 = vst.msk [vmem:[%s10173_s3 + $0xa8] sm:$0x3f] %vm6472_vm3, %v6718_v4  ;;  %v6690_v34 = vld [vmem:[#allocation3 + $0x318] sm:$0x3f]  ;;  %6517 = vst.msk [vmem:[#allocation3 + $0x168] sm:$0x3f] %vm6472_vm3, %v5269_v62  ;;  %v1312_v46 = vadd.f32 %v9566_v63, %v9803_v20  ;;  %v4374_v19 = vcombine.high %v9904_v23, %v9904_v23  ;;  %v1802_v7 = vadd.f32 %v9566_v63, %v9823_v49  ;;  %v1346_v5 = vpop.f32.mrf.mxu0 }
 0x22a   :  { %6572 = vst.msk [vmem:[#allocation3 + $0x320] sm:$0xff] %vm2061_vm2, %v6177_v35  ;;  %v2045_v44 = vmax.f32 %v9831_v22, 0.0  ;;  %v6746_v33 = vmax.f32 %v6633_v10, %v6690_v34  ;;  %v6193_v37 = vcombine.low %v6185_v47, %v6192_v40  ;;  %2144 = vst.msk [vmem:[#allocation2 + $0x290] sm:$0xff] %vm2061_vm2, %v1947_v38  ;;  %v1307_v22 = vadd.f32 %v9566_v63, %v9827_v42  ;;  %v9951_v42 = vld [vmem:[%s10172_s2] ss:$0 sm:$0xff] }
 0x22b   :  { %v1950_v50 = vmax.f32 %v1312_v46, 0.0  ;;  %v1797_v20 = vadd.f32 %v9566_v63, %v9837_v15  ;;  %v1322_v30 = vadd.f32 %v9566_v63, %v9842_v53  ;;  %v9945_v49 = vcombine.low %v4373_v41, %v9904_v23 }
 0x22c   :  { %2242 = vst.msk [vmem:[#allocation2 + $0x5a0] sm:$0xff] %vm2061_vm2, %v2045_v44  ;;  %v2048_v18 = vmax.f32 %v1802_v7, 0.0  ;;  %v1812_v63 = vadd.f32 %v9951_v42, %v9847_v2  ;;  %v1317_v15 = vadd.f32 %v9951_v42, %v9852_v51  ;;  %v1949_v53 = vmax.f32 %v1307_v22, 0.0 }
 0x22d   :  { %6802 = vst.msk [vmem:[%s10173_s3 + $0x188] sm:$0x3f] %vm6472_vm3, %v6746_v33  ;;  %6573 = vst.msk [vmem:[#allocation3 + $0x328] sm:$0x3f] %vm6472_vm3, %v6193_v37  ;;  %v2047_v0 = vmax.f32 %v1797_v20, 0.0  ;;  %v1952_v39 = vmax.f32 %v1322_v30, 0.0  ;;  %v1807_v25 = vadd.f32 %v9951_v42, %v9859_v28  ;;  %v1332_v29 = vadd.f32 %v9951_v42, %v9863_v24 }
 0x22e   :  { %2147 = vst.msk [vmem:[#allocation2 + $0x2a8] sm:$0xff] %vm2061_vm2, %v1950_v50  ;;  %2245 = vst.msk [vmem:[#allocation2 + $0x5b8] sm:$0xff] %vm2061_vm2, %v2048_v18  ;;  %v2050_v55 = vmax.f32 %v1812_v63, 0.0  ;;  %v1951_v16 = vmax.f32 %v1317_v15, 0.0  ;;  %v1822_v2 = vadd.f32 %v9951_v42, %v9872_v52  ;;  %v1327_v28 = vadd.f32 %v9951_v42, %v9877_v56 }
 0x22f   :  { %2146 = vst.msk [vmem:[#allocation2 + $0x2a0] sm:$0xff] %vm2061_vm2, %v1949_v53  ;;  %2244 = vst.msk [vmem:[#allocation2 + $0x5b0] sm:$0xff] %vm2061_vm2, %v2047_v0  ;;  %v2049_v51 = vmax.f32 %v1807_v25, 0.0  ;;  %v1817_v6 = vadd.f32 %v9951_v42, %v9884_v58  ;;  %v1342_v24 = vadd.f32 %v9951_v42, %v9887_v14  ;;  %v1954_v52 = vmax.f32 %v1332_v29, 0.0 }
 0x230   :  { %2149 = vst.msk [vmem:[#allocation2 + $0x2b8] sm:$0xff] %vm2061_vm2, %v1952_v39  ;;  %2247 = vst.msk [vmem:[#allocation2 + $0x5c8] sm:$0xff] %vm2061_vm2, %v2050_v55  ;;  %v2052_v36 = vmax.f32 %v1822_v2, 0.0  ;;  %v1832_v21 = vadd.f32 %v9951_v42, %v7521_v3  ;;  %v1337_v8 = vadd.f32 %v9951_v42, %v1336_v45  ;;  %v1953_v56 = vmax.f32 %v1327_v28, 0.0  ;;  %v1836_v3 = vpop.f32.mrf.mxu1  ;;  %v7380_v45 = vpop.f32.mrf.mxu0 }
 0x231   :  { %2148 = vst.msk [vmem:[#allocation2 + $0x2b0] sm:$0xff] %vm2061_vm2, %v1951_v16  ;;  %v2340_v27 = vld [vmem:[#allocation2 + $0x290] ss:$2 sm:$0xff]  ;;  %v2536_v12 = vld [vmem:[#allocation2 + $0x291] ss:$2 sm:$0xff]  ;;  %2246 = vst.msk [vmem:[#allocation2 + $0x5c0] sm:$0xff] %vm2061_vm2, %v2049_v51  ;;  %v1827_v61 = vadd.f32 %v9951_v42, %v1826_v26  ;;  %v1352_v14 = vadd.f32 %v9951_v42, %v7377_v32  ;;  %v1842_v31 = vadd.f32 %v9951_v42, %v7524_v60 }
 0x232   :  { %v2051_v58 = vmax.f32 %v1817_v6, 0.0  ;;  %v2690_v48 = vmax.f32 %v2340_v27, %v2536_v12  ;;  %2151 = vst.msk [vmem:[#allocation2 + $0x2c8] sm:$0xff] %vm2061_vm2, %v1954_v52  ;;  %2249 = vst.msk [vmem:[#allocation2 + $0x5d8] sm:$0xff] %vm2061_vm2, %v2052_v36  ;;  %v1956_v9 = vmax.f32 %v1342_v24, 0.0  ;;  %v2054_v59 = vmax.f32 %v1832_v21, 0.0 }
 0x233   :  { %v2438_v43 = vld [vmem:[#allocation2 + $0x5a0] ss:$2 sm:$0xff]  ;;  %v2634_v1 = vld [vmem:[#allocation2 + $0x5a1] ss:$2 sm:$0xff]  ;;  %2150 = vst.msk [vmem:[#allocation2 + $0x2c0] sm:$0xff] %vm2061_vm2, %v1953_v56  ;;  %v1955_v35 = vmax.f32 %v1337_v8, 0.0  ;;  %v6202_v41 = vrot.slane %v9945_v49, %v8416_v54  ;;  %v9996_v46 = vadd.f32 %v9951_v42, %v1346_v5  ;;  %v9999_v33 = vadd.f32 %v9951_v42, %v1836_v3 }
 0x234   :  { %v2739_v4 = vmax.f32 %v2438_v43, %v2634_v1  ;;  %2248 = vst.msk [vmem:[#allocation2 + $0x5d0] sm:$0xff] %vm2061_vm2, %v2051_v58  ;;  %v2053_v62 = vmax.f32 %v1827_v61, 0.0  ;;  %v1958_v47 = vmax.f32 %v1352_v14, 0.0  ;;  %v3542_v40 = vcombine.high %v2690_v48, %v2690_v48  ;;  %2153 = vst.msk [vmem:[#allocation2 + $0x2d8] sm:$0xff] %vm2061_vm2, %v1956_v9 }
 0x235   :  { %v3549_v38 = vrot.slane %v2690_v48, %v8416_v54  ;;  %2251 = vst.msk [vmem:[#allocation2 + $0x5e8] sm:$0xff] %vm2061_vm2, %v2054_v59  ;;  %v2056_v10 = vmax.f32 %v1842_v31, 0.0  ;;  %2152 = vst.msk [vmem:[#allocation2 + $0x2d0] sm:$0xff] %vm2061_vm2, %v1955_v35  ;;  %v10007_v30 = vadd.f32 %v9951_v42, %v7380_v45 }
 0x236   :  { %v4375_v34 = vcombine.high %v2739_v4, %v2739_v4  ;;  %v4382_v44 = vrot.slane %v2739_v4, %v8416_v54  ;;  %2250 = vst.msk [vmem:[#allocation2 + $0x5e0] sm:$0xff] %vm2061_vm2, %v2053_v62  ;;  %2155 = vst.msk [vmem:[#allocation2 + $0x2e8] sm:$0xff] %vm2061_vm2, %v1958_v47  ;;  %v3556_v37 = vrot.slane %v3542_v40, %v8416_v54  ;;  %v2342_v50 = vld [vmem:[#allocation2 + $0x2a0] ss:$2 sm:$0xff]  ;;  %v2538_v22 = vld [vmem:[#allocation2 + $0x2a1] ss:$2 sm:$0xff] }
 0x237   :  { %v3557_v7 = vcombine.high %v3549_v38, %v3549_v38  ;;  %v5271_v26 = vcombine.low %v3541_v57, %v3549_v38  ;;  %v2440_v20 = vld [vmem:[#allocation2 + $0x5b0] ss:$2 sm:$0xff]  ;;  %2253 = vst.msk [vmem:[#allocation2 + $0x5f8] sm:$0xff] %vm2061_vm2, %v2056_v10  ;;  %v2691_v63 = vmax.f32 %v2342_v50, %v2538_v22  ;;  %v2636_v15 = vld [vmem:[#allocation2 + $0x5b1] ss:$2 sm:$0xff] }
 0x238   :  { %v4389_v32 = vrot.slane %v4375_v34, %v8416_v54  ;;  %v4390_v49 = vcombine.high %v4382_v44, %v4382_v44  ;;  %v6195_v18 = vcombine.low %v4374_v19, %v4382_v44  ;;  %v3558_v53 = vcombine.high %v3556_v37, %v3556_v37  ;;  %v2344_v29 = vld [vmem:[#allocation2 + $0x2b0] ss:$2 sm:$0xff]  ;;  %v2540_v51 = vld [vmem:[#allocation2 + $0x2b1] ss:$2 sm:$0xff]  ;;  %v2442_v28 = vld [vmem:[#allocation2 + $0x5c0] ss:$2 sm:$0xff] }
 0x239   :  { %v5285_v13 = vrot.slane %v5271_v26, %v8416_v54  ;;  %v5287_v57 = vcombine.low %v3557_v7, %v3556_v37  ;;  %v2740_v0 = vmax.f32 %v2440_v20, %v2636_v15  ;;  %v3559_v16 = vcombine.high %v2691_v63, %v2691_v63  ;;  %v2638_v6 = vld [vmem:[#allocation2 + $0x5c1] ss:$2 sm:$0xff] }
 0x23a   :  { %v4391_v39 = vcombine.high %v4389_v32, %v4389_v32  ;;  %v6209_v25 = vrot.slane %v6195_v18, %v8416_v54  ;;  %v6211_v55 = vcombine.low %v4390_v49, %v4389_v32  ;;  %v5301_v19 = vrot.slane %v3558_v53, %v8416_v54  ;;  %v2346_v21 = vld [vmem:[#allocation2 + $0x2c0] ss:$2 sm:$0xff]  ;;  %v2542_v8 = vld [vmem:[#allocation2 + $0x2c1] ss:$2 sm:$0xff] }
 0x23b   :  { %v5286_v2 = vcombine.low %v5278_v11, %v5285_v13  ;;  %v5294_v23 = vrot.slane %v5287_v57, %v8416_v54  ;;  %v3566_v60 = vrot.slane %v2691_v63, %v8416_v54  ;;  %v3573_v36 = vrot.slane %v3559_v16, %v8416_v54  ;;  %v6606_v34 = vld [vmem:[#allocation3 + $0x160] sm:$0xff]  ;;  %v2444_v18 = vld [vmem:[#allocation2 + $0x5d0] ss:$2 sm:$0xff]  ;;  %v2640_v63 = vld [vmem:[#allocation2 + $0x5d1] ss:$2 sm:$0xff] }
 0x23c   :  { %v6210_v24 = vcombine.low %v6202_v41, %v6209_v25  ;;  %v6218_v5 = vrot.slane %v6211_v55, %v8416_v54  ;;  %v6225_v52 = vrot.slane %v4391_v39, %v8416_v54  ;;  %v4392_v27 = vcombine.high %v2740_v0, %v2740_v0  ;;  %v6634_v15 = vld [vmem:[#allocation3 + $0x320] sm:$0xff]  ;;  %v6607_v25 = vld [vmem:[#allocation3 + $0x168] sm:$0x3f] }
 0x23d   :  { %v5302_v17 = vcombine.low %v5294_v23, %v5301_v19  ;;  %6518 = vst.msk [vmem:[#allocation3 + $0x170] sm:$0xff] %vm2061_vm2, %v5286_v2  ;;  %v3574_v11 = vcombine.high %v3566_v60, %v3566_v60  ;;  %v4399_v12 = vrot.slane %v2740_v0, %v8416_v54  ;;  %v3575_v58 = vcombine.high %v3573_v36, %v3573_v36  ;;  %v6635_v55 = vld [vmem:[#allocation3 + $0x328] sm:$0x3f] }
 0x23e   :  { %v6226_v56 = vcombine.low %v6218_v5, %v6225_v52  ;;  %6574 = vst.msk [vmem:[#allocation3 + $0x330] sm:$0xff] %vm2061_vm2, %v6210_v24  ;;  %v2692_v61 = vmax.f32 %v2344_v29, %v2540_v51  ;;  %v2741_v14 = vmax.f32 %v2442_v28, %v2638_v6  ;;  %v4406_v43 = vrot.slane %v4392_v27, %v8416_v54  ;;  %v2348_v5 = vld [vmem:[#allocation2 + $0x2d0] ss:$2 sm:$0xff]  ;;  %v2544_v52 = vld [vmem:[#allocation2 + $0x2d1] ss:$2 sm:$0xff] }
 0x23f   :  { %6519 = vst.msk [vmem:[#allocation3 + $0x178] sm:$0x3f] %vm6472_vm3, %v5302_v17  ;;  %v5303_v48 = vcombine.low %v3566_v60, %v3574_v11  ;;  %v4407_v1 = vcombine.high %v4399_v12, %v4399_v12  ;;  %v2693_v9 = vmax.f32 %v2346_v21, %v2542_v8  ;;  %v5304_v59 = vcombine.low %v3573_v36, %v3575_v58  ;;  %v7527_v36 = vpop.f32.mrf.mxu1  ;;  %v2446_v27 = vld [vmem:[#allocation2 + $0x5e0] ss:$2 sm:$0xff] }
 0x240   :  { %6575 = vst.msk [vmem:[#allocation3 + $0x338] sm:$0x3f] %vm6472_vm3, %v6226_v56  ;;  %v3576_v31 = vcombine.high %v2692_v61, %v2692_v61  ;;  %v3583_v3 = vrot.slane %v2692_v61, %v8416_v54  ;;  %v4409_v4 = vcombine.high %v2741_v14, %v2741_v14  ;;  %v4408_v62 = vcombine.high %v4406_v43, %v4406_v43 }
 0x241   :  { %v5311_v35 = vrot.slane %v5303_v48, %v8416_v54  ;;  %v6227_v47 = vcombine.low %v4399_v12, %v4407_v1  ;;  %v4416_v45 = vrot.slane %v2741_v14, %v8416_v54  ;;  %v5318_v41 = vrot.slane %v5304_v59, %v8416_v54  ;;  %v2642_v12 = vld [vmem:[#allocation2 + $0x5e1] ss:$2 sm:$0xff]  ;;  %v1356_v59 = vpop.f32.mrf.mxu0 }
 0x242   :  { %v3590_v40 = vrot.slane %v3576_v31, %v8416_v54  ;;  %v3591_v38 = vcombine.high %v3583_v3, %v3583_v3  ;;  %v4423_v10 = vrot.slane %v4409_v4, %v8416_v54  ;;  %v6228_v44 = vcombine.low %v4406_v43, %v4408_v62  ;;  %v1846_v62 = vpop.f32.mrf.mxu1 }
 0x243   :  { %v6235_v37 = vrot.slane %v6227_v47, %v8416_v54  ;;  %v4424_v7 = vcombine.high %v4416_v45, %v4416_v45  ;;  %v3593_v26 = vcombine.high %v2693_v9, %v2693_v9  ;;  %v5319_v22 = vcombine.low %v5311_v35, %v5318_v41 }
 0x244   :  { %v6663_v50 = vld [vmem:[#allocation3 + $0x170] sm:$0xff]  ;;  %v5320_v20 = vcombine.low %v3583_v3, %v3591_v38  ;;  %v5334_v32 = vrot.slane %v3590_v40, %v8416_v54  ;;  %v6258_v49 = vrot.slane %v4423_v10, %v8416_v54  ;;  %v6242_v57 = vrot.slane %v6228_v44, %v8416_v54 }
 0x245   :  { %v6719_v53 = vmax.f32 %v6606_v34, %v6663_v50  ;;  %v6691_v13 = vld [vmem:[#allocation3 + $0x330] sm:$0xff]  ;;  %v6244_v0 = vcombine.low %v4416_v45, %v4424_v7  ;;  %v3592_v39 = vcombine.high %v3590_v40, %v3590_v40  ;;  %6520 = vst.msk [vmem:[#allocation3 + $0x180] sm:$0xff] %vm2061_vm2, %v5319_v22  ;;  %v3600_v23 = vrot.slane %v2693_v9, %v8416_v54  ;;  %v7383_v50 = vpop.f32.mrf.mxu0 }
 0x246   :  { %v6664_v16 = vld [vmem:[#allocation3 + $0x178] sm:$0x3f]  ;;  %v6747_v29 = vmax.f32 %v6634_v15, %v6691_v13  ;;  %v5327_v2 = vrot.slane %v5320_v20, %v8416_v54  ;;  %v3607_v19 = vrot.slane %v3593_v26, %v8416_v54  ;;  %v6243_v28 = vcombine.low %v6235_v37, %v6242_v57 }
 0x247   :  { %v6720_v60 = vmax.f32 %v6607_v25, %v6664_v16  ;;  %6775 = vst.msk [vmem:[%s10173_s3 + $0xb0] sm:$0xff] %vm2061_vm2, %v6719_v53  ;;  %v6692_v51 = vld [vmem:[#allocation3 + $0x338] sm:$0x3f]  ;;  %v6251_v6 = vrot.slane %v6244_v0, %v8416_v54  ;;  %v2742_v24 = vmax.f32 %v2444_v18, %v2640_v63  ;;  %v3608_v17 = vcombine.high %v3600_v23, %v3600_v23  ;;  %v1366_v16 = vpop.f32.mrf.mxu0 }
 0x248   :  { %v6748_v21 = vmax.f32 %v6635_v55, %v6692_v51  ;;  %6803 = vst.msk [vmem:[%s10173_s3 + $0x190] sm:$0xff] %vm2061_vm2, %v6747_v29  ;;  %v5335_v8 = vcombine.low %v5327_v2, %v5334_v32  ;;  %v5336_v11 = vcombine.low %v3592_v39, %v3600_v23  ;;  %6576 = vst.msk [vmem:[#allocation3 + $0x340] sm:$0xff] %vm2061_vm2, %v6243_v28  ;;  %v1957_v40 = vmax.f32 %v9996_v46, 0.0  ;;  %v7530_v46 = vpop.f32.mrf.mxu1 }
 0x249   :  { %6776 = vst.msk [vmem:[%s10173_s3 + $0xb8] sm:$0x3f] %vm6472_vm3, %v6720_v60  ;;  %v6259_v56 = vcombine.low %v6251_v6, %v6258_v49  ;;  %v4425_v58 = vcombine.high %v4423_v10, %v4423_v10  ;;  %v4426_v61 = vcombine.high %v2742_v24, %v2742_v24  ;;  %v4433_v14 = vrot.slane %v2742_v24, %v8416_v54 }
 0x24a   :  { %6804 = vst.msk [vmem:[%s10173_s3 + $0x198] sm:$0x3f] %vm6472_vm3, %v6748_v21  ;;  %6521 = vst.msk [vmem:[#allocation3 + $0x188] sm:$0x3f] %vm6472_vm3, %v5335_v8  ;;  %v5337_v48 = vcombine.low %v3608_v17, %v3607_v19  ;;  %v5344_v43 = vrot.slane %v5336_v11, %v8416_v54  ;;  %v2694_v1 = vmax.f32 %v2348_v5, %v2544_v52  ;;  %v2055_v49 = vmax.f32 %v9999_v33, 0.0  ;;  %v1856_v23 = vpop.f32.mrf.mxu1 }
 0x24b   :  { %v3609_v9 = vcombine.high %v3607_v19, %v3607_v19  ;;  %6577 = vst.msk [vmem:[#allocation3 + $0x348] sm:$0x3f] %vm6472_vm3, %v6259_v56  ;;  %v4440_v31 = vrot.slane %v4426_v61, %v8416_v54  ;;  %v4441_v3 = vcombine.high %v4433_v14, %v4433_v14  ;;  %v6260_v4 = vcombine.low %v4425_v58, %v4433_v14 }
 0x24c   :  { %v2743_v35 = vmax.f32 %v2446_v27, %v2642_v12  ;;  %v5351_v47 = vrot.slane %v5337_v48, %v8416_v54  ;;  %v3610_v45 = vcombine.high %v2694_v1, %v2694_v1  ;;  %v3617_v41 = vrot.slane %v2694_v1, %v8416_v54  ;;  %2154 = vst.msk [vmem:[#allocation2 + $0x2e0] sm:$0xff] %vm2061_vm2, %v1957_v40  ;;  %v6608_v12 = vld [vmem:[#allocation3 + $0x180] sm:$0xff] }
 0x24d   :  { %v6261_v38 = vcombine.low %v4441_v3, %v4440_v31  ;;  %v4442_v10 = vcombine.high %v4440_v31, %v4440_v31  ;;  %v1852_v26 = vadd.f32 %v9951_v42, %v7527_v36  ;;  %v6268_v22 = vrot.slane %v6260_v4, %v8416_v54  ;;  %2252 = vst.msk [vmem:[#allocation2 + $0x5f0] sm:$0xff] %vm2061_vm2, %v2055_v49 }
 0x24e   :  { %v4443_v34 = vcombine.high %v2743_v35, %v2743_v35  ;;  %v5352_v44 = vcombine.low %v5344_v43, %v5351_v47  ;;  %v3625_v37 = vcombine.high %v3617_v41, %v3617_v41  ;;  %v5353_v7 = vcombine.low %v3609_v9, %v3617_v41 }
 0x24f   :  { %v6275_v20 = vrot.slane %v6261_v38, %v8416_v54  ;;  %v4450_v32 = vrot.slane %v2743_v35, %v8416_v54  ;;  %v3624_v18 = vrot.slane %v3610_v45, %v8416_v54  ;;  %v1960_v53 = vmax.f32 %v10007_v30, 0.0  ;;  %v6636_v31 = vld [vmem:[#allocation3 + $0x340] sm:$0xff] }
 0x250   :  { %6522 = vst.msk [vmem:[#allocation3 + $0x190] sm:$0xff] %vm2061_vm2, %v5352_v44  ;;  %v5360_v63 = vrot.slane %v5353_v7, %v8416_v54  ;;  %v5367_v15 = vrot.slane %v3625_v37, %v8416_v54  ;;  %v4457_v57 = vrot.slane %v4443_v34, %v8416_v54  ;;  %v2058_v33 = vmax.f32 %v1852_v26, 0.0 }
 0x251   :  { %v6276_v13 = vcombine.low %v6268_v22, %v6275_v20  ;;  %v4458_v0 = vcombine.high %v4450_v32, %v4450_v32  ;;  %v6277_v39 = vcombine.low %v4442_v10, %v4450_v32  ;;  %2157 = vst.msk [vmem:[#allocation2 + $0x2f8] sm:$0xff] %vm2061_vm2, %v1960_v53  ;;  %v1357_v55 = vadd.f32 %v9951_v42, %v1356_v59  ;;  %v6609_v47 = vld [vmem:[#allocation3 + $0x188] sm:$0x3f] }
 0x252   :  { %v5368_v25 = vcombine.low %v5360_v63, %v5367_v15  ;;  %v1847_v2 = vadd.f32 %v9951_v42, %v1846_v62  ;;  %v3626_v19 = vcombine.high %v3624_v18, %v3624_v18  ;;  %2255 = vst.msk [vmem:[#allocation2 + $0x608] sm:$0xff] %vm2061_vm2, %v2058_v33  ;;  %v1372_v51 = vadd.f32 %v9951_v42, %v7383_v50  ;;  %v6637_v37 = vld [vmem:[#allocation3 + $0x348] sm:$0x3f] }
 0x253   :  { %6578 = vst.msk [vmem:[#allocation3 + $0x350] sm:$0xff] %vm2061_vm2, %v6276_v13  ;;  %v6284_v29 = vrot.slane %v6277_v39, %v8416_v54  ;;  %v6291_v30 = vrot.slane %v4458_v0, %v8416_v54  ;;  %v1959_v60 = vmax.f32 %v1357_v55, 0.0  ;;  %v1862_v28 = vadd.f32 %v9951_v42, %v7530_v46  ;;  %v2350_v5 = vld [vmem:[#allocation2 + $0x2e0] ss:$2 sm:$0xff]  ;;  %v2546_v52 = vld [vmem:[#allocation2 + $0x2e1] ss:$2 sm:$0xff] }
 0x254   :  { %6523 = vst.msk [vmem:[#allocation3 + $0x198] sm:$0x3f] %vm6472_vm3, %v5368_v25  ;;  %v4459_v6 = vcombine.high %v4457_v57, %v4457_v57  ;;  %v2057_v36 = vmax.f32 %v1847_v2, 0.0  ;;  %v1367_v21 = vadd.f32 %v9951_v42, %v1366_v16  ;;  %v2695_v8 = vmax.f32 %v2350_v5, %v2546_v52  ;;  %v2448_v43 = vld [vmem:[#allocation2 + $0x5f0] ss:$2 sm:$0xff] }
 0x255   :  { %v6292_v24 = vcombine.low %v6284_v29, %v6291_v30  ;;  %2156 = vst.msk [vmem:[#allocation2 + $0x2f0] sm:$0xff] %vm2061_vm2, %v1959_v60  ;;  %v1962_v17 = vmax.f32 %v1372_v51, 0.0  ;;  %v2060_v11 = vmax.f32 %v1862_v28, 0.0  ;;  %v1857_v27 = vadd.f32 %v9951_v42, %v1856_v23  ;;  %v2644_v1 = vld [vmem:[#allocation2 + $0x5f1] ss:$2 sm:$0xff] }
 0x256   :  { %2254 = vst.msk [vmem:[#allocation2 + $0x600] sm:$0xff] %vm2061_vm2, %v2057_v36  ;;  %v1961_v58 = vmax.f32 %v1367_v21, 0.0  ;;  %v3627_v14 = vcombine.high %v2695_v8, %v2695_v8  ;;  %v3634_v48 = vrot.slane %v2695_v8, %v8416_v54  ;;  %v5369_v59 = vcombine.low %v3624_v18, %v3626_v19 }
 0x257   :  { %v6665_v56 = vld [vmem:[#allocation3 + $0x190] sm:$0xff]  ;;  %6579 = vst.msk [vmem:[#allocation3 + $0x358] sm:$0x3f] %vm6472_vm3, %v6292_v24  ;;  %v2059_v9 = vmax.f32 %v1857_v27, 0.0  ;;  %v2744_v42 = vmax.f32 %v2448_v43, %v2644_v1  ;;  %v6293_v4 = vcombine.low %v4457_v57, %v4459_v6 }
 0x258   :  { %v6721_v61 = vmax.f32 %v6608_v12, %v6665_v56  ;;  %2159 = vst.msk [vmem:[#allocation2 + $0x308] sm:$0xff] %vm2061_vm2, %v1962_v17  ;;  %2257 = vst.msk [vmem:[#allocation2 + $0x618] sm:$0xff] %vm2061_vm2, %v2060_v11  ;;  %v3641_v35 = vrot.slane %v3627_v14, %v8416_v54  ;;  %v3642_v62 = vcombine.high %v3634_v48, %v3634_v48 }
 0x259   :  { %2158 = vst.msk [vmem:[#allocation2 + $0x300] sm:$0xff] %vm2061_vm2, %v1961_v58  ;;  %2256 = vst.msk [vmem:[#allocation2 + $0x610] sm:$0xff] %vm2061_vm2, %v2059_v9  ;;  %v4460_v40 = vcombine.high %v2744_v42, %v2744_v42  ;;  %v4467_v38 = vrot.slane %v2744_v42, %v8416_v54  ;;  %v5377_v7 = vrot.slane %v5369_v59, %v8416_v54 }
 0x25a   :  { %6777 = vst.msk [vmem:[%s10173_s3 + $0xc0] sm:$0xff] %vm2061_vm2, %v6721_v61  ;;  %v6693_v3 = vld [vmem:[#allocation3 + $0x350] sm:$0xff]  ;;  %v3643_v34 = vcombine.high %v3641_v35, %v3641_v35  ;;  %v5370_v44 = vcombine.low %v3634_v48, %v3642_v62  ;;  %v6301_v32 = vrot.slane %v6293_v4, %v8416_v54 }
 0x25b   :  { %v6749_v45 = vmax.f32 %v6636_v31, %v6693_v3  ;;  %v6666_v41 = vld [vmem:[#allocation3 + $0x198] sm:$0x3f]  ;;  %v4474_v26 = vrot.slane %v4460_v40, %v8416_v54  ;;  %v4475_v50 = vcombine.high %v4467_v38, %v4467_v38 }
 0x25c   :  { %v6722_v10 = vmax.f32 %v6609_v47, %v6666_v41  ;;  %v2352_v22 = vld [vmem:[#allocation2 + $0x2f0] ss:$2 sm:$0xff]  ;;  %v2548_v20 = vld [vmem:[#allocation2 + $0x2f1] ss:$2 sm:$0xff]  ;;  %v5384_v46 = vrot.slane %v5370_v44, %v8416_v54  ;;  %v5386_v18 = vcombine.low %v3641_v35, %v3643_v34 }
 0x25d   :  { %6805 = vst.msk [vmem:[%s10173_s3 + $0x1a0] sm:$0xff] %vm2061_vm2, %v6749_v45  ;;  %v2696_v63 = vmax.f32 %v2352_v22, %v2548_v20  ;;  %v2450_v15 = vld [vmem:[#allocation2 + $0x600] ss:$2 sm:$0xff]  ;;  %v2646_v53 = vld [vmem:[#allocation2 + $0x601] ss:$2 sm:$0xff]  ;;  %v4476_v57 = vcombine.high %v4474_v26, %v4474_v26  ;;  %v6294_v0 = vcombine.low %v4467_v38, %v4475_v50 }
 0x25e   :  { %6778 = vst.msk [vmem:[%s10173_s3 + $0xc8] sm:$0x3f] %vm6472_vm3, %v6722_v10  ;;  %v6694_v49 = vld [vmem:[#allocation3 + $0x358] sm:$0x3f]  ;;  %v2745_v39 = vmax.f32 %v2450_v15, %v2646_v53  ;;  %v5385_v25 = vcombine.low %v5377_v7, %v5384_v46  ;;  %v5393_v16 = vrot.slane %v5386_v18, %v8416_v54 }
 0x25f   :  { %v6750_v13 = vmax.f32 %v6637_v37, %v6694_v49  ;;  %v3644_v33 = vcombine.high %v2696_v63, %v2696_v63  ;;  %v3651_v55 = vrot.slane %v2696_v63, %v8416_v54  ;;  %v6308_v2 = vrot.slane %v6294_v0, %v8416_v54 }
 0x260   :  { %v2354_v29 = vld [vmem:[#allocation2 + $0x300] ss:$2 sm:$0xff]  ;;  %v2550_v30 = vld [vmem:[#allocation2 + $0x301] ss:$2 sm:$0xff]  ;;  %v6310_v23 = vcombine.low %v4474_v26, %v4476_v57  ;;  %v4477_v19 = vcombine.high %v2745_v39, %v2745_v39  ;;  %v4484_v60 = vrot.slane %v2745_v39, %v8416_v54  ;;  %6524 = vst.msk [vmem:[#allocation3 + $0x1a0] sm:$0xff] %vm2061_vm2, %v5385_v25 }
 0x261   :  { %6806 = vst.msk [vmem:[%s10173_s3 + $0x1a8] sm:$0x3f] %vm6472_vm3, %v6750_v13  ;;  %v3658_v51 = vrot.slane %v3644_v33, %v8416_v54  ;;  %v3659_v28 = vcombine.high %v3651_v55, %v3651_v55  ;;  %v5400_v6 = vrot.slane %v3651_v55, %v8416_v54  ;;  %v2697_v24 = vmax.f32 %v2354_v29, %v2550_v30  ;;  %v2452_v5 = vld [vmem:[#allocation2 + $0x610] ss:$2 sm:$0xff]  ;;  %v2648_v52 = vld [vmem:[#allocation2 + $0x611] ss:$2 sm:$0xff] }
 0x262   :  { %v6309_v36 = vcombine.low %v6301_v32, %v6308_v2  ;;  %v4491_v21 = vrot.slane %v4477_v19, %v8416_v54  ;;  %v6317_v8 = vrot.slane %v6310_v23, %v8416_v54  ;;  %v4492_v11 = vcombine.high %v4484_v60, %v4484_v60 }
 0x263   :  { %v5401_v17 = vcombine.low %v5393_v16, %v5400_v6  ;;  %v6324_v27 = vrot.slane %v4484_v60, %v8416_v54  ;;  %v3660_v12 = vcombine.high %v3658_v51, %v3658_v51  ;;  %v5402_v56 = vcombine.low %v3659_v28, %v3658_v51 }
 0x264   :  { %6580 = vst.msk [vmem:[#allocation3 + $0x360] sm:$0xff] %vm2061_vm2, %v6309_v36  ;;  %v3661_v58 = vcombine.high %v2697_v24, %v2697_v24  ;;  %v3668_v61 = vrot.slane %v2697_v24, %v8416_v54  ;;  %v2746_v14 = vmax.f32 %v2452_v5, %v2648_v52  ;;  %v4493_v43 = vcombine.high %v4491_v21, %v4491_v21 }
 0x265   :  { %6525 = vst.msk [vmem:[#allocation3 + $0x1a8] sm:$0x3f] %vm6472_vm3, %v5401_v17  ;;  %v6325_v48 = vcombine.low %v6317_v8, %v6324_v27  ;;  %v6326_v42 = vcombine.low %v4492_v11, %v4491_v21  ;;  %v5410_v4 = vrot.slane %v5402_v56, %v8416_v54 }
 0x266   :  { %v3675_v1 = vrot.slane %v3661_v58, %v8416_v54  ;;  %v3676_v9 = vcombine.high %v3668_v61, %v3668_v61  ;;  %v5403_v59 = vcombine.low %v3660_v12, %v3668_v61  ;;  %v4494_v31 = vcombine.high %v2746_v14, %v2746_v14 }
 0x267   :  { %6581 = vst.msk [vmem:[#allocation3 + $0x368] sm:$0x3f] %vm6472_vm3, %v6325_v48  ;;  %v4501_v3 = vrot.slane %v2746_v14, %v8416_v54  ;;  %v6334_v44 = vrot.slane %v6326_v42, %v8416_v54  ;;  %v6610_v46 = vld [vmem:[#allocation3 + $0x1a0] sm:$0xff] }
 0x268   :  { %v3677_v35 = vcombine.high %v3675_v1, %v3675_v1  ;;  %v5417_v62 = vrot.slane %v5403_v59, %v8416_v54  ;;  %v5419_v47 = vcombine.low %v3676_v9, %v3675_v1  ;;  %v4508_v45 = vrot.slane %v4494_v31, %v8416_v54 }
 0x269   :  { %v4509_v41 = vcombine.high %v4501_v3, %v4501_v3  ;;  %v6327_v40 = vcombine.low %v4493_v43, %v4501_v3 }
 0x26a   :  { %v5418_v38 = vcombine.low %v5410_v4, %v5417_v62  ;;  %v5426_v10 = vrot.slane %v5419_v47, %v8416_v54  ;;  %v5433_v34 = vrot.slane %v3677_v35, %v8416_v54  ;;  %v4510_v37 = vcombine.high %v4508_v45, %v4508_v45 }
 0x26b   :  { %v6341_v7 = vrot.slane %v6327_v40, %v8416_v54  ;;  %v6343_v26 = vcombine.low %v4509_v41, %v4508_v45  ;;  %v6638_v13 = vld [vmem:[#allocation3 + $0x360] sm:$0xff] }
 0x26c   :  { %v5434_v50 = vcombine.low %v5426_v10, %v5433_v34  ;;  %6526 = vst.msk [vmem:[#allocation3 + $0x1b0] sm:$0xff] %vm2061_vm2, %v5418_v38  ;;  %v6357_v32 = vrot.slane %v4510_v37, %v8416_v54  ;;  %v6611_v15 = vld [vmem:[#allocation3 + $0x1a8] sm:$0x3f] }
 0x26d   :  { %v6342_v22 = vcombine.low %v6334_v44, %v6341_v7  ;;  %v6350_v20 = vrot.slane %v6343_v26, %v8416_v54 }
 0x26e   :  { %6527 = vst.msk [vmem:[#allocation3 + $0x1b8] sm:$0x3f] %vm6472_vm3, %v5434_v50  ;;  %v6639_v39 = vld [vmem:[#allocation3 + $0x368] sm:$0x3f] }
 0x26f   :  { %v6358_v49 = vcombine.low %v6350_v20, %v6357_v32  ;;  %6582 = vst.msk [vmem:[#allocation3 + $0x370] sm:$0xff] %vm2061_vm2, %v6342_v22 }
 0x271   :  { %6583 = vst.msk [vmem:[#allocation3 + $0x378] sm:$0x3f] %vm6472_vm3, %v6358_v49 }
 0x273   :  { %v6667_v18 = vld [vmem:[#allocation3 + $0x1b0] sm:$0xff] }
 0x274   :  { %v6723_v63 = vmax.f32 %v6610_v46, %v6667_v18 }
 0x275   :  { %v6668_v53 = vld [vmem:[#allocation3 + $0x1b8] sm:$0x3f] }
 0x276   :  { %v6724_v57 = vmax.f32 %v6611_v15, %v6668_v53  ;;  %6779 = vst.msk [vmem:[%s10173_s3 + $0xd0] sm:$0xff] %vm2061_vm2, %v6723_v63  ;;  %v6695_v54 = vld [vmem:[#allocation3 + $0x370] sm:$0xff] }
 0x277   :  { %v6751_v0 = vmax.f32 %v6638_v13, %v6695_v54 }
 0x278   :  { %6780 = vst.msk [vmem:[%s10173_s3 + $0xd8] sm:$0x3f] %vm6472_vm3, %v6724_v57  ;;  %v6696_v25 = vld [vmem:[#allocation3 + $0x378] sm:$0x3f] }
 0x279   :  { %v6752_v33 = vmax.f32 %v6639_v39, %v6696_v25  ;;  %6807 = vst.msk [vmem:[%s10173_s3 + $0x1b0] sm:$0xff] %vm2061_vm2, %v6751_v0 }
 0x27b   :  { %6808 = vst.msk [vmem:[%s10173_s3 + $0x1b8] sm:$0x3f] %vm6472_vm3, %v6752_v33 }

// kernel: dann_forward.4
= control target key start
LH: loop header
LB: loop body
LE: loop exit
PB: predicated region body
PF: predicated region fallthrough
CT: control target
= control target key end

     0   :  { %v2889_v0 = vmov 0.0   ;;  %vm2890_vm0 = vmmov 0   ;;  %vm296_vm1 = vcmask 261120   ;;  %vm1157_vm2 = vcmask 392192   ;;  %s4305_s1 = inlined_call_operand.vmem [shape: f32[800,48], index: 1, kind: input, shape index: {}]   ;;  %s4306_s0 = inlined_call_operand.vmem [shape: f32[200,800], index: 0, kind: input, shape index: {}]   ;;  %s4307_s2 = inlined_call_operand.vmem [shape: f32[1,48], index: 2, kind: input, shape index: {}]   ;;  %s4308_s3 = inlined_call_operand.vmem [shape: f32[2,5,5,48], index: 3, kind: output, shape index: {}]  }
   0x1   :  { %372 = vmatprep.subr.mxu0 %v2889_v0  ;;  %v204_v1 = vld [vmem:[%s4305_s1 + $0x78] sm:$0xff]  ;;  %562 = vmatprep.subr.mxu1 %v2889_v0  ;;  %v203_v3 = vld [vmem:[%s4305_s1 + $0x70] sm:$0xff]  ;;  %v202_v5 = vld [vmem:[%s4305_s1 + $0x68] sm:$0xff]  ;;  %vm2672_vm3 = vcmask 389120  }
   0x2   :  { %v236_v2 = vld [vmem:[%s4305_s1 + $0x178] sm:$0xff]  ;;  %373 = vmatpush1.msra.mxu0 %v204_v1  ;;  %v235_v4 = vld [vmem:[%s4305_s1 + $0x170] sm:$0xff]  ;;  %v234_v6 = vld [vmem:[%s4305_s1 + $0x168] sm:$0xff] }
   0x3   :  { %563 = vmatpush1.msra.mxu1 %v236_v2  ;;  %374 = vmatprep.subr.mxu0 %v2889_v0  ;;  %v201_v7 = vld [vmem:[%s4305_s1 + $0x60] sm:$0xff]  ;;  %v200_v9 = vld [vmem:[%s4305_s1 + $0x58] sm:$0xff]  ;;  %v199_v11 = vld [vmem:[%s4305_s1 + $0x50] sm:$0xff] }
   0x4   :  { %564 = vmatprep.subr.mxu1 %v2889_v0  ;;  %375 = vmatpush1.msra.mxu0 %v203_v3  ;;  %v233_v8 = vld [vmem:[%s4305_s1 + $0x160] sm:$0xff]  ;;  %v232_v10 = vld [vmem:[%s4305_s1 + $0x158] sm:$0xff]  ;;  %v231_v12 = vld [vmem:[%s4305_s1 + $0x150] sm:$0xff] }
   0x5   :  { %565 = vmatpush1.msra.mxu1 %v235_v4  ;;  %376 = vmatprep.subr.mxu0 %v2889_v0  ;;  %v198_v13 = vld [vmem:[%s4305_s1 + $0x48] sm:$0xff]  ;;  %v197_v15 = vld [vmem:[%s4305_s1 + $0x40] sm:$0xff]  ;;  %v196_v17 = vld [vmem:[%s4305_s1 + $0x38] sm:$0xff] }
   0x6   :  { %566 = vmatprep.subr.mxu1 %v2889_v0  ;;  %377 = vmatpush1.msra.mxu0 %v202_v5  ;;  %v230_v14 = vld [vmem:[%s4305_s1 + $0x148] sm:$0xff]  ;;  %v229_v16 = vld [vmem:[%s4305_s1 + $0x140] sm:$0xff]  ;;  %v228_v18 = vld [vmem:[%s4305_s1 + $0x138] sm:$0xff] }
   0x7   :  { %567 = vmatpush1.msra.mxu1 %v234_v6  ;;  %378 = vmatprep.subr.mxu0 %v2889_v0  ;;  %v195_v19 = vld [vmem:[%s4305_s1 + $0x30] sm:$0xff]  ;;  %v194_v21 = vld [vmem:[%s4305_s1 + $0x28] sm:$0xff]  ;;  %v193_v23 = vld [vmem:[%s4305_s1 + $0x20] sm:$0xff] }
   0x8   :  { %568 = vmatprep.subr.mxu1 %v2889_v0  ;;  %379 = vmatpush1.msra.mxu0 %v201_v7  ;;  %v227_v20 = vld [vmem:[%s4305_s1 + $0x130] sm:$0xff]  ;;  %v226_v22 = vld [vmem:[%s4305_s1 + $0x128] sm:$0xff]  ;;  %v225_v24 = vld [vmem:[%s4305_s1 + $0x120] sm:$0xff] }
   0x9   :  { %569 = vmatpush1.msra.mxu1 %v233_v8  ;;  %380 = vmatprep.subr.mxu0 %v2889_v0  ;;  %v192_v25 = vld [vmem:[%s4305_s1 + $0x18] sm:$0xff]  ;;  %v191_v27 = vld [vmem:[%s4305_s1 + $0x10] sm:$0xff]  ;;  %v190_v29 = vld [vmem:[%s4305_s1 + $0x8] sm:$0xff] }
   0xa   :  { %570 = vmatprep.subr.mxu1 %v2889_v0  ;;  %381 = vmatpush1.msra.mxu0 %v200_v9  ;;  %v224_v26 = vld [vmem:[%s4305_s1 + $0x118] sm:$0xff]  ;;  %v223_v28 = vld [vmem:[%s4305_s1 + $0x110] sm:$0xff]  ;;  %v222_v30 = vld [vmem:[%s4305_s1 + $0x108] sm:$0xff] }
   0xb   :  { %571 = vmatpush1.msra.mxu1 %v232_v10  ;;  %382 = vmatprep.subr.mxu0 %v2889_v0  ;;  %v189_v31 = vld [vmem:[%s4305_s1] sm:$0xff]  ;;  %v220_v33 = vld [vmem:[%s4305_s1 + $0xf8] sm:$0xff]  ;;  %v219_v35 = vld [vmem:[%s4305_s1 + $0xf0] sm:$0xff] }
   0xc   :  { %572 = vmatprep.subr.mxu1 %v2889_v0  ;;  %383 = vmatpush1.msra.mxu0 %v199_v11  ;;  %v221_v32 = vld [vmem:[%s4305_s1 + $0x100] sm:$0xff]  ;;  %v252_v34 = vld [vmem:[%s4305_s1 + $0x1f8] sm:$0xff]  ;;  %v251_v36 = vld [vmem:[%s4305_s1 + $0x1f0] sm:$0xff] }
   0xd   :  { %573 = vmatpush1.msra.mxu1 %v231_v12  ;;  %384 = vmatprep.subr.mxu0 %v2889_v0  ;;  %v218_v37 = vld [vmem:[%s4305_s1 + $0xe8] sm:$0xff]  ;;  %v217_v39 = vld [vmem:[%s4305_s1 + $0xe0] sm:$0xff]  ;;  %v216_v41 = vld [vmem:[%s4305_s1 + $0xd8] sm:$0xff] }
   0xe   :  { %574 = vmatprep.subr.mxu1 %v2889_v0  ;;  %385 = vmatpush1.msra.mxu0 %v198_v13  ;;  %v250_v38 = vld [vmem:[%s4305_s1 + $0x1e8] sm:$0xff]  ;;  %v249_v40 = vld [vmem:[%s4305_s1 + $0x1e0] sm:$0xff]  ;;  %v248_v42 = vld [vmem:[%s4305_s1 + $0x1d8] sm:$0xff] }
   0xf   :  { %575 = vmatpush1.msra.mxu1 %v230_v14  ;;  %386 = vmatprep.subr.mxu0 %v2889_v0  ;;  %v215_v43 = vld [vmem:[%s4305_s1 + $0xd0] sm:$0xff]  ;;  %v214_v45 = vld [vmem:[%s4305_s1 + $0xc8] sm:$0xff]  ;;  %v213_v47 = vld [vmem:[%s4305_s1 + $0xc0] sm:$0xff] }
  0x10   :  { %576 = vmatprep.subr.mxu1 %v2889_v0  ;;  %387 = vmatpush1.msra.mxu0 %v197_v15  ;;  %v247_v44 = vld [vmem:[%s4305_s1 + $0x1d0] sm:$0xff]  ;;  %v246_v46 = vld [vmem:[%s4305_s1 + $0x1c8] sm:$0xff]  ;;  %v245_v48 = vld [vmem:[%s4305_s1 + $0x1c0] sm:$0xff] }
  0x11   :  { %577 = vmatpush1.msra.mxu1 %v229_v16  ;;  %388 = vmatprep.subr.mxu0 %v2889_v0  ;;  %v212_v49 = vld [vmem:[%s4305_s1 + $0xb8] sm:$0xff]  ;;  %v211_v51 = vld [vmem:[%s4305_s1 + $0xb0] sm:$0xff]  ;;  %v210_v53 = vld [vmem:[%s4305_s1 + $0xa8] sm:$0xff] }
  0x12   :  { %578 = vmatprep.subr.mxu1 %v2889_v0  ;;  %389 = vmatpush1.msra.mxu0 %v196_v17  ;;  %v244_v50 = vld [vmem:[%s4305_s1 + $0x1b8] sm:$0xff]  ;;  %v243_v52 = vld [vmem:[%s4305_s1 + $0x1b0] sm:$0xff]  ;;  %v242_v54 = vld [vmem:[%s4305_s1 + $0x1a8] sm:$0xff] }
  0x13   :  { %579 = vmatpush1.msra.mxu1 %v228_v18  ;;  %390 = vmatprep.subr.mxu0 %v2889_v0  ;;  %v209_v55 = vld [vmem:[%s4305_s1 + $0xa0] sm:$0xff]  ;;  %v208_v57 = vld [vmem:[%s4305_s1 + $0x98] sm:$0xff]  ;;  %v207_v59 = vld [vmem:[%s4305_s1 + $0x90] sm:$0xff] }
  0x14   :  { %580 = vmatprep.subr.mxu1 %v2889_v0  ;;  %391 = vmatpush1.msra.mxu0 %v195_v19  ;;  %v241_v56 = vld [vmem:[%s4305_s1 + $0x1a0] sm:$0xff]  ;;  %v240_v58 = vld [vmem:[%s4305_s1 + $0x198] sm:$0xff]  ;;  %v239_v60 = vld [vmem:[%s4305_s1 + $0x190] sm:$0xff] }
  0x15   :  { %581 = vmatpush1.msra.mxu1 %v227_v20  ;;  %392 = vmatprep.subr.mxu0 %v2889_v0  ;;  %v206_v61 = vld [vmem:[%s4305_s1 + $0x88] sm:$0xff]  ;;  %v205_v1 = vld [vmem:[%s4305_s1 + $0x80] sm:$0xff]  ;;  %v17_v4 = vld [vmem:[%s4306_s0 + $0x18] sm:$0xff] }
  0x16   :  { %582 = vmatprep.subr.mxu1 %v2889_v0  ;;  %393 = vmatpush1.msra.mxu0 %v194_v21  ;;  %v238_v62 = vld [vmem:[%s4305_s1 + $0x188] sm:$0xff]  ;;  %v14_v2 = vld [vmem:[%s4306_s0] sm:$0xff]  ;;  %v16_v5 = vld [vmem:[%s4306_s0 + $0x10] sm:$0xff] }
  0x17   :  { %583 = vmatpush1.msra.mxu1 %v226_v22  ;;  %394 = vmatprep.subr.mxu0 %v2889_v0  ;;  %v15_v63 = vld [vmem:[%s4306_s0 + $0x8] sm:$0xff]  ;;  %v237_v3 = vld [vmem:[%s4305_s1 + $0x180] sm:$0xff]  ;;  %v268_v6 = vld [vmem:[%s4305_s1 + $0x278] sm:$0xff] }
  0x18   :  { %584 = vmatprep.subr.mxu1 %v2889_v0  ;;  %395 = vmatpush1.msra.mxu0 %v193_v23  ;;  %v22_v7 = vld [vmem:[%s4306_s0 + $0x40] sm:$0xff]  ;;  %v288_v8 = vld [vmem:[%s4305_s1 + $0x318] sm:$0xff]  ;;  %v24_v10 = vld [vmem:[%s4306_s0 + $0x50] sm:$0xff] }
  0x19   :  { %585 = vmatpush1.msra.mxu1 %v225_v24  ;;  %396 = vmatprep.subr.mxu0 %v2889_v0  ;;  %v21_v9 = vld [vmem:[%s4306_s0 + $0x38] sm:$0xff]  ;;  %v23_v11 = vld [vmem:[%s4306_s0 + $0x48] sm:$0xff]  ;;  %v267_v12 = vld [vmem:[%s4305_s1 + $0x270] sm:$0xff] }
  0x1a   :  { %586 = vmatprep.subr.mxu1 %v2889_v0  ;;  %397 = vmatpush1.msra.mxu0 %v192_v25  ;;  %v29_v13 = vld [vmem:[%s4306_s0 + $0x78] sm:$0xff]  ;;  %v28_v14 = vld [vmem:[%s4306_s0 + $0x70] sm:$0xff]  ;;  %v31_v15 = vld [vmem:[%s4306_s0 + $0x88] sm:$0xff] }
  0x1b   :  { %587 = vmatpush1.msra.mxu1 %v224_v26  ;;  %398 = vmatprep.subr.mxu0 %v2889_v0  ;;  %v266_v16 = vld [vmem:[%s4305_s1 + $0x268] sm:$0xff]  ;;  %v36_v17 = vld [vmem:[%s4306_s0 + $0xb0] sm:$0xff]  ;;  %v30_v18 = vld [vmem:[%s4306_s0 + $0x80] sm:$0xff] }
  0x1c   :  { %588 = vmatprep.subr.mxu1 %v2889_v0  ;;  %399 = vmatpush1.msra.mxu0 %v191_v27  ;;  %v265_v19 = vld [vmem:[%s4305_s1 + $0x260] sm:$0xff]  ;;  %v35_v21 = vld [vmem:[%s4306_s0 + $0xa8] sm:$0xff]  ;;  %v264_v22 = vld [vmem:[%s4305_s1 + $0x258] sm:$0xff] }
  0x1d   :  { %589 = vmatpush1.msra.mxu1 %v223_v28  ;;  %400 = vmatprep.subr.mxu0 %v2889_v0  ;;  %v38_v20 = vld [vmem:[%s4306_s0 + $0xc0] sm:$0xff]  ;;  %v43_v23 = vld [vmem:[%s4306_s0 + $0xe8] sm:$0xff]  ;;  %v37_v24 = vld [vmem:[%s4306_s0 + $0xb8] sm:$0xff] }
  0x1e   :  { %590 = vmatprep.subr.mxu1 %v2889_v0  ;;  %401 = vmatpush1.msra.mxu0 %v190_v29  ;;  %v45_v25 = vld [vmem:[%s4306_s0 + $0xf8] sm:$0xff]  ;;  %v263_v26 = vld [vmem:[%s4305_s1 + $0x250] sm:$0xff]  ;;  %v42_v27 = vld [vmem:[%s4306_s0 + $0xe0] sm:$0xff] }
  0x1f   :  { %591 = vmatpush1.msra.mxu1 %v222_v30  ;;  %402 = vmatprep.subr.mxu0 %v2889_v0  ;;  %v50_v28 = vld [vmem:[%s4306_s0 + $0x120] sm:$0xff]  ;;  %v262_v29 = vld [vmem:[%s4305_s1 + $0x248] sm:$0xff]  ;;  %v44_v30 = vld [vmem:[%s4306_s0 + $0xf0] sm:$0xff] }
  0x20   :  { %592 = vmatprep.subr.mxu1 %v2889_v0  ;;  %403 = vmatpush1.msra.mxu0 %v189_v31  ;;  %v52_v31 = vld [vmem:[%s4306_s0 + $0x130] sm:$0xff] }
  0x21   :  { %593 = vmatpush1.msra.mxu1 %v221_v32  ;;  %404 = vmatprep.subr.mxu0 %v2889_v0  ;;  %v261_v32 = vld [vmem:[%s4305_s1 + $0x240] sm:$0xff] }
  0x22   :  { %594 = vmatprep.subr.mxu1 %v2889_v0  ;;  %405 = vmatpush2.msra.mxu0 %v220_v33  ;;  %v49_v33 = vld [vmem:[%s4306_s0 + $0x118] sm:$0xff] }
  0x23   :  { %595 = vmatpush2.msra.mxu1 %v252_v34  ;;  %406 = vmatprep.subr.mxu0 %v2889_v0  ;;  %v57_v34 = vld [vmem:[%s4306_s0 + $0x158] sm:$0xff] }
  0x24   :  { %596 = vmatprep.subr.mxu1 %v2889_v0  ;;  %407 = vmatpush2.msra.mxu0 %v219_v35  ;;  %v260_v35 = vld [vmem:[%s4305_s1 + $0x238] sm:$0xff] }
  0x25   :  { %597 = vmatpush2.msra.mxu1 %v251_v36  ;;  %408 = vmatprep.subr.mxu0 %v2889_v0  ;;  %v51_v36 = vld [vmem:[%s4306_s0 + $0x128] sm:$0xff] }
  0x26   :  { %598 = vmatprep.subr.mxu1 %v2889_v0  ;;  %409 = vmatpush2.msra.mxu0 %v218_v37  ;;  %v59_v37 = vld [vmem:[%s4306_s0 + $0x168] sm:$0xff] }
  0x27   :  { %599 = vmatpush2.msra.mxu1 %v250_v38  ;;  %410 = vmatprep.subr.mxu0 %v2889_v0  ;;  %v287_v38 = vld [vmem:[%s4305_s1 + $0x310] sm:$0xff] }
  0x28   :  { %600 = vmatprep.subr.mxu1 %v2889_v0  ;;  %411 = vmatpush2.msra.mxu0 %v217_v39  ;;  %v56_v39 = vld [vmem:[%s4306_s0 + $0x150] sm:$0xff] }
  0x29   :  { %601 = vmatpush2.msra.mxu1 %v249_v40  ;;  %412 = vmatprep.subr.mxu0 %v2889_v0  ;;  %v64_v40 = vld [vmem:[%s4306_s0 + $0x190] sm:$0xff] }
  0x2a   :  { %602 = vmatprep.subr.mxu1 %v2889_v0  ;;  %413 = vmatpush2.msra.mxu0 %v216_v41  ;;  %v259_v41 = vld [vmem:[%s4305_s1 + $0x230] sm:$0xff] }
  0x2b   :  { %603 = vmatpush2.msra.mxu1 %v248_v42  ;;  %414 = vmatprep.subr.mxu0 %v2889_v0  ;;  %v58_v42 = vld [vmem:[%s4306_s0 + $0x160] sm:$0xff] }
  0x2c   :  { %604 = vmatprep.subr.mxu1 %v2889_v0  ;;  %415 = vmatpush2.msra.mxu0 %v215_v43  ;;  %v66_v43 = vld [vmem:[%s4306_s0 + $0x1a0] sm:$0xff] }
  0x2d   :  { %605 = vmatpush2.msra.mxu1 %v247_v44  ;;  %416 = vmatprep.subr.mxu0 %v2889_v0  ;;  %v258_v44 = vld [vmem:[%s4305_s1 + $0x228] sm:$0xff] }
  0x2e   :  { %606 = vmatprep.subr.mxu1 %v2889_v0  ;;  %417 = vmatpush2.msra.mxu0 %v214_v45  ;;  %v63_v45 = vld [vmem:[%s4306_s0 + $0x188] sm:$0xff] }
  0x2f   :  { %607 = vmatpush2.msra.mxu1 %v246_v46  ;;  %418 = vmatprep.subr.mxu0 %v2889_v0  ;;  %v71_v46 = vld [vmem:[%s4306_s0 + $0x1c8] sm:$0xff] }
  0x30   :  { %608 = vmatprep.subr.mxu1 %v2889_v0  ;;  %419 = vmatpush2.msra.mxu0 %v213_v47  ;;  %v257_v47 = vld [vmem:[%s4305_s1 + $0x220] sm:$0xff] }
  0x31   :  { %609 = vmatpush2.msra.mxu1 %v245_v48  ;;  %420 = vmatprep.subr.mxu0 %v2889_v0  ;;  %v65_v48 = vld [vmem:[%s4306_s0 + $0x198] sm:$0xff] }
  0x32   :  { %610 = vmatprep.subr.mxu1 %v2889_v0  ;;  %421 = vmatpush2.msra.mxu0 %v212_v49  ;;  %v73_v49 = vld [vmem:[%s4306_s0 + $0x1d8] sm:$0xff] }
  0x33   :  { %611 = vmatpush2.msra.mxu1 %v244_v50  ;;  %422 = vmatprep.subr.mxu0 %v2889_v0  ;;  %v256_v50 = vld [vmem:[%s4305_s1 + $0x218] sm:$0xff] }
  0x34   :  { %612 = vmatprep.subr.mxu1 %v2889_v0  ;;  %423 = vmatpush2.msra.mxu0 %v211_v51  ;;  %v70_v51 = vld [vmem:[%s4306_s0 + $0x1c0] sm:$0xff] }
  0x35   :  { %613 = vmatpush2.msra.mxu1 %v243_v52  ;;  %424 = vmatprep.subr.mxu0 %v2889_v0  ;;  %v78_v52 = vld [vmem:[%s4306_s0 + $0x200] sm:$0xff] }
  0x36   :  { %614 = vmatprep.subr.mxu1 %v2889_v0  ;;  %425 = vmatpush2.msra.mxu0 %v210_v53  ;;  %v255_v53 = vld [vmem:[%s4305_s1 + $0x210] sm:$0xff] }
  0x37   :  { %615 = vmatpush2.msra.mxu1 %v242_v54  ;;  %426 = vmatprep.subr.mxu0 %v2889_v0  ;;  %v72_v54 = vld [vmem:[%s4306_s0 + $0x1d0] sm:$0xff] }
  0x38   :  { %616 = vmatprep.subr.mxu1 %v2889_v0  ;;  %427 = vmatpush2.msra.mxu0 %v209_v55  ;;  %v80_v55 = vld [vmem:[%s4306_s0 + $0x210] sm:$0xff] }
  0x39   :  { %617 = vmatpush2.msra.mxu1 %v241_v56  ;;  %428 = vmatprep.subr.mxu0 %v2889_v0  ;;  %v254_v56 = vld [vmem:[%s4305_s1 + $0x208] sm:$0xff] }
  0x3a   :  { %618 = vmatprep.subr.mxu1 %v2889_v0  ;;  %429 = vmatpush2.msra.mxu0 %v208_v57  ;;  %v77_v57 = vld [vmem:[%s4306_s0 + $0x1f8] sm:$0xff] }
  0x3b   :  { %619 = vmatpush2.msra.mxu1 %v240_v58  ;;  %430 = vmatprep.subr.mxu0 %v2889_v0  ;;  %v85_v58 = vld [vmem:[%s4306_s0 + $0x238] sm:$0xff] }
  0x3c   :  { %620 = vmatprep.subr.mxu1 %v2889_v0  ;;  %431 = vmatpush2.msra.mxu0 %v207_v59  ;;  %v253_v59 = vld [vmem:[%s4305_s1 + $0x200] sm:$0xff] }
  0x3d   :  { %621 = vmatpush2.msra.mxu1 %v239_v60  ;;  %432 = vmatprep.subr.mxu0 %v2889_v0  ;;  %v79_v60 = vld [vmem:[%s4306_s0 + $0x208] sm:$0xff] }
  0x3e   :  { %622 = vmatprep.subr.mxu1 %v2889_v0  ;;  %433 = vmatpush2.msra.mxu0 %v206_v61  ;;  %v87_v61 = vld [vmem:[%s4306_s0 + $0x248] sm:$0xff] }
  0x3f   :  { %623 = vmatpush2.msra.mxu1 %v238_v62  ;;  %434 = vmatprep.subr.mxu0 %v2889_v0  ;;  %v284_v62 = vld [vmem:[%s4305_s1 + $0x2f8] sm:$0xff] }
  0x40   :  { %436 = vmatprep.mubr.f32.mxu0 %v15_v63  ;;  %435 = vmatpush2.msra.mxu0 %v205_v1  ;;  %v84_v63 = vld [vmem:[%s4306_s0 + $0x230] sm:$0xff] }
  0x41   :  { %624 = vmatprep.subr.mxu1 %v2889_v0  ;;  %437 = vmatmul.mubr.f32.vlgmr.msra.gmra.mxu0 %v14_v2  ;;  %v92_v1 = vld [vmem:[%s4306_s0 + $0x270] sm:$0xff]  ;;  %v286_v2 = vld [vmem:[%s4305_s1 + $0x308] sm:$0xff] }
  0x42   :  { %625 = vmatpush2.msra.mxu1 %v237_v3  ;;  %626 = vmatprep.mubr.f32.mxu1 %v17_v4  ;;  %v86_v3 = vld [vmem:[%s4306_s0 + $0x240] sm:$0xff] }
  0x43   :  { %752 = vmatprep.subr.mxu0 %v2889_v0  ;;  %627 = vmatmul.mubr.f32.vlgmr.msra.gmra.mxu1 %v16_v5  ;;  %v94_v4 = vld [vmem:[%s4306_s0 + $0x280] sm:$0xff]  ;;  %v283_v5 = vld [vmem:[%s4305_s1 + $0x2f0] sm:$0xff] }
  0x44   :  { %753 = vmatpush1.msra.mxu0 %v268_v6  ;;  %2803 = vmatprep.subr.mxu1 %v2889_v0  ;;  %v91_v6 = vld [vmem:[%s4306_s0 + $0x268] sm:$0xff] }
  0x45   :  { %441 = vmatprep.mubr.f32.mxu0 %v22_v7  ;;  %2804 = vmatpush3.msra.mxu1 %v288_v8  ;;  %v99_v7 = vld [vmem:[%s4306_s0 + $0x2a8] sm:$0xff] }
  0x46   :  { %442 = vmatmul.mubr.f32.gmra.mxu0 %v21_v9  ;;  %631 = vmatprep.mubr.f32.mxu1 %v24_v10  ;;  %v282_v8 = vld [vmem:[%s4305_s1 + $0x2e8] sm:$0xff]  ;;  %v93_v9 = vld [vmem:[%s4306_s0 + $0x278] sm:$0xff] }
  0x47   :  { %754 = vmatprep.subr.mxu0 %v2889_v0  ;;  %632 = vmatmul.mubr.f32.gmra.mxu1 %v23_v11  ;;  %v101_v10 = vld [vmem:[%s4306_s0 + $0x2b8] sm:$0xff]  ;;  %v281_v11 = vld [vmem:[%s4305_s1 + $0x2e0] sm:$0xff] }
  0x48   :  { %755 = vmatpush1.msra.mxu0 %v267_v12  ;;  %446 = vmatprep.mubr.f32.mxu0 %v29_v13  ;;  %v98_v12 = vld [vmem:[%s4306_s0 + $0x2a0] sm:$0xff] }
  0x49   :  { %756 = vmatprep.subr.mxu0 %v2889_v0  ;;  %636 = vmatprep.mubr.f32.mxu1 %v31_v15  ;;  %v106_v13 = vld [vmem:[%s4306_s0 + $0x2e0] sm:$0xff]  ;;  %v100_v15 = vld [vmem:[%s4306_s0 + $0x2b0] sm:$0xff] }
  0x4a   :  { %447 = vmatmul.mubr.f32.gmra.mxu0 %v28_v14  ;;  %2805 = vmatprep.subr.mxu1 %v2889_v0  ;;  %v280_v14 = vld [vmem:[%s4305_s1 + $0x2d8] sm:$0xff] }
  0x4b   :  { %757 = vmatpush1.msra.mxu0 %v266_v16  ;;  %451 = vmatprep.mubr.f32.mxu0 %v36_v17  ;;  %v108_v16 = vld [vmem:[%s4306_s0 + $0x2f0] sm:$0xff] }
  0x4c   :  { %637 = vmatmul.mubr.f32.gmra.mxu1 %v30_v18  ;;  %758 = vmatprep.subr.mxu0 %v2889_v0  ;;  %v279_v17 = vld [vmem:[%s4305_s1 + $0x2d0] sm:$0xff]  ;;  %v105_v18 = vld [vmem:[%s4306_s0 + $0x2d8] sm:$0xff] }
  0x4d   :  { %759 = vmatpush1.msra.mxu0 %v265_v19  ;;  %641 = vmatprep.mubr.f32.mxu1 %v38_v20  ;;  %v113_v19 = vld [vmem:[%s4306_s0 + $0x318] sm:$0xff]  ;;  %v278_v20 = vld [vmem:[%s4305_s1 + $0x2c8] sm:$0xff] }
  0x4e   :  { %452 = vmatmul.mubr.f32.gmra.mxu0 %v35_v21  ;;  %760 = vmatprep.subr.mxu0 %v2889_v0  ;;  %v107_v21 = vld [vmem:[%s4306_s0 + $0x2e8] sm:$0xff] }
  0x4f   :  { %761 = vmatpush1.msra.mxu0 %v264_v22  ;;  %456 = vmatprep.mubr.f32.mxu0 %v43_v23  ;;  %v115_v22 = vld [vmem:[%s4306_s0 + $0x328] sm:$0xff]  ;;  %v277_v23 = vld [vmem:[%s4305_s1 + $0x2c0] sm:$0xff] }
  0x50   :  { %642 = vmatmul.mubr.f32.gmra.mxu1 %v37_v24  ;;  %762 = vmatprep.subr.mxu0 %v2889_v0  ;;  %v112_v24 = vld [vmem:[%s4306_s0 + $0x310] sm:$0xff] }
  0x51   :  { %646 = vmatprep.mubr.f32.mxu1 %v45_v25  ;;  %763 = vmatpush1.msra.mxu0 %v263_v26  ;;  %v120_v25 = vld [vmem:[%s4306_s0 + $0x350] sm:$0xff]  ;;  %v276_v26 = vld [vmem:[%s4305_s1 + $0x2b8] sm:$0xff] }
  0x52   :  { %457 = vmatmul.mubr.f32.gmra.mxu0 %v42_v27  ;;  %764 = vmatprep.subr.mxu0 %v2889_v0  ;;  %v114_v27 = vld [vmem:[%s4306_s0 + $0x320] sm:$0xff] }
  0x53   :  { %461 = vmatprep.mubr.f32.mxu0 %v50_v28  ;;  %765 = vmatpush1.msra.mxu0 %v262_v29  ;;  %v122_v28 = vld [vmem:[%s4306_s0 + $0x360] sm:$0xff] }
  0x54   :  { %647 = vmatmul.mubr.f32.gmra.mxu1 %v44_v30  ;;  %766 = vmatprep.subr.mxu0 %v2889_v0  ;;  %v285_v29 = vld [vmem:[%s4305_s1 + $0x300] sm:$0xff]  ;;  %v119_v30 = vld [vmem:[%s4306_s0 + $0x348] sm:$0xff] }
  0x55   :  { %651 = vmatprep.mubr.f32.mxu1 %v52_v31  ;;  %767 = vmatpush1.msra.mxu0 %v261_v32  ;;  %v127_v31 = vld [vmem:[%s4306_s0 + $0x388] sm:$0xff]  ;;  %v275_v32 = vld [vmem:[%s4305_s1 + $0x2b0] sm:$0xff] }
  0x56   :  { %462 = vmatmul.mubr.f32.gmra.mxu0 %v49_v33  ;;  %768 = vmatprep.subr.mxu0 %v2889_v0  ;;  %v121_v33 = vld [vmem:[%s4306_s0 + $0x358] sm:$0xff] }
  0x57   :  { %466 = vmatprep.mubr.f32.mxu0 %v57_v34  ;;  %769 = vmatpush1.msra.mxu0 %v260_v35  ;;  %v129_v34 = vld [vmem:[%s4306_s0 + $0x398] sm:$0xff]  ;;  %v274_v35 = vld [vmem:[%s4305_s1 + $0x2a8] sm:$0xff] }
  0x58   :  { %652 = vmatmul.mubr.f32.gmra.mxu1 %v51_v36  ;;  %770 = vmatprep.subr.mxu0 %v2889_v0  ;;  %v126_v36 = vld [vmem:[%s4306_s0 + $0x380] sm:$0xff] }
  0x59   :  { %656 = vmatprep.mubr.f32.mxu1 %v59_v37  ;;  %2806 = vmatpush3.msra.mxu1 %v287_v38  ;;  %v134_v37 = vld [vmem:[%s4306_s0 + $0x3c0] sm:$0xff] }
  0x5a   :  { %467 = vmatmul.mubr.f32.gmra.mxu0 %v56_v39  ;;  %2807 = vmatprep.subr.mxu1 %v2889_v0  ;;  %v273_v38 = vld [vmem:[%s4305_s1 + $0x2a0] sm:$0xff]  ;;  %v128_v39 = vld [vmem:[%s4306_s0 + $0x390] sm:$0xff] }
  0x5b   :  { %471 = vmatprep.mubr.f32.mxu0 %v64_v40  ;;  %771 = vmatpush1.msra.mxu0 %v259_v41  ;;  %v136_v40 = vld [vmem:[%s4306_s0 + $0x3d0] sm:$0xff]  ;;  %v272_v41 = vld [vmem:[%s4305_s1 + $0x298] sm:$0xff] }
  0x5c   :  { %657 = vmatmul.mubr.f32.gmra.mxu1 %v58_v42  ;;  %772 = vmatprep.subr.mxu0 %v2889_v0  ;;  %v133_v42 = vld [vmem:[%s4306_s0 + $0x3b8] sm:$0xff] }
  0x5d   :  { %661 = vmatprep.mubr.f32.mxu1 %v66_v43  ;;  %773 = vmatpush1.msra.mxu0 %v258_v44  ;;  %v141_v43 = vld [vmem:[%s4306_s0 + $0x3f8] sm:$0xff]  ;;  %v271_v44 = vld [vmem:[%s4305_s1 + $0x290] sm:$0xff] }
  0x5e   :  { %472 = vmatmul.mubr.f32.gmra.mxu0 %v63_v45  ;;  %774 = vmatprep.subr.mxu0 %v2889_v0  ;;  %v135_v45 = vld [vmem:[%s4306_s0 + $0x3c8] sm:$0xff] }
  0x5f   :  { %476 = vmatprep.mubr.f32.mxu0 %v71_v46  ;;  %775 = vmatpush1.msra.mxu0 %v257_v47  ;;  %v143_v46 = vld [vmem:[%s4306_s0 + $0x408] sm:$0xff] }
  0x60   :  { %662 = vmatmul.mubr.f32.gmra.mxu1 %v65_v48  ;;  %776 = vmatprep.subr.mxu0 %v2889_v0  ;;  %v270_v47 = vld [vmem:[%s4305_s1 + $0x288] sm:$0xff]  ;;  %v140_v48 = vld [vmem:[%s4306_s0 + $0x3f0] sm:$0xff] }
  0x61   :  { %666 = vmatprep.mubr.f32.mxu1 %v73_v49  ;;  %777 = vmatpush1.msra.mxu0 %v256_v50  ;;  %v148_v49 = vld [vmem:[%s4306_s0 + $0x430] sm:$0xff]  ;;  %v269_v50 = vld [vmem:[%s4305_s1 + $0x280] sm:$0xff] }
  0x62   :  { %477 = vmatmul.mubr.f32.gmra.mxu0 %v70_v51  ;;  %778 = vmatprep.subr.mxu0 %v2889_v0  ;;  %v142_v51 = vld [vmem:[%s4306_s0 + $0x400] sm:$0xff] }
  0x63   :  { %481 = vmatprep.mubr.f32.mxu0 %v78_v52  ;;  %779 = vmatpush1.msra.mxu0 %v255_v53  ;;  %v150_v52 = vld [vmem:[%s4306_s0 + $0x440] sm:$0xff]  ;;  %v147_v53 = vld [vmem:[%s4306_s0 + $0x428] sm:$0xff] }
  0x64   :  { %667 = vmatmul.mubr.f32.gmra.mxu1 %v72_v54  ;;  %780 = vmatprep.subr.mxu0 %v2889_v0  ;;  %v155_v54 = vld [vmem:[%s4306_s0 + $0x468] sm:$0xff] }
  0x65   :  { %671 = vmatprep.mubr.f32.mxu1 %v80_v55  ;;  %781 = vmatpush1.msra.mxu0 %v254_v56  ;;  %v149_v55 = vld [vmem:[%s4306_s0 + $0x438] sm:$0xff] }
  0x66   :  { %482 = vmatmul.mubr.f32.gmra.mxu0 %v77_v57  ;;  %782 = vmatprep.subr.mxu0 %v2889_v0  ;;  %v157_v56 = vld [vmem:[%s4306_s0 + $0x478] sm:$0xff]  ;;  %v154_v57 = vld [vmem:[%s4306_s0 + $0x460] sm:$0xff] }
  0x67   :  { %486 = vmatprep.mubr.f32.mxu0 %v85_v58  ;;  %783 = vmatpush1.msra.mxu0 %v253_v59  ;;  %v162_v58 = vld [vmem:[%s4306_s0 + $0x4a0] sm:$0xff]  ;;  %v156_v59 = vld [vmem:[%s4306_s0 + $0x470] sm:$0xff] }
  0x68   :  { %672 = vmatmul.mubr.f32.gmra.mxu1 %v79_v60  ;;  %784 = vmatprep.subr.mxu0 %v2889_v0  ;;  %v164_v60 = vld [vmem:[%s4306_s0 + $0x4b0] sm:$0xff] }
  0x69   :  { %676 = vmatprep.mubr.f32.mxu1 %v87_v61  ;;  %785 = vmatpush2.msra.mxu0 %v284_v62  ;;  %v161_v61 = vld [vmem:[%s4306_s0 + $0x498] sm:$0xff] }
  0x6a   :  { %487 = vmatmul.mubr.f32.gmra.mxu0 %v84_v63  ;;  %2808 = vmatpush3.msra.mxu1 %v286_v2  ;;  %v169_v62 = vld [vmem:[%s4306_s0 + $0x4d8] sm:$0xff]  ;;  %v163_v63 = vld [vmem:[%s4306_s0 + $0x4a8] sm:$0xff]  ;;  %v168_v2 = vld [vmem:[%s4306_s0 + $0x4d0] sm:$0xff] }
  0x6b   :  { %491 = vmatprep.mubr.f32.mxu0 %v92_v1  ;;  %786 = vmatprep.subr.mxu0 %v2889_v0  ;;  %v171_v1 = vld [vmem:[%s4306_s0 + $0x4e8] sm:$0xff] }
  0x6c   :  { %677 = vmatmul.mubr.f32.gmra.mxu1 %v86_v3  ;;  %787 = vmatpush2.msra.mxu0 %v283_v5  ;;  %v176_v3 = vld [vmem:[%s4306_s0 + $0x510] sm:$0xff]  ;;  %v178_v5 = vld [vmem:[%s4306_s0 + $0x520] sm:$0xff] }
  0x6d   :  { %681 = vmatprep.mubr.f32.mxu1 %v94_v4  ;;  %788 = vmatprep.subr.mxu0 %v2889_v0  ;;  %v170_v4 = vld [vmem:[%s4306_s0 + $0x4e0] sm:$0xff] }
  0x6e   :  { %492 = vmatmul.mubr.f32.gmra.mxu0 %v91_v6  ;;  %2809 = vmatprep.subr.mxu1 %v2889_v0  ;;  %v175_v6 = vld [vmem:[%s4306_s0 + $0x508] sm:$0xff] }
  0x6f   :  { %496 = vmatprep.mubr.f32.mxu0 %v99_v7  ;;  %789 = vmatpush2.msra.mxu0 %v282_v8  ;;  %v183_v7 = vld [vmem:[%s4306_s0 + $0x548] sm:$0xff]  ;;  %v177_v8 = vld [vmem:[%s4306_s0 + $0x518] sm:$0xff] }
  0x70   :  { %682 = vmatmul.mubr.f32.gmra.mxu1 %v93_v9  ;;  %790 = vmatprep.subr.mxu0 %v2889_v0  ;;  %v185_v9 = vld [vmem:[%s4306_s0 + $0x558] sm:$0xff] }
  0x71   :  { %686 = vmatprep.mubr.f32.mxu1 %v101_v10  ;;  %791 = vmatpush2.msra.mxu0 %v281_v11  ;;  %v182_v10 = vld [vmem:[%s4306_s0 + $0x540] sm:$0xff]  ;;  %v19_v11 = vld [vmem:[%s4306_s0 + $0x28] sm:$0xff] }
  0x72   :  { %497 = vmatmul.mubr.f32.gmra.mxu0 %v98_v12  ;;  %792 = vmatprep.subr.mxu0 %v2889_v0  ;;  %v184_v12 = vld [vmem:[%s4306_s0 + $0x550] sm:$0xff] }
  0x73   :  { %501 = vmatprep.mubr.f32.mxu0 %v106_v13  ;;  %793 = vmatpush2.msra.mxu0 %v280_v14  ;;  %v18_v13 = vld [vmem:[%s4306_s0 + $0x20] sm:$0xff] }
  0x74   :  { %687 = vmatmul.mubr.f32.gmra.mxu1 %v100_v15  ;;  %794 = vmatprep.subr.mxu0 %v2889_v0  ;;  %v26_v14 = vld [vmem:[%s4306_s0 + $0x60] sm:$0xff]  ;;  %v20_v15 = vld [vmem:[%s4306_s0 + $0x30] sm:$0xff] }
  0x75   :  { %691 = vmatprep.mubr.f32.mxu1 %v108_v16  ;;  %795 = vmatpush2.msra.mxu0 %v279_v17  ;;  %v25_v16 = vld [vmem:[%s4306_s0 + $0x58] sm:$0xff] }
  0x76   :  { %502 = vmatmul.mubr.f32.gmra.mxu0 %v105_v18  ;;  %796 = vmatprep.subr.mxu0 %v2889_v0  ;;  %v33_v17 = vld [vmem:[%s4306_s0 + $0x98] sm:$0xff]  ;;  %v27_v18 = vld [vmem:[%s4306_s0 + $0x68] sm:$0xff] }
  0x77   :  { %506 = vmatprep.mubr.f32.mxu0 %v113_v19  ;;  %797 = vmatpush2.msra.mxu0 %v278_v20  ;;  %v32_v19 = vld [vmem:[%s4306_s0 + $0x90] sm:$0xff] }
  0x78   :  { %692 = vmatmul.mubr.f32.gmra.mxu1 %v107_v21  ;;  %798 = vmatprep.subr.mxu0 %v2889_v0  ;;  %v40_v20 = vld [vmem:[%s4306_s0 + $0xd0] sm:$0xff]  ;;  %v34_v21 = vld [vmem:[%s4306_s0 + $0xa0] sm:$0xff] }
  0x79   :  { %696 = vmatprep.mubr.f32.mxu1 %v115_v22  ;;  %799 = vmatpush2.msra.mxu0 %v277_v23  ;;  %v39_v22 = vld [vmem:[%s4306_s0 + $0xc8] sm:$0xff] }
  0x7a   :  { %507 = vmatmul.mubr.f32.gmra.mxu0 %v112_v24  ;;  %800 = vmatprep.subr.mxu0 %v2889_v0  ;;  %v47_v23 = vld [vmem:[%s4306_s0 + $0x108] sm:$0xff]  ;;  %v41_v24 = vld [vmem:[%s4306_s0 + $0xd8] sm:$0xff] }
  0x7b   :  { %511 = vmatprep.mubr.f32.mxu0 %v120_v25  ;;  %801 = vmatpush2.msra.mxu0 %v276_v26  ;;  %v46_v25 = vld [vmem:[%s4306_s0 + $0x100] sm:$0xff] }
  0x7c   :  { %697 = vmatmul.mubr.f32.gmra.mxu1 %v114_v27  ;;  %802 = vmatprep.subr.mxu0 %v2889_v0  ;;  %v54_v26 = vld [vmem:[%s4306_s0 + $0x140] sm:$0xff]  ;;  %v48_v27 = vld [vmem:[%s4306_s0 + $0x110] sm:$0xff] }
  0x7d   :  { %701 = vmatprep.mubr.f32.mxu1 %v122_v28  ;;  %2810 = vmatpush3.msra.mxu1 %v285_v29  ;;  %v53_v28 = vld [vmem:[%s4306_s0 + $0x138] sm:$0xff] }
  0x7e   :  { %512 = vmatmul.mubr.f32.gmra.mxu0 %v119_v30  ;;  %v61_v29 = vld [vmem:[%s4306_s0 + $0x178] sm:$0xff]  ;;  %v55_v30 = vld [vmem:[%s4306_s0 + $0x148] sm:$0xff] }
  0x7f   :  { %516 = vmatprep.mubr.f32.mxu0 %v127_v31  ;;  %803 = vmatpush2.msra.mxu0 %v275_v32  ;;  %v60_v31 = vld [vmem:[%s4306_s0 + $0x170] sm:$0xff] }
  0x80   :  { %702 = vmatmul.mubr.f32.gmra.mxu1 %v121_v33  ;;  %804 = vmatprep.subr.mxu0 %v2889_v0  ;;  %v68_v32 = vld [vmem:[%s4306_s0 + $0x1b0] sm:$0xff]  ;;  %v62_v33 = vld [vmem:[%s4306_s0 + $0x180] sm:$0xff] }
  0x81   :  { %706 = vmatprep.mubr.f32.mxu1 %v129_v34  ;;  %805 = vmatpush2.msra.mxu0 %v274_v35  ;;  %v67_v34 = vld [vmem:[%s4306_s0 + $0x1a8] sm:$0xff] }
  0x82   :  { %517 = vmatmul.mubr.f32.gmra.mxu0 %v126_v36  ;;  %806 = vmatprep.subr.mxu0 %v2889_v0  ;;  %v75_v35 = vld [vmem:[%s4306_s0 + $0x1e8] sm:$0xff]  ;;  %v69_v36 = vld [vmem:[%s4306_s0 + $0x1b8] sm:$0xff] }
  0x83   :  { %521 = vmatprep.mubr.f32.mxu0 %v134_v37  ;;  %807 = vmatpush2.msra.mxu0 %v273_v38  ;;  %v74_v37 = vld [vmem:[%s4306_s0 + $0x1e0] sm:$0xff] }
  0x84   :  { %707 = vmatmul.mubr.f32.gmra.mxu1 %v128_v39  ;;  %808 = vmatprep.subr.mxu0 %v2889_v0  ;;  %v82_v38 = vld [vmem:[%s4306_s0 + $0x220] sm:$0xff]  ;;  %v76_v39 = vld [vmem:[%s4306_s0 + $0x1f0] sm:$0xff] }
  0x85   :  { %711 = vmatprep.mubr.f32.mxu1 %v136_v40  ;;  %809 = vmatpush2.msra.mxu0 %v272_v41  ;;  %v81_v40 = vld [vmem:[%s4306_s0 + $0x218] sm:$0xff] }
  0x86   :  { %522 = vmatmul.mubr.f32.gmra.mxu0 %v133_v42  ;;  %810 = vmatprep.subr.mxu0 %v2889_v0  ;;  %v89_v41 = vld [vmem:[%s4306_s0 + $0x258] sm:$0xff]  ;;  %v83_v42 = vld [vmem:[%s4306_s0 + $0x228] sm:$0xff] }
  0x87   :  { %526 = vmatprep.mubr.f32.mxu0 %v141_v43  ;;  %811 = vmatpush2.msra.mxu0 %v271_v44  ;;  %v88_v43 = vld [vmem:[%s4306_s0 + $0x250] sm:$0xff] }
  0x88   :  { %712 = vmatmul.mubr.f32.gmra.mxu1 %v135_v45  ;;  %812 = vmatprep.subr.mxu0 %v2889_v0  ;;  %v96_v44 = vld [vmem:[%s4306_s0 + $0x290] sm:$0xff]  ;;  %v90_v45 = vld [vmem:[%s4306_s0 + $0x260] sm:$0xff] }
  0x89   :  { %716 = vmatprep.mubr.f32.mxu1 %v143_v46  ;;  %813 = vmatpush2.msra.mxu0 %v270_v47  ;;  %v95_v46 = vld [vmem:[%s4306_s0 + $0x288] sm:$0xff] }
  0x8a   :  { %527 = vmatmul.mubr.f32.gmra.mxu0 %v140_v48  ;;  %814 = vmatprep.subr.mxu0 %v2889_v0  ;;  %v103_v47 = vld [vmem:[%s4306_s0 + $0x2c8] sm:$0xff]  ;;  %v97_v48 = vld [vmem:[%s4306_s0 + $0x298] sm:$0xff] }
  0x8b   :  { %531 = vmatprep.mubr.f32.mxu0 %v148_v49  ;;  %815 = vmatpush2.msra.mxu0 %v269_v50  ;;  %v102_v49 = vld [vmem:[%s4306_s0 + $0x2c0] sm:$0xff] }
  0x8c   :  { %717 = vmatmul.mubr.f32.gmra.mxu1 %v142_v51  ;;  %v110_v50 = vld [vmem:[%s4306_s0 + $0x300] sm:$0xff]  ;;  %v104_v51 = vld [vmem:[%s4306_s0 + $0x2d0] sm:$0xff] }
  0x8d   :  { %721 = vmatprep.mubr.f32.mxu1 %v150_v52  ;;  %v109_v52 = vld [vmem:[%s4306_s0 + $0x2f8] sm:$0xff] }
  0x8e   :  { %532 = vmatmul.mubr.f32.gmra.mxu0 %v147_v53  ;;  %v117_v53 = vld [vmem:[%s4306_s0 + $0x338] sm:$0xff] }
  0x8f   :  { %536 = vmatprep.mubr.f32.mxu0 %v155_v54  ;;  %v111_v54 = vld [vmem:[%s4306_s0 + $0x308] sm:$0xff] }
  0x90   :  { %722 = vmatmul.mubr.f32.gmra.mxu1 %v149_v55  ;;  %v116_v55 = vld [vmem:[%s4306_s0 + $0x330] sm:$0xff] }
  0x91   :  { %726 = vmatprep.mubr.f32.mxu1 %v157_v56  ;;  %v124_v56 = vld [vmem:[%s4306_s0 + $0x370] sm:$0xff] }
  0x92   :  { %537 = vmatmul.mubr.f32.gmra.mxu0 %v154_v57  ;;  %v118_v57 = vld [vmem:[%s4306_s0 + $0x340] sm:$0xff] }
  0x93   :  { %541 = vmatprep.mubr.f32.mxu0 %v162_v58  ;;  %v123_v58 = vld [vmem:[%s4306_s0 + $0x368] sm:$0xff] }
  0x94   :  { %727 = vmatmul.mubr.f32.gmra.mxu1 %v156_v59  ;;  %v131_v59 = vld [vmem:[%s4306_s0 + $0x3a8] sm:$0xff] }
  0x95   :  { %731 = vmatprep.mubr.f32.mxu1 %v164_v60  ;;  %v125_v60 = vld [vmem:[%s4306_s0 + $0x378] sm:$0xff] }
  0x96   :  { %542 = vmatmul.mubr.f32.gmra.mxu0 %v161_v61  ;;  %v130_v61 = vld [vmem:[%s4306_s0 + $0x3a0] sm:$0xff] }
  0x97   :  { %546 = vmatprep.mubr.f32.mxu0 %v169_v62  ;;  %v138_v62 = vld [vmem:[%s4306_s0 + $0x3e0] sm:$0xff] }
  0x98   :  { %732 = vmatmul.mubr.f32.gmra.mxu1 %v163_v63  ;;  %v132_v63 = vld [vmem:[%s4306_s0 + $0x3b0] sm:$0xff] }
  0x99   :  { %736 = vmatprep.mubr.f32.mxu1 %v171_v1  ;;  %v137_v1 = vld [vmem:[%s4306_s0 + $0x3d8] sm:$0xff] }
  0x9a   :  { %547 = vmatmul.mubr.f32.gmra.mxu0 %v168_v2  ;;  %v145_v2 = vld [vmem:[%s4306_s0 + $0x418] sm:$0xff] }
  0x9b   :  { %551 = vmatprep.mubr.f32.mxu0 %v176_v3  ;;  %v139_v3 = vld [vmem:[%s4306_s0 + $0x3e8] sm:$0xff] }
  0x9c   :  { %737 = vmatmul.mubr.f32.gmra.mxu1 %v170_v4  ;;  %v144_v4 = vld [vmem:[%s4306_s0 + $0x410] sm:$0xff] }
  0x9d   :  { %741 = vmatprep.mubr.f32.mxu1 %v178_v5  ;;  %v152_v5 = vld [vmem:[%s4306_s0 + $0x450] sm:$0xff] }
  0x9e   :  { %552 = vmatmul.mubr.f32.gmra.mxu0 %v175_v6  ;;  %v146_v6 = vld [vmem:[%s4306_s0 + $0x420] sm:$0xff] }
  0x9f   :  { %556 = vmatprep.mubr.f32.mxu0 %v183_v7  ;;  %v151_v7 = vld [vmem:[%s4306_s0 + $0x448] sm:$0xff] }
  0xa0   :  { %742 = vmatmul.mubr.f32.gmra.mxu1 %v177_v8  ;;  %v159_v8 = vld [vmem:[%s4306_s0 + $0x488] sm:$0xff] }
  0xa1   :  { %746 = vmatprep.mubr.f32.mxu1 %v185_v9  ;;  %v153_v9 = vld [vmem:[%s4306_s0 + $0x458] sm:$0xff] }
  0xa2   :  { %557 = vmatmul.mubr.f32.gmra.mxu0 %v182_v10  ;;  %v158_v10 = vld [vmem:[%s4306_s0 + $0x480] sm:$0xff] }
  0xa3   :  { %816 = vmatprep.mubr.f32.mxu0 %v19_v11  ;;  %v166_v11 = vld [vmem:[%s4306_s0 + $0x4c0] sm:$0xff] }
  0xa4   :  { %747 = vmatmul.mubr.f32.gmra.mxu1 %v184_v12  ;;  %v160_v12 = vld [vmem:[%s4306_s0 + $0x490] sm:$0xff] }
  0xa5   :  { %2811 = vmatprep.mubr.msk.f32.mxu1 %vm2890_vm0, %v2889_v0 }
  0xa6   :  { %817 = vmatmul.mubr.f32.vlgmr.msra.gmra.mxu0 %v18_v13  ;;  %v165_v13 = vld [vmem:[%s4306_s0 + $0x4b8] sm:$0xff] }
  0xa7   :  { %821 = vmatprep.mubr.f32.mxu0 %v26_v14  ;;  %v173_v14 = vld [vmem:[%s4306_s0 + $0x4f8] sm:$0xff] }
  0xa8   :  { %2812 = vmatmul.mubr.msk.f32.vlgmr.msra.gmra.mxu1 %vm296_vm1, %v20_v15  ;;  %v167_v15 = vld [vmem:[%s4306_s0 + $0x4c8] sm:$0xff] }
  0xa9   :  { %2814 = vmatprep.mubr.msk.f32.mxu1 %vm2890_vm0, %v2889_v0 }
  0xaa   :  { %822 = vmatmul.mubr.f32.gmra.mxu0 %v25_v16  ;;  %v172_v16 = vld [vmem:[%s4306_s0 + $0x4f0] sm:$0xff] }
  0xab   :  { %826 = vmatprep.mubr.f32.mxu0 %v33_v17  ;;  %v180_v17 = vld [vmem:[%s4306_s0 + $0x530] sm:$0xff] }
  0xac   :  { %2815 = vmatmul.mubr.msk.f32.gmra.mxu1 %vm296_vm1, %v27_v18  ;;  %v174_v18 = vld [vmem:[%s4306_s0 + $0x500] sm:$0xff] }
  0xad   :  { %2817 = vmatprep.mubr.msk.f32.mxu1 %vm2890_vm0, %v2889_v0 }
  0xae   :  { %827 = vmatmul.mubr.f32.gmra.mxu0 %v32_v19  ;;  %v179_v19 = vld [vmem:[%s4306_s0 + $0x528] sm:$0xff] }
  0xaf   :  { %831 = vmatprep.mubr.f32.mxu0 %v40_v20  ;;  %v3897_v20 = vld [vmem:[%s4307_s2] ss:$0 sm:$0xff] }
  0xb0   :  { %2818 = vmatmul.mubr.msk.f32.gmra.mxu1 %vm296_vm1, %v34_v21  ;;  %v187_v21 = vld [vmem:[%s4306_s0 + $0x568] sm:$0xff] }
  0xb1   :  { %2820 = vmatprep.mubr.msk.f32.mxu1 %vm2890_vm0, %v2889_v0 }
  0xb2   :  { %832 = vmatmul.mubr.f32.gmra.mxu0 %v39_v22  ;;  %v181_v22 = vld [vmem:[%s4306_s0 + $0x538] sm:$0xff] }
  0xb3   :  { %836 = vmatprep.mubr.f32.mxu0 %v47_v23 }
  0xb4   :  { %2821 = vmatmul.mubr.msk.f32.gmra.mxu1 %vm296_vm1, %v41_v24 }
  0xb5   :  { %2823 = vmatprep.mubr.msk.f32.mxu1 %vm2890_vm0, %v2889_v0 }
  0xb6   :  { %837 = vmatmul.mubr.f32.gmra.mxu0 %v46_v25  ;;  %v186_v25 = vld [vmem:[%s4306_s0 + $0x560] sm:$0xff] }
  0xb7   :  { %841 = vmatprep.mubr.f32.mxu0 %v54_v26 }
  0xb8   :  { %2824 = vmatmul.mubr.msk.f32.gmra.mxu1 %vm296_vm1, %v48_v27 }
  0xb9   :  { %2826 = vmatprep.mubr.msk.f32.mxu1 %vm2890_vm0, %v2889_v0 }
  0xba   :  { %842 = vmatmul.mubr.f32.gmra.mxu0 %v53_v28 }
  0xbb   :  { %846 = vmatprep.mubr.f32.mxu0 %v61_v29  ;;  %v188_v29 = vld [vmem:[%s4306_s0 + $0x570] sm:$0xff] }
  0xbc   :  { %2827 = vmatmul.mubr.msk.f32.gmra.mxu1 %vm296_vm1, %v55_v30 }
  0xbd   :  { %2829 = vmatprep.mubr.msk.f32.mxu1 %vm2890_vm0, %v2889_v0 }
  0xbe   :  { %847 = vmatmul.mubr.f32.gmra.mxu0 %v60_v31 }
  0xbf   :  { %851 = vmatprep.mubr.f32.mxu0 %v68_v32 }
  0xc0   :  { %2830 = vmatmul.mubr.msk.f32.gmra.mxu1 %vm296_vm1, %v62_v33 }
  0xc1   :  { %2832 = vmatprep.mubr.msk.f32.mxu1 %vm2890_vm0, %v2889_v0 }
  0xc2   :  { %852 = vmatmul.mubr.f32.gmra.mxu0 %v67_v34 }
  0xc3   :  { %856 = vmatprep.mubr.f32.mxu0 %v75_v35 }
  0xc4   :  { %2833 = vmatmul.mubr.msk.f32.gmra.mxu1 %vm296_vm1, %v69_v36 }
  0xc5   :  { %2835 = vmatprep.mubr.msk.f32.mxu1 %vm2890_vm0, %v2889_v0 }
  0xc6   :  { %857 = vmatmul.mubr.f32.gmra.mxu0 %v74_v37 }
  0xc7   :  { %861 = vmatprep.mubr.f32.mxu0 %v82_v38 }
  0xc8   :  { %2836 = vmatmul.mubr.msk.f32.gmra.mxu1 %vm296_vm1, %v76_v39 }
  0xc9   :  { %2838 = vmatprep.mubr.msk.f32.mxu1 %vm2890_vm0, %v2889_v0 }
  0xca   :  { %862 = vmatmul.mubr.f32.gmra.mxu0 %v81_v40 }
  0xcb   :  { %866 = vmatprep.mubr.f32.mxu0 %v89_v41 }
  0xcc   :  { %2839 = vmatmul.mubr.msk.f32.gmra.mxu1 %vm296_vm1, %v83_v42 }
  0xcd   :  { %2841 = vmatprep.mubr.msk.f32.mxu1 %vm2890_vm0, %v2889_v0 }
  0xce   :  { %867 = vmatmul.mubr.f32.gmra.mxu0 %v88_v43 }
  0xcf   :  { %871 = vmatprep.mubr.f32.mxu0 %v96_v44 }
  0xd0   :  { %2842 = vmatmul.mubr.msk.f32.gmra.mxu1 %vm296_vm1, %v90_v45 }
  0xd1   :  { %2844 = vmatprep.mubr.msk.f32.mxu1 %vm2890_vm0, %v2889_v0 }
  0xd2   :  { %872 = vmatmul.mubr.f32.gmra.mxu0 %v95_v46 }
  0xd3   :  { %876 = vmatprep.mubr.f32.mxu0 %v103_v47 }
  0xd4   :  { %2845 = vmatmul.mubr.msk.f32.gmra.mxu1 %vm296_vm1, %v97_v48 }
  0xd5   :  { %2847 = vmatprep.mubr.msk.f32.mxu1 %vm2890_vm0, %v2889_v0 }
  0xd6   :  { %877 = vmatmul.mubr.f32.gmra.mxu0 %v102_v49 }
  0xd7   :  { %881 = vmatprep.mubr.f32.mxu0 %v110_v50 }
  0xd8   :  { %2848 = vmatmul.mubr.msk.f32.gmra.mxu1 %vm296_vm1, %v104_v51 }
  0xd9   :  { %2850 = vmatprep.mubr.msk.f32.mxu1 %vm2890_vm0, %v2889_v0 }
  0xda   :  { %882 = vmatmul.mubr.f32.gmra.mxu0 %v109_v52 }
  0xdb   :  { %886 = vmatprep.mubr.f32.mxu0 %v117_v53 }
  0xdc   :  { %2851 = vmatmul.mubr.msk.f32.gmra.mxu1 %vm296_vm1, %v111_v54 }
  0xdd   :  { %2853 = vmatprep.mubr.msk.f32.mxu1 %vm2890_vm0, %v2889_v0 }
  0xde   :  { %887 = vmatmul.mubr.f32.gmra.mxu0 %v116_v55 }
  0xdf   :  { %891 = vmatprep.mubr.f32.mxu0 %v124_v56 }
  0xe0   :  { %2854 = vmatmul.mubr.msk.f32.gmra.mxu1 %vm296_vm1, %v118_v57 }
  0xe1   :  { %2856 = vmatprep.mubr.msk.f32.mxu1 %vm2890_vm0, %v2889_v0 }
  0xe2   :  { %892 = vmatmul.mubr.f32.gmra.mxu0 %v123_v58 }
  0xe3   :  { %896 = vmatprep.mubr.f32.mxu0 %v131_v59 }
  0xe4   :  { %2857 = vmatmul.mubr.msk.f32.gmra.mxu1 %vm296_vm1, %v125_v60 }
  0xe5   :  { %2859 = vmatprep.mubr.msk.f32.mxu1 %vm2890_vm0, %v2889_v0 }
  0xe6   :  { %897 = vmatmul.mubr.f32.gmra.mxu0 %v130_v61 }
  0xe7   :  { %901 = vmatprep.mubr.f32.mxu0 %v138_v62 }
  0xe8   :  { %2860 = vmatmul.mubr.msk.f32.gmra.mxu1 %vm296_vm1, %v132_v63 }
  0xe9   :  { %2862 = vmatprep.mubr.msk.f32.mxu1 %vm2890_vm0, %v2889_v0 }
  0xea   :  { %902 = vmatmul.mubr.f32.gmra.mxu0 %v137_v1 }
  0xeb   :  { %906 = vmatprep.mubr.f32.mxu0 %v145_v2 }
  0xec   :  { %2863 = vmatmul.mubr.msk.f32.gmra.mxu1 %vm296_vm1, %v139_v3 }
  0xed   :  { %2865 = vmatprep.mubr.msk.f32.mxu1 %vm2890_vm0, %v2889_v0 }
  0xee   :  { %907 = vmatmul.mubr.f32.gmra.mxu0 %v144_v4 }
  0xef   :  { %911 = vmatprep.mubr.f32.mxu0 %v152_v5 }
  0xf0   :  { %2866 = vmatmul.mubr.msk.f32.gmra.mxu1 %vm296_vm1, %v146_v6 }
  0xf1   :  { %2868 = vmatprep.mubr.msk.f32.mxu1 %vm2890_vm0, %v2889_v0 }
  0xf2   :  { %912 = vmatmul.mubr.f32.gmra.mxu0 %v151_v7 }
  0xf3   :  { %916 = vmatprep.mubr.f32.mxu0 %v159_v8 }
  0xf4   :  { %2869 = vmatmul.mubr.msk.f32.gmra.mxu1 %vm296_vm1, %v153_v9 }
  0xf5   :  { %2871 = vmatprep.mubr.msk.f32.mxu1 %vm2890_vm0, %v2889_v0 }
  0xf6   :  { %917 = vmatmul.mubr.f32.gmra.mxu0 %v158_v10 }
  0xf7   :  { %921 = vmatprep.mubr.f32.mxu0 %v166_v11 }
  0xf8   :  { %2872 = vmatmul.mubr.msk.f32.gmra.mxu1 %vm296_vm1, %v160_v12 }
  0xf9   :  { %2874 = vmatprep.mubr.msk.f32.mxu1 %vm2890_vm0, %v2889_v0 }
  0xfa   :  { %922 = vmatmul.mubr.f32.gmra.mxu0 %v165_v13 }
  0xfb   :  { %926 = vmatprep.mubr.f32.mxu0 %v173_v14 }
  0xfc   :  { %2875 = vmatmul.mubr.msk.f32.gmra.mxu1 %vm296_vm1, %v167_v15 }
  0xfd   :  { %2877 = vmatprep.mubr.msk.f32.mxu1 %vm2890_vm0, %v2889_v0 }
  0xfe   :  { %927 = vmatmul.mubr.f32.gmra.mxu0 %v172_v16 }
  0xff   :  { %931 = vmatprep.mubr.f32.mxu0 %v180_v17 }
 0x100   :  { %2878 = vmatmul.mubr.msk.f32.gmra.mxu1 %vm296_vm1, %v174_v18 }
 0x101   :  { %2880 = vmatprep.mubr.msk.f32.mxu1 %vm2890_vm0, %v2889_v0  ;;  %v438_v23 = vpop.f32.mrf.mxu0 }
 0x102   :  { %932 = vmatmul.mubr.f32.gmra.mxu0 %v179_v19  ;;  %v439_v24 = vadd.f32 %v3897_v20, %v438_v23 }
 0x103   :  { %936 = vmatprep.mubr.f32.mxu0 %v187_v21  ;;  %v628_v26 = vpop.f32.mrf.mxu1  ;;  %v440_v27 = vpop.f32.mrf.mxu0 }
 0x104   :  { %2881 = vmatmul.mubr.msk.f32.gmra.mxu1 %vm296_vm1, %v181_v22  ;;  %v3912_v28 = vadd.f32 %v628_v26, %v439_v24 }
 0x105   :  { %2883 = vmatprep.mubr.msk.f32.mxu1 %vm2890_vm0, %v2889_v0  ;;  %v630_v30 = vpop.f32.mrf.mxu1 }
 0x106   :  { %v443_v31 = vpop.f32.mrf.mxu0  ;;  %937 = vmatmul.mubr.f32.gmra.mxu0 %v186_v25 }
 0x107   :  { %v444_v32 = vadd.f32 %v3897_v20, %v443_v31  ;;  %v633_v33 = vpop.f32.mrf.mxu1 }
 0x108   :  { %2884 = vmatmul.mubr.msk.f32.gmra.mxu1 %vm296_vm1, %v188_v29  ;;  %v445_v34 = vpop.f32.mrf.mxu0 }
 0x109   :  { %v3921_v35 = vadd.f32 %v633_v33, %v444_v32  ;;  %v635_v36 = vpop.f32.mrf.mxu1 }
 0x10a   :  { %v448_v37 = vpop.f32.mrf.mxu0 }
 0x10b   :  { %v449_v38 = vadd.f32 %v3897_v20, %v448_v37 }
 0x10c   :  { %v638_v0 = vpop.f32.mrf.mxu1  ;;  %v450_v39 = vpop.f32.mrf.mxu0 }
 0x10d   :  { %v3924_v40 = vadd.f32 %v638_v0, %v449_v38 }
 0x10e   :  { %v640_v41 = vpop.f32.mrf.mxu1  ;;  %v453_v42 = vpop.f32.mrf.mxu0 }
 0x10f   :  { %v454_v43 = vadd.f32 %v3897_v20, %v453_v42 }
 0x110   :  { %v643_v44 = vpop.f32.mrf.mxu1  ;;  %v455_v45 = vpop.f32.mrf.mxu0 }
 0x111   :  { %v3927_v46 = vadd.f32 %v643_v44, %v454_v43 }
 0x112   :  { %v645_v47 = vpop.f32.mrf.mxu1  ;;  %v458_v48 = vpop.f32.mrf.mxu0 }
 0x113   :  { %v459_v49 = vadd.f32 %v3897_v20, %v458_v48 }
 0x114   :  { %v648_v50 = vpop.f32.mrf.mxu1  ;;  %v460_v51 = vpop.f32.mrf.mxu0 }
 0x115   :  { %v3930_v52 = vadd.f32 %v648_v50, %v459_v49 }
 0x116   :  { %v650_v53 = vpop.f32.mrf.mxu1  ;;  %v463_v54 = vpop.f32.mrf.mxu0 }
 0x117   :  { %v464_v55 = vadd.f32 %v3897_v20, %v463_v54 }
 0x118   :  { %v653_v56 = vpop.f32.mrf.mxu1  ;;  %v465_v57 = vpop.f32.mrf.mxu0 }
 0x119   :  { %v3933_v58 = vadd.f32 %v653_v56, %v464_v55 }
 0x11a   :  { %v655_v59 = vpop.f32.mrf.mxu1  ;;  %v468_v60 = vpop.f32.mrf.mxu0 }
 0x11b   :  { %v469_v61 = vadd.f32 %v3897_v20, %v468_v60 }
 0x11c   :  { %v658_v62 = vpop.f32.mrf.mxu1  ;;  %v470_v63 = vpop.f32.mrf.mxu0 }
 0x11d   :  { %v3936_v1 = vadd.f32 %v658_v62, %v469_v61 }
 0x11e   :  { %v660_v2 = vpop.f32.mrf.mxu1  ;;  %v473_v3 = vpop.f32.mrf.mxu0 }
 0x11f   :  { %v474_v4 = vadd.f32 %v3897_v20, %v473_v3 }
 0x120   :  { %v663_v5 = vpop.f32.mrf.mxu1  ;;  %v475_v6 = vpop.f32.mrf.mxu0 }
 0x121   :  { %v3939_v7 = vadd.f32 %v663_v5, %v474_v4 }
 0x122   :  { %v665_v8 = vpop.f32.mrf.mxu1  ;;  %v478_v9 = vpop.f32.mrf.mxu0 }
 0x123   :  { %v479_v10 = vadd.f32 %v3897_v20, %v478_v9 }
 0x124   :  { %v668_v11 = vpop.f32.mrf.mxu1  ;;  %v480_v12 = vpop.f32.mrf.mxu0 }
 0x125   :  { %v3942_v13 = vadd.f32 %v668_v11, %v479_v10 }
 0x126   :  { %v670_v14 = vpop.f32.mrf.mxu1  ;;  %v483_v15 = vpop.f32.mrf.mxu0 }
 0x127   :  { %v484_v16 = vadd.f32 %v3897_v20, %v483_v15 }
 0x128   :  { %v673_v17 = vpop.f32.mrf.mxu1  ;;  %v485_v18 = vpop.f32.mrf.mxu0 }
 0x129   :  { %v3945_v19 = vadd.f32 %v673_v17, %v484_v16 }
 0x12a   :  { %v675_v21 = vpop.f32.mrf.mxu1  ;;  %v488_v22 = vpop.f32.mrf.mxu0 }
 0x12b   :  { %v489_v23 = vadd.f32 %v3897_v20, %v488_v22 }
 0x12c   :  { %v678_v24 = vpop.f32.mrf.mxu1  ;;  %v490_v25 = vpop.f32.mrf.mxu0 }
 0x12d   :  { %v3948_v26 = vadd.f32 %v678_v24, %v489_v23 }
 0x12e   :  { %v680_v27 = vpop.f32.mrf.mxu1  ;;  %v493_v29 = vpop.f32.mrf.mxu0 }
 0x12f   :  { %v494_v30 = vadd.f32 %v3897_v20, %v493_v29 }
 0x130   :  { %v683_v31 = vpop.f32.mrf.mxu1  ;;  %v495_v32 = vpop.f32.mrf.mxu0 }
 0x131   :  { %v3951_v33 = vadd.f32 %v683_v31, %v494_v30 }
 0x132   :  { %v685_v34 = vpop.f32.mrf.mxu1  ;;  %v498_v36 = vpop.f32.mrf.mxu0 }
 0x133   :  { %v499_v37 = vadd.f32 %v3897_v20, %v498_v36 }
 0x134   :  { %v688_v38 = vpop.f32.mrf.mxu1  ;;  %v500_v0 = vpop.f32.mrf.mxu0 }
 0x135   :  { %v3954_v39 = vadd.f32 %v688_v38, %v499_v37 }
 0x136   :  { %v690_v41 = vpop.f32.mrf.mxu1  ;;  %v503_v42 = vpop.f32.mrf.mxu0 }
 0x137   :  { %v504_v43 = vadd.f32 %v3897_v20, %v503_v42 }
 0x138   :  { %v693_v44 = vpop.f32.mrf.mxu1  ;;  %v505_v45 = vpop.f32.mrf.mxu0 }
 0x139   :  { %v3957_v47 = vadd.f32 %v693_v44, %v504_v43 }
 0x13a   :  { %v695_v48 = vpop.f32.mrf.mxu1  ;;  %v508_v49 = vpop.f32.mrf.mxu0 }
 0x13b   :  { %v509_v50 = vadd.f32 %v3897_v20, %v508_v49 }
 0x13c   :  { %v698_v51 = vpop.f32.mrf.mxu1  ;;  %v510_v53 = vpop.f32.mrf.mxu0 }
 0x13d   :  { %v3960_v54 = vadd.f32 %v698_v51, %v509_v50 }
 0x13e   :  { %v700_v55 = vpop.f32.mrf.mxu1  ;;  %v513_v56 = vpop.f32.mrf.mxu0 }
 0x13f   :  { %v514_v57 = vadd.f32 %v3897_v20, %v513_v56 }
 0x140   :  { %v703_v59 = vpop.f32.mrf.mxu1  ;;  %v515_v60 = vpop.f32.mrf.mxu0 }
 0x141   :  { %v3963_v61 = vadd.f32 %v703_v59, %v514_v57 }
 0x142   :  { %v705_v62 = vpop.f32.mrf.mxu1  ;;  %v518_v63 = vpop.f32.mrf.mxu0 }
 0x143   :  { %v519_v2 = vadd.f32 %v3897_v20, %v518_v63 }
 0x144   :  { %v708_v3 = vpop.f32.mrf.mxu1  ;;  %v520_v4 = vpop.f32.mrf.mxu0 }
 0x145   :  { %v3966_v5 = vadd.f32 %v708_v3, %v519_v2 }
 0x146   :  { %v710_v6 = vpop.f32.mrf.mxu1  ;;  %v523_v8 = vpop.f32.mrf.mxu0 }
 0x147   :  { %v524_v9 = vadd.f32 %v3897_v20, %v523_v8 }
 0x148   :  { %v713_v10 = vpop.f32.mrf.mxu1  ;;  %v525_v11 = vpop.f32.mrf.mxu0 }
 0x149   :  { %v3969_v12 = vadd.f32 %v713_v10, %v524_v9 }
 0x14a   :  { %v715_v14 = vpop.f32.mrf.mxu1  ;;  %v528_v15 = vpop.f32.mrf.mxu0 }
 0x14b   :  { %v529_v16 = vadd.f32 %v3897_v20, %v528_v15 }
 0x14c   :  { %v718_v17 = vpop.f32.mrf.mxu1  ;;  %v530_v18 = vpop.f32.mrf.mxu0 }
 0x14d   :  { %v3972_v21 = vadd.f32 %v718_v17, %v529_v16 }
 0x14e   :  { %v720_v22 = vpop.f32.mrf.mxu1  ;;  %v533_v23 = vpop.f32.mrf.mxu0 }
 0x14f   :  { %v534_v24 = vadd.f32 %v3897_v20, %v533_v23 }
 0x150   :  { %v723_v25 = vpop.f32.mrf.mxu1  ;;  %v535_v27 = vpop.f32.mrf.mxu0 }
 0x151   :  { %v3975_v29 = vadd.f32 %v723_v25, %v534_v24 }
 0x152   :  { %v725_v30 = vpop.f32.mrf.mxu1  ;;  %v538_v31 = vpop.f32.mrf.mxu0 }
 0x153   :  { %v539_v32 = vadd.f32 %v3897_v20, %v538_v31 }
 0x154   :  { %v728_v34 = vpop.f32.mrf.mxu1  ;;  %v540_v36 = vpop.f32.mrf.mxu0 }
 0x155   :  { %v3978_v37 = vadd.f32 %v728_v34, %v539_v32  ;;  %v2891_v32 = vmov 1966171168  }
 0x156   :  { %v730_v38 = vpop.f32.mrf.mxu1  ;;  %v543_v0 = vpop.f32.mrf.mxu0  ;;  %v1262_v34 = vunpack.c.l.s4 %v2891_v32 }
 0x157   :  { %v544_v41 = vadd.f32 %v3897_v20, %v543_v0 }
 0x158   :  { %v733_v42 = vpop.f32.mrf.mxu1  ;;  %v545_v43 = vpop.f32.mrf.mxu0 }
 0x159   :  { %v3981_v44 = vadd.f32 %v733_v42, %v544_v41  ;;  %v1263_v43 = vunpack.c.0.s8 %v1262_v34 }
 0x15a   :  { %v735_v45 = vpop.f32.mrf.mxu1  ;;  %v548_v48 = vpop.f32.mrf.mxu0 }
 0x15b   :  { %v549_v49 = vadd.f32 %v3897_v20, %v548_v48 }
 0x15c   :  { %v738_v50 = vpop.f32.mrf.mxu1  ;;  %v550_v51 = vpop.f32.mrf.mxu0 }
 0x15d   :  { %v3984_v53 = vadd.f32 %v738_v50, %v549_v49 }
 0x15e   :  { %v740_v55 = vpop.f32.mrf.mxu1  ;;  %v553_v56 = vpop.f32.mrf.mxu0 }
 0x15f   :  { %v554_v57 = vadd.f32 %v3897_v20, %v553_v56 }
 0x160   :  { %v743_v59 = vpop.f32.mrf.mxu1  ;;  %v555_v60 = vpop.f32.mrf.mxu0 }
 0x161   :  { %v3987_v62 = vadd.f32 %v743_v59, %v554_v57 }
 0x162   :  { %v745_v63 = vpop.f32.mrf.mxu1  ;;  %v558_v2 = vpop.f32.mrf.mxu0 }
 0x163   :  { %v559_v3 = vadd.f32 %v3897_v20, %v558_v2 }
 0x164   :  { %v748_v4 = vpop.f32.mrf.mxu1  ;;  %v560_v6 = vpop.f32.mrf.mxu0 }
 0x165   :  { %v3990_v8 = vadd.f32 %v748_v4, %v559_v3 }
 0x166   :  { %v750_v9 = vpop.f32.mrf.mxu1  ;;  %v818_v10 = vpop.f32.mrf.mxu0 }
 0x167   :  { %v819_v11 = vadd.f32 %v818_v10, %v3912_v28  ;;  %v1264_v28 = vlaneseq }
 0x168   :  { %v1008_v14 = vpop.f32.mrf.mxu1  ;;  %v820_v15 = vpop.f32.mrf.mxu0 }
 0x169   :  { %v1009_v16 = vadd.f32 %v1008_v14, %v819_v11  ;;  %v1265_v45 = vshrl.u32 %v1264_v28, 7 }
 0x16a   :  { %v2813_v17 = vpop.f32.mrf.mxu1  ;;  %v823_v18 = vpop.f32.mrf.mxu0 }
 0x16b   :  { %v1132_v22 = vmax.f32 %v1009_v16, 0.0  ;;  %v824_v23 = vadd.f32 %v823_v18, %v3921_v35 }
 0x16c   :  { %v1013_v24 = vpop.f32.mrf.mxu1  ;;  %v825_v25 = vpop.f32.mrf.mxu0 }
 0x16d   :  { %1158 = vst.msk [vmem:[#allocation2] sm:$0xff] %vm1157_vm2, %v1132_v22  ;;  %v1014_v20 = vadd.f32 %v1013_v24, %v824_v23 }
 0x16e   :  { %v2816_v27 = vpop.f32.mrf.mxu1  ;;  %v828_v30 = vpop.f32.mrf.mxu0 }
 0x16f   :  { %v1133_v31 = vmax.f32 %v1014_v20, 0.0  ;;  %v829_v36 = vadd.f32 %v828_v30, %v3924_v40  ;;  %v3999_v40 = vsub.s32 %v1263_v43, %v1265_v45 }
 0x170   :  { %v1018_v38 = vpop.f32.mrf.mxu1  ;;  %v830_v0 = vpop.f32.mrf.mxu0 }
 0x171   :  { %1159 = vst.msk [vmem:[#allocation2 + $0x8] sm:$0xff] %vm1157_vm2, %v1133_v31  ;;  %v1019_v41 = vadd.f32 %v1018_v38, %v829_v36 }
 0x172   :  { %v2819_v42 = vpop.f32.mrf.mxu1  ;;  %v833_v35 = vpop.f32.mrf.mxu0 }
 0x173   :  { %v1134_v48 = vmax.f32 %v1019_v41, 0.0  ;;  %v834_v49 = vadd.f32 %v833_v35, %v3927_v46 }
 0x174   :  { %v1023_v50 = vpop.f32.mrf.mxu1  ;;  %v835_v51 = vpop.f32.mrf.mxu0 }
 0x175   :  { %1160 = vst.msk [vmem:[#allocation2 + $0x10] sm:$0xff] %vm1157_vm2, %v1134_v48  ;;  %v1024_v55 = vadd.f32 %v1023_v50, %v834_v49 }
 0x176   :  { %v2822_v56 = vpop.f32.mrf.mxu1  ;;  %v838_v57 = vpop.f32.mrf.mxu0 }
 0x177   :  { %v1135_v59 = vmax.f32 %v1024_v55, 0.0  ;;  %v839_v60 = vadd.f32 %v838_v57, %v3930_v52 }
 0x178   :  { %v1183_v63 = vld [vmem:[#allocation2] ss:$2 sm:$0xff]  ;;  %v1209_v2 = vld [vmem:[#allocation2 + $0x1] ss:$2 sm:$0xff]  ;;  %v1028_v3 = vpop.f32.mrf.mxu1  ;;  %v840_v4 = vpop.f32.mrf.mxu0 }
 0x179   :  { %v1234_v6 = vmax.f32 %v1183_v63, %v1209_v2  ;;  %1161 = vst.msk [vmem:[#allocation2 + $0x18] sm:$0xff] %vm1157_vm2, %v1135_v59  ;;  %v1029_v46 = vadd.f32 %v1028_v3, %v839_v60 }
 0x17a   :  { %v2825_v9 = vpop.f32.mrf.mxu1  ;;  %v843_v10 = vpop.f32.mrf.mxu0 }
 0x17b   :  { %v1260_v11 = vcombine.high %v1234_v6, %v1234_v6  ;;  %v1267_v14 = vrot.slane %v1234_v6, %v3999_v40  ;;  %v1136_v15 = vmax.f32 %v1029_v46, 0.0  ;;  %v844_v16 = vadd.f32 %v843_v10, %v3933_v58 }
 0x17c   :  { %v1033_v17 = vpop.f32.mrf.mxu1  ;;  %v845_v18 = vpop.f32.mrf.mxu0 }
 0x17d   :  { %v1274_v52 = vrot.slane %v1260_v11, %v3999_v40  ;;  %v1275_v22 = vcombine.high %v1267_v14, %v1267_v14  ;;  %1162 = vst.msk [vmem:[#allocation2 + $0x20] sm:$0xff] %vm1157_vm2, %v1136_v15  ;;  %v1034_v23 = vadd.f32 %v1033_v17, %v844_v16  ;;  %v1283_v24 = vrot.slane %v1267_v14, %v3999_v40 }
 0x17e   :  { %v2828_v25 = vpop.f32.mrf.mxu1  ;;  %v848_v20 = vpop.f32.mrf.mxu0 }
 0x17f   :  { %v1276_v27 = vcombine.high %v1274_v52, %v1274_v52  ;;  %v1290_v30 = vrot.slane %v1274_v52, %v3999_v40  ;;  %v1297_v31 = vrot.slane %v1275_v22, %v3999_v40  ;;  %v1137_v32 = vmax.f32 %v1034_v23, 0.0 }
 0x180   :  { %v1185_v34 = vld [vmem:[#allocation2 + $0x10] ss:$2 sm:$0xff]  ;;  %v1211_v58 = vld [vmem:[#allocation2 + $0x11] ss:$2 sm:$0xff]  ;;  %v849_v28 = vadd.f32 %v848_v20, %v3936_v1  ;;  %v1038_v36 = vpop.f32.mrf.mxu1  ;;  %v850_v38 = vpop.f32.mrf.mxu0 }
 0x181   :  { %v1304_v0 = vrot.slane %v1276_v27, %v3999_v40  ;;  %v1306_v41 = vcombine.high %v1290_v30, %v1290_v30  ;;  %v1872_v42 = vcombine.low %v1283_v24, %v1297_v31  ;;  %v2764_v35 = vcombine.high %v1283_v24, %v1297_v31  ;;  %1163 = vst.msk [vmem:[#allocation2 + $0x28] sm:$0xff] %vm1157_vm2, %v1137_v32 }
 0x182   :  { %v1894_v43 = vrot.slane %v1290_v30, %v3999_v40  ;;  %v1235_v45 = vmax.f32 %v1185_v34, %v1211_v58  ;;  %v1039_v48 = vadd.f32 %v1038_v36, %v849_v28  ;;  %v2831_v49 = vpop.f32.mrf.mxu1  ;;  %v853_v50 = vpop.f32.mrf.mxu0 }
 0x183   :  { %v1880_v51 = vrot.slane %v1872_v42, %v3999_v40  ;;  %v1887_v55 = vrot.slane %v2764_v35, %v3999_v40  ;;  %v1911_v1 = vcombine.low %v1304_v0, %v1306_v41  ;;  %v1308_v3 = vcombine.high %v1304_v0, %v1304_v0 }
 0x184   :  { %v1309_v56 = vcombine.high %v1235_v45, %v1235_v45  ;;  %v1316_v57 = vrot.slane %v1235_v45, %v3999_v40  ;;  %v1138_v59 = vmax.f32 %v1039_v48, 0.0  ;;  %v1043_v60 = vpop.f32.mrf.mxu1  ;;  %v855_v63 = vpop.f32.mrf.mxu0  ;;  %v854_v4 = vadd.f32 %v853_v50, %v3939_v7 }
 0x185   :  { %v1895_v2 = vcombine.low %v1880_v51, %v1887_v55  ;;  %v1909_v6 = vrot.slane %v1894_v43, %v3999_v40  ;;  %v1919_v16 = vrot.slane %v1911_v1, %v3999_v40 }
 0x186   :  { %v1323_v46 = vrot.slane %v1309_v56, %v3999_v40  ;;  %v1324_v9 = vcombine.high %v1316_v57, %v1316_v57  ;;  %v1332_v10 = vrot.slane %v1316_v57, %v3999_v40  ;;  %1164 = vst.msk [vmem:[#allocation2 + $0x30] sm:$0xff] %vm1157_vm2, %v1138_v59  ;;  %v2834_v11 = vpop.f32.mrf.mxu1  ;;  %v858_v14 = vpop.f32.mrf.mxu0  ;;  %v1044_v17 = vadd.f32 %v1043_v60, %v854_v4 }
 0x187   :  { %v1902_v15 = vrot.slane %v1895_v2, %v3999_v40  ;;  %v859_v18 = vadd.f32 %v858_v14, %v3942_v13 }
 0x188   :  { %v1325_v52 = vcombine.high %v1323_v46, %v1323_v46  ;;  %v1339_v7 = vrot.slane %v1323_v46, %v3999_v40  ;;  %v1346_v22 = vrot.slane %v1324_v9, %v3999_v40  ;;  %v1912_v23 = vcombine.low %v1308_v3, %v1332_v10  ;;  %v1187_v24 = vld [vmem:[#allocation2 + $0x20] ss:$2 sm:$0xff]  ;;  %v1213_v25 = vld [vmem:[#allocation2 + $0x21] ss:$2 sm:$0xff]  ;;  %v1048_v20 = vpop.f32.mrf.mxu1  ;;  %v860_v27 = vpop.f32.mrf.mxu0 }
 0x189   :  { %v1910_v30 = vcombine.low %v1902_v15, %v1909_v6  ;;  %v1236_v31 = vmax.f32 %v1187_v24, %v1213_v25  ;;  %v1139_v32 = vmax.f32 %v1044_v17, 0.0  ;;  %v1049_v34 = vadd.f32 %v1048_v20, %v859_v18 }
 0x18a   :  { %v1353_v58 = vrot.slane %v1325_v52, %v3999_v40  ;;  %v1355_v28 = vcombine.high %v1339_v7, %v1339_v7  ;;  %v1926_v36 = vrot.slane %v1912_v23, %v3999_v40  ;;  %v1933_v13 = vrot.slane %v1346_v22, %v3999_v40  ;;  %v2837_v38 = vpop.f32.mrf.mxu1  ;;  %v863_v0 = vpop.f32.mrf.mxu0 }
 0x18b   :  { %2673 = vst.msk [vmem:[#allocation3] sm:$0x1f] %vm2672_vm3, %v1910_v30  ;;  %v2765_v41 = vcombine.high %v1332_v10, %v1346_v22  ;;  %v1358_v42 = vcombine.high %v1236_v31, %v1236_v31  ;;  %v1365_v35 = vrot.slane %v1236_v31, %v3999_v40  ;;  %v1140_v43 = vmax.f32 %v1049_v34, 0.0 }
 0x18c   :  { %1165 = vst.msk [vmem:[#allocation2 + $0x38] sm:$0xff] %vm1157_vm2, %v1139_v32  ;;  %v1934_v45 = vcombine.low %v1919_v16, %v1926_v36  ;;  %v1948_v48 = vrot.slane %v1933_v13, %v3999_v40  ;;  %v1951_v49 = vcombine.low %v1339_v7, %v1353_v58  ;;  %v1053_v50 = vpop.f32.mrf.mxu1  ;;  %v865_v51 = vpop.f32.mrf.mxu0  ;;  %v1972_v1 = vrot.slane %v1355_v28, %v3999_v40 }
 0x18d   :  { %v1958_v55 = vrot.slane %v2765_v41, %v3999_v40  ;;  %v1372_v56 = vrot.slane %v1358_v42, %v3999_v40  ;;  %v1373_v57 = vcombine.high %v1365_v35, %v1365_v35  ;;  %1166 = vst.msk [vmem:[#allocation2 + $0x40] sm:$0xff] %vm1157_vm2, %v1140_v43  ;;  %v1357_v63 = vcombine.high %v1353_v58, %v1353_v58 }
 0x18e   :  { %v1941_v59 = vrot.slane %v1934_v45, %v3999_v40  ;;  %v1965_v60 = vrot.slane %v1951_v49, %v3999_v40  ;;  %v1381_v2 = vrot.slane %v1365_v35, %v3999_v40  ;;  %v2840_v3 = vpop.f32.mrf.mxu1  ;;  %v868_v4 = vpop.f32.mrf.mxu0  ;;  %v864_v10 = vadd.f32 %v863_v0, %v3945_v19 }
 0x18f   :  { %v1374_v6 = vcombine.high %v1372_v56, %v1372_v56  ;;  %v1388_v46 = vrot.slane %v1372_v56, %v3999_v40  ;;  %v1395_v9 = vrot.slane %v1373_v57, %v3999_v40  ;;  %v869_v23 = vadd.f32 %v868_v4, %v3948_v26 }
 0x190   :  { %v1949_v11 = vcombine.low %v1941_v59, %v1948_v48  ;;  %v1973_v14 = vcombine.low %v1958_v55, %v1965_v60  ;;  %v1403_v15 = vcombine.high %v1381_v2, %v1381_v2  ;;  %v1989_v16 = vcombine.low %v1357_v63, %v1381_v2  ;;  %v1058_v17 = vpop.f32.mrf.mxu1  ;;  %v870_v18 = vpop.f32.mrf.mxu0 }
 0x191   :  { %v1402_v52 = vrot.slane %v1374_v6, %v3999_v40  ;;  %v1405_v7 = vcombine.high %v1395_v9, %v1395_v9  ;;  %v1054_v22 = vadd.f32 %v1053_v50, %v864_v10  ;;  %v1987_v25 = vrot.slane %v1972_v1, %v3999_v40 }
 0x192   :  { %v1980_v24 = vrot.slane %v1973_v14, %v3999_v40  ;;  %2674 = vst.msk [vmem:[#allocation3 + $0x8] sm:$0x1f] %vm2672_vm3, %v1949_v11  ;;  %v1990_v20 = vcombine.low %v1395_v9, %v1403_v15  ;;  %v1997_v19 = vrot.slane %v1989_v16, %v3999_v40  ;;  %v2843_v31 = vpop.f32.mrf.mxu1  ;;  %v873_v32 = vpop.f32.mrf.mxu0  ;;  %v1059_v0 = vadd.f32 %v1058_v17, %v869_v23 }
 0x193   :  { %v1189_v27 = vld [vmem:[#allocation2 + $0x30] ss:$2 sm:$0xff]  ;;  %v1215_v30 = vld [vmem:[#allocation2 + $0x31] ss:$2 sm:$0xff]  ;;  %v2011_v34 = vrot.slane %v1405_v7, %v3999_v40  ;;  %v2028_v58 = vcombine.low %v1388_v46, %v1402_v52  ;;  %v2766_v28 = vcombine.high %v1388_v46, %v1402_v52  ;;  %v1141_v38 = vmax.f32 %v1054_v22, 0.0 }
 0x194   :  { %v1237_v36 = vmax.f32 %v1189_v27, %v1215_v30  ;;  %v1988_v13 = vcombine.low %v1980_v24, %v1987_v25  ;;  %v2004_v26 = vrot.slane %v1990_v20, %v3999_v40  ;;  %v1063_v41 = vpop.f32.mrf.mxu1  ;;  %v875_v42 = vpop.f32.mrf.mxu0  ;;  %v1142_v50 = vmax.f32 %v1059_v0, 0.0 }
 0x195   :  { %v2036_v35 = vrot.slane %v2028_v58, %v3999_v40  ;;  %v2043_v43 = vrot.slane %v2766_v28, %v3999_v40  ;;  %1167 = vst.msk [vmem:[#allocation2 + $0x48] sm:$0xff] %vm1157_vm2, %v1141_v38  ;;  %v874_v51 = vadd.f32 %v873_v32, %v3951_v33  ;;  %v2026_v56 = vrot.slane %v2011_v34, %v3999_v40  ;;  %v2693_v33 = vld [vmem:[#allocation3] sm:$0x1f] }
 0x196   :  { %v1407_v45 = vcombine.high %v1237_v36, %v1237_v36  ;;  %2675 = vst.msk [vmem:[#allocation3 + $0x10] sm:$0x1f] %vm2672_vm3, %v1988_v13  ;;  %v2012_v48 = vcombine.low %v1997_v19, %v2004_v26  ;;  %v1414_v49 = vrot.slane %v1237_v36, %v3999_v40  ;;  %v2846_v55 = vpop.f32.mrf.mxu1  ;;  %v878_v1 = vpop.f32.mrf.mxu0 }
 0x197   :  { %v2051_v57 = vcombine.low %v2036_v35, %v2043_v43  ;;  %v879_v60 = vadd.f32 %v878_v1, %v3954_v39  ;;  %1168 = vst.msk [vmem:[#allocation2 + $0x50] sm:$0xff] %vm1157_vm2, %v1142_v50  ;;  %v1064_v4 = vadd.f32 %v1063_v41, %v874_v51 }
 0x198   :  { %v1421_v59 = vrot.slane %v1407_v45, %v3999_v40  ;;  %v2019_v63 = vrot.slane %v2012_v48, %v3999_v40  ;;  %v1422_v2 = vcombine.high %v1414_v49, %v1414_v49  ;;  %v1430_v3 = vrot.slane %v1414_v49, %v3999_v40  ;;  %v1068_v6 = vpop.f32.mrf.mxu1  ;;  %v880_v46 = vpop.f32.mrf.mxu0 }
 0x199   :  { %v2704_v9 = vld [vmem:[#allocation3 + $0x8] sm:$0x1f]  ;;  %v2058_v11 = vrot.slane %v2051_v57, %v3999_v40  ;;  %v1069_v14 = vadd.f32 %v1068_v6, %v879_v60  ;;  %v1143_v23 = vmax.f32 %v1064_v4, 0.0 }
 0x19a   :  { %v1423_v10 = vcombine.high %v1421_v59, %v1421_v59  ;;  %v2714_v15 = vmax.f32 %v2693_v33, %v2704_v9  ;;  %v2027_v16 = vcombine.low %v2019_v63, %v2026_v56  ;;  %v1444_v39 = vrot.slane %v1422_v2, %v3999_v40  ;;  %v2849_v18 = vpop.f32.mrf.mxu1  ;;  %v883_v52 = vpop.f32.mrf.mxu0 }
 0x19b   :  { %v1452_v17 = vcombine.high %v1430_v3, %v1430_v3  ;;  %v2050_v22 = vrot.slane %v1430_v3, %v3999_v40  ;;  %v1144_v24 = vmax.f32 %v1069_v14, 0.0  ;;  %v4076_v25 = vrot.slane %v1421_v59, %v3999_v40  ;;  %1169 = vst.msk [vmem:[#allocation2 + $0x58] sm:$0xff] %vm1157_vm2, %v1143_v23 }
 0x19c   :  { %v4067_v7 = vrot.slane %v1423_v10, %v3999_v40  ;;  %2724 = vst.msk [vmem:[%s4308_s3] sm:$0x1f] %vm2672_vm3, %v2714_v15  ;;  %2676 = vst.msk [vmem:[#allocation3 + $0x18] sm:$0x1f] %vm2672_vm3, %v2027_v16  ;;  %v1454_v20 = vcombine.high %v1444_v39, %v1444_v39  ;;  %v884_v27 = vadd.f32 %v883_v52, %v3957_v47  ;;  %v1073_v30 = vpop.f32.mrf.mxu1  ;;  %v885_v31 = vpop.f32.mrf.mxu0  ;;  %v1191_v34 = vld [vmem:[#allocation2 + $0x40] ss:$2 sm:$0xff] }
 0x19d   :  { %v2067_v19 = vcombine.low %v1444_v39, %v1452_v17  ;;  %v2065_v32 = vrot.slane %v2050_v22, %v3999_v40  ;;  %v1217_v58 = vld [vmem:[#allocation2 + $0x41] ss:$2 sm:$0xff]  ;;  %1170 = vst.msk [vmem:[#allocation2 + $0x60] sm:$0xff] %vm1157_vm2, %v1144_v24  ;;  %v2694_v60 = vld [vmem:[#allocation3 + $0x10] sm:$0x1f] }
 0x19e   :  { %v2068_v28 = vcombine.low %v1454_v20, %v4076_v25  ;;  %v1238_v36 = vmax.f32 %v1191_v34, %v1217_v58  ;;  %v1074_v13 = vadd.f32 %v1073_v30, %v884_v27  ;;  %v2852_v26 = vpop.f32.mrf.mxu1  ;;  %v888_v38 = vpop.f32.mrf.mxu0  ;;  %v2089_v47 = vrot.slane %v4067_v7, %v3999_v40 }
 0x19f   :  { %v2066_v0 = vcombine.low %v2058_v11, %v2065_v32  ;;  %v2075_v41 = vrot.slane %v2067_v19, %v3999_v40  ;;  %v889_v42 = vadd.f32 %v888_v38, %v3960_v54  ;;  %v2767_v3 = vcombine.high %v4076_v25, %v4067_v7 }
 0x1a0   :  { %v2082_v35 = vrot.slane %v2068_v28, %v3999_v40  ;;  %v1456_v43 = vcombine.high %v1238_v36, %v1238_v36  ;;  %v1463_v45 = vrot.slane %v1238_v36, %v3999_v40  ;;  %v1145_v48 = vmax.f32 %v1074_v13, 0.0  ;;  %v1078_v49 = vpop.f32.mrf.mxu1  ;;  %v890_v50 = vpop.f32.mrf.mxu0 }
 0x1a1   :  { %2677 = vst.msk [vmem:[#allocation3 + $0x20] sm:$0x1f] %vm2672_vm3, %v2066_v0  ;;  %v1079_v51 = vadd.f32 %v1078_v49, %v889_v42  ;;  %v2104_v2 = vrot.slane %v2089_v47, %v3999_v40  ;;  %v2114_v36 = vrot.slane %v2767_v3, %v3999_v40 }
 0x1a2   :  { %v2090_v55 = vcombine.low %v2075_v41, %v2082_v35  ;;  %v1470_v1 = vrot.slane %v1456_v43, %v3999_v40  ;;  %v1471_v56 = vcombine.high %v1463_v45, %v1463_v45  ;;  %v1479_v57 = vrot.slane %v1463_v45, %v3999_v40  ;;  %1171 = vst.msk [vmem:[#allocation2 + $0x68] sm:$0xff] %vm1157_vm2, %v1145_v48  ;;  %v2855_v54 = vpop.f32.mrf.mxu1  ;;  %v893_v59 = vpop.f32.mrf.mxu0  ;;  %v1193_v11 = vld [vmem:[#allocation2 + $0x50] ss:$2 sm:$0xff]  ;;  %v1219_v14 = vld [vmem:[#allocation2 + $0x51] ss:$2 sm:$0xff] }
 0x1a3   :  { %v2705_v63 = vld [vmem:[#allocation3 + $0x18] sm:$0x1f]  ;;  %v1146_v4 = vmax.f32 %v1079_v51, 0.0  ;;  %v894_v6 = vadd.f32 %v893_v59, %v3963_v61  ;;  %v1239_v18 = vmax.f32 %v1193_v11, %v1219_v14 }
 0x1a4   :  { %v2715_v46 = vmax.f32 %v2694_v60, %v2705_v63  ;;  %v2097_v33 = vrot.slane %v2090_v55, %v3999_v40  ;;  %v1472_v9 = vcombine.high %v1470_v1, %v1470_v1  ;;  %v1486_v10 = vrot.slane %v1470_v1, %v3999_v40  ;;  %v1083_v15 = vpop.f32.mrf.mxu1  ;;  %v895_v16 = vpop.f32.mrf.mxu0 }
 0x1a5   :  { %v1493_v39 = vrot.slane %v1471_v56, %v3999_v40  ;;  %v1501_v17 = vcombine.high %v1479_v57, %v1479_v57  ;;  %1172 = vst.msk [vmem:[#allocation2 + $0x70] sm:$0xff] %vm1157_vm2, %v1146_v4  ;;  %v1084_v52 = vadd.f32 %v1083_v15, %v894_v6  ;;  %v1505_v27 = vcombine.high %v1239_v18, %v1239_v18 }
 0x1a6   :  { %2725 = vst.msk [vmem:[%s4308_s3 + $0x8] sm:$0x1f] %vm2672_vm3, %v2715_v46  ;;  %v2105_v61 = vcombine.low %v2097_v33, %v2104_v2  ;;  %v1500_v7 = vrot.slane %v1472_v9, %v3999_v40  ;;  %v1502_v22 = vcombine.high %v1486_v10, %v1486_v10  ;;  %v2858_v23 = vpop.f32.mrf.mxu1  ;;  %v898_v24 = vpop.f32.mrf.mxu0  ;;  %v1512_v32 = vrot.slane %v1239_v18, %v3999_v40 }
 0x1a7   :  { %v1503_v25 = vcombine.high %v1493_v39, %v1493_v39  ;;  %v2107_v20 = vcombine.low %v1479_v57, %v1493_v39  ;;  %v2128_v19 = vrot.slane %v1501_v17, %v3999_v40  ;;  %v1147_v34 = vmax.f32 %v1084_v52, 0.0 }
 0x1a8   :  { %2678 = vst.msk [vmem:[#allocation3 + $0x28] sm:$0x1f] %vm2672_vm3, %v2105_v61  ;;  %v1504_v30 = vcombine.high %v1500_v7, %v1500_v7  ;;  %v2146_v31 = vcombine.low %v1500_v7, %v1502_v22  ;;  %v1088_v58 = vpop.f32.mrf.mxu1  ;;  %v900_v28 = vpop.f32.mrf.mxu0  ;;  %v1519_v38 = vrot.slane %v1505_v27, %v3999_v40  ;;  %v1520_v43 = vcombine.high %v1512_v32, %v1512_v32  ;;  %v2695_v14 = vld [vmem:[#allocation3 + $0x20] sm:$0x1f] }
 0x1a9   :  { %v2121_v13 = vrot.slane %v2107_v20, %v3999_v40  ;;  %v2145_v26 = vcombine.low %v1503_v25, %v1486_v10  ;;  %v1195_v0 = vld [vmem:[#allocation2 + $0x60] ss:$2 sm:$0xff]  ;;  %v1221_v41 = vld [vmem:[#allocation2 + $0x61] ss:$2 sm:$0xff]  ;;  %v2143_v47 = vrot.slane %v2128_v19, %v3999_v40  ;;  %1173 = vst.msk [vmem:[#allocation2 + $0x78] sm:$0xff] %vm1157_vm2, %v1147_v34  ;;  %v1528_v1 = vrot.slane %v1512_v32, %v3999_v40 }
 0x1aa   :  { %v2160_v42 = vrot.slane %v2146_v31, %v3999_v40  ;;  %v2167_v35 = vrot.slane %v1504_v30, %v3999_v40  ;;  %v2861_v45 = vpop.f32.mrf.mxu1  ;;  %v4116_v48 = vpop.f32.mrf.mxu0  ;;  %v1521_v51 = vcombine.high %v1519_v38, %v1519_v38  ;;  %v1535_v55 = vrot.slane %v1519_v38, %v3999_v40 }
 0x1ab   :  { %v2129_v49 = vcombine.low %v2114_v36, %v2121_v13  ;;  %v2153_v50 = vrot.slane %v2145_v26, %v3999_v40  ;;  %v1542_v56 = vrot.slane %v1520_v43, %v3999_v40  ;;  %v1240_v57 = vmax.f32 %v1195_v0, %v1221_v41 }
 0x1ac   :  { %v899_v54 = vadd.f32 %v898_v24, %v3966_v5  ;;  %v4123_v59 = vpop.f32.mrf.mxu1  ;;  %v905_v60 = vpop.f32.mrf.mxu0  ;;  %v1549_v3 = vrot.slane %v1521_v51, %v3999_v40  ;;  %v1551_v4 = vcombine.high %v1535_v55, %v1535_v55  ;;  %v2206_v33 = vrot.slane %v1535_v55, %v3999_v40 }
 0x1ad   :  { %v2136_v63 = vrot.slane %v2129_v49, %v3999_v40  ;;  %v2168_v2 = vcombine.low %v2153_v50, %v2160_v42  ;;  %v2184_v6 = vcombine.low %v1528_v1, %v1542_v56  ;;  %v2768_v46 = vcombine.high %v1528_v1, %v1542_v56 }
 0x1ae   :  { %v1554_v9 = vcombine.high %v1240_v57, %v1240_v57  ;;  %v2864_v10 = vpop.f32.mrf.mxu1  ;;  %v4128_v11 = vpop.f32.mrf.mxu0  ;;  %v2182_v39 = vrot.slane %v2167_v35, %v3999_v40  ;;  %v2223_v17 = vcombine.low %v1549_v3, %v1551_v4  ;;  %v1553_v7 = vcombine.high %v1549_v3, %v1549_v3 }
 0x1af   :  { %v2706_v15 = vld [vmem:[#allocation3 + $0x28] sm:$0x1f]  ;;  %v2144_v5 = vcombine.low %v2136_v63, %v2143_v47  ;;  %v2175_v16 = vrot.slane %v2168_v2, %v3999_v40  ;;  %v2192_v52 = vrot.slane %v2184_v6, %v3999_v40  ;;  %v2199_v61 = vrot.slane %v2768_v46, %v3999_v40 }
 0x1b0   :  { %v2716_v18 = vmax.f32 %v2695_v14, %v2706_v15  ;;  %v4134_v22 = vpop.f32.mrf.mxu1  ;;  %v910_v23 = vpop.f32.mrf.mxu0  ;;  %v2221_v25 = vrot.slane %v2206_v33, %v3999_v40  ;;  %v1561_v20 = vrot.slane %v1240_v57, %v3999_v40  ;;  %v1568_v19 = vrot.slane %v1554_v9, %v3999_v40  ;;  %v1197_v27 = vld [vmem:[#allocation2 + $0x70] ss:$2 sm:$0xff]  ;;  %v1223_v30 = vld [vmem:[#allocation2 + $0x71] ss:$2 sm:$0xff] }
 0x1b1   :  { %v2183_v24 = vcombine.low %v2175_v16, %v2182_v39  ;;  %2679 = vst.msk [vmem:[#allocation3 + $0x30] sm:$0x1f] %vm2672_vm3, %v2144_v5  ;;  %v2207_v31 = vcombine.low %v2192_v52, %v2199_v61  ;;  %v2231_v32 = vrot.slane %v2223_v17, %v3999_v40  ;;  %v1241_v34 = vmax.f32 %v1197_v27, %v1223_v30 }
 0x1b2   :  { %2726 = vst.msk [vmem:[%s4308_s3 + $0x10] sm:$0x1f] %vm2672_vm3, %v2716_v18  ;;  %v1089_v28 = vadd.f32 %v1088_v58, %v899_v54  ;;  %v2867_v36 = vpop.f32.mrf.mxu1  ;;  %v4145_v13 = vpop.f32.mrf.mxu0  ;;  %v1569_v26 = vcombine.high %v1561_v20, %v1561_v20  ;;  %v1570_v38 = vcombine.high %v1568_v19, %v1568_v19  ;;  %v1577_v0 = vrot.slane %v1561_v20, %v3999_v40 }
 0x1b3   :  { %2680 = vst.msk [vmem:[#allocation3 + $0x38] sm:$0x1f] %vm2672_vm3, %v2183_v24  ;;  %v1584_v41 = vrot.slane %v1568_v19, %v3999_v40  ;;  %v2214_v47 = vrot.slane %v2207_v31, %v3999_v40  ;;  %v1603_v42 = vcombine.high %v1241_v34, %v1241_v34  ;;  %v1610_v35 = vrot.slane %v1241_v34, %v3999_v40 }
 0x1b4   :  { %v1148_v43 = vmax.f32 %v1089_v28, 0.0  ;;  %v4152_v45 = vpop.f32.mrf.mxu1  ;;  %v915_v58 = vpop.f32.mrf.mxu0  ;;  %v1591_v49 = vrot.slane %v1569_v26, %v3999_v40  ;;  %v1598_v50 = vrot.slane %v1570_v38, %v3999_v40  ;;  %v2224_v55 = vcombine.low %v1553_v7, %v1577_v0 }
 0x1b5   :  { %v1600_v51 = vcombine.high %v1584_v41, %v1584_v41  ;;  %v2222_v1 = vcombine.low %v2214_v47, %v2221_v25  ;;  %v1617_v56 = vrot.slane %v1603_v42, %v3999_v40  ;;  %v1618_v57 = vcombine.high %v1610_v35, %v1610_v35 }
 0x1b6   :  { %v1626_v54 = vrot.slane %v1610_v35, %v3999_v40  ;;  %1174 = vst.msk [vmem:[#allocation2 + $0x80] sm:$0xff] %vm1157_vm2, %v1148_v43  ;;  %v2870_v60 = vpop.f32.mrf.mxu1  ;;  %v918_v63 = vpop.f32.mrf.mxu0  ;;  %v2238_v2 = vrot.slane %v2224_v55, %v3999_v40  ;;  %v2245_v3 = vrot.slane %v1591_v49, %v3999_v40  ;;  %v2769_v4 = vcombine.high %v1577_v0, %v1591_v49 }
 0x1b7   :  { %v2263_v6 = vcombine.low %v1584_v41, %v1598_v50  ;;  %2681 = vst.msk [vmem:[#allocation3 + $0x40] sm:$0x1f] %vm2672_vm3, %v2222_v1  ;;  %v2284_v46 = vrot.slane %v1600_v51, %v3999_v40  ;;  %v904_v33 = vadd.f32 %v4116_v48, %v3969_v12  ;;  %v1602_v16 = vcombine.high %v1598_v50, %v1598_v50 }
 0x1b8   :  { %v1108_v9 = vpop.f32.mrf.mxu1  ;;  %v920_v10 = vpop.f32.mrf.mxu0  ;;  %v2246_v14 = vcombine.low %v2231_v32, %v2238_v2  ;;  %v2270_v15 = vrot.slane %v2769_v4, %v3999_v40  ;;  %v2696_v39 = vld [vmem:[#allocation3 + $0x30] sm:$0x1f]  ;;  %v2260_v18 = vrot.slane %v2245_v3, %v3999_v40  ;;  %v1619_v52 = vcombine.high %v1617_v56, %v1617_v56 }
 0x1b9   :  { %v2277_v5 = vrot.slane %v2263_v6, %v3999_v40  ;;  %v1640_v61 = vrot.slane %v1618_v57, %v3999_v40  ;;  %v1648_v7 = vcombine.high %v1626_v54, %v1626_v54  ;;  %v2301_v20 = vcombine.low %v1602_v16, %v1626_v54 }
 0x1ba   :  { %v2707_v17 = vld [vmem:[#allocation3 + $0x38] sm:$0x1f]  ;;  %v2873_v23 = vpop.f32.mrf.mxu1  ;;  %v923_v24 = vpop.f32.mrf.mxu0  ;;  %v2253_v12 = vrot.slane %v2246_v14, %v3999_v40  ;;  %v2299_v28 = vrot.slane %v2284_v46, %v3999_v40  ;;  %v1094_v36 = vadd.f32 %v4123_v59, %v904_v33  ;;  %v1647_v26 = vrot.slane %v1619_v52, %v3999_v40 }
 0x1bb   :  { %v2717_v25 = vmax.f32 %v2696_v39, %v2707_v17  ;;  %v2285_v48 = vcombine.low %v2270_v15, %v2277_v5  ;;  %v1650_v19 = vcombine.high %v1640_v61, %v1640_v61  ;;  %v2302_v27 = vcombine.low %v1640_v61, %v1648_v7 }
 0x1bc   :  { %v1113_v30 = vpop.f32.mrf.mxu1  ;;  %v925_v31 = vpop.f32.mrf.mxu0  ;;  %v2261_v32 = vcombine.low %v2253_v12, %v2260_v18  ;;  %v2309_v38 = vrot.slane %v2301_v20, %v3999_v40  ;;  %v1149_v43 = vmax.f32 %v1094_v36, 0.0  ;;  %v909_v58 = vadd.f32 %v4128_v11, %v3972_v21 }
 0x1bd   :  { %2727 = vst.msk [vmem:[%s4308_s3 + $0x18] sm:$0x1f] %vm2672_vm3, %v2717_v25  ;;  %v2292_v34 = vrot.slane %v2285_v48, %v3999_v40  ;;  %v2316_v0 = vrot.slane %v2302_v27, %v3999_v40  ;;  %v2323_v41 = vrot.slane %v1650_v19, %v3999_v40  ;;  %v914_v59 = vadd.f32 %v4145_v13, %v3975_v29 }
 0x1be   :  { %v2876_v47 = vpop.f32.mrf.mxu1  ;;  %v928_v42 = vpop.f32.mrf.mxu0  ;;  %2682 = vst.msk [vmem:[#allocation3 + $0x48] sm:$0x1f] %vm2672_vm3, %v2261_v32  ;;  %v1633_v49 = vrot.slane %v1617_v56, %v3999_v40  ;;  %v919_v51 = vadd.f32 %v918_v63, %v3978_v37  ;;  %v1099_v57 = vadd.f32 %v4134_v22, %v909_v58  ;;  %v924_v21 = vadd.f32 %v923_v24, %v3981_v44 }
 0x1bf   :  { %v2300_v35 = vcombine.low %v2292_v34, %v2299_v28  ;;  %v2324_v50 = vcombine.low %v2309_v38, %v2316_v0  ;;  %1175 = vst.msk [vmem:[#allocation2 + $0x88] sm:$0xff] %vm1157_vm2, %v1149_v43  ;;  %v1104_v54 = vadd.f32 %v4152_v45, %v914_v59  ;;  %v929_v11 = vadd.f32 %v928_v42, %v3984_v53 }
 0x1c0   :  { %v1118_v55 = vpop.f32.mrf.mxu1  ;;  %v930_v1 = vpop.f32.mrf.mxu0  ;;  %v2338_v13 = vrot.slane %v2323_v41, %v3999_v40  ;;  %v2340_v56 = vcombine.low %v1633_v49, %v1647_v26  ;;  %v1109_v37 = vadd.f32 %v1108_v9, %v919_v51  ;;  %v1150_v2 = vmax.f32 %v1099_v57, 0.0  ;;  %v2697_v9 = vld [vmem:[#allocation3 + $0x40] sm:$0x1f] }
 0x1c1   :  { %2683 = vst.msk [vmem:[#allocation3 + $0x50] sm:$0x1f] %vm2672_vm3, %v2300_v35  ;;  %v2331_v29 = vrot.slane %v2324_v50, %v3999_v40  ;;  %v1151_v3 = vmax.f32 %v1104_v54, 0.0  ;;  %v1114_v4 = vadd.f32 %v1113_v30, %v924_v21  ;;  %v1119_v6 = vadd.f32 %v1118_v55, %v929_v11 }
 0x1c2   :  { %v2879_v60 = vpop.f32.mrf.mxu1  ;;  %v933_v63 = vpop.f32.mrf.mxu0  ;;  %v2770_v22 = vcombine.high %v1633_v49, %v1647_v26  ;;  %v1152_v33 = vmax.f32 %v1109_v37, 0.0  ;;  %1176 = vst.msk [vmem:[#allocation2 + $0x90] sm:$0xff] %vm1157_vm2, %v1150_v2  ;;  %v2348_v18 = vrot.slane %v2340_v56, %v3999_v40 }
 0x1c3   :  { %v2339_v46 = vcombine.low %v2331_v29, %v2338_v13  ;;  %v934_v45 = vadd.f32 %v933_v63, %v3987_v62  ;;  %1177 = vst.msk [vmem:[#allocation2 + $0x98] sm:$0xff] %vm1157_vm2, %v1151_v3  ;;  %v1153_v53 = vmax.f32 %v1114_v4, 0.0  ;;  %v1154_v14 = vmax.f32 %v1119_v6, 0.0 }
 0x1c4   :  { %v1123_v44 = vpop.f32.mrf.mxu1  ;;  %v935_v10 = vpop.f32.mrf.mxu0  ;;  %1178 = vst.msk [vmem:[#allocation2 + $0xa0] sm:$0xff] %vm1157_vm2, %v1152_v33  ;;  %v2355_v52 = vrot.slane %v2770_v22, %v3999_v40 }
 0x1c5   :  { %v2708_v15 = vld [vmem:[#allocation3 + $0x48] sm:$0x1f]  ;;  %2684 = vst.msk [vmem:[#allocation3 + $0x58] sm:$0x1f] %vm2672_vm3, %v2339_v46  ;;  %v1124_v5 = vadd.f32 %v1123_v44, %v934_v45 }
 0x1c6   :  { %v2882_v16 = vpop.f32.mrf.mxu1  ;;  %v938_v39 = vpop.f32.mrf.mxu0  ;;  %v2718_v17 = vmax.f32 %v2697_v9, %v2708_v15  ;;  %1179 = vst.msk [vmem:[#allocation2 + $0xa8] sm:$0xff] %vm1157_vm2, %v1153_v53  ;;  %1180 = vst.msk [vmem:[#allocation2 + $0xb0] sm:$0xff] %vm1157_vm2, %v1154_v14  ;;  %v1199_v61 = vld [vmem:[#allocation2 + $0x80] ss:$2 sm:$0xff]  ;;  %v1225_v7 = vld [vmem:[#allocation2 + $0x81] ss:$2 sm:$0xff]  ;;  %v2363_v30 = vcombine.low %v2348_v18, %v2355_v52 }
 0x1c7   :  { %v939_v62 = vadd.f32 %v938_v39, %v3990_v8  ;;  %v1242_v25 = vmax.f32 %v1199_v61, %v1225_v7  ;;  %v1155_v12 = vmax.f32 %v1124_v5, 0.0 }
 0x1c8   :  { %v1128_v23 = vpop.f32.mrf.mxu1  ;;  %v940_v24 = vpop.f32.mrf.mxu0  ;;  %2728 = vst.msk [vmem:[%s4308_s3 + $0x20] sm:$0x1f] %vm2672_vm3, %v2718_v17  ;;  %v2698_v34 = vld [vmem:[#allocation3 + $0x50] sm:$0x1f]  ;;  %v2370_v58 = vrot.slane %v2363_v30, %v3999_v40 }
 0x1c9   :  { %v1129_v48 = vadd.f32 %v1128_v23, %v939_v62  ;;  %v1652_v19 = vcombine.high %v1242_v25, %v1242_v25  ;;  %v1659_v8 = vrot.slane %v1242_v25, %v3999_v40  ;;  %1181 = vst.msk [vmem:[#allocation2 + $0xb8] sm:$0xff] %vm1157_vm2, %v1155_v12 }
 0x1ca   :  { %v2885_v20 = vpop.f32.mrf.mxu1  ;;  %v1201_v31 = vld [vmem:[#allocation2 + $0x90] ss:$2 sm:$0xff]  ;;  %v1227_v32 = vld [vmem:[#allocation2 + $0x91] ss:$2 sm:$0xff] }
 0x1cb   :  { %v1156_v27 = vmax.f32 %v1129_v48, 0.0  ;;  %v1666_v36 = vrot.slane %v1652_v19, %v3999_v40  ;;  %v1667_v26 = vcombine.high %v1659_v8, %v1659_v8  ;;  %v1675_v38 = vrot.slane %v1659_v8, %v3999_v40 }
 0x1cc   :  { %v2709_v28 = vld [vmem:[#allocation3 + $0x58] sm:$0x1f]  ;;  %v1243_v0 = vmax.f32 %v1201_v31, %v1227_v32 }
 0x1cd   :  { %1182 = vst.msk [vmem:[#allocation2 + $0xc0] sm:$0xff] %vm1157_vm2, %v1156_v27  ;;  %v2719_v41 = vmax.f32 %v2698_v34, %v2709_v28  ;;  %v1668_v47 = vcombine.high %v1666_v36, %v1666_v36  ;;  %v1689_v42 = vrot.slane %v1667_v26, %v3999_v40  ;;  %v1697_v35 = vcombine.high %v1675_v38, %v1675_v38  ;;  %v1203_v50 = vld [vmem:[#allocation2 + $0xa0] ss:$2 sm:$0xff]  ;;  %v1229_v51 = vld [vmem:[#allocation2 + $0xa1] ss:$2 sm:$0xff] }
 0x1ce   :  { %v2362_v43 = vrot.slane %v1675_v38, %v3999_v40  ;;  %v1701_v59 = vcombine.high %v1243_v0, %v1243_v0  ;;  %v1708_v49 = vrot.slane %v1243_v0, %v3999_v40  ;;  %v1682_v55 = vrot.slane %v1666_v36, %v3999_v40 }
 0x1cf   :  { %2729 = vst.msk [vmem:[%s4308_s3 + $0x28] sm:$0x1f] %vm2672_vm3, %v2719_v41  ;;  %v1696_v1 = vrot.slane %v1668_v47, %v3999_v40  ;;  %v1699_v57 = vcombine.high %v1689_v42, %v1689_v42  ;;  %v2379_v54 = vcombine.low %v1689_v42, %v1697_v35  ;;  %v1244_v63 = vmax.f32 %v1203_v50, %v1229_v51 }
 0x1d0   :  { %v2377_v21 = vrot.slane %v2362_v43, %v3999_v40  ;;  %v1715_v11 = vrot.slane %v1701_v59, %v3999_v40  ;;  %v1716_v29 = vcombine.high %v1708_v49, %v1708_v49  ;;  %v1724_v13 = vrot.slane %v1708_v49, %v3999_v40  ;;  %v1205_v20 = vld [vmem:[#allocation2 + $0xb0] ss:$2 sm:$0xff]  ;;  %v1231_v19 = vld [vmem:[#allocation2 + $0xb1] ss:$2 sm:$0xff] }
 0x1d1   :  { %v2380_v56 = vcombine.low %v1699_v57, %v1682_v55  ;;  %v2387_v37 = vrot.slane %v2379_v54, %v3999_v40  ;;  %v2771_v60 = vcombine.high %v1682_v55, %v1696_v1  ;;  %v2401_v22 = vrot.slane %v1696_v1, %v3999_v40 }
 0x1d2   :  { %v2378_v2 = vcombine.low %v2370_v58, %v2377_v21  ;;  %v1717_v3 = vcombine.high %v1715_v11, %v1715_v11  ;;  %v1731_v4 = vrot.slane %v1715_v11, %v3999_v40  ;;  %v1738_v6 = vrot.slane %v1716_v29, %v3999_v40 }
 0x1d3   :  { %v2394_v46 = vrot.slane %v2380_v56, %v3999_v40  ;;  %v2426_v33 = vrot.slane %v2771_v60, %v3999_v40  ;;  %v1746_v45 = vcombine.high %v1724_v13, %v1724_v13  ;;  %v1750_v5 = vcombine.high %v1244_v63, %v1244_v63 }
 0x1d4   :  { %2685 = vst.msk [vmem:[#allocation3 + $0x60] sm:$0x1f] %vm2672_vm3, %v2378_v2  ;;  %v1745_v44 = vrot.slane %v1717_v3, %v3999_v40  ;;  %v1747_v10 = vcombine.high %v1731_v4, %v1731_v4  ;;  %v1748_v53 = vcombine.high %v1738_v6, %v1738_v6  ;;  %v2419_v14 = vcombine.low %v1724_v13, %v1738_v6  ;;  %v1207_v58 = vld [vmem:[#allocation2 + $0xc0] ss:$2 sm:$0xf] }
 0x1d5   :  { %v2402_v9 = vcombine.low %v2387_v37, %v2394_v46  ;;  %v2440_v15 = vrot.slane %v1746_v45, %v3999_v40  ;;  %v1757_v16 = vrot.slane %v1244_v63, %v3999_v40  ;;  %v2416_v61 = vrot.slane %v2401_v22, %v3999_v40  ;;  %v1233_v59 = vld [vmem:[#allocation2 + $0xc1] ss:$2 sm:$0xf] }
 0x1d6   :  { %v1749_v39 = vcombine.high %v1745_v44, %v1745_v44  ;;  %v2433_v17 = vrot.slane %v2419_v14, %v3999_v40  ;;  %v2457_v62 = vcombine.low %v1748_v53, %v1731_v4  ;;  %v2458_v18 = vcombine.low %v1745_v44, %v1747_v10 }
 0x1d7   :  { %v2409_v52 = vrot.slane %v2402_v9, %v3999_v40  ;;  %v1764_v7 = vrot.slane %v1750_v5, %v3999_v40  ;;  %v1765_v23 = vcombine.high %v1757_v16, %v1757_v16  ;;  %v2455_v27 = vrot.slane %v2440_v15, %v3999_v40 }
 0x1d8   :  { %v2441_v24 = vcombine.low %v2426_v33, %v2433_v17  ;;  %v2465_v25 = vrot.slane %v2457_v62, %v3999_v40  ;;  %v2472_v12 = vrot.slane %v2458_v18, %v3999_v40  ;;  %v2479_v48 = vrot.slane %v1749_v39, %v3999_v40 }
 0x1d9   :  { %v2417_v8 = vcombine.low %v2409_v52, %v2416_v61  ;;  %v1766_v30 = vcombine.high %v1764_v7, %v1764_v7  ;;  %v1780_v31 = vrot.slane %v1764_v7, %v3999_v40  ;;  %v1773_v28 = vrot.slane %v1757_v16, %v3999_v40 }
 0x1da   :  { %v2448_v32 = vrot.slane %v2441_v24, %v3999_v40  ;;  %v2480_v34 = vcombine.low %v2465_v25, %v2472_v12  ;;  %v1787_v36 = vrot.slane %v1765_v23, %v3999_v40  ;;  %v2494_v26 = vrot.slane %v2479_v48, %v3999_v40 }
 0x1db   :  { %2686 = vst.msk [vmem:[#allocation3 + $0x68] sm:$0x1f] %vm2672_vm3, %v2417_v8  ;;  %v1794_v38 = vrot.slane %v1766_v30, %v3999_v40  ;;  %v1796_v0 = vcombine.high %v1780_v31, %v1780_v31  ;;  %v1245_v41 = vmax.f32 %v1205_v20, %v1231_v19  ;;  %v2518_v49 = vrot.slane %v1780_v31, %v3999_v40  ;;  %v2699_v4 = vld [vmem:[#allocation3 + $0x60] sm:$0x1f] }
 0x1dc   :  { %v2456_v47 = vcombine.low %v2448_v32, %v2455_v27  ;;  %v2487_v42 = vrot.slane %v2480_v34, %v3999_v40  ;;  %v2496_v35 = vcombine.low %v1773_v28, %v1787_v36  ;;  %v2772_v43 = vcombine.high %v1773_v28, %v1787_v36 }
 0x1dd   :  { %v2535_v50 = vcombine.low %v1794_v38, %v1796_v0  ;;  %v1799_v51 = vcombine.high %v1245_v41, %v1245_v41  ;;  %v1806_v54 = vrot.slane %v1245_v41, %v3999_v40  ;;  %v1246_v11 = vmax.f32 %v1207_v58, %v1233_v59 }
 0x1de   :  { %v2495_v55 = vcombine.low %v2487_v42, %v2494_v26  ;;  %2687 = vst.msk [vmem:[#allocation3 + $0x70] sm:$0x1f] %vm2672_vm3, %v2456_v47  ;;  %v2504_v1 = vrot.slane %v2496_v35, %v3999_v40  ;;  %v2511_v57 = vrot.slane %v2772_v43, %v3999_v40  ;;  %v1798_v13 = vcombine.high %v1794_v38, %v1794_v38 }
 0x1df   :  { %v1813_v21 = vrot.slane %v1799_v51, %v3999_v40  ;;  %v1814_v56 = vcombine.high %v1806_v54, %v1806_v54  ;;  %v1822_v37 = vrot.slane %v1806_v54, %v3999_v40  ;;  %v2533_v60 = vrot.slane %v2518_v49, %v3999_v40 }
 0x1e0   :  { %2688 = vst.msk [vmem:[#allocation3 + $0x78] sm:$0x1f] %vm2672_vm3, %v2495_v55  ;;  %v2519_v29 = vcombine.low %v2504_v1, %v2511_v57  ;;  %v1854_v3 = vrot.slane %v1246_v11, %v3999_v40  ;;  %v2543_v45 = vrot.slane %v2535_v50, %v3999_v40 }
 0x1e1   :  { %v1815_v63 = vcombine.high %v1813_v21, %v1813_v21  ;;  %v1829_v2 = vrot.slane %v1813_v21, %v3999_v40  ;;  %v1836_v22 = vrot.slane %v1814_v56, %v3999_v40  ;;  %v2536_v33 = vcombine.low %v1798_v13, %v1822_v37 }
 0x1e2   :  { %v2710_v6 = vld [vmem:[#allocation3 + $0x68] sm:$0x1f]  ;;  %v2526_v46 = vrot.slane %v2519_v29, %v3999_v40  ;;  %v1855_v14 = vcombine.high %v1854_v3, %v1854_v3  ;;  %v1862_v62 = vrot.slane %v1854_v3, %v3999_v40 }
 0x1e3   :  { %v2720_v44 = vmax.f32 %v2699_v4, %v2710_v6  ;;  %v1843_v10 = vrot.slane %v1815_v63, %v3999_v40  ;;  %v1845_v53 = vcombine.high %v1829_v2, %v1829_v2  ;;  %v2550_v15 = vrot.slane %v2536_v33, %v3999_v40 }
 0x1e4   :  { %v2534_v9 = vcombine.low %v2526_v46, %v2533_v60  ;;  %v2557_v5 = vrot.slane %v1836_v22, %v3999_v40  ;;  %v2773_v16 = vcombine.high %v1822_v37, %v1836_v22  ;;  %v1869_v61 = vrot.slane %v1855_v14, %v3999_v40 }
 0x1e5   :  { %2730 = vst.msk [vmem:[%s4308_s3 + $0x30] sm:$0x1f] %vm2672_vm3, %v2720_v44  ;;  %v2575_v39 = vcombine.low %v1829_v2, %v1843_v10  ;;  %v1847_v17 = vcombine.high %v1843_v10, %v1843_v10  ;;  %v2558_v18 = vcombine.low %v2543_v45, %v2550_v15  ;;  %v2596_v52 = vrot.slane %v1845_v53, %v3999_v40  ;;  %v2700_v7 = vld [vmem:[#allocation3 + $0x70] sm:$0x1f] }
 0x1e6   :  { %2689 = vst.msk [vmem:[#allocation3 + $0x80] sm:$0x1f] %vm2672_vm3, %v2534_v9  ;;  %v2582_v24 = vrot.slane %v2773_v16, %v3999_v40  ;;  %v1870_v12 = vcombine.high %v1862_v62, %v1862_v62  ;;  %v2572_v8 = vrot.slane %v2557_v5, %v3999_v40  ;;  %v1871_v27 = vcombine.high %v1869_v61, %v1869_v61 }
 0x1e7   :  { %v2711_v23 = vld [vmem:[#allocation3 + $0x78] sm:$0x1f]  ;;  %v2589_v25 = vrot.slane %v2575_v39, %v3999_v40  ;;  %v2613_v48 = vcombine.low %v1847_v17, %v1862_v62  ;;  %v2565_v19 = vrot.slane %v2558_v18, %v3999_v40  ;;  %v2611_v36 = vrot.slane %v2596_v52, %v3999_v40 }
 0x1e8   :  { %v2721_v20 = vmax.f32 %v2700_v7, %v2711_v23  ;;  %v2614_v31 = vcombine.low %v1869_v61, %v1870_v12  ;;  %v2635_v38 = vrot.slane %v1871_v27, %v3999_v40 }
 0x1e9   :  { %v2597_v30 = vcombine.low %v2582_v24, %v2589_v25  ;;  %v2621_v32 = vrot.slane %v2613_v48, %v3999_v40  ;;  %v2573_v34 = vcombine.low %v2565_v19, %v2572_v8 }
 0x1ea   :  { %2731 = vst.msk [vmem:[%s4308_s3 + $0x38] sm:$0x1f] %vm2672_vm3, %v2721_v20  ;;  %v2628_v26 = vrot.slane %v2614_v31, %v3999_v40  ;;  %v2650_v42 = vrot.slane %v2635_v38, %v3999_v40 }
 0x1eb   :  { %v2604_v28 = vrot.slane %v2597_v30, %v3999_v40  ;;  %2690 = vst.msk [vmem:[#allocation3 + $0x88] sm:$0x1f] %vm2672_vm3, %v2573_v34 }
 0x1ec   :  { %v2636_v41 = vcombine.low %v2621_v32, %v2628_v26 }
 0x1ed   :  { %v2612_v0 = vcombine.low %v2604_v28, %v2611_v36  ;;  %v2701_v43 = vld [vmem:[#allocation3 + $0x80] sm:$0x1f] }
 0x1ee   :  { %v2643_v47 = vrot.slane %v2636_v41, %v3999_v40 }
 0x1ef   :  { %2691 = vst.msk [vmem:[#allocation3 + $0x90] sm:$0x1f] %vm2672_vm3, %v2612_v0 }
 0x1f0   :  { %v2651_v35 = vcombine.low %v2643_v47, %v2650_v42 }
 0x1f2   :  { %v2712_v58 = vld [vmem:[#allocation3 + $0x88] sm:$0x1f]  ;;  %2692 = vst.msk [vmem:[#allocation3 + $0x98] sm:$0x1f] %vm2672_vm3, %v2651_v35 }
 0x1f3   :  { %v2722_v59 = vmax.f32 %v2701_v43, %v2712_v58 }
 0x1f5   :  { %2732 = vst.msk [vmem:[%s4308_s3 + $0x40] sm:$0x1f] %vm2672_vm3, %v2722_v59 }
 0x1f6   :  { %v2702_v49 = vld [vmem:[#allocation3 + $0x90] sm:$0x1f] }
 0x1f9   :  { %v2713_v50 = vld [vmem:[#allocation3 + $0x98] sm:$0x1f] }
 0x1fa   :  { %v2723_v51 = vmax.f32 %v2702_v49, %v2713_v50 }
 0x1fc   :  { %2733 = vst.msk [vmem:[%s4308_s3 + $0x48] sm:$0x1f] %vm2672_vm3, %v2723_v51 }

// kernel: dann_forward.5
= control target key start
LH: loop header
LB: loop body
LE: loop exit
PB: predicated region body
PF: predicated region fallthrough
CT: control target
= control target key end

     0   :  { %s2431_s0 = inlined_call_operand.vmem [shape: f32[2,1200], index: 0, kind: input, shape index: {}]   ;;  %s2432_s1 = inlined_call_operand.vmem [shape: f32[1200,200], index: 1, kind: input, shape index: {}]   ;;  %s2433_s2 = inlined_call_operand.vmem [shape: f32[1,200], index: 2, kind: input, shape index: {}]   ;;  %s2434_s3 = inlined_call_operand.vmem [shape: f32[100,100], index: 3, kind: input, shape index: {}]   ;;  %s2435_s4 = inlined_call_operand.vmem [shape: f32[1,100], index: 4, kind: input, shape index: {}]   ;;  %s2436_s5 = inlined_call_operand.vmem [shape: f32[100,10], index: 5, kind: input, shape index: {}]   ;;  %s2437_s6 = inlined_call_operand.vmem [shape: f32[1,10], index: 6, kind: input, shape index: {}]   ;;  %s2438_s7 = inlined_call_operand.vmem [shape: f32[100,1], index: 7, kind: input, shape index: {}]   ;;  %s2439_s8 = inlined_call_operand.<no memory space> [shape: f32[1,1], index: 8, kind: input, shape index: {}]   ;;  %s2440_s9 = inlined_call_operand.hbm [shape: f32[2,10], index: 9, kind: output, shape index: {0}]   ;;  %s2441_s10 = inlined_call_operand.vmem [shape: f32[2,1], index: 10, kind: output, shape index: {1}]  }
   0x1   :  { %v16_v0 = vstv %s2439_s8 }
   0x2   :  { %17 = vst [vmem:[#allocation2] sm:$0x1] %v16_v0 }
   0x3   :  { %v71_v1 = vld [vmem:[%s2432_s1 + $0xf8] sm:$0xff]  ;;  %v70_v2 = vld [vmem:[%s2432_s1 + $0xf0] sm:$0xff]  ;;  %v69_v3 = vld [vmem:[%s2432_s1 + $0xe8] sm:$0xff] }
   0x4   :  { %409 = vmatprep.subr.mxu0 %v71_v1  ;;  %v135_v4 = vld [vmem:[%s2432_s1 + $0x2f8] sm:$0xff]  ;;  %v68_v5 = vld [vmem:[%s2432_s1 + $0xe0] sm:$0xff]  ;;  %v134_v6 = vld [vmem:[%s2432_s1 + $0x2f0] sm:$0xff] }
   0x5   :  { %410 = vmatpush1.msra.mxu0 %v70_v2  ;;  %480 = vmatprep.subr.mxu1 %v135_v4  ;;  %v67_v7 = vld [vmem:[%s2432_s1 + $0xd8] sm:$0xff]  ;;  %v133_v8 = vld [vmem:[%s2432_s1 + $0x2e8] sm:$0xff]  ;;  %v66_v9 = vld [vmem:[%s2432_s1 + $0xd0] sm:$0xff] }
   0x6   :  { %411 = vmatprep.subr.mxu0 %v69_v3  ;;  %481 = vmatpush1.msra.mxu1 %v134_v6  ;;  %v132_v10 = vld [vmem:[%s2432_s1 + $0x2e0] sm:$0xff]  ;;  %v131_v11 = vld [vmem:[%s2432_s1 + $0x2d8] sm:$0xff]  ;;  %v65_v12 = vld [vmem:[%s2432_s1 + $0xc8] sm:$0xff] }
   0x7   :  { %412 = vmatpush1.msra.mxu0 %v68_v5  ;;  %482 = vmatprep.subr.mxu1 %v133_v8  ;;  %v130_v13 = vld [vmem:[%s2432_s1 + $0x2d0] sm:$0xff]  ;;  %v64_v14 = vld [vmem:[%s2432_s1 + $0xc0] sm:$0xff]  ;;  %v129_v15 = vld [vmem:[%s2432_s1 + $0x2c8] sm:$0xff] }
   0x8   :  { %413 = vmatprep.subr.mxu0 %v67_v7  ;;  %483 = vmatpush1.msra.mxu1 %v132_v10  ;;  %v63_v16 = vld [vmem:[%s2432_s1 + $0xb8] sm:$0xff]  ;;  %v128_v17 = vld [vmem:[%s2432_s1 + $0x2c0] sm:$0xff]  ;;  %v62_v18 = vld [vmem:[%s2432_s1 + $0xb0] sm:$0xff] }
   0x9   :  { %414 = vmatpush1.msra.mxu0 %v66_v9  ;;  %484 = vmatprep.subr.mxu1 %v131_v11  ;;  %v127_v19 = vld [vmem:[%s2432_s1 + $0x2b8] sm:$0xff]  ;;  %v61_v20 = vld [vmem:[%s2432_s1 + $0xa8] sm:$0xff]  ;;  %v126_v21 = vld [vmem:[%s2432_s1 + $0x2b0] sm:$0xff] }
   0xa   :  { %415 = vmatprep.subr.mxu0 %v65_v12  ;;  %485 = vmatpush1.msra.mxu1 %v130_v13  ;;  %v60_v22 = vld [vmem:[%s2432_s1 + $0xa0] sm:$0xff]  ;;  %v125_v23 = vld [vmem:[%s2432_s1 + $0x2a8] sm:$0xff]  ;;  %v59_v24 = vld [vmem:[%s2432_s1 + $0x98] sm:$0xff] }
   0xb   :  { %416 = vmatpush1.msra.mxu0 %v64_v14  ;;  %486 = vmatprep.subr.mxu1 %v129_v15  ;;  %v124_v25 = vld [vmem:[%s2432_s1 + $0x2a0] sm:$0xff]  ;;  %v58_v26 = vld [vmem:[%s2432_s1 + $0x90] sm:$0xff]  ;;  %v123_v27 = vld [vmem:[%s2432_s1 + $0x298] sm:$0xff] }
   0xc   :  { %417 = vmatprep.subr.mxu0 %v63_v16  ;;  %487 = vmatpush1.msra.mxu1 %v128_v17  ;;  %v57_v28 = vld [vmem:[%s2432_s1 + $0x88] sm:$0xff]  ;;  %v122_v29 = vld [vmem:[%s2432_s1 + $0x290] sm:$0xff]  ;;  %v56_v30 = vld [vmem:[%s2432_s1 + $0x80] sm:$0xff] }
   0xd   :  { %418 = vmatpush1.msra.mxu0 %v62_v18  ;;  %488 = vmatprep.subr.mxu1 %v127_v19  ;;  %v121_v31 = vld [vmem:[%s2432_s1 + $0x288] sm:$0xff]  ;;  %v55_v32 = vld [vmem:[%s2432_s1 + $0x78] sm:$0xff]  ;;  %v120_v33 = vld [vmem:[%s2432_s1 + $0x280] sm:$0xff] }
   0xe   :  { %419 = vmatprep.subr.mxu0 %v61_v20  ;;  %489 = vmatpush1.msra.mxu1 %v126_v21  ;;  %v54_v34 = vld [vmem:[%s2432_s1 + $0x70] sm:$0xff]  ;;  %v119_v35 = vld [vmem:[%s2432_s1 + $0x278] sm:$0xff]  ;;  %v53_v36 = vld [vmem:[%s2432_s1 + $0x68] sm:$0xff] }
   0xf   :  { %420 = vmatpush1.msra.mxu0 %v60_v22  ;;  %490 = vmatprep.subr.mxu1 %v125_v23  ;;  %v118_v37 = vld [vmem:[%s2432_s1 + $0x270] sm:$0xff]  ;;  %v52_v38 = vld [vmem:[%s2432_s1 + $0x60] sm:$0xff]  ;;  %v117_v39 = vld [vmem:[%s2432_s1 + $0x268] sm:$0xff] }
  0x10   :  { %421 = vmatprep.subr.mxu0 %v59_v24  ;;  %491 = vmatpush1.msra.mxu1 %v124_v25  ;;  %v51_v40 = vld [vmem:[%s2432_s1 + $0x58] sm:$0xff]  ;;  %v116_v41 = vld [vmem:[%s2432_s1 + $0x260] sm:$0xff]  ;;  %v50_v42 = vld [vmem:[%s2432_s1 + $0x50] sm:$0xff] }
  0x11   :  { %422 = vmatpush1.msra.mxu0 %v58_v26  ;;  %492 = vmatprep.subr.mxu1 %v123_v27  ;;  %v115_v43 = vld [vmem:[%s2432_s1 + $0x258] sm:$0xff]  ;;  %v49_v44 = vld [vmem:[%s2432_s1 + $0x48] sm:$0xff]  ;;  %v114_v45 = vld [vmem:[%s2432_s1 + $0x250] sm:$0xff] }
  0x12   :  { %423 = vmatprep.subr.mxu0 %v57_v28  ;;  %493 = vmatpush1.msra.mxu1 %v122_v29  ;;  %v48_v46 = vld [vmem:[%s2432_s1 + $0x40] sm:$0xff]  ;;  %v113_v47 = vld [vmem:[%s2432_s1 + $0x248] sm:$0xff]  ;;  %v47_v48 = vld [vmem:[%s2432_s1 + $0x38] sm:$0xff]  ;;  %v342_v28 = vlaneseq  ;;  %v1260_v29 = vmov 1983009808  }
  0x13   :  { %424 = vmatpush1.msra.mxu0 %v56_v30  ;;  %494 = vmatprep.subr.mxu1 %v121_v31  ;;  %v112_v49 = vld [vmem:[%s2432_s1 + $0x240] sm:$0xff]  ;;  %v46_v50 = vld [vmem:[%s2432_s1 + $0x30] sm:$0xff]  ;;  %v111_v51 = vld [vmem:[%s2432_s1 + $0x238] sm:$0xff]  ;;  %v357_v30 = vunpack.c.l.s4 %v1260_v29 }
  0x14   :  { %425 = vmatprep.subr.mxu0 %v55_v32  ;;  %495 = vmatpush1.msra.mxu1 %v120_v33  ;;  %v45_v52 = vld [vmem:[%s2432_s1 + $0x28] sm:$0xff]  ;;  %v110_v53 = vld [vmem:[%s2432_s1 + $0x230] sm:$0xff]  ;;  %v44_v54 = vld [vmem:[%s2432_s1 + $0x20] sm:$0xff] }
  0x15   :  { %426 = vmatpush1.msra.mxu0 %v54_v34  ;;  %496 = vmatprep.subr.mxu1 %v119_v35  ;;  %v109_v55 = vld [vmem:[%s2432_s1 + $0x228] sm:$0xff]  ;;  %v43_v56 = vld [vmem:[%s2432_s1 + $0x18] sm:$0xff]  ;;  %v108_v57 = vld [vmem:[%s2432_s1 + $0x220] sm:$0xff] }
  0x16   :  { %427 = vmatprep.subr.mxu0 %v53_v36  ;;  %497 = vmatpush1.msra.mxu1 %v118_v37  ;;  %v42_v58 = vld [vmem:[%s2432_s1 + $0x10] sm:$0xff]  ;;  %v107_v59 = vld [vmem:[%s2432_s1 + $0x218] sm:$0xff]  ;;  %v41_v60 = vld [vmem:[%s2432_s1 + $0x8] sm:$0xff] }
  0x17   :  { %428 = vmatpush1.msra.mxu0 %v52_v38  ;;  %498 = vmatprep.subr.mxu1 %v117_v39  ;;  %v106_v61 = vld [vmem:[%s2432_s1 + $0x210] sm:$0xff]  ;;  %v40_v62 = vld [vmem:[%s2432_s1] sm:$0xff]  ;;  %v105_v63 = vld [vmem:[%s2432_s1 + $0x208] sm:$0xff]  ;;  %v1620_v39 = vshrl.u32 %v342_v28, 7 }
  0x18   :  { %429 = vmatprep.subr.mxu0 %v51_v40  ;;  %499 = vmatpush1.msra.mxu1 %v116_v41  ;;  %v103_v0 = vld [vmem:[%s2432_s1 + $0x1f8] sm:$0xff]  ;;  %v104_v1 = vld [vmem:[%s2432_s1 + $0x200] sm:$0xff]  ;;  %v102_v2 = vld [vmem:[%s2432_s1 + $0x1f0] sm:$0xff]  ;;  %v358_v40 = vunpack.c.0.s8 %v357_v30 }
  0x19   :  { %430 = vmatpush1.msra.mxu0 %v50_v42  ;;  %500 = vmatprep.subr.mxu1 %v115_v43  ;;  %v167_v3 = vld [vmem:[%s2432_s1 + $0x3f8] sm:$0xff]  ;;  %v101_v4 = vld [vmem:[%s2432_s1 + $0x1e8] sm:$0xff]  ;;  %v166_v5 = vld [vmem:[%s2432_s1 + $0x3f0] sm:$0xff] }
  0x1a   :  { %431 = vmatprep.subr.mxu0 %v49_v44  ;;  %501 = vmatpush1.msra.mxu1 %v114_v45  ;;  %v100_v6 = vld [vmem:[%s2432_s1 + $0x1e0] sm:$0xff]  ;;  %v165_v7 = vld [vmem:[%s2432_s1 + $0x3e8] sm:$0xff]  ;;  %v99_v8 = vld [vmem:[%s2432_s1 + $0x1d8] sm:$0xff] }
  0x1b   :  { %432 = vmatpush1.msra.mxu0 %v48_v46  ;;  %502 = vmatprep.subr.mxu1 %v113_v47  ;;  %v164_v9 = vld [vmem:[%s2432_s1 + $0x3e0] sm:$0xff]  ;;  %v98_v10 = vld [vmem:[%s2432_s1 + $0x1d0] sm:$0xff]  ;;  %v163_v11 = vld [vmem:[%s2432_s1 + $0x3d8] sm:$0xff] }
  0x1c   :  { %433 = vmatprep.subr.mxu0 %v47_v48  ;;  %503 = vmatpush1.msra.mxu1 %v112_v49  ;;  %v97_v12 = vld [vmem:[%s2432_s1 + $0x1c8] sm:$0xff]  ;;  %v162_v13 = vld [vmem:[%s2432_s1 + $0x3d0] sm:$0xff]  ;;  %v96_v14 = vld [vmem:[%s2432_s1 + $0x1c0] sm:$0xff]  ;;  %v1647_v49 = vsub.s32 %v358_v40, %v1620_v39 }
  0x1d   :  { %434 = vmatpush1.msra.mxu0 %v46_v50  ;;  %504 = vmatprep.subr.mxu1 %v111_v51  ;;  %v161_v15 = vld [vmem:[%s2432_s1 + $0x3c8] sm:$0xff]  ;;  %v95_v16 = vld [vmem:[%s2432_s1 + $0x1b8] sm:$0xff]  ;;  %v160_v17 = vld [vmem:[%s2432_s1 + $0x3c0] sm:$0xff] }
  0x1e   :  { %435 = vmatprep.subr.mxu0 %v45_v52  ;;  %505 = vmatpush1.msra.mxu1 %v110_v53  ;;  %v94_v18 = vld [vmem:[%s2432_s1 + $0x1b0] sm:$0xff]  ;;  %v159_v19 = vld [vmem:[%s2432_s1 + $0x3b8] sm:$0xff]  ;;  %v93_v20 = vld [vmem:[%s2432_s1 + $0x1a8] sm:$0xff] }
  0x1f   :  { %436 = vmatpush1.msra.mxu0 %v44_v54  ;;  %506 = vmatprep.subr.mxu1 %v109_v55  ;;  %v158_v21 = vld [vmem:[%s2432_s1 + $0x3b0] sm:$0xff]  ;;  %v92_v22 = vld [vmem:[%s2432_s1 + $0x1a0] sm:$0xff]  ;;  %v157_v23 = vld [vmem:[%s2432_s1 + $0x3a8] sm:$0xff] }
  0x20   :  { %437 = vmatprep.subr.mxu0 %v43_v56  ;;  %507 = vmatpush1.msra.mxu1 %v108_v57  ;;  %v91_v24 = vld [vmem:[%s2432_s1 + $0x198] sm:$0xff]  ;;  %v156_v25 = vld [vmem:[%s2432_s1 + $0x3a0] sm:$0xff]  ;;  %v90_v26 = vld [vmem:[%s2432_s1 + $0x190] sm:$0xff] }
  0x21   :  { %438 = vmatpush1.msra.mxu0 %v42_v58  ;;  %508 = vmatprep.subr.mxu1 %v107_v59  ;;  %v155_v27 = vld [vmem:[%s2432_s1 + $0x398] sm:$0xff]  ;;  %v89_v31 = vld [vmem:[%s2432_s1 + $0x188] sm:$0xff]  ;;  %v154_v32 = vld [vmem:[%s2432_s1 + $0x390] sm:$0xff] }
  0x22   :  { %439 = vmatprep.subr.mxu0 %v41_v60  ;;  %509 = vmatpush1.msra.mxu1 %v106_v61  ;;  %v88_v33 = vld [vmem:[%s2432_s1 + $0x180] sm:$0xff]  ;;  %v153_v34 = vld [vmem:[%s2432_s1 + $0x388] sm:$0xff]  ;;  %v87_v35 = vld [vmem:[%s2432_s1 + $0x178] sm:$0xff] }
  0x23   :  { %440 = vmatpush1.msra.mxu0 %v40_v62  ;;  %510 = vmatprep.subr.mxu1 %v105_v63  ;;  %v152_v36 = vld [vmem:[%s2432_s1 + $0x380] sm:$0xff]  ;;  %v86_v37 = vld [vmem:[%s2432_s1 + $0x170] sm:$0xff]  ;;  %v151_v38 = vld [vmem:[%s2432_s1 + $0x378] sm:$0xff] }
  0x24   :  { %441 = vmatprep.subr.mxu0 %v103_v0  ;;  %511 = vmatpush1.msra.mxu1 %v104_v1  ;;  %v85_v41 = vld [vmem:[%s2432_s1 + $0x168] sm:$0xff]  ;;  %v150_v42 = vld [vmem:[%s2432_s1 + $0x370] sm:$0xff]  ;;  %v84_v43 = vld [vmem:[%s2432_s1 + $0x160] sm:$0xff] }
  0x25   :  { %442 = vmatpush2.msra.mxu0 %v102_v2  ;;  %512 = vmatprep.subr.mxu1 %v167_v3  ;;  %v149_v44 = vld [vmem:[%s2432_s1 + $0x368] sm:$0xff]  ;;  %v83_v45 = vld [vmem:[%s2432_s1 + $0x158] sm:$0xff]  ;;  %v148_v46 = vld [vmem:[%s2432_s1 + $0x360] sm:$0xff] }
  0x26   :  { %443 = vmatprep.subr.mxu0 %v101_v4  ;;  %513 = vmatpush2.msra.mxu1 %v166_v5  ;;  %v82_v47 = vld [vmem:[%s2432_s1 + $0x150] sm:$0xff]  ;;  %v147_v48 = vld [vmem:[%s2432_s1 + $0x358] sm:$0xff]  ;;  %v81_v50 = vld [vmem:[%s2432_s1 + $0x148] sm:$0xff] }
  0x27   :  { %444 = vmatpush2.msra.mxu0 %v100_v6  ;;  %514 = vmatprep.subr.mxu1 %v165_v7  ;;  %v146_v51 = vld [vmem:[%s2432_s1 + $0x350] sm:$0xff]  ;;  %v37_v52 = vld [vmem:[%s2431_s0] sm:$0xff]  ;;  %v145_v54 = vld [vmem:[%s2432_s1 + $0x348] sm:$0xff] }
  0x28   :  { %445 = vmatprep.subr.mxu0 %v99_v8  ;;  %515 = vmatpush2.msra.mxu1 %v164_v9  ;;  %v80_v53 = vld [vmem:[%s2432_s1 + $0x140] sm:$0xff]  ;;  %v79_v55 = vld [vmem:[%s2432_s1 + $0x138] sm:$0xff]  ;;  %v78_v57 = vld [vmem:[%s2432_s1 + $0x130] sm:$0xff]  ;;  %v362_v59 = vrot.slane %v37_v52, %v1647_v49  ;;  %v355_v60 = vcombine.high %v37_v52, %v37_v52 }
  0x29   :  { %446 = vmatpush2.msra.mxu0 %v98_v10  ;;  %516 = vmatprep.subr.mxu1 %v163_v11  ;;  %v144_v56 = vld [vmem:[%s2432_s1 + $0x340] sm:$0xff]  ;;  %v143_v58 = vld [vmem:[%s2432_s1 + $0x338] sm:$0xff]  ;;  %v77_v61 = vld [vmem:[%s2432_s1 + $0x128] sm:$0xff] }
  0x2a   :  { %447 = vmatprep.subr.mxu0 %v97_v12  ;;  %517 = vmatpush2.msra.mxu1 %v162_v13  ;;  %v142_v62 = vld [vmem:[%s2432_s1 + $0x330] sm:$0xff]  ;;  %v76_v63 = vld [vmem:[%s2432_s1 + $0x120] sm:$0xff]  ;;  %v141_v0 = vld [vmem:[%s2432_s1 + $0x328] sm:$0xff]  ;;  %v370_v5 = vcombine.high %v362_v59, %v362_v59  ;;  %v369_v6 = vrot.slane %v355_v60, %v1647_v49 }
  0x2b   :  { %448 = vmatpush2.msra.mxu0 %v96_v14  ;;  %518 = vmatprep.subr.mxu1 %v161_v15  ;;  %v75_v1 = vld [vmem:[%s2432_s1 + $0x118] sm:$0xff]  ;;  %v140_v2 = vld [vmem:[%s2432_s1 + $0x320] sm:$0xff]  ;;  %v74_v3 = vld [vmem:[%s2432_s1 + $0x110] sm:$0xff] }
  0x2c   :  { %449 = vmatprep.subr.mxu0 %v95_v16  ;;  %519 = vmatpush2.msra.mxu1 %v160_v17  ;;  %v139_v4 = vld [vmem:[%s2432_s1 + $0x318] sm:$0xff]  ;;  %v73_v7 = vld [vmem:[%s2432_s1 + $0x108] sm:$0xff]  ;;  %v72_v8 = vld [vmem:[%s2432_s1 + $0x100] sm:$0xff]  ;;  %v371_v13 = vcombine.high %v369_v6, %v369_v6 }
  0x2d   :  { %450 = vmatpush2.msra.mxu0 %v94_v18  ;;  %520 = vmatprep.subr.mxu1 %v159_v19  ;;  %v138_v9 = vld [vmem:[%s2432_s1 + $0x310] sm:$0xff]  ;;  %v137_v10 = vld [vmem:[%s2432_s1 + $0x308] sm:$0xff]  ;;  %v199_v11 = vld [vmem:[%s2432_s1 + $0x4f8] sm:$0xff] }
  0x2e   :  { %451 = vmatprep.subr.mxu0 %v93_v20  ;;  %521 = vmatpush2.msra.mxu1 %v158_v21  ;;  %v136_v12 = vld [vmem:[%s2432_s1 + $0x300] sm:$0xff]  ;;  %v198_v14 = vld [vmem:[%s2432_s1 + $0x4f0] sm:$0xff]  ;;  %v197_v15 = vld [vmem:[%s2432_s1 + $0x4e8] sm:$0xff] }
  0x2f   :  { %452 = vmatpush2.msra.mxu0 %v92_v22  ;;  %522 = vmatprep.subr.mxu1 %v157_v23  ;;  %v263_v16 = vld [vmem:[%s2432_s1 + $0x6f8] sm:$0xff]  ;;  %v196_v17 = vld [vmem:[%s2432_s1 + $0x4e0] sm:$0xff]  ;;  %v262_v18 = vld [vmem:[%s2432_s1 + $0x6f0] sm:$0xff] }
  0x30   :  { %453 = vmatprep.subr.mxu0 %v91_v24  ;;  %523 = vmatpush2.msra.mxu1 %v156_v25  ;;  %v195_v19 = vld [vmem:[%s2432_s1 + $0x4d8] sm:$0xff]  ;;  %v261_v20 = vld [vmem:[%s2432_s1 + $0x6e8] sm:$0xff]  ;;  %v194_v21 = vld [vmem:[%s2432_s1 + $0x4d0] sm:$0xff] }
  0x31   :  { %454 = vmatpush2.msra.mxu0 %v90_v26  ;;  %524 = vmatprep.subr.mxu1 %v155_v27  ;;  %v260_v22 = vld [vmem:[%s2432_s1 + $0x6e0] sm:$0xff]  ;;  %v193_v23 = vld [vmem:[%s2432_s1 + $0x4c8] sm:$0xff]  ;;  %v259_v24 = vld [vmem:[%s2432_s1 + $0x6d8] sm:$0xff] }
  0x32   :  { %455 = vmatprep.subr.mxu0 %v89_v31  ;;  %525 = vmatpush2.msra.mxu1 %v154_v32  ;;  %v192_v25 = vld [vmem:[%s2432_s1 + $0x4c0] sm:$0xff]  ;;  %v258_v26 = vld [vmem:[%s2432_s1 + $0x6d0] sm:$0xff]  ;;  %v191_v27 = vld [vmem:[%s2432_s1 + $0x4b8] sm:$0xff] }
  0x33   :  { %456 = vmatpush2.msra.mxu0 %v88_v33  ;;  %526 = vmatprep.subr.mxu1 %v153_v34  ;;  %v257_v28 = vld [vmem:[%s2432_s1 + $0x6c8] sm:$0xff]  ;;  %v190_v29 = vld [vmem:[%s2432_s1 + $0x4b0] sm:$0xff]  ;;  %v256_v30 = vld [vmem:[%s2432_s1 + $0x6c0] sm:$0xff] }
  0x34   :  { %457 = vmatprep.subr.mxu0 %v87_v35  ;;  %527 = vmatpush2.msra.mxu1 %v152_v36  ;;  %v189_v31 = vld [vmem:[%s2432_s1 + $0x4a8] sm:$0xff]  ;;  %v255_v32 = vld [vmem:[%s2432_s1 + $0x6b8] sm:$0xff]  ;;  %v188_v33 = vld [vmem:[%s2432_s1 + $0x4a0] sm:$0xff] }
  0x35   :  { %458 = vmatpush2.msra.mxu0 %v86_v37  ;;  %528 = vmatprep.subr.mxu1 %v151_v38  ;;  %v254_v34 = vld [vmem:[%s2432_s1 + $0x6b0] sm:$0xff]  ;;  %v187_v35 = vld [vmem:[%s2432_s1 + $0x498] sm:$0xff]  ;;  %v253_v36 = vld [vmem:[%s2432_s1 + $0x6a8] sm:$0xff] }
  0x36   :  { %459 = vmatprep.subr.mxu0 %v85_v41  ;;  %529 = vmatpush2.msra.mxu1 %v150_v42  ;;  %v186_v37 = vld [vmem:[%s2432_s1 + $0x490] sm:$0xff]  ;;  %v252_v38 = vld [vmem:[%s2432_s1 + $0x6a0] sm:$0xff]  ;;  %v185_v40 = vld [vmem:[%s2432_s1 + $0x488] sm:$0xff] }
  0x37   :  { %460 = vmatpush2.msra.mxu0 %v84_v43  ;;  %530 = vmatprep.subr.mxu1 %v149_v44  ;;  %v251_v41 = vld [vmem:[%s2432_s1 + $0x698] sm:$0xff]  ;;  %v184_v42 = vld [vmem:[%s2432_s1 + $0x480] sm:$0xff]  ;;  %v250_v43 = vld [vmem:[%s2432_s1 + $0x690] sm:$0xff] }
  0x38   :  { %461 = vmatprep.subr.mxu0 %v83_v45  ;;  %531 = vmatpush2.msra.mxu1 %v148_v46  ;;  %v183_v44 = vld [vmem:[%s2432_s1 + $0x478] sm:$0xff]  ;;  %v249_v45 = vld [vmem:[%s2432_s1 + $0x688] sm:$0xff]  ;;  %v182_v46 = vld [vmem:[%s2432_s1 + $0x470] sm:$0xff] }
  0x39   :  { %462 = vmatpush2.msra.mxu0 %v82_v47  ;;  %532 = vmatprep.subr.mxu1 %v147_v48  ;;  %v248_v47 = vld [vmem:[%s2432_s1 + $0x680] sm:$0xff]  ;;  %v181_v48 = vld [vmem:[%s2432_s1 + $0x468] sm:$0xff]  ;;  %v246_v52 = vld [vmem:[%s2432_s1 + $0x670] sm:$0xff] }
  0x3a   :  { %463 = vmatprep.subr.mxu0 %v81_v50  ;;  %533 = vmatpush2.msra.mxu1 %v146_v51  ;;  %v247_v50 = vld [vmem:[%s2432_s1 + $0x678] sm:$0xff]  ;;  %v180_v51 = vld [vmem:[%s2432_s1 + $0x460] sm:$0xff]  ;;  %v242_v60 = vld [vmem:[%s2432_s1 + $0x650] sm:$0xff] }
  0x3b   :  { %464 = vmatpush2.msra.mxu0 %v80_v53  ;;  %534 = vmatprep.subr.mxu1 %v145_v54  ;;  %v179_v53 = vld [vmem:[%s2432_s1 + $0x458] sm:$0xff]  ;;  %v245_v54 = vld [vmem:[%s2432_s1 + $0x668] sm:$0xff] }
  0x3c   :  { %465 = vmatprep.subr.mxu0 %v79_v55  ;;  %535 = vmatpush2.msra.mxu1 %v144_v56  ;;  %v178_v55 = vld [vmem:[%s2432_s1 + $0x450] sm:$0xff]  ;;  %v244_v56 = vld [vmem:[%s2432_s1 + $0x660] sm:$0xff] }
  0x3d   :  { %466 = vmatpush2.msra.mxu0 %v78_v57  ;;  %536 = vmatprep.subr.mxu1 %v143_v58  ;;  %v177_v57 = vld [vmem:[%s2432_s1 + $0x448] sm:$0xff]  ;;  %v243_v58 = vld [vmem:[%s2432_s1 + $0x658] sm:$0xff] }
  0x3e   :  { %467 = vmatprep.subr.mxu0 %v77_v61  ;;  %537 = vmatpush2.msra.mxu1 %v142_v62  ;;  %v175_v61 = vld [vmem:[%s2432_s1 + $0x438] sm:$0xff]  ;;  %v241_v62 = vld [vmem:[%s2432_s1 + $0x648] sm:$0xff] }
  0x3f   :  { %468 = vmatpush2.msra.mxu0 %v76_v63  ;;  %538 = vmatprep.subr.mxu1 %v141_v0  ;;  %v174_v63 = vld [vmem:[%s2432_s1 + $0x430] sm:$0xff]  ;;  %v240_v0 = vld [vmem:[%s2432_s1 + $0x640] sm:$0xff] }
  0x40   :  { %469 = vmatprep.subr.mxu0 %v75_v1  ;;  %539 = vmatpush2.msra.mxu1 %v140_v2  ;;  %v173_v1 = vld [vmem:[%s2432_s1 + $0x428] sm:$0xff]  ;;  %v239_v2 = vld [vmem:[%s2432_s1 + $0x638] sm:$0xff] }
  0x41   :  { %470 = vmatpush2.msra.mxu0 %v74_v3  ;;  %540 = vmatprep.subr.mxu1 %v139_v4  ;;  %v172_v3 = vld [vmem:[%s2432_s1 + $0x420] sm:$0xff]  ;;  %v238_v4 = vld [vmem:[%s2432_s1 + $0x630] sm:$0xff] }
  0x42   :  { %471 = vmatprep.subr.mxu0 %v73_v7  ;;  %473 = vmatprep.mubr.f32.mxu0 %v370_v5  ;;  %v171_v5 = vld [vmem:[%s2432_s1 + $0x418] sm:$0xff]  ;;  %v170_v7 = vld [vmem:[%s2432_s1 + $0x410] sm:$0xff] }
  0x43   :  { %472 = vmatpush2.msra.mxu0 %v72_v8  ;;  %541 = vmatpush2.msra.mxu1 %v138_v9  ;;  %v236_v8 = vld [vmem:[%s2432_s1 + $0x620] sm:$0xff]  ;;  %v169_v9 = vld [vmem:[%s2432_s1 + $0x408] sm:$0xff] }
  0x44   :  { %474 = vmatmul.mubr.f32.vlgmr.msra.gmra.mxu0 %v362_v59  ;;  %542 = vmatprep.subr.mxu1 %v137_v10  ;;  %v176_v59 = vld [vmem:[%s2432_s1 + $0x440] sm:$0xff]  ;;  %v235_v10 = vld [vmem:[%s2432_s1 + $0x618] sm:$0xff] }
  0x45   :  { %551 = vmatprep.subr.mxu0 %v199_v11  ;;  %543 = vmatpush2.msra.mxu1 %v136_v12  ;;  %v168_v11 = vld [vmem:[%s2432_s1 + $0x400] sm:$0xff]  ;;  %v234_v12 = vld [vmem:[%s2432_s1 + $0x610] sm:$0xff] }
  0x46   :  { %544 = vmatprep.mubr.f32.mxu1 %v371_v13  ;;  %552 = vmatpush1.msra.mxu0 %v198_v14  ;;  %v231_v13 = vld [vmem:[%s2432_s1 + $0x5f8] sm:$0xff]  ;;  %v233_v14 = vld [vmem:[%s2432_s1 + $0x608] sm:$0xff] }
  0x47   :  { %545 = vmatmul.mubr.f32.vlgmr.msra.gmra.mxu1 %v369_v6  ;;  %553 = vmatprep.subr.mxu0 %v197_v15  ;;  %v237_v6 = vld [vmem:[%s2432_s1 + $0x628] sm:$0xff]  ;;  %v230_v15 = vld [vmem:[%s2432_s1 + $0x5f0] sm:$0xff] }
  0x48   :  { %622 = vmatprep.subr.mxu1 %v263_v16  ;;  %554 = vmatpush1.msra.mxu0 %v196_v17  ;;  %v232_v16 = vld [vmem:[%s2432_s1 + $0x600] sm:$0xff]  ;;  %v229_v17 = vld [vmem:[%s2432_s1 + $0x5e8] sm:$0xff] }
  0x49   :  { %623 = vmatpush1.msra.mxu1 %v262_v18  ;;  %555 = vmatprep.subr.mxu0 %v195_v19  ;;  %v295_v18 = vld [vmem:[%s2432_s1 + $0x7f8] sm:$0xff]  ;;  %v228_v19 = vld [vmem:[%s2432_s1 + $0x5e0] sm:$0xff] }
  0x4a   :  { %624 = vmatprep.subr.mxu1 %v261_v20  ;;  %556 = vmatpush1.msra.mxu0 %v194_v21  ;;  %v294_v20 = vld [vmem:[%s2432_s1 + $0x7f0] sm:$0xff]  ;;  %v227_v21 = vld [vmem:[%s2432_s1 + $0x5d8] sm:$0xff] }
  0x4b   :  { %625 = vmatpush1.msra.mxu1 %v260_v22  ;;  %557 = vmatprep.subr.mxu0 %v193_v23  ;;  %v293_v22 = vld [vmem:[%s2432_s1 + $0x7e8] sm:$0xff]  ;;  %v226_v23 = vld [vmem:[%s2432_s1 + $0x5d0] sm:$0xff] }
  0x4c   :  { %626 = vmatprep.subr.mxu1 %v259_v24  ;;  %558 = vmatpush1.msra.mxu0 %v192_v25  ;;  %v292_v24 = vld [vmem:[%s2432_s1 + $0x7e0] sm:$0xff]  ;;  %v225_v25 = vld [vmem:[%s2432_s1 + $0x5c8] sm:$0xff] }
  0x4d   :  { %627 = vmatpush1.msra.mxu1 %v258_v26  ;;  %559 = vmatprep.subr.mxu0 %v191_v27 }
  0x4e   :  { %628 = vmatprep.subr.mxu1 %v257_v28  ;;  %560 = vmatpush1.msra.mxu0 %v190_v29 }
  0x4f   :  { %629 = vmatpush1.msra.mxu1 %v256_v30  ;;  %561 = vmatprep.subr.mxu0 %v189_v31 }
  0x50   :  { %630 = vmatprep.subr.mxu1 %v255_v32  ;;  %562 = vmatpush1.msra.mxu0 %v188_v33 }
  0x51   :  { %631 = vmatpush1.msra.mxu1 %v254_v34  ;;  %563 = vmatprep.subr.mxu0 %v187_v35 }
  0x52   :  { %632 = vmatprep.subr.mxu1 %v253_v36  ;;  %564 = vmatpush1.msra.mxu0 %v186_v37 }
  0x53   :  { %633 = vmatpush1.msra.mxu1 %v252_v38  ;;  %565 = vmatprep.subr.mxu0 %v185_v40 }
  0x54   :  { %634 = vmatprep.subr.mxu1 %v251_v41  ;;  %566 = vmatpush1.msra.mxu0 %v184_v42 }
  0x55   :  { %635 = vmatpush1.msra.mxu1 %v250_v43  ;;  %567 = vmatprep.subr.mxu0 %v183_v44 }
  0x56   :  { %636 = vmatprep.subr.mxu1 %v249_v45  ;;  %568 = vmatpush1.msra.mxu0 %v182_v46 }
  0x57   :  { %637 = vmatpush1.msra.mxu1 %v248_v47  ;;  %569 = vmatprep.subr.mxu0 %v181_v48 }
  0x58   :  { %638 = vmatprep.subr.mxu1 %v247_v50  ;;  %570 = vmatpush1.msra.mxu0 %v180_v51 }
  0x59   :  { %639 = vmatpush1.msra.mxu1 %v246_v52  ;;  %571 = vmatprep.subr.mxu0 %v179_v53 }
  0x5a   :  { %640 = vmatprep.subr.mxu1 %v245_v54  ;;  %572 = vmatpush1.msra.mxu0 %v178_v55 }
  0x5b   :  { %641 = vmatpush1.msra.mxu1 %v244_v56  ;;  %573 = vmatprep.subr.mxu0 %v177_v57 }
  0x5c   :  { %642 = vmatprep.subr.mxu1 %v243_v58  ;;  %574 = vmatpush1.msra.mxu0 %v176_v59 }
  0x5d   :  { %643 = vmatpush1.msra.mxu1 %v242_v60  ;;  %575 = vmatprep.subr.mxu0 %v175_v61 }
  0x5e   :  { %644 = vmatprep.subr.mxu1 %v241_v62  ;;  %576 = vmatpush1.msra.mxu0 %v174_v63 }
  0x5f   :  { %645 = vmatpush1.msra.mxu1 %v240_v0  ;;  %577 = vmatprep.subr.mxu0 %v173_v1 }
  0x60   :  { %646 = vmatprep.subr.mxu1 %v239_v2  ;;  %578 = vmatpush1.msra.mxu0 %v172_v3 }
  0x61   :  { %647 = vmatpush1.msra.mxu1 %v238_v4  ;;  %579 = vmatprep.subr.mxu0 %v171_v5 }
  0x62   :  { %648 = vmatprep.subr.mxu1 %v237_v6  ;;  %580 = vmatpush1.msra.mxu0 %v170_v7 }
  0x63   :  { %649 = vmatpush1.msra.mxu1 %v236_v8  ;;  %581 = vmatprep.subr.mxu0 %v169_v9 }
  0x64   :  { %650 = vmatprep.subr.mxu1 %v235_v10  ;;  %582 = vmatpush1.msra.mxu0 %v168_v11 }
  0x65   :  { %651 = vmatpush1.msra.mxu1 %v234_v12  ;;  %583 = vmatprep.subr.mxu0 %v231_v13 }
  0x66   :  { %652 = vmatprep.subr.mxu1 %v233_v14  ;;  %584 = vmatpush2.msra.mxu0 %v230_v15 }
  0x67   :  { %653 = vmatpush1.msra.mxu1 %v232_v16  ;;  %585 = vmatprep.subr.mxu0 %v229_v17 }
  0x68   :  { %654 = vmatprep.subr.mxu1 %v295_v18  ;;  %586 = vmatpush2.msra.mxu0 %v228_v19 }
  0x69   :  { %18 = vsyncpa [#allocation4], 0  ;;  %655 = vmatpush2.msra.mxu1 %v294_v20  ;;  %587 = vmatprep.subr.mxu0 %v227_v21  ;;  %v291_v26 = vld [vmem:[%s2432_s1 + $0x7d8] sm:$0xff]  ;;  %v224_v27 = vld [vmem:[%s2432_s1 + $0x5c0] sm:$0xff]  ;;  %vm406_vm0 = vcmask 392192   ;;  %vm790_vm1 = vcmask 1043456  }
  0x6a   :  { %656 = vmatprep.subr.mxu1 %v293_v22  ;;  %588 = vmatpush2.msra.mxu0 %v226_v23  ;;  %v290_v28 = vld [vmem:[%s2432_s1 + $0x7d0] sm:$0xff]  ;;  %v223_v29 = vld [vmem:[%s2432_s1 + $0x5b8] sm:$0xff]  ;;  %v289_v30 = vld [vmem:[%s2432_s1 + $0x7c8] sm:$0xff]  ;;  %vm1262_vm2 = vmmov 0   ;;  %vm786_vm3 = vcmask 818176   ;;  %s1263_s13 = smov 28  }
  0x6b   :  { %657 = vmatpush2.msra.mxu1 %v292_v24  ;;  %589 = vmatprep.subr.mxu0 %v225_v25  ;;  %v222_v31 = vld [vmem:[%s2432_s1 + $0x5b0] sm:$0xff]  ;;  %v288_v32 = vld [vmem:[%s2432_s1 + $0x7c0] sm:$0xff]  ;;  %v221_v33 = vld [vmem:[%s2432_s1 + $0x5a8] sm:$0xff]  ;;  %vm988_vm4 = vcmask 228352   ;;  %vm1069_vm5 = vcmask 1024   ;;  %s1264_s15 = smov [#allocation3]  }
  0x6c   :  { %658 = vmatprep.subr.mxu1 %v291_v26  ;;  %590 = vmatpush2.msra.mxu0 %v224_v27  ;;  %v287_v34 = vld [vmem:[%s2432_s1 + $0x7b8] sm:$0xff]  ;;  %v220_v35 = vld [vmem:[%s2432_s1 + $0x5a0] sm:$0xff]  ;;  %v286_v36 = vld [vmem:[%s2432_s1 + $0x7b0] sm:$0xff]  ;;  %s1077_s16 = sshll.u32 %s1264_s15, 4  ;;  %vm961_vm6 = vcmask 74752   ;;  %s1078_s16 = int_to_ptr.vmem [resolvable:$true] %s1077_s16 }
  0x6d   :  { %659 = vmatpush2.msra.mxu1 %v290_v28  ;;  %591 = vmatprep.subr.mxu0 %v223_v29  ;;  %v219_v37 = vld [vmem:[%s2432_s1 + $0x598] sm:$0xff]  ;;  %v285_v38 = vld [vmem:[%s2432_s1 + $0x7a8] sm:$0xff]  ;;  %v218_v40 = vld [vmem:[%s2432_s1 + $0x590] sm:$0xff]  ;;  %s1238_s17 = scalar_lea.vmem %s1078_s16, 32  ;;  %p1243_p1 = scmp.lt.s32.totalorder %s1078_s16, %s1078_s16 }
  0x6e   :  { %660 = vmatprep.subr.mxu1 %v289_v30  ;;  %592 = vmatpush2.msra.mxu0 %v222_v31  ;;  %v284_v41 = vld [vmem:[%s2432_s1 + $0x7a0] sm:$0xff]  ;;  %v217_v42 = vld [vmem:[%s2432_s1 + $0x588] sm:$0xff]  ;;  %v283_v43 = vld [vmem:[%s2432_s1 + $0x798] sm:$0xff]  ;;  %p1239_p0 = scmp.ne.s32.totalorder %s1078_s16, %s1238_s17  ;;  %p1244_p2 = scmp.lt.s32.totalorder %s1238_s17, %s1238_s17 }
  0x6f   :  { %661 = vmatpush2.msra.mxu1 %v288_v32  ;;  %593 = vmatprep.subr.mxu0 %v221_v33  ;;  %v216_v44 = vld [vmem:[%s2432_s1 + $0x580] sm:$0xff]  ;;  %v282_v45 = vld [vmem:[%s2432_s1 + $0x790] sm:$0xff]  ;;  %v215_v46 = vld [vmem:[%s2432_s1 + $0x578] sm:$0xff] }
  0x70   :  { %662 = vmatprep.subr.mxu1 %v287_v34  ;;  %594 = vmatpush2.msra.mxu0 %v220_v35  ;;  %v281_v47 = vld [vmem:[%s2432_s1 + $0x788] sm:$0xff]  ;;  %v214_v48 = vld [vmem:[%s2432_s1 + $0x570] sm:$0xff]  ;;  %v280_v50 = vld [vmem:[%s2432_s1 + $0x780] sm:$0xff]  ;;  %p1245_p3 = por %p1244_p2, %p1243_p1 }
  0x71   :  { %663 = vmatpush2.msra.mxu1 %v286_v36  ;;  %595 = vmatprep.subr.mxu0 %v219_v37  ;;  %v213_v51 = vld [vmem:[%s2432_s1 + $0x568] sm:$0xff]  ;;  %v279_v52 = vld [vmem:[%s2432_s1 + $0x778] sm:$0xff]  ;;  %v212_v53 = vld [vmem:[%s2432_s1 + $0x560] sm:$0xff] }
  0x72   :  { %664 = vmatprep.subr.mxu1 %v285_v38  ;;  %596 = vmatpush2.msra.mxu0 %v218_v40  ;;  %v278_v54 = vld [vmem:[%s2432_s1 + $0x770] sm:$0xff]  ;;  %v211_v55 = vld [vmem:[%s2432_s1 + $0x558] sm:$0xff]  ;;  %v277_v56 = vld [vmem:[%s2432_s1 + $0x768] sm:$0xff]  ;;  %p1246_p4 = pnand %p1245_p3, %p1239_p0 }
  0x73   :  { %665 = vmatpush2.msra.mxu1 %v284_v41  ;;  %597 = vmatprep.subr.mxu0 %v217_v42  ;;  %v210_v57 = vld [vmem:[%s2432_s1 + $0x550] sm:$0xff]  ;;  %v276_v58 = vld [vmem:[%s2432_s1 + $0x760] sm:$0xff]  ;;  %v209_v59 = vld [vmem:[%s2432_s1 + $0x548] sm:$0xff] }
  0x74   :  { %666 = vmatprep.subr.mxu1 %v283_v43  ;;  %598 = vmatpush2.msra.mxu0 %v216_v44  ;;  %v275_v60 = vld [vmem:[%s2432_s1 + $0x758] sm:$0xff]  ;;  %v208_v61 = vld [vmem:[%s2432_s1 + $0x540] sm:$0xff]  ;;  %v38_v62 = vld [vmem:[%s2431_s0 + $0x8] sm:$0xff] }
  0x75   :  { %667 = vmatpush2.msra.mxu1 %v282_v45  ;;  %599 = vmatprep.subr.mxu0 %v215_v46  ;;  %v274_v63 = vld [vmem:[%s2432_s1 + $0x750] sm:$0xff]  ;;  %v207_v0 = vld [vmem:[%s2432_s1 + $0x538] sm:$0xff]  ;;  %v273_v1 = vld [vmem:[%s2432_s1 + $0x748] sm:$0xff]  ;;  %v372_v5 = vcombine.high %v38_v62, %v38_v62  ;;  %v379_v8 = vrot.slane %v38_v62, %v1647_v49 }
  0x76   :  { %668 = vmatprep.subr.mxu1 %v281_v47  ;;  %600 = vmatpush2.msra.mxu0 %v214_v48  ;;  %v206_v2 = vld [vmem:[%s2432_s1 + $0x530] sm:$0xff]  ;;  %v272_v3 = vld [vmem:[%s2432_s1 + $0x740] sm:$0xff]  ;;  %v205_v4 = vld [vmem:[%s2432_s1 + $0x528] sm:$0xff] }
  0x77   :  { %669 = vmatpush2.msra.mxu1 %v280_v50  ;;  %601 = vmatprep.subr.mxu0 %v213_v51  ;;  %v271_v6 = vld [vmem:[%s2432_s1 + $0x738] sm:$0xff]  ;;  %v204_v7 = vld [vmem:[%s2432_s1 + $0x520] sm:$0xff]  ;;  %v270_v9 = vld [vmem:[%s2432_s1 + $0x730] sm:$0xff]  ;;  %v386_v15 = vrot.slane %v372_v5, %v1647_v49  ;;  %v387_v18 = vcombine.high %v379_v8, %v379_v8 }
  0x78   :  { %670 = vmatprep.subr.mxu1 %v279_v52  ;;  %602 = vmatpush2.msra.mxu0 %v212_v53  ;;  %v203_v10 = vld [vmem:[%s2432_s1 + $0x518] sm:$0xff]  ;;  %v269_v11 = vld [vmem:[%s2432_s1 + $0x728] sm:$0xff]  ;;  %v202_v12 = vld [vmem:[%s2432_s1 + $0x510] sm:$0xff] }
  0x79   :  { %671 = vmatpush2.msra.mxu1 %v278_v54  ;;  %603 = vmatprep.subr.mxu0 %v211_v55  ;;  %v268_v13 = vld [vmem:[%s2432_s1 + $0x720] sm:$0xff]  ;;  %v201_v14 = vld [vmem:[%s2432_s1 + $0x508] sm:$0xff]  ;;  %v267_v16 = vld [vmem:[%s2432_s1 + $0x718] sm:$0xff]  ;;  %v388_v23 = vcombine.high %v386_v15, %v386_v15 }
  0x7a   :  { %672 = vmatprep.subr.mxu1 %v277_v56  ;;  %604 = vmatpush2.msra.mxu0 %v210_v57  ;;  %v200_v17 = vld [vmem:[%s2432_s1 + $0x500] sm:$0xff]  ;;  %v266_v19 = vld [vmem:[%s2432_s1 + $0x710] sm:$0xff]  ;;  %v265_v49 = vld [vmem:[%s2432_s1 + $0x708] sm:$0xff] }
  0x7b   :  { %673 = vmatpush2.msra.mxu1 %v276_v58  ;;  %605 = vmatprep.subr.mxu0 %v209_v59  ;;  %v2106_v20 = vld.sshfl [vmem:[%s2431_s0 + $0x10] sm:$0x33 pattern:$0x76325410]  ;;  %v327_v21 = vld [vmem:[%s2432_s1 + $0x8f8] sm:$0xff]  ;;  %v264_v22 = vld [vmem:[%s2432_s1 + $0x700] sm:$0xff] }
  0x7c   :  { %674 = vmatprep.subr.mxu1 %v275_v60  ;;  %606 = vmatpush2.msra.mxu0 %v208_v61  ;;  %v326_v24 = vld [vmem:[%s2432_s1 + $0x8f0] sm:$0xff]  ;;  %v325_v25 = vld [vmem:[%s2432_s1 + $0x8e8] sm:$0xff]  ;;  %v396_v26 = vcombine.high %v2106_v20, %v2106_v20  ;;  %v324_v27 = vld [vmem:[%s2432_s1 + $0x8e0] sm:$0xff] }
  0x7d   :  { %675 = vmatpush2.msra.mxu1 %v274_v63  ;;  %607 = vmatprep.subr.mxu0 %v207_v0  ;;  %v323_v28 = vld [vmem:[%s2432_s1 + $0x8d8] sm:$0xff]  ;;  %v322_v29 = vld [vmem:[%s2432_s1 + $0x8d0] sm:$0xff]  ;;  %v321_v30 = vld [vmem:[%s2432_s1 + $0x8c8] sm:$0xff] }
  0x7e   :  { %676 = vmatprep.subr.mxu1 %v273_v1  ;;  %608 = vmatpush2.msra.mxu0 %v206_v2  ;;  %v320_v31 = vld [vmem:[%s2432_s1 + $0x8c0] sm:$0xff]  ;;  %v319_v32 = vld [vmem:[%s2432_s1 + $0x8b8] sm:$0xff]  ;;  %v318_v33 = vld [vmem:[%s2432_s1 + $0x8b0] sm:$0xff] }
  0x7f   :  { %677 = vmatpush2.msra.mxu1 %v272_v3  ;;  %609 = vmatprep.subr.mxu0 %v205_v4  ;;  %v317_v34 = vld [vmem:[%s2432_s1 + $0x8a8] sm:$0xff]  ;;  %v316_v35 = vld [vmem:[%s2432_s1 + $0x8a0] sm:$0xff]  ;;  %v315_v36 = vld [vmem:[%s2432_s1 + $0x898] sm:$0xff] }
  0x80   :  { %678 = vmatprep.subr.mxu1 %v271_v6  ;;  %610 = vmatpush2.msra.mxu0 %v204_v7  ;;  %v314_v37 = vld [vmem:[%s2432_s1 + $0x890] sm:$0xff]  ;;  %v313_v38 = vld [vmem:[%s2432_s1 + $0x888] sm:$0xff]  ;;  %v312_v40 = vld [vmem:[%s2432_s1 + $0x880] sm:$0xff]  ;;  %v1261_v7 = vmov 0.0  }
  0x81   :  { %679 = vmatpush2.msra.mxu1 %v270_v9  ;;  %611 = vmatprep.subr.mxu0 %v203_v10  ;;  %v311_v41 = vld [vmem:[%s2432_s1 + $0x878] sm:$0xff]  ;;  %v310_v42 = vld [vmem:[%s2432_s1 + $0x870] sm:$0xff]  ;;  %v309_v43 = vld [vmem:[%s2432_s1 + $0x868] sm:$0xff] }
  0x82   :  { %680 = vmatprep.subr.mxu1 %v269_v11  ;;  %612 = vmatpush2.msra.mxu0 %v202_v12  ;;  %v308_v44 = vld [vmem:[%s2432_s1 + $0x860] sm:$0xff]  ;;  %v307_v45 = vld [vmem:[%s2432_s1 + $0x858] sm:$0xff]  ;;  %v306_v46 = vld [vmem:[%s2432_s1 + $0x850] sm:$0xff] }
  0x83   :  { %681 = vmatpush2.msra.mxu1 %v268_v13  ;;  %613 = vmatprep.subr.mxu0 %v201_v14  ;;  %v305_v47 = vld [vmem:[%s2432_s1 + $0x848] sm:$0xff]  ;;  %v304_v48 = vld [vmem:[%s2432_s1 + $0x840] sm:$0xff]  ;;  %v303_v50 = vld [vmem:[%s2432_s1 + $0x838] sm:$0xff] }
  0x84   :  { %682 = vmatprep.subr.mxu1 %v267_v16  ;;  %614 = vmatpush2.msra.mxu0 %v200_v17  ;;  %v302_v51 = vld [vmem:[%s2432_s1 + $0x830] sm:$0xff]  ;;  %v301_v52 = vld [vmem:[%s2432_s1 + $0x828] sm:$0xff]  ;;  %v300_v53 = vld [vmem:[%s2432_s1 + $0x820] sm:$0xff] }
  0x85   :  { %615 = vmatprep.mubr.f32.mxu0 %v387_v18  ;;  %683 = vmatpush2.msra.mxu1 %v266_v19  ;;  %v299_v54 = vld [vmem:[%s2432_s1 + $0x818] sm:$0xff]  ;;  %v298_v55 = vld [vmem:[%s2432_s1 + $0x810] sm:$0xff]  ;;  %v297_v56 = vld [vmem:[%s2432_s1 + $0x808] sm:$0xff] }
  0x86   :  { %616 = vmatmul.mubr.f32.vlgmr.msra.gmra.mxu0 %v379_v8  ;;  %684 = vmatprep.subr.mxu1 %v265_v49  ;;  %v296_v57 = vld [vmem:[%s2432_s1 + $0x800] sm:$0xff]  ;;  %v339_v58 = vld [vmem:[%s2432_s1 + $0x958] sm:$0xff]  ;;  %v338_v59 = vld [vmem:[%s2432_s1 + $0x950] sm:$0xff] }
  0x87   :  { %693 = vmatprep.subr.mxu0 %v327_v21  ;;  %685 = vmatpush2.msra.mxu1 %v264_v22  ;;  %v337_v60 = vld [vmem:[%s2432_s1 + $0x948] sm:$0xff]  ;;  %v336_v61 = vld [vmem:[%s2432_s1 + $0x940] sm:$0xff]  ;;  %v335_v62 = vld [vmem:[%s2432_s1 + $0x938] sm:$0xff] }
  0x88   :  { %686 = vmatprep.mubr.f32.mxu1 %v388_v23  ;;  %694 = vmatpush1.msra.mxu0 %v326_v24  ;;  %v334_v63 = vld [vmem:[%s2432_s1 + $0x930] sm:$0xff]  ;;  %v333_v0 = vld [vmem:[%s2432_s1 + $0x928] sm:$0xff]  ;;  %v332_v1 = vld [vmem:[%s2432_s1 + $0x920] sm:$0xff] }
  0x89   :  { %687 = vmatmul.mubr.f32.vlgmr.msra.gmra.mxu1 %v386_v15  ;;  %695 = vmatprep.subr.mxu0 %v325_v25  ;;  %v331_v2 = vld [vmem:[%s2432_s1 + $0x918] sm:$0xff]  ;;  %v330_v3 = vld [vmem:[%s2432_s1 + $0x910] sm:$0xff]  ;;  %v329_v4 = vld [vmem:[%s2432_s1 + $0x908] sm:$0xff] }
  0x8a   :  { %696 = vmatpush1.msra.mxu0 %v324_v27  ;;  %1090 = vmatprep.mubr.msk.f32.mxu0 %vm406_vm0, %v396_v26  ;;  %v328_v5 = vld [vmem:[%s2432_s1 + $0x900] sm:$0xff]  ;;  %v777_v8 = vld [vmem:[%s2434_s3 + $0x58] sm:$0xff]  ;;  %v776_v9 = vld [vmem:[%s2434_s3 + $0x50] sm:$0xff] }
  0x8b   :  { %697 = vmatprep.subr.mxu0 %v323_v28  ;;  %v778_v6 = vld [vmem:[%s2434_s3 + $0x60] sm:$0xf]  ;;  %1142 = vmatprep.subr.mxu1 %v1261_v7  ;;  %v775_v10 = vld [vmem:[%s2434_s3 + $0x48] sm:$0xff]  ;;  %v773_v12 = vld [vmem:[%s2434_s3 + $0x38] sm:$0xff] }
  0x8c   :  { %698 = vmatpush1.msra.mxu0 %v322_v29  ;;  %1143 = vmatpush3.msk.msra.mxu1 %vm790_vm1, %v778_v6  ;;  %v774_v11 = vld [vmem:[%s2434_s3 + $0x40] sm:$0xff]  ;;  %v772_v13 = vld [vmem:[%s2434_s3 + $0x30] sm:$0xff]  ;;  %v771_v14 = vld [vmem:[%s2434_s3 + $0x28] sm:$0xff]  ;;  %v344_v29 = vsub.s32 0, %v1620_v39 }
  0x8d   :  { %699 = vmatprep.subr.mxu0 %v321_v30  ;;  %1144 = vmatprep.subr.mxu1 %v1261_v7  ;;  %v770_v15 = vld [vmem:[%s2434_s3 + $0x20] sm:$0xff]  ;;  %v769_v16 = vld [vmem:[%s2434_s3 + $0x18] sm:$0xff]  ;;  %v768_v17 = vld [vmem:[%s2434_s3 + $0x10] sm:$0xff] }
  0x8e   :  { %700 = vmatpush1.msra.mxu0 %v320_v31  ;;  %1145 = vmatpush3.msra.mxu1 %v777_v8  ;;  %v767_v18 = vld [vmem:[%s2434_s3 + $0x8] sm:$0xff]  ;;  %v766_v19 = vld [vmem:[%s2434_s3] sm:$0xff]  ;;  %v973_v21 = vld [vmem:[%s2438_s7 + $0x50] sm:$0xff]  ;;  %v348_v31 = vsub.s32 1, %v1620_v39 }
  0x8f   :  { %701 = vmatprep.subr.mxu0 %v319_v32  ;;  %1146 = vmatprep.subr.mxu1 %v1261_v7  ;;  %v975_v49 = vld [vmem:[%s2438_s7 + $0x60] sm:$0xf]  ;;  %v972_v22 = vld [vmem:[%s2438_s7 + $0x48] sm:$0xff]  ;;  %v970_v24 = vld [vmem:[%s2438_s7 + $0x38] sm:$0xff] }
  0x90   :  { %702 = vmatpush1.msra.mxu0 %v318_v33  ;;  %1147 = vmatpush3.msra.mxu1 %v776_v9  ;;  %v971_v23 = vld [vmem:[%s2438_s7 + $0x40] sm:$0xff]  ;;  %v969_v25 = vld [vmem:[%s2438_s7 + $0x30] sm:$0xff]  ;;  %v968_v26 = vld [vmem:[%s2438_s7 + $0x28] sm:$0xff] }
  0x91   :  { %703 = vmatprep.subr.mxu0 %v317_v34  ;;  %1148 = vmatprep.subr.mxu1 %v1261_v7  ;;  %v967_v27 = vld [vmem:[%s2438_s7 + $0x20] sm:$0xff]  ;;  %v966_v28 = vld [vmem:[%s2438_s7 + $0x18] sm:$0xff]  ;;  %v867_v6 = vld [vmem:[%s2436_s5 + $0x10] sm:$0xff] }
  0x92   :  { %704 = vmatpush1.msra.mxu0 %v316_v35  ;;  %1149 = vmatpush3.msra.mxu1 %v775_v10  ;;  %v340_v30 = vld [vmem:[%s2433_s2] sm:$0x3]  ;;  %v866_v8 = vld [vmem:[%s2436_s5 + $0x8] sm:$0xff] }
  0x93   :  { %705 = vmatprep.subr.mxu0 %v315_v36  ;;  %1150 = vmatprep.subr.mxu1 %v1261_v7  ;;  %v345_v33 = vrot.slane %v340_v30, %v344_v29  ;;  %v349_v34 = vrot.slane %v340_v30, %v348_v31  ;;  %v865_v9 = vld [vmem:[%s2436_s5] sm:$0xff] }
  0x94   :  { %706 = vmatpush1.msra.mxu0 %v314_v37  ;;  %1151 = vmatpush3.msra.mxu1 %v774_v11 }
  0x95   :  { %707 = vmatprep.subr.mxu0 %v313_v38  ;;  %1152 = vmatprep.subr.mxu1 %v1261_v7 }
  0x96   :  { %708 = vmatpush1.msra.mxu0 %v312_v40  ;;  %1153 = vmatpush3.msra.mxu1 %v773_v12 }
  0x97   :  { %709 = vmatprep.subr.mxu0 %v311_v41  ;;  %1154 = vmatprep.subr.mxu1 %v1261_v7  ;;  %v965_v41 = vld [vmem:[%s2438_s7 + $0x10] sm:$0xff] }
  0x98   :  { %710 = vmatpush1.msra.mxu0 %v310_v42  ;;  %1155 = vmatpush3.msra.mxu1 %v772_v13  ;;  %v964_v42 = vld [vmem:[%s2438_s7 + $0x8] sm:$0xff]  ;;  %v1091_v13 = vld [vmem:[%s2435_s4] ss:$0 sm:$0xff] }
  0x99   :  { %711 = vmatprep.subr.mxu0 %v309_v43  ;;  %1156 = vmatprep.subr.mxu1 %v1261_v7 }
  0x9a   :  { %712 = vmatpush1.msra.mxu0 %v308_v44  ;;  %1157 = vmatpush3.msra.mxu1 %v771_v14 }
  0x9b   :  { %713 = vmatprep.subr.mxu0 %v307_v45  ;;  %1158 = vmatprep.subr.mxu1 %v1261_v7 }
  0x9c   :  { %714 = vmatpush1.msra.mxu0 %v306_v46  ;;  %1159 = vmatpush3.msra.mxu1 %v770_v15 }
  0x9d   :  { %715 = vmatprep.subr.mxu0 %v305_v47  ;;  %1160 = vmatprep.subr.mxu1 %v1261_v7 }
  0x9e   :  { %716 = vmatpush1.msra.mxu0 %v304_v48  ;;  %1161 = vmatpush3.msra.mxu1 %v769_v16  ;;  %v963_v48 = vld [vmem:[%s2438_s7] sm:$0xff] }
  0x9f   :  { %717 = vmatprep.subr.mxu0 %v303_v50  ;;  %1162 = vmatprep.subr.mxu1 %v1261_v7 }
  0xa0   :  { %718 = vmatpush1.msra.mxu0 %v302_v51  ;;  %1163 = vmatpush3.msra.mxu1 %v768_v17 }
  0xa1   :  { %719 = vmatprep.subr.mxu0 %v301_v52  ;;  %1164 = vmatprep.subr.mxu1 %v1261_v7 }
  0xa2   :  { %720 = vmatpush1.msra.mxu0 %v300_v53  ;;  %1165 = vmatpush3.msra.mxu1 %v767_v18 }
  0xa3   :  { %721 = vmatprep.subr.mxu0 %v299_v54  ;;  %1166 = vmatprep.subr.mxu1 %v1261_v7 }
  0xa4   :  { %722 = vmatpush1.msra.mxu0 %v298_v55  ;;  %1167 = vmatpush3.msra.mxu1 %v766_v19 }
  0xa5   :  { %723 = vmatprep.subr.mxu0 %v297_v56  ;;  %1168 = vmatprep.mubr.msk.f32.mxu1 %vm1262_vm2, %v1261_v7 }
  0xa6   :  { %724 = vmatpush1.msra.mxu0 %v296_v57  ;;  %1171 = vmatprep.subr.mxu1 %v1261_v7 }
  0xa7   :  { %745 = vmatprep.subr.mxu0 %v339_v58 }
  0xa8   :  { %746 = vmatpush2.msra.mxu0 %v338_v59  ;;  %v877_v59 = vld [vmem:[%s2436_s5 + $0x60] sm:$0xf] }
  0xa9   :  { %747 = vmatprep.subr.mxu0 %v337_v60  ;;  %v876_v60 = vld [vmem:[%s2436_s5 + $0x58] sm:$0xff] }
  0xaa   :  { %748 = vmatpush2.msra.mxu0 %v336_v61 }
  0xab   :  { %749 = vmatprep.subr.mxu0 %v335_v62  ;;  %v875_v62 = vld [vmem:[%s2436_s5 + $0x50] sm:$0xff] }
  0xac   :  { %750 = vmatpush2.msra.mxu0 %v334_v63  ;;  %v874_v63 = vld [vmem:[%s2436_s5 + $0x48] sm:$0xff] }
  0xad   :  { %751 = vmatprep.subr.mxu0 %v333_v0  ;;  %v873_v0 = vld [vmem:[%s2436_s5 + $0x40] sm:$0xff] }
  0xae   :  { %752 = vmatpush2.msra.mxu0 %v332_v1  ;;  %v872_v1 = vld [vmem:[%s2436_s5 + $0x38] sm:$0xff] }
  0xaf   :  { %753 = vmatprep.subr.mxu0 %v331_v2  ;;  %v871_v2 = vld [vmem:[%s2436_s5 + $0x30] sm:$0xff] }
  0xb0   :  { %754 = vmatpush2.msra.mxu0 %v330_v3  ;;  %v870_v3 = vld [vmem:[%s2436_s5 + $0x28] sm:$0xff] }
  0xb1   :  { %755 = vmatprep.subr.mxu0 %v329_v4  ;;  %v869_v4 = vld [vmem:[%s2436_s5 + $0x20] sm:$0xff] }
  0xb2   :  { %756 = vmatpush2.msra.mxu0 %v328_v5  ;;  %v868_v5 = vld [vmem:[%s2436_s5 + $0x18] sm:$0xff] }
  0xb3   :  { %758 = vmatmul.mubr.f32.vlgmr.msra.gmra.mxu0 %v2106_v20  ;;  %1200 = vmatprep.subr.mxu0 %v1261_v7  ;;  %v974_v20 = vld [vmem:[%s2438_s7 + $0x58] sm:$0xff] }
  0xb4   :  { %1226 = vmatprep.mubr.msk.f32.mxu0 %vm1262_vm2, %v1261_v7  ;;  %1201 = vmatpush3.msk.msra.mxu0 %vm790_vm1, %v975_v49 }
  0xb5   :  { %1202 = vmatprep.subr.mxu0 %v1261_v7 }
  0xb6   :  { %1203 = vmatpush3.msra.mxu0 %v974_v20 }
  0xb7   :  { %1204 = vmatprep.subr.mxu0 %v1261_v7 }
  0xb8   :  { %1205 = vmatpush3.msra.mxu0 %v973_v21 }
  0xb9   :  { %1206 = vmatprep.subr.mxu0 %v1261_v7 }
  0xba   :  { %1207 = vmatpush3.msra.mxu0 %v972_v22 }
  0xbb   :  { %1208 = vmatprep.subr.mxu0 %v1261_v7 }
  0xbc   :  { %1209 = vmatpush3.msra.mxu0 %v971_v23 }
  0xbd   :  { %1210 = vmatprep.subr.mxu0 %v1261_v7 }
  0xbe   :  { %1211 = vmatpush3.msra.mxu0 %v970_v24  ;;  %v1094_v24 = vld [vmem:[%s2437_s6] ss:$0 sm:$0xff] }
  0xbf   :  { %1212 = vmatprep.subr.mxu0 %v1261_v7 }
  0xc0   :  { %1213 = vmatpush3.msra.mxu0 %v969_v25 }
  0xc1   :  { %1214 = vmatprep.subr.mxu0 %v1261_v7 }
  0xc2   :  { %1215 = vmatpush3.msra.mxu0 %v968_v26 }
  0xc3   :  { %1216 = vmatprep.subr.mxu0 %v1261_v7 }
  0xc4   :  { %1217 = vmatpush3.msra.mxu0 %v967_v27 }
  0xc5   :  { %1218 = vmatprep.subr.mxu0 %v1261_v7 }
  0xc6   :  { %1219 = vmatpush3.msra.mxu0 %v966_v28 }
  0xc7   :  { %1220 = vmatprep.subr.mxu0 %v1261_v7 }
  0xc8   :  { %1221 = vmatpush3.msra.mxu0 %v965_v41 }
  0xc9   :  { %1222 = vmatprep.subr.mxu0 %v1261_v7 }
  0xca   :  { %1223 = vmatpush3.msra.mxu0 %v964_v42 }
  0xcb   :  { %1224 = vmatprep.subr.mxu0 %v1261_v7 }
  0xcc   :  { %1225 = vmatpush3.msra.mxu0 %v963_v48 }
 0x104   :  { %v475_v32 = vpop.f32.mrf.mxu0 }
 0x105   :  { %v476_v37 = vadd.f32 %v475_v32, %v345_v33 }
 0x106   :  { %v477_v35 = vpop.f32.mrf.mxu0 }
 0x107   :  { %v546_v36 = vpop.f32.mrf.mxu1  ;;  %v478_v40 = vadd.f32 %v477_v35, %v349_v34 }
 0x108   :  { %v547_v44 = vadd.f32 %v546_v36, %v476_v37 }
 0x109   :  { %v548_v43 = vpop.f32.mrf.mxu1 }
 0x10a   :  { %v549_v46 = vadd.f32 %v548_v43, %v478_v40 }
 0x146   :  { %v617_v38 = vpop.f32.mrf.mxu0 }
 0x147   :  { %v618_v47 = vadd.f32 %v617_v38, %v547_v44 }
 0x148   :  { %v619_v39 = vpop.f32.mrf.mxu0 }
 0x149   :  { %v688_v45 = vpop.f32.mrf.mxu1  ;;  %v620_v50 = vadd.f32 %v619_v39, %v549_v46 }
 0x14a   :  { %v689_v52 = vadd.f32 %v688_v45, %v618_v47 }
 0x14b   :  { %v690_v51 = vpop.f32.mrf.mxu1 }
 0x14c   :  { %v691_v54 = vadd.f32 %v690_v51, %v620_v50 }
 0x173   :  { %v759_v53 = vpop.f32.mrf.mxu0 }
 0x174   :  { %v760_v55 = vadd.f32 %v759_v53, %v689_v52 }
 0x175   :  { %v761_v56 = vpop.f32.mrf.mxu0 }
 0x176   :  { %v764_v57 = vmax.f32 %v760_v55, 0.0  ;;  %v762_v58 = vadd.f32 %v761_v56, %v691_v54 }
 0x178   :  { %984 = vrot.lane.b32.xlu0 %v764_v57, %s1263_s13  ;;  %1169 = vmatmul.mubr.msk.f32.vlgmr.msra.gmra.mxu1 %vm786_vm3, %v764_v57  ;;  %v765_v61 = vmax.f32 %v762_v58, 0.0 }
 0x179   :  { %1172 = vmatpush3.msk.msra.mxu1 %vm790_vm1, %v877_v59  ;;  %1197 = vmatprep.mubr.msk.f32.mxu1 %vm1262_vm2, %v1261_v7 }
 0x17a   :  { %1173 = vmatprep.subr.mxu1 %v1261_v7 }
 0x17b   :  { %1174 = vmatpush3.msra.mxu1 %v876_v60 }
 0x17c   :  { %986 = vrot.lane.b32.xlu0 %v765_v61, %s1263_s13  ;;  %1175 = vmatprep.subr.mxu1 %v1261_v7 }
 0x17d   :  { %1176 = vmatpush3.msra.mxu1 %v875_v62 }
 0x17e   :  { %1177 = vmatprep.subr.mxu1 %v1261_v7 }
 0x17f   :  { %1178 = vmatpush3.msra.mxu1 %v874_v63 }
 0x180   :  { %1179 = vmatprep.subr.mxu1 %v1261_v7 }
 0x181   :  { %1180 = vmatpush3.msra.mxu1 %v873_v0 }
 0x182   :  { %1181 = vmatprep.subr.mxu1 %v1261_v7 }
 0x183   :  { %1182 = vmatpush3.msra.mxu1 %v872_v1 }
 0x184   :  { %1183 = vmatprep.subr.mxu1 %v1261_v7 }
 0x185   :  { %1184 = vmatpush3.msra.mxu1 %v871_v2 }
 0x186   :  { %1185 = vmatprep.subr.mxu1 %v1261_v7 }
 0x187   :  { %1186 = vmatpush3.msra.mxu1 %v870_v3 }
 0x188   :  { %1187 = vmatprep.subr.mxu1 %v1261_v7 }
 0x189   :  { %1188 = vmatpush3.msra.mxu1 %v869_v4 }
 0x18a   :  { %1189 = vmatprep.subr.mxu1 %v1261_v7 }
 0x18b   :  { %1190 = vmatpush3.msra.mxu1 %v868_v5 }
 0x18c   :  { %1191 = vmatprep.subr.mxu1 %v1261_v7 }
 0x18d   :  { %1192 = vmatpush3.msra.mxu1 %v867_v6 }
 0x18e   :  { %1193 = vmatprep.subr.mxu1 %v1261_v7 }
 0x18f   :  { %1194 = vmatpush3.msra.mxu1 %v866_v8 }
 0x190   :  { %1195 = vmatprep.subr.mxu1 %v1261_v7  ;;  %v1097_v7 = vld [vmem:[#allocation2] ss:$0 sm:$0xff] }
 0x191   :  { %1196 = vmatpush3.msra.mxu1 %v865_v9 }
 0x1ea   :  { %v985_v10 = vpop.permute.xlu0 %984 }
 0x1ee   :  { %v987_v11 = vpop.permute.xlu0 %986 }
 0x1ef   :  { %v989_v12 = vsel %vm988_vm4, %v985_v10, %v987_v11 }
 0x1f0   :  { %1227 = vmatmul.mubr.msk.f32.vlgmr.msra.gmra.mxu0 %vm786_vm3, %v989_v12 }
 0x238   :  { %v860_v14 = vpop.f32.mrf.mxu1 }
 0x239   :  { %v861_v15 = vadd.f32 %v1091_v13, %v860_v14 }
 0x23a   :  { %v1170_v16 = vpop.f32.mrf.mxu1 }
 0x23b   :  { %v864_v17 = vmax.f32 %v861_v15, 0.0 }
 0x23d   :  { %1198 = vmatmul.mubr.msk.f32.vlgmr.msra.gmra.mxu1 %vm786_vm3, %v864_v17 }
 0x2b0   :  { %v1061_v18 = vpop.f32.mrf.mxu0 }
 0x2b1   :  { %v1062_v19 = vadd.f32 %v1097_v7, %v1061_v18 }
 0x2b2   :  { %v1228_v49 = vpop.f32.mrf.mxu0 }
 0x2b3   :  { %v1065_v20 = vmul.f32 0.5, %v1062_v19 }
 0x2b5   :  { %1236 = vtanh.f32 %v1065_v20 }
 0x2c2   :  { %v1237_v21 = vpop.eup %1236 }
 0x2c3   :  { %v1067_v22 = vadd.f32 1.0, %v1237_v21 }
 0x2c5   :  { %v1068_v23 = vmul.f32 0.5, %v1067_v22 }
 0x2c7   :  { %1070 = vst.msk [vmem:[%s2441_s10] sm:$0x3] %vm1069_vm5, %v1068_v23 }
 0x2fd   :  { %v957_v25 = vpop.f32.mrf.mxu1 }
 0x2fe   :  { %v958_v26 = vadd.f32 %v1094_v24, %v957_v25 }
 0x2ff   :  { %v1199_v27 = vpop.f32.mrf.mxu1 }
 0x300   :  { %962 = vst.msk [vmem:[#allocation3] sm:$0x3] %vm961_vm6, %v958_v26 }
 0x301   :  { %1249 = shalt.err (!%p1246_p4)
}
 0x302   :  { %1080 = dma.vmem_to_hbm [thread:$0]  %s1078_s16, 32, %s2440_s9, [#allocation4]  }
 0x303   :  { %1258 = dma.done.wait [#allocation4], 32  }
 0x304   :  { %1259 = vsyncadd [#allocation4], 4294967264 }
 0x305   :  { %1088 = vsyncpa [#allocation4], 1 }

</bundles_post_ra>
